<compile_context>
chip_gen: v5e
topology: v5e:2x2
jax: 0.10.0
libtpu: 0.0.40
codegen_flags: <defaults>
</compile_context>

<pallas_src>
import functools

import numpy as np
import jax
import jax.numpy as jnp
from jax.experimental import pallas as pl
from jax.experimental.pallas import tpu as pltpu


_SQRT_2 = 1.4142135623730951


# ----------------------------------------------------------------------------
# In-kernel helpers (operate on (C, HW) f32 tiles)
# ----------------------------------------------------------------------------
def _erf_f32(x):
    # Abramowitz & Stegun 7.1.26 (|abs err| < 1.5e-7) — matches torch F.gelu
    # within fp32 tolerance.
    a1, a2, a3, a4, a5 = 0.254829592, -0.284496736, 1.421413741, -1.453152027, 1.061405429
    p = 0.3275911
    s = jnp.where(x >= 0.0, 1.0, -1.0)
    ax = jnp.abs(x)
    t = 1.0 / (1.0 + p * ax)
    poly = ((((a5 * t + a4) * t + a3) * t + a2) * t + a1) * t
    return s * (1.0 - poly * jnp.exp(-ax * ax))


def _layernorm(x, w, b):
    # x: (C, HW); w, b: (C, 1).  WithBias LayerNorm over the channel axis
    # (sublanes), per pixel.  var is the biased (unbiased=False) variance.
    mu = jnp.mean(x, axis=0, keepdims=True)
    var = jnp.mean((x - mu) * (x - mu), axis=0, keepdims=True)
    return (x - mu) * jax.lax.rsqrt(var + 1e-5) * w + b


def _dwconv3x3(x, wdw, bdw, masks, W):
    # 3x3 depthwise conv with zero padding=1 on the flattened spatial axis.
    # x: (Cc, HW); wdw: (Cc, 9) (PyTorch (Cc,1,3,3) row-major); bdw: (Cc, 1);
    # masks: (9, HW) precomputed spatial-boundary masks (same tap order).
    HW = x.shape[1]
    acc = jnp.zeros_like(x)
    t = 0
    for dy in (-1, 0, 1):
        for dx in (-1, 0, 1):
            d = dy * W + dx
            # shifted[i] = x[(i + d) mod HW]; out-of-image wrap is zeroed by masks.
            shifted = x if d == 0 else pltpu.roll(x, (-d) % HW, 1)
            acc = acc + shifted * masks[t:t + 1, :] * wdw[:, t:t + 1]
            t += 1
    return acc + bdw


# ----------------------------------------------------------------------------
# Fused branch kernels (one batch element per grid step)
# ----------------------------------------------------------------------------
def attn_branch_kernel(x_ref, ln_w_ref, ln_b_ref, qkv_w_ref, qkv_b_ref,
                       dw_w_ref, dw_b_ref, temp_ref, hmask_ref,
                       proj_w_ref, proj_b_ref, masks_ref, o_ref, *, W):
    # x = x + project_out(attention(qkv_dwconv(qkv(LN1(x)))))
    C = x_ref.shape[1]
    x = x_ref[0].astype(jnp.float32)                                  # (C, HW)

    y = _layernorm(x, ln_w_ref[...], ln_b_ref[...])

    # 1x1 conv: (3C, C) @ (C, HW)
    qkv = jnp.dot(qkv_w_ref[...], y,
                  preferred_element_type=jnp.float32) + qkv_b_ref[...]
    qkv = _dwconv3x3(qkv, dw_w_ref[...], dw_b_ref[...], masks_ref[...], W)

    q = qkv[:C, :]
    k = qkv[C:2 * C, :]
    v = qkv[2 * C:, :]

    # F.normalize(dim=-1): x / clamp_min(||x||, 1e-12)  (per channel, over HW)
    qn = q * jax.lax.rsqrt(jnp.maximum(jnp.sum(q * q, axis=1, keepdims=True), 1e-24))
    kn = k * jax.lax.rsqrt(jnp.maximum(jnp.sum(k * k, axis=1, keepdims=True), 1e-24))

    # All heads at once: full (C, C) gram, restricted to the per-head
    # block-diagonal via hmask; temperature is broadcast per-row.
    scores = jax.lax.dot_general(qn, kn, (((1,), (1,)), ((), ())),
                                 preferred_element_type=jnp.float32)  # (C, C)
    scores = scores * temp_ref[...]                                   # (C, 1) per-row temp
    hm = hmask_ref[...]                                               # (C, C) 0/1
    scores = jnp.where(hm > 0.5, scores, -1e30)

    m = jnp.max(scores, axis=1, keepdims=True)
    p = jnp.exp(scores - m) * hm
    p = p / jnp.sum(p, axis=1, keepdims=True)

    attn_out = jnp.dot(p, v, preferred_element_type=jnp.float32)      # (C, HW)

    out = jnp.dot(proj_w_ref[...], attn_out,
                  preferred_element_type=jnp.float32) + proj_b_ref[...]
    o_ref[0] = (x + out).astype(o_ref.dtype)


def ffn_branch_kernel(x_ref, ln_w_ref, ln_b_ref, pin_w_ref, pin_b_ref,
                      dw_w_ref, dw_b_ref, pout_w_ref, pout_b_ref,
                      masks_ref, o_ref, *, W):
    # x = x + project_out(gelu(x1) * x2) where x1, x2 = dwconv(project_in(LN2(x)))
    x = x_ref[0].astype(jnp.float32)                                  # (C, HW)

    y = _layernorm(x, ln_w_ref[...], ln_b_ref[...])
    y = jnp.dot(pin_w_ref[...], y,
                preferred_element_type=jnp.float32) + pin_b_ref[...]  # (2h, HW)
    y = _dwconv3x3(y, dw_w_ref[...], dw_b_ref[...], masks_ref[...], W)

    hid = dw_w_ref.shape[0] // 2
    x1 = y[:hid, :]
    x2 = y[hid:, :]
    g = 0.5 * x1 * (1.0 + _erf_f32(x1 * (1.0 / _SQRT_2)))             # exact GELU

    out = jnp.dot(pout_w_ref[...], g * x2,
                  preferred_element_type=jnp.float32) + pout_b_ref[...]
    o_ref[0] = (x + out).astype(o_ref.dtype)


# ----------------------------------------------------------------------------
# Pallas wrappers
# ----------------------------------------------------------------------------
def _full_spec(shape):
    zeros = (0,) * len(shape)
    return pl.BlockSpec(shape, lambda b: zeros)


def attn_branch(x3, ln_w, ln_b, qkv_w, qkv_b, dw_w, dw_b,
                temp_rows, head_mask, proj_w, proj_b, masks, *, W):
    B, C, HW = x3.shape
    xspec = pl.BlockSpec((1, C, HW), lambda b: (b, 0, 0))
    weights = (ln_w, ln_b, qkv_w, qkv_b, dw_w, dw_b,
               temp_rows, head_mask, proj_w, proj_b, masks)
    return pl.pallas_call(
        functools.partial(attn_branch_kernel, W=W),
        out_shape=jax.ShapeDtypeStruct((B, C, HW), x3.dtype),
        grid=(B,),
        in_specs=[xspec] + [_full_spec(a.shape) for a in weights],
        out_specs=xspec,
        compiler_params=pltpu.CompilerParams(dimension_semantics=("parallel",)),
    )(x3, *weights)


def ffn_branch(x3, ln_w, ln_b, pin_w, pin_b, dw_w, dw_b,
               pout_w, pout_b, masks, *, W):
    B, C, HW = x3.shape
    xspec = pl.BlockSpec((1, C, HW), lambda b: (b, 0, 0))
    weights = (ln_w, ln_b, pin_w, pin_b, dw_w, dw_b, pout_w, pout_b, masks)
    return pl.pallas_call(
        functools.partial(ffn_branch_kernel, W=W),
        out_shape=jax.ShapeDtypeStruct((B, C, HW), x3.dtype),
        grid=(B,),
        in_specs=[xspec] + [_full_spec(a.shape) for a in weights],
        out_specs=xspec,
        compiler_params=pltpu.CompilerParams(dimension_semantics=("parallel",)),
    )(x3, *weights)


# ----------------------------------------------------------------------------
# Host-side constant builders (trace-time, tiny)
# ----------------------------------------------------------------------------
def _dwconv_masks(H, W):
    # (9, HW) f32: 1.0 where the 3x3 tap (dy, dx) reads inside the image.
    HW = H * W
    pos = np.arange(HW)
    h, w = pos // W, pos % W
    rows = []
    for dy in (-1, 0, 1):
        for dx in (-1, 0, 1):
            ok = (h + dy >= 0) & (h + dy < H) & (w + dx >= 0) & (w + dx < W)
            rows.append(ok.astype(np.float32))
    return jnp.asarray(np.stack(rows, axis=0))


def _head_mask(C, num_heads):
    # (C, C) f32 block-diagonal mask: 1.0 iff channels belong to the same head.
    ch = C // num_heads
    idx = np.arange(C) // ch
    return jnp.asarray((idx[:, None] == idx[None, :]).astype(np.float32))


# ----------------------------------------------------------------------------
# TransformerBlock forward
# ----------------------------------------------------------------------------
def transformer_block(x, params, num_heads):
    """x: (B, C, H, W) float32 (NCHW, PyTorch convention)."""
    B, C, H, W = x.shape
    HW = H * W
    ch = C // num_heads

    # NCHW -> (B, C, HW): pure reshape, no data movement.  HW lives on lanes.
    x3 = x.reshape(B, C, HW)

    masks = _dwconv_masks(H, W)
    hmask = _head_mask(C, num_heads)
    col = lambda v: v.reshape(-1, 1)
    temp_rows = jnp.repeat(params["temperature"].reshape(-1), ch).reshape(C, 1)

    # ---- x = x + Attention(LN1(x)) ----
    x3 = attn_branch(
        x3,
        col(params["norm1_w"]), col(params["norm1_b"]),
        params["qkv_w"], col(params["qkv_b"]),
        params["qkv_dw_w"].reshape(3 * C, 9), col(params["qkv_dw_b"]),
        temp_rows, hmask,
        params["proj_w"], col(params["proj_b"]),
        masks, W=W)

    # ---- x = x + FeedForward(LN2(x)) ----
    x3 = ffn_branch(
        x3,
        col(params["norm2_w"]), col(params["norm2_b"]),
        params["pin_w"], col(params["pin_b"]),
        params["dw_w"].reshape(-1, 9), col(params["dw_b"]),
        params["pout_w"], col(params["pout_b"]),
        masks, W=W)

    return x3.reshape(B, C, H, W)


# ----------------------------------------------------------------------------
# Deterministic synthetic parameters (PyTorch Conv2d weight layouts)
# ----------------------------------------------------------------------------
def init_params(key, dim, num_heads, ffn_expansion_factor):
    hidden = int(dim * ffn_expansion_factor)
    keys = jax.random.split(key, 12)
    n = lambda k, shape, s=0.05: (s * jax.random.normal(k, shape)).astype(jnp.float32)
    return {
        # LayerNorms (WithBias): ones / zeros as in the module
        "norm1_w": jnp.ones((dim,), jnp.float32),
        "norm1_b": jnp.zeros((dim,), jnp.float32),
        "norm2_w": jnp.ones((dim,), jnp.float32),
        "norm2_b": jnp.zeros((dim,), jnp.float32),
        # Attention
        "temperature": jnp.ones((num_heads,), jnp.float32),
        "qkv_w": n(keys[0], (3 * dim, dim)),        # Conv2d 1x1: (Cout, Cin)
        "qkv_b": n(keys[1], (3 * dim,)),
        "qkv_dw_w": n(keys[2], (3 * dim, 3, 3)),    # depthwise: (C, 3, 3)
        "qkv_dw_b": n(keys[3], (3 * dim,)),
        "proj_w": n(keys[4], (dim, dim)),
        "proj_b": n(keys[5], (dim,)),
        # FeedForward
        "pin_w": n(keys[6], (2 * hidden, dim)),
        "pin_b": n(keys[7], (2 * hidden,)),
        "dw_w": n(keys[8], (2 * hidden, 3, 3)),
        "dw_b": n(keys[9], (2 * hidden,)),
        "pout_w": n(keys[10], (dim, hidden)),
        "pout_b": n(keys[11], (dim,)),
    }


if __name__ == "__main__":
    dim = 32
    num_heads = 4
    ffn_expansion_factor = 2
    B, H, W = 2, 16, 16

    root = jax.random.PRNGKey(0)
    k_x, k_p = jax.random.split(root)
    x = jax.random.normal(k_x, (B, dim, H, W), dtype=jnp.float32)   # NCHW input
    params = init_params(k_p, dim, num_heads, ffn_expansion_factor)

    fwd = jax.jit(functools.partial(transformer_block, num_heads=num_heads))
    out = jax.block_until_ready(fwd(x, params))

    assert out.shape == (B, dim, H, W)
    assert bool(jnp.all(jnp.isfinite(out)))
    print("KERNEL_OK")
</pallas_src>

<mosaic_0001>
module attributes {stable_mosaic.version = 11 : i64} {
  func.func @attn_branch_kernel(%arg0: i32, %arg1: memref<1x32x256xf32, #tpu.memory_space<vmem>>, %arg2: memref<32x1xf32, #tpu.memory_space<vmem>>, %arg3: memref<32x1xf32, #tpu.memory_space<vmem>>, %arg4: memref<96x32xf32, #tpu.memory_space<vmem>>, %arg5: memref<96x1xf32, #tpu.memory_space<vmem>>, %arg6: memref<96x9xf32, #tpu.memory_space<vmem>>, %arg7: memref<96x1xf32, #tpu.memory_space<vmem>>, %arg8: memref<32x1xf32, #tpu.memory_space<vmem>>, %arg9: memref<32x32xf32, #tpu.memory_space<vmem>>, %arg10: memref<32x32xf32, #tpu.memory_space<vmem>>, %arg11: memref<32x1xf32, #tpu.memory_space<vmem>>, %arg12: memref<9x256xf32, #tpu.memory_space<vmem>>, %arg13: memref<1x32x256xf32, #tpu.memory_space<vmem>>) attributes {dimension_semantics = [#tpu.dimension_semantics<parallel>], iteration_bounds = array<i64: 2>, scalar_prefetch = 0 : i64, scratch_operands = 0 : i64, tpu.core_type = #tpu.core_type<tc>, window_params = [{transform_indices = @transform_0, window_bounds = array<i64: 1, 32, 256>}, {pipeline_mode = #tpu.pipeline_mode<synchronous>, transform_indices = @transform_1, window_bounds = array<i64: 32, 1>}, {pipeline_mode = #tpu.pipeline_mode<synchronous>, transform_indices = @transform_2, window_bounds = array<i64: 32, 1>}, {pipeline_mode = #tpu.pipeline_mode<synchronous>, transform_indices = @transform_3, window_bounds = array<i64: 96, 32>}, {pipeline_mode = #tpu.pipeline_mode<synchronous>, transform_indices = @transform_4, window_bounds = array<i64: 96, 1>}, {pipeline_mode = #tpu.pipeline_mode<synchronous>, transform_indices = @transform_5, window_bounds = array<i64: 96, 9>}, {pipeline_mode = #tpu.pipeline_mode<synchronous>, transform_indices = @transform_6, window_bounds = array<i64: 96, 1>}, {pipeline_mode = #tpu.pipeline_mode<synchronous>, transform_indices = @transform_7, window_bounds = array<i64: 32, 1>}, {pipeline_mode = #tpu.pipeline_mode<synchronous>, transform_indices = @transform_8, window_bounds = array<i64: 32, 32>}, {pipeline_mode = #tpu.pipeline_mode<synchronous>, transform_indices = @transform_9, window_bounds = array<i64: 32, 32>}, {pipeline_mode = #tpu.pipeline_mode<synchronous>, transform_indices = @transform_10, window_bounds = array<i64: 32, 1>}, {pipeline_mode = #tpu.pipeline_mode<synchronous>, transform_indices = @transform_11, window_bounds = array<i64: 9, 256>}, {transform_indices = @transform_12, window_bounds = array<i64: 1, 32, 256>}]} {
    %c0 = arith.constant 0 : index
    %c0_0 = arith.constant 0 : index
    %c0_1 = arith.constant 0 : index
    %0 = vector.load %arg1[%c0, %c0_0, %c0_1] : memref<1x32x256xf32, #tpu.memory_space<vmem>>, vector<1x32x256xf32>
    %1 = vector.shape_cast %0 : vector<1x32x256xf32> to vector<32x256xf32>
    %c0_2 = arith.constant 0 : index
    %c0_3 = arith.constant 0 : index
    %2 = vector.load %arg2[%c0_2, %c0_3] : memref<32x1xf32, #tpu.memory_space<vmem>>, vector<32x1xf32>
    %c0_4 = arith.constant 0 : index
    %c0_5 = arith.constant 0 : index
    %3 = vector.load %arg3[%c0_4, %c0_5] : memref<32x1xf32, #tpu.memory_space<vmem>>, vector<32x1xf32>
    %cst = arith.constant dense<0.000000e+00> : vector<256xf32>
    %4 = vector.multi_reduction <add>, %1, %cst [0] : vector<32x256xf32> to vector<256xf32>
    %5 = vector.shape_cast %4 : vector<256xf32> to vector<1x256xf32>
    %cst_6 = arith.constant 3.200000e+01 : f32
    %6 = vector.broadcast %cst_6 : f32 to vector<1x256xf32>
    %7 = arith.divf %5, %6 : vector<1x256xf32>
    %8 = vector.broadcast %7 : vector<1x256xf32> to vector<32x256xf32>
    %9 = arith.subf %1, %8 : vector<32x256xf32>
    %10 = vector.broadcast %7 : vector<1x256xf32> to vector<32x256xf32>
    %11 = arith.subf %1, %10 : vector<32x256xf32>
    %12 = arith.mulf %9, %11 : vector<32x256xf32>
    %cst_7 = arith.constant dense<0.000000e+00> : vector<256xf32>
    %13 = vector.multi_reduction <add>, %12, %cst_7 [0] : vector<32x256xf32> to vector<256xf32>
    %14 = vector.shape_cast %13 : vector<256xf32> to vector<1x256xf32>
    %cst_8 = arith.constant 3.200000e+01 : f32
    %15 = vector.broadcast %cst_8 : f32 to vector<1x256xf32>
    %16 = arith.divf %14, %15 : vector<1x256xf32>
    %17 = vector.broadcast %7 : vector<1x256xf32> to vector<32x256xf32>
    %18 = arith.subf %1, %17 : vector<32x256xf32>
    %cst_9 = arith.constant 9.99999974E-6 : f32
    %19 = vector.broadcast %cst_9 : f32 to vector<1x256xf32>
    %20 = arith.addf %16, %19 : vector<1x256xf32>
    %21 = math.rsqrt %20 : vector<1x256xf32>
    %22 = vector.broadcast %21 : vector<1x256xf32> to vector<32x256xf32>
    %23 = arith.mulf %18, %22 : vector<32x256xf32>
    %24 = vector.broadcast %2 : vector<32x1xf32> to vector<32x256xf32>
    %25 = arith.mulf %23, %24 : vector<32x256xf32>
    %26 = vector.broadcast %3 : vector<32x1xf32> to vector<32x256xf32>
    %27 = arith.addf %25, %26 : vector<32x256xf32>
    %c0_10 = arith.constant 0 : index
    %c0_11 = arith.constant 0 : index
    %28 = vector.load %arg4[%c0_10, %c0_11] : memref<96x32xf32, #tpu.memory_space<vmem>>, vector<96x32xf32>
    %cst_12 = arith.constant dense<0.000000e+00> : vector<96x256xf32>
    %29 = tpu.matmul %28, %27, %cst_12 {dimension_numbers = #tpu.dot_dimension_numbers<[1], [0], [0], [1], [0, 0, 1, 1], [], []>} : vector<96x32xf32>, vector<32x256xf32>, vector<96x256xf32> -> vector<96x256xf32>
    %c0_13 = arith.constant 0 : index
    %c0_14 = arith.constant 0 : index
    %30 = vector.load %arg5[%c0_13, %c0_14] : memref<96x1xf32, #tpu.memory_space<vmem>>, vector<96x1xf32>
    %31 = vector.broadcast %30 : vector<96x1xf32> to vector<96x256xf32>
    %32 = arith.addf %29, %31 : vector<96x256xf32>
    %c0_15 = arith.constant 0 : index
    %c0_16 = arith.constant 0 : index
    %33 = vector.load %arg6[%c0_15, %c0_16] : memref<96x9xf32, #tpu.memory_space<vmem>>, vector<96x9xf32>
    %c0_17 = arith.constant 0 : index
    %c0_18 = arith.constant 0 : index
    %34 = vector.load %arg7[%c0_17, %c0_18] : memref<96x1xf32, #tpu.memory_space<vmem>>, vector<96x1xf32>
    %c0_19 = arith.constant 0 : index
    %c0_20 = arith.constant 0 : index
    %35 = vector.load %arg12[%c0_19, %c0_20] : memref<9x256xf32, #tpu.memory_space<vmem>>, vector<9x256xf32>
    %cst_21 = arith.constant 0.000000e+00 : f32
    %36 = vector.broadcast %cst_21 : f32 to vector<96x256xf32>
    %c17_i32 = arith.constant 17 : i32
    %37 = tpu.dynamic_rotate %32 by %c17_i32 dim 1 : vector<96x256xf32>, i32 -> vector<96x256xf32>
    %38 = vector.extract_strided_slice %35 {offsets = [0, 0], sizes = [1, 256], strides = [1, 1]} : vector<9x256xf32> to vector<1x256xf32>
    %39 = vector.broadcast %38 : vector<1x256xf32> to vector<96x256xf32>
    %40 = arith.mulf %37, %39 : vector<96x256xf32>
    %41 = vector.extract_strided_slice %33 {offsets = [0, 0], sizes = [96, 1], strides = [1, 1]} : vector<96x9xf32> to vector<96x1xf32>
    %42 = vector.broadcast %41 : vector<96x1xf32> to vector<96x256xf32>
    %43 = arith.mulf %40, %42 : vector<96x256xf32>
    %44 = arith.addf %36, %43 : vector<96x256xf32>
    %c16_i32 = arith.constant 16 : i32
    %45 = tpu.dynamic_rotate %32 by %c16_i32 dim 1 : vector<96x256xf32>, i32 -> vector<96x256xf32>
    %46 = vector.extract_strided_slice %35 {offsets = [1, 0], sizes = [1, 256], strides = [1, 1]} : vector<9x256xf32> to vector<1x256xf32>
    %47 = vector.broadcast %46 : vector<1x256xf32> to vector<96x256xf32>
    %48 = arith.mulf %45, %47 : vector<96x256xf32>
    %49 = vector.extract_strided_slice %33 {offsets = [0, 1], sizes = [96, 1], strides = [1, 1]} : vector<96x9xf32> to vector<96x1xf32>
    %50 = vector.broadcast %49 : vector<96x1xf32> to vector<96x256xf32>
    %51 = arith.mulf %48, %50 : vector<96x256xf32>
    %52 = arith.addf %44, %51 : vector<96x256xf32>
    %c15_i32 = arith.constant 15 : i32
    %53 = tpu.dynamic_rotate %32 by %c15_i32 dim 1 : vector<96x256xf32>, i32 -> vector<96x256xf32>
    %54 = vector.extract_strided_slice %35 {offsets = [2, 0], sizes = [1, 256], strides = [1, 1]} : vector<9x256xf32> to vector<1x256xf32>
    %55 = vector.broadcast %54 : vector<1x256xf32> to vector<96x256xf32>
    %56 = arith.mulf %53, %55 : vector<96x256xf32>
    %57 = vector.extract_strided_slice %33 {offsets = [0, 2], sizes = [96, 1], strides = [1, 1]} : vector<96x9xf32> to vector<96x1xf32>
    %58 = vector.broadcast %57 : vector<96x1xf32> to vector<96x256xf32>
    %59 = arith.mulf %56, %58 : vector<96x256xf32>
    %60 = arith.addf %52, %59 : vector<96x256xf32>
    %c1_i32 = arith.constant 1 : i32
    %61 = tpu.dynamic_rotate %32 by %c1_i32 dim 1 : vector<96x256xf32>, i32 -> vector<96x256xf32>
    %62 = vector.extract_strided_slice %35 {offsets = [3, 0], sizes = [1, 256], strides = [1, 1]} : vector<9x256xf32> to vector<1x256xf32>
    %63 = vector.broadcast %62 : vector<1x256xf32> to vector<96x256xf32>
    %64 = arith.mulf %61, %63 : vector<96x256xf32>
    %65 = vector.extract_strided_slice %33 {offsets = [0, 3], sizes = [96, 1], strides = [1, 1]} : vector<96x9xf32> to vector<96x1xf32>
    %66 = vector.broadcast %65 : vector<96x1xf32> to vector<96x256xf32>
    %67 = arith.mulf %64, %66 : vector<96x256xf32>
    %68 = arith.addf %60, %67 : vector<96x256xf32>
    %69 = vector.extract_strided_slice %35 {offsets = [4, 0], sizes = [1, 256], strides = [1, 1]} : vector<9x256xf32> to vector<1x256xf32>
    %70 = vector.broadcast %69 : vector<1x256xf32> to vector<96x256xf32>
    %71 = arith.mulf %32, %70 : vector<96x256xf32>
    %72 = vector.extract_strided_slice %33 {offsets = [0, 4], sizes = [96, 1], strides = [1, 1]} : vector<96x9xf32> to vector<96x1xf32>
    %73 = vector.broadcast %72 : vector<96x1xf32> to vector<96x256xf32>
    %74 = arith.mulf %71, %73 : vector<96x256xf32>
    %75 = arith.addf %68, %74 : vector<96x256xf32>
    %c255_i32 = arith.constant 255 : i32
    %76 = tpu.dynamic_rotate %32 by %c255_i32 dim 1 : vector<96x256xf32>, i32 -> vector<96x256xf32>
    %77 = vector.extract_strided_slice %35 {offsets = [5, 0], sizes = [1, 256], strides = [1, 1]} : vector<9x256xf32> to vector<1x256xf32>
    %78 = vector.broadcast %77 : vector<1x256xf32> to vector<96x256xf32>
    %79 = arith.mulf %76, %78 : vector<96x256xf32>
    %80 = vector.extract_strided_slice %33 {offsets = [0, 5], sizes = [96, 1], strides = [1, 1]} : vector<96x9xf32> to vector<96x1xf32>
    %81 = vector.broadcast %80 : vector<96x1xf32> to vector<96x256xf32>
    %82 = arith.mulf %79, %81 : vector<96x256xf32>
    %83 = arith.addf %75, %82 : vector<96x256xf32>
    %c241_i32 = arith.constant 241 : i32
    %84 = tpu.dynamic_rotate %32 by %c241_i32 dim 1 : vector<96x256xf32>, i32 -> vector<96x256xf32>
    %85 = vector.extract_strided_slice %35 {offsets = [6, 0], sizes = [1, 256], strides = [1, 1]} : vector<9x256xf32> to vector<1x256xf32>
    %86 = vector.broadcast %85 : vector<1x256xf32> to vector<96x256xf32>
    %87 = arith.mulf %84, %86 : vector<96x256xf32>
    %88 = vector.extract_strided_slice %33 {offsets = [0, 6], sizes = [96, 1], strides = [1, 1]} : vector<96x9xf32> to vector<96x1xf32>
    %89 = vector.broadcast %88 : vector<96x1xf32> to vector<96x256xf32>
    %90 = arith.mulf %87, %89 : vector<96x256xf32>
    %91 = arith.addf %83, %90 : vector<96x256xf32>
    %c240_i32 = arith.constant 240 : i32
    %92 = tpu.dynamic_rotate %32 by %c240_i32 dim 1 : vector<96x256xf32>, i32 -> vector<96x256xf32>
    %93 = vector.extract_strided_slice %35 {offsets = [7, 0], sizes = [1, 256], strides = [1, 1]} : vector<9x256xf32> to vector<1x256xf32>
    %94 = vector.broadcast %93 : vector<1x256xf32> to vector<96x256xf32>
    %95 = arith.mulf %92, %94 : vector<96x256xf32>
    %96 = vector.extract_strided_slice %33 {offsets = [0, 7], sizes = [96, 1], strides = [1, 1]} : vector<96x9xf32> to vector<96x1xf32>
    %97 = vector.broadcast %96 : vector<96x1xf32> to vector<96x256xf32>
    %98 = arith.mulf %95, %97 : vector<96x256xf32>
    %99 = arith.addf %91, %98 : vector<96x256xf32>
    %c239_i32 = arith.constant 239 : i32
    %100 = tpu.dynamic_rotate %32 by %c239_i32 dim 1 : vector<96x256xf32>, i32 -> vector<96x256xf32>
    %101 = vector.extract_strided_slice %35 {offsets = [8, 0], sizes = [1, 256], strides = [1, 1]} : vector<9x256xf32> to vector<1x256xf32>
    %102 = vector.broadcast %101 : vector<1x256xf32> to vector<96x256xf32>
    %103 = arith.mulf %100, %102 : vector<96x256xf32>
    %104 = vector.extract_strided_slice %33 {offsets = [0, 8], sizes = [96, 1], strides = [1, 1]} : vector<96x9xf32> to vector<96x1xf32>
    %105 = vector.broadcast %104 : vector<96x1xf32> to vector<96x256xf32>
    %106 = arith.mulf %103, %105 : vector<96x256xf32>
    %107 = arith.addf %99, %106 : vector<96x256xf32>
    %108 = vector.broadcast %34 : vector<96x1xf32> to vector<96x256xf32>
    %109 = arith.addf %107, %108 : vector<96x256xf32>
    %110 = vector.extract_strided_slice %109 {offsets = [0, 0], sizes = [32, 256], strides = [1, 1]} : vector<96x256xf32> to vector<32x256xf32>
    %111 = vector.extract_strided_slice %109 {offsets = [32, 0], sizes = [32, 256], strides = [1, 1]} : vector<96x256xf32> to vector<32x256xf32>
    %112 = vector.extract_strided_slice %109 {offsets = [64, 0], sizes = [32, 256], strides = [1, 1]} : vector<96x256xf32> to vector<32x256xf32>
    %113 = arith.mulf %110, %110 : vector<32x256xf32>
    %cst_22 = arith.constant dense<0.000000e+00> : vector<32xf32>
    %114 = vector.multi_reduction <add>, %113, %cst_22 [1] : vector<32x256xf32> to vector<32xf32>
    %115 = vector.shape_cast %114 : vector<32xf32> to vector<32x1xf32>
    %cst_23 = arith.constant 1.000000e-24 : f32
    %116 = vector.broadcast %cst_23 : f32 to vector<32x1xf32>
    %117 = arith.maximumf %115, %116 : vector<32x1xf32>
    %118 = math.rsqrt %117 : vector<32x1xf32>
    %119 = vector.broadcast %118 : vector<32x1xf32> to vector<32x256xf32>
    %120 = arith.mulf %110, %119 : vector<32x256xf32>
    %121 = arith.mulf %111, %111 : vector<32x256xf32>
    %cst_24 = arith.constant dense<0.000000e+00> : vector<32xf32>
    %122 = vector.multi_reduction <add>, %121, %cst_24 [1] : vector<32x256xf32> to vector<32xf32>
    %123 = vector.shape_cast %122 : vector<32xf32> to vector<32x1xf32>
    %cst_25 = arith.constant 1.000000e-24 : f32
    %124 = vector.broadcast %cst_25 : f32 to vector<32x1xf32>
    %125 = arith.maximumf %123, %124 : vector<32x1xf32>
    %126 = math.rsqrt %125 : vector<32x1xf32>
    %127 = vector.broadcast %126 : vector<32x1xf32> to vector<32x256xf32>
    %128 = arith.mulf %111, %127 : vector<32x256xf32>
    %cst_26 = arith.constant dense<0.000000e+00> : vector<32x32xf32>
    %129 = tpu.matmul %120, %128, %cst_26 {dimension_numbers = #tpu.dot_dimension_numbers<[1], [1], [0], [0], [0, 0, 1, 0], [], []>} : vector<32x256xf32>, vector<32x256xf32>, vector<32x32xf32> -> vector<32x32xf32>
    %c0_27 = arith.constant 0 : index
    %c0_28 = arith.constant 0 : index
    %130 = vector.load %arg8[%c0_27, %c0_28] : memref<32x1xf32, #tpu.memory_space<vmem>>, vector<32x1xf32>
    %131 = vector.broadcast %130 : vector<32x1xf32> to vector<32x32xf32>
    %132 = arith.mulf %129, %131 : vector<32x32xf32>
    %c0_29 = arith.constant 0 : index
    %c0_30 = arith.constant 0 : index
    %133 = vector.load %arg9[%c0_29, %c0_30] : memref<32x32xf32, #tpu.memory_space<vmem>>, vector<32x32xf32>
    %cst_31 = arith.constant 5.000000e-01 : f32
    %134 = vector.broadcast %cst_31 : f32 to vector<32x32xf32>
    %135 = arith.cmpf ogt, %133, %134 : vector<32x32xf32>
    %cst_32 = arith.constant -1.000000e+30 : f32
    %136 = vector.broadcast %cst_32 : f32 to vector<32x32xf32>
    %137 = arith.select %135, %132, %136 : vector<32x32xi1>, vector<32x32xf32>
    %cst_33 = arith.constant dense<0xFF800000> : vector<32xf32>
    %138 = vector.multi_reduction <maximumf>, %137, %cst_33 [1] : vector<32x32xf32> to vector<32xf32>
    %139 = vector.shape_cast %138 : vector<32xf32> to vector<32x1xf32>
    %140 = vector.broadcast %139 : vector<32x1xf32> to vector<32x32xf32>
    %141 = arith.subf %137, %140 : vector<32x32xf32>
    %142 = math.exp %141 : vector<32x32xf32>
    %143 = arith.mulf %142, %133 : vector<32x32xf32>
    %cst_34 = arith.constant dense<0.000000e+00> : vector<32xf32>
    %144 = vector.multi_reduction <add>, %143, %cst_34 [1] : vector<32x32xf32> to vector<32xf32>
    %145 = vector.shape_cast %144 : vector<32xf32> to vector<32x1xf32>
    %146 = vector.broadcast %145 : vector<32x1xf32> to vector<32x32xf32>
    %147 = arith.divf %143, %146 : vector<32x32xf32>
    %cst_35 = arith.constant dense<0.000000e+00> : vector<32x256xf32>
    %148 = tpu.matmul %147, %112, %cst_35 {dimension_numbers = #tpu.dot_dimension_numbers<[1], [0], [0], [1], [0, 0, 1, 1], [], []>} : vector<32x32xf32>, vector<32x256xf32>, vector<32x256xf32> -> vector<32x256xf32>
    %c0_36 = arith.constant 0 : index
    %c0_37 = arith.constant 0 : index
    %149 = vector.load %arg10[%c0_36, %c0_37] : memref<32x32xf32, #tpu.memory_space<vmem>>, vector<32x32xf32>
    %cst_38 = arith.constant dense<0.000000e+00> : vector<32x256xf32>
    %150 = tpu.matmul %149, %148, %cst_38 {dimension_numbers = #tpu.dot_dimension_numbers<[1], [0], [0], [1], [0, 0, 1, 1], [], []>} : vector<32x32xf32>, vector<32x256xf32>, vector<32x256xf32> -> vector<32x256xf32>
    %c0_39 = arith.constant 0 : index
    %c0_40 = arith.constant 0 : index
    %151 = vector.load %arg11[%c0_39, %c0_40] : memref<32x1xf32, #tpu.memory_space<vmem>>, vector<32x1xf32>
    %152 = vector.broadcast %151 : vector<32x1xf32> to vector<32x256xf32>
    %153 = arith.addf %150, %152 : vector<32x256xf32>
    %154 = arith.addf %1, %153 : vector<32x256xf32>
    %c0_41 = arith.constant 0 : index
    %c0_42 = arith.constant 0 : index
    %c0_43 = arith.constant 0 : index
    %155 = vector.load %arg13[%c0_41, %c0_42, %c0_43] : memref<1x32x256xf32, #tpu.memory_space<vmem>>, vector<1x32x256xf32>
    %156 = vector.shape_cast %155 : vector<1x32x256xf32> to vector<32x256xf32>
    %157 = vector.shape_cast %154 : vector<32x256xf32> to vector<1x32x256xf32>
    tpu.vector_store %arg13[%c0_41, %c0_42, %c0_43], %157 {strides = array<i32>} : memref<1x32x256xf32, #tpu.memory_space<vmem>>, vector<1x32x256xf32>,
    return
  }
  func.func @transform_0(%arg0: i32) -> (i32, i32, i32) {
    %c0_i32 = arith.constant 0 : i32
    %c0_i32_0 = arith.constant 0 : i32
    %c0_i32_1 = arith.constant 0 : i32
    return %arg0, %c0_i32, %c0_i32_0 : i32, i32, i32
  }
  func.func @transform_1(%arg0: i32) -> (i32, i32) {
    %c0_i32 = arith.constant 0 : i32
    %c0_i32_0 = arith.constant 0 : i32
    %c0_i32_1 = arith.constant 0 : i32
    return %c0_i32, %c0_i32_0 : i32, i32
  }
  func.func @transform_2(%arg0: i32) -> (i32, i32) {
    %c0_i32 = arith.constant 0 : i32
    %c0_i32_0 = arith.constant 0 : i32
    %c0_i32_1 = arith.constant 0 : i32
    return %c0_i32, %c0_i32_0 : i32, i32
  }
  func.func @transform_3(%arg0: i32) -> (i32, i32) {
    %c0_i32 = arith.constant 0 : i32
    %c0_i32_0 = arith.constant 0 : i32
    %c0_i32_1 = arith.constant 0 : i32
    return %c0_i32, %c0_i32_0 : i32, i32
  }
  func.func @transform_4(%arg0: i32) -> (i32, i32) {
    %c0_i32 = arith.constant 0 : i32
    %c0_i32_0 = arith.constant 0 : i32
    %c0_i32_1 = arith.constant 0 : i32
    return %c0_i32, %c0_i32_0 : i32, i32
  }
  func.func @transform_5(%arg0: i32) -> (i32, i32) {
    %c0_i32 = arith.constant 0 : i32
    %c0_i32_0 = arith.constant 0 : i32
    %c0_i32_1 = arith.constant 0 : i32
    return %c0_i32, %c0_i32_0 : i32, i32
  }
  func.func @transform_6(%arg0: i32) -> (i32, i32) {
    %c0_i32 = arith.constant 0 : i32
    %c0_i32_0 = arith.constant 0 : i32
    %c0_i32_1 = arith.constant 0 : i32
    return %c0_i32, %c0_i32_0 : i32, i32
  }
  func.func @transform_7(%arg0: i32) -> (i32, i32) {
    %c0_i32 = arith.constant 0 : i32
    %c0_i32_0 = arith.constant 0 : i32
    %c0_i32_1 = arith.constant 0 : i32
    return %c0_i32, %c0_i32_0 : i32, i32
  }
  func.func @transform_8(%arg0: i32) -> (i32, i32) {
    %c0_i32 = arith.constant 0 : i32
    %c0_i32_0 = arith.constant 0 : i32
    %c0_i32_1 = arith.constant 0 : i32
    return %c0_i32, %c0_i32_0 : i32, i32
  }
  func.func @transform_9(%arg0: i32) -> (i32, i32) {
    %c0_i32 = arith.constant 0 : i32
    %c0_i32_0 = arith.constant 0 : i32
    %c0_i32_1 = arith.constant 0 : i32
    return %c0_i32, %c0_i32_0 : i32, i32
  }
  func.func @transform_10(%arg0: i32) -> (i32, i32) {
    %c0_i32 = arith.constant 0 : i32
    %c0_i32_0 = arith.constant 0 : i32
    %c0_i32_1 = arith.constant 0 : i32
    return %c0_i32, %c0_i32_0 : i32, i32
  }
  func.func @transform_11(%arg0: i32) -> (i32, i32) {
    %c0_i32 = arith.constant 0 : i32
    %c0_i32_0 = arith.constant 0 : i32
    %c0_i32_1 = arith.constant 0 : i32
    return %c0_i32, %c0_i32_0 : i32, i32
  }
  func.func @transform_12(%arg0: i32) -> (i32, i32, i32) {
    %c0_i32 = arith.constant 0 : i32
    %c0_i32_0 = arith.constant 0 : i32
    %c0_i32_1 = arith.constant 0 : i32
    return %arg0, %c0_i32, %c0_i32_0 : i32, i32, i32
  }
}

module attributes {stable_mosaic.version = 11 : i64} {
  func.func @ffn_branch_kernel(%arg0: i32, %arg1: memref<1x32x256xf32, #tpu.memory_space<vmem>>, %arg2: memref<32x1xf32, #tpu.memory_space<vmem>>, %arg3: memref<32x1xf32, #tpu.memory_space<vmem>>, %arg4: memref<128x32xf32, #tpu.memory_space<vmem>>, %arg5: memref<128x1xf32, #tpu.memory_space<vmem>>, %arg6: memref<128x9xf32, #tpu.memory_space<vmem>>, %arg7: memref<128x1xf32, #tpu.memory_space<vmem>>, %arg8: memref<32x64xf32, #tpu.memory_space<vmem>>, %arg9: memref<32x1xf32, #tpu.memory_space<vmem>>, %arg10: memref<9x256xf32, #tpu.memory_space<vmem>>, %arg11: memref<1x32x256xf32, #tpu.memory_space<vmem>>) attributes {dimension_semantics = [#tpu.dimension_semantics<parallel>], iteration_bounds = array<i64: 2>, scalar_prefetch = 0 : i64, scratch_operands = 0 : i64, tpu.core_type = #tpu.core_type<tc>, window_params = [{transform_indices = @transform_0, window_bounds = array<i64: 1, 32, 256>}, {pipeline_mode = #tpu.pipeline_mode<synchronous>, transform_indices = @transform_1, window_bounds = array<i64: 32, 1>}, {pipeline_mode = #tpu.pipeline_mode<synchronous>, transform_indices = @transform_2, window_bounds = array<i64: 32, 1>}, {pipeline_mode = #tpu.pipeline_mode<synchronous>, transform_indices = @transform_3, window_bounds = array<i64: 128, 32>}, {pipeline_mode = #tpu.pipeline_mode<synchronous>, transform_indices = @transform_4, window_bounds = array<i64: 128, 1>}, {pipeline_mode = #tpu.pipeline_mode<synchronous>, transform_indices = @transform_5, window_bounds = array<i64: 128, 9>}, {pipeline_mode = #tpu.pipeline_mode<synchronous>, transform_indices = @transform_6, window_bounds = array<i64: 128, 1>}, {pipeline_mode = #tpu.pipeline_mode<synchronous>, transform_indices = @transform_7, window_bounds = array<i64: 32, 64>}, {pipeline_mode = #tpu.pipeline_mode<synchronous>, transform_indices = @transform_8, window_bounds = array<i64: 32, 1>}, {pipeline_mode = #tpu.pipeline_mode<synchronous>, transform_indices = @transform_9, window_bounds = array<i64: 9, 256>}, {transform_indices = @transform_10, window_bounds = array<i64: 1, 32, 256>}]} {
    %c0 = arith.constant 0 : index
    %c0_0 = arith.constant 0 : index
    %c0_1 = arith.constant 0 : index
    %0 = vector.load %arg1[%c0, %c0_0, %c0_1] : memref<1x32x256xf32, #tpu.memory_space<vmem>>, vector<1x32x256xf32>
    %1 = vector.shape_cast %0 : vector<1x32x256xf32> to vector<32x256xf32>
    %c0_2 = arith.constant 0 : index
    %c0_3 = arith.constant 0 : index
    %2 = vector.load %arg2[%c0_2, %c0_3] : memref<32x1xf32, #tpu.memory_space<vmem>>, vector<32x1xf32>
    %c0_4 = arith.constant 0 : index
    %c0_5 = arith.constant 0 : index
    %3 = vector.load %arg3[%c0_4, %c0_5] : memref<32x1xf32, #tpu.memory_space<vmem>>, vector<32x1xf32>
    %cst = arith.constant dense<0.000000e+00> : vector<256xf32>
    %4 = vector.multi_reduction <add>, %1, %cst [0] : vector<32x256xf32> to vector<256xf32>
    %5 = vector.shape_cast %4 : vector<256xf32> to vector<1x256xf32>
    %cst_6 = arith.constant 3.200000e+01 : f32
    %6 = vector.broadcast %cst_6 : f32 to vector<1x256xf32>
    %7 = arith.divf %5, %6 : vector<1x256xf32>
    %8 = vector.broadcast %7 : vector<1x256xf32> to vector<32x256xf32>
    %9 = arith.subf %1, %8 : vector<32x256xf32>
    %10 = vector.broadcast %7 : vector<1x256xf32> to vector<32x256xf32>
    %11 = arith.subf %1, %10 : vector<32x256xf32>
    %12 = arith.mulf %9, %11 : vector<32x256xf32>
    %cst_7 = arith.constant dense<0.000000e+00> : vector<256xf32>
    %13 = vector.multi_reduction <add>, %12, %cst_7 [0] : vector<32x256xf32> to vector<256xf32>
    %14 = vector.shape_cast %13 : vector<256xf32> to vector<1x256xf32>
    %cst_8 = arith.constant 3.200000e+01 : f32
    %15 = vector.broadcast %cst_8 : f32 to vector<1x256xf32>
    %16 = arith.divf %14, %15 : vector<1x256xf32>
    %17 = vector.broadcast %7 : vector<1x256xf32> to vector<32x256xf32>
    %18 = arith.subf %1, %17 : vector<32x256xf32>
    %cst_9 = arith.constant 9.99999974E-6 : f32
    %19 = vector.broadcast %cst_9 : f32 to vector<1x256xf32>
    %20 = arith.addf %16, %19 : vector<1x256xf32>
    %21 = math.rsqrt %20 : vector<1x256xf32>
    %22 = vector.broadcast %21 : vector<1x256xf32> to vector<32x256xf32>
    %23 = arith.mulf %18, %22 : vector<32x256xf32>
    %24 = vector.broadcast %2 : vector<32x1xf32> to vector<32x256xf32>
    %25 = arith.mulf %23, %24 : vector<32x256xf32>
    %26 = vector.broadcast %3 : vector<32x1xf32> to vector<32x256xf32>
    %27 = arith.addf %25, %26 : vector<32x256xf32>
    %c0_10 = arith.constant 0 : index
    %c0_11 = arith.constant 0 : index
    %28 = vector.load %arg4[%c0_10, %c0_11] : memref<128x32xf32, #tpu.memory_space<vmem>>, vector<128x32xf32>
    %cst_12 = arith.constant dense<0.000000e+00> : vector<128x256xf32>
    %29 = tpu.matmul %28, %27, %cst_12 {dimension_numbers = #tpu.dot_dimension_numbers<[1], [0], [0], [1], [0, 0, 1, 1], [], []>} : vector<128x32xf32>, vector<32x256xf32>, vector<128x256xf32> -> vector<128x256xf32>
    %c0_13 = arith.constant 0 : index
    %c0_14 = arith.constant 0 : index
    %30 = vector.load %arg5[%c0_13, %c0_14] : memref<128x1xf32, #tpu.memory_space<vmem>>, vector<128x1xf32>
    %31 = vector.broadcast %30 : vector<128x1xf32> to vector<128x256xf32>
    %32 = arith.addf %29, %31 : vector<128x256xf32>
    %c0_15 = arith.constant 0 : index
    %c0_16 = arith.constant 0 : index
    %33 = vector.load %arg6[%c0_15, %c0_16] : memref<128x9xf32, #tpu.memory_space<vmem>>, vector<128x9xf32>
    %c0_17 = arith.constant 0 : index
    %c0_18 = arith.constant 0 : index
    %34 = vector.load %arg7[%c0_17, %c0_18] : memref<128x1xf32, #tpu.memory_space<vmem>>, vector<128x1xf32>
    %c0_19 = arith.constant 0 : index
    %c0_20 = arith.constant 0 : index
    %35 = vector.load %arg10[%c0_19, %c0_20] : memref<9x256xf32, #tpu.memory_space<vmem>>, vector<9x256xf32>
    %cst_21 = arith.constant 0.000000e+00 : f32
    %36 = vector.broadcast %cst_21 : f32 to vector<128x256xf32>
    %c17_i32 = arith.constant 17 : i32
    %37 = tpu.dynamic_rotate %32 by %c17_i32 dim 1 : vector<128x256xf32>, i32 -> vector<128x256xf32>
    %38 = vector.extract_strided_slice %35 {offsets = [0, 0], sizes = [1, 256], strides = [1, 1]} : vector<9x256xf32> to vector<1x256xf32>
    %39 = vector.broadcast %38 : vector<1x256xf32> to vector<128x256xf32>
    %40 = arith.mulf %37, %39 : vector<128x256xf32>
    %41 = vector.extract_strided_slice %33 {offsets = [0, 0], sizes = [128, 1], strides = [1, 1]} : vector<128x9xf32> to vector<128x1xf32>
    %42 = vector.broadcast %41 : vector<128x1xf32> to vector<128x256xf32>
    %43 = arith.mulf %40, %42 : vector<128x256xf32>
    %44 = arith.addf %36, %43 : vector<128x256xf32>
    %c16_i32 = arith.constant 16 : i32
    %45 = tpu.dynamic_rotate %32 by %c16_i32 dim 1 : vector<128x256xf32>, i32 -> vector<128x256xf32>
    %46 = vector.extract_strided_slice %35 {offsets = [1, 0], sizes = [1, 256], strides = [1, 1]} : vector<9x256xf32> to vector<1x256xf32>
    %47 = vector.broadcast %46 : vector<1x256xf32> to vector<128x256xf32>
    %48 = arith.mulf %45, %47 : vector<128x256xf32>
    %49 = vector.extract_strided_slice %33 {offsets = [0, 1], sizes = [128, 1], strides = [1, 1]} : vector<128x9xf32> to vector<128x1xf32>
    %50 = vector.broadcast %49 : vector<128x1xf32> to vector<128x256xf32>
    %51 = arith.mulf %48, %50 : vector<128x256xf32>
    %52 = arith.addf %44, %51 : vector<128x256xf32>
    %c15_i32 = arith.constant 15 : i32
    %53 = tpu.dynamic_rotate %32 by %c15_i32 dim 1 : vector<128x256xf32>, i32 -> vector<128x256xf32>
    %54 = vector.extract_strided_slice %35 {offsets = [2, 0], sizes = [1, 256], strides = [1, 1]} : vector<9x256xf32> to vector<1x256xf32>
    %55 = vector.broadcast %54 : vector<1x256xf32> to vector<128x256xf32>
    %56 = arith.mulf %53, %55 : vector<128x256xf32>
    %57 = vector.extract_strided_slice %33 {offsets = [0, 2], sizes = [128, 1], strides = [1, 1]} : vector<128x9xf32> to vector<128x1xf32>
    %58 = vector.broadcast %57 : vector<128x1xf32> to vector<128x256xf32>
    %59 = arith.mulf %56, %58 : vector<128x256xf32>
    %60 = arith.addf %52, %59 : vector<128x256xf32>
    %c1_i32 = arith.constant 1 : i32
    %61 = tpu.dynamic_rotate %32 by %c1_i32 dim 1 : vector<128x256xf32>, i32 -> vector<128x256xf32>
    %62 = vector.extract_strided_slice %35 {offsets = [3, 0], sizes = [1, 256], strides = [1, 1]} : vector<9x256xf32> to vector<1x256xf32>
    %63 = vector.broadcast %62 : vector<1x256xf32> to vector<128x256xf32>
    %64 = arith.mulf %61, %63 : vector<128x256xf32>
    %65 = vector.extract_strided_slice %33 {offsets = [0, 3], sizes = [128, 1], strides = [1, 1]} : vector<128x9xf32> to vector<128x1xf32>
    %66 = vector.broadcast %65 : vector<128x1xf32> to vector<128x256xf32>
    %67 = arith.mulf %64, %66 : vector<128x256xf32>
    %68 = arith.addf %60, %67 : vector<128x256xf32>
    %69 = vector.extract_strided_slice %35 {offsets = [4, 0], sizes = [1, 256], strides = [1, 1]} : vector<9x256xf32> to vector<1x256xf32>
    %70 = vector.broadcast %69 : vector<1x256xf32> to vector<128x256xf32>
    %71 = arith.mulf %32, %70 : vector<128x256xf32>
    %72 = vector.extract_strided_slice %33 {offsets = [0, 4], sizes = [128, 1], strides = [1, 1]} : vector<128x9xf32> to vector<128x1xf32>
    %73 = vector.broadcast %72 : vector<128x1xf32> to vector<128x256xf32>
    %74 = arith.mulf %71, %73 : vector<128x256xf32>
    %75 = arith.addf %68, %74 : vector<128x256xf32>
    %c255_i32 = arith.constant 255 : i32
    %76 = tpu.dynamic_rotate %32 by %c255_i32 dim 1 : vector<128x256xf32>, i32 -> vector<128x256xf32>
    %77 = vector.extract_strided_slice %35 {offsets = [5, 0], sizes = [1, 256], strides = [1, 1]} : vector<9x256xf32> to vector<1x256xf32>
    %78 = vector.broadcast %77 : vector<1x256xf32> to vector<128x256xf32>
    %79 = arith.mulf %76, %78 : vector<128x256xf32>
    %80 = vector.extract_strided_slice %33 {offsets = [0, 5], sizes = [128, 1], strides = [1, 1]} : vector<128x9xf32> to vector<128x1xf32>
    %81 = vector.broadcast %80 : vector<128x1xf32> to vector<128x256xf32>
    %82 = arith.mulf %79, %81 : vector<128x256xf32>
    %83 = arith.addf %75, %82 : vector<128x256xf32>
    %c241_i32 = arith.constant 241 : i32
    %84 = tpu.dynamic_rotate %32 by %c241_i32 dim 1 : vector<128x256xf32>, i32 -> vector<128x256xf32>
    %85 = vector.extract_strided_slice %35 {offsets = [6, 0], sizes = [1, 256], strides = [1, 1]} : vector<9x256xf32> to vector<1x256xf32>
    %86 = vector.broadcast %85 : vector<1x256xf32> to vector<128x256xf32>
    %87 = arith.mulf %84, %86 : vector<128x256xf32>
    %88 = vector.extract_strided_slice %33 {offsets = [0, 6], sizes = [128, 1], strides = [1, 1]} : vector<128x9xf32> to vector<128x1xf32>
    %89 = vector.broadcast %88 : vector<128x1xf32> to vector<128x256xf32>
    %90 = arith.mulf %87, %89 : vector<128x256xf32>
    %91 = arith.addf %83, %90 : vector<128x256xf32>
    %c240_i32 = arith.constant 240 : i32
    %92 = tpu.dynamic_rotate %32 by %c240_i32 dim 1 : vector<128x256xf32>, i32 -> vector<128x256xf32>
    %93 = vector.extract_strided_slice %35 {offsets = [7, 0], sizes = [1, 256], strides = [1, 1]} : vector<9x256xf32> to vector<1x256xf32>
    %94 = vector.broadcast %93 : vector<1x256xf32> to vector<128x256xf32>
    %95 = arith.mulf %92, %94 : vector<128x256xf32>
    %96 = vector.extract_strided_slice %33 {offsets = [0, 7], sizes = [128, 1], strides = [1, 1]} : vector<128x9xf32> to vector<128x1xf32>
    %97 = vector.broadcast %96 : vector<128x1xf32> to vector<128x256xf32>
    %98 = arith.mulf %95, %97 : vector<128x256xf32>
    %99 = arith.addf %91, %98 : vector<128x256xf32>
    %c239_i32 = arith.constant 239 : i32
    %100 = tpu.dynamic_rotate %32 by %c239_i32 dim 1 : vector<128x256xf32>, i32 -> vector<128x256xf32>
    %101 = vector.extract_strided_slice %35 {offsets = [8, 0], sizes = [1, 256], strides = [1, 1]} : vector<9x256xf32> to vector<1x256xf32>
    %102 = vector.broadcast %101 : vector<1x256xf32> to vector<128x256xf32>
    %103 = arith.mulf %100, %102 : vector<128x256xf32>
    %104 = vector.extract_strided_slice %33 {offsets = [0, 8], sizes = [128, 1], strides = [1, 1]} : vector<128x9xf32> to vector<128x1xf32>
    %105 = vector.broadcast %104 : vector<128x1xf32> to vector<128x256xf32>
    %106 = arith.mulf %103, %105 : vector<128x256xf32>
    %107 = arith.addf %99, %106 : vector<128x256xf32>
    %108 = vector.broadcast %34 : vector<128x1xf32> to vector<128x256xf32>
    %109 = arith.addf %107, %108 : vector<128x256xf32>
    %110 = vector.extract_strided_slice %109 {offsets = [0, 0], sizes = [64, 256], strides = [1, 1]} : vector<128x256xf32> to vector<64x256xf32>
    %111 = vector.extract_strided_slice %109 {offsets = [64, 0], sizes = [64, 256], strides = [1, 1]} : vector<128x256xf32> to vector<64x256xf32>
    %cst_22 = arith.constant 5.000000e-01 : f32
    %112 = vector.broadcast %cst_22 : f32 to vector<64x256xf32>
    %113 = arith.mulf %112, %110 : vector<64x256xf32>
    %cst_23 = arith.constant 0.707106769 : f32
    %114 = vector.broadcast %cst_23 : f32 to vector<64x256xf32>
    %115 = arith.mulf %110, %114 : vector<64x256xf32>
    %cst_24 = arith.constant 0.000000e+00 : f32
    %116 = vector.broadcast %cst_24 : f32 to vector<64x256xf32>
    %117 = arith.cmpf oge, %115, %116 : vector<64x256xf32>
    %cst_25 = arith.constant 1.000000e+00 : f32
    %cst_26 = arith.constant -1.000000e+00 : f32
    %118 = vector.broadcast %cst_25 : f32 to vector<64x256xf32>
    %119 = vector.broadcast %cst_26 : f32 to vector<64x256xf32>
    %120 = arith.select %117, %118, %119 : vector<64x256xi1>, vector<64x256xf32>
    %121 = math.absf %115 : vector<64x256xf32>
    %cst_27 = arith.constant 0.327591091 : f32
    %122 = vector.broadcast %cst_27 : f32 to vector<64x256xf32>
    %123 = arith.mulf %122, %121 : vector<64x256xf32>
    %cst_28 = arith.constant 1.000000e+00 : f32
    %124 = vector.broadcast %cst_28 : f32 to vector<64x256xf32>
    %125 = arith.addf %124, %123 : vector<64x256xf32>
    %cst_29 = arith.constant 1.000000e+00 : f32
    %126 = vector.broadcast %cst_29 : f32 to vector<64x256xf32>
    %127 = arith.divf %126, %125 : vector<64x256xf32>
    %cst_30 = arith.constant 1.06140542 : f32
    %128 = vector.broadcast %cst_30 : f32 to vector<64x256xf32>
    %129 = arith.mulf %128, %127 : vector<64x256xf32>
    %cst_31 = arith.constant -1.45315206 : f32
    %130 = vector.broadcast %cst_31 : f32 to vector<64x256xf32>
    %131 = arith.addf %129, %130 : vector<64x256xf32>
    %132 = arith.mulf %131, %127 : vector<64x256xf32>
    %cst_32 = arith.constant 1.42141378 : f32
    %133 = vector.broadcast %cst_32 : f32 to vector<64x256xf32>
    %134 = arith.addf %132, %133 : vector<64x256xf32>
    %135 = arith.mulf %134, %127 : vector<64x256xf32>
    %cst_33 = arith.constant -0.284496725 : f32
    %136 = vector.broadcast %cst_33 : f32 to vector<64x256xf32>
    %137 = arith.addf %135, %136 : vector<64x256xf32>
    %138 = arith.mulf %137, %127 : vector<64x256xf32>
    %cst_34 = arith.constant 0.254829586 : f32
    %139 = vector.broadcast %cst_34 : f32 to vector<64x256xf32>
    %140 = arith.addf %138, %139 : vector<64x256xf32>
    %141 = arith.mulf %140, %127 : vector<64x256xf32>
    %cst_35 = arith.constant 0.000000e+00 : f32
    %142 = vector.broadcast %cst_35 : f32 to vector<64x256xf32>
    %143 = arith.subf %142, %121 : vector<64x256xf32>
    %144 = arith.mulf %143, %121 : vector<64x256xf32>
    %145 = math.exp %144 : vector<64x256xf32>
    %146 = arith.mulf %141, %145 : vector<64x256xf32>
    %cst_36 = arith.constant 1.000000e+00 : f32
    %147 = vector.broadcast %cst_36 : f32 to vector<64x256xf32>
    %148 = arith.subf %147, %146 : vector<64x256xf32>
    %149 = arith.mulf %120, %148 : vector<64x256xf32>
    %cst_37 = arith.constant 1.000000e+00 : f32
    %150 = vector.broadcast %cst_37 : f32 to vector<64x256xf32>
    %151 = arith.addf %150, %149 : vector<64x256xf32>
    %152 = arith.mulf %113, %151 : vector<64x256xf32>
    %c0_38 = arith.constant 0 : index
    %c0_39 = arith.constant 0 : index
    %153 = vector.load %arg8[%c0_38, %c0_39] : memref<32x64xf32, #tpu.memory_space<vmem>>, vector<32x64xf32>
    %154 = arith.mulf %152, %111 : vector<64x256xf32>
    %cst_40 = arith.constant dense<0.000000e+00> : vector<32x256xf32>
    %155 = tpu.matmul %153, %154, %cst_40 {dimension_numbers = #tpu.dot_dimension_numbers<[1], [0], [0], [1], [0, 0, 1, 1], [], []>} : vector<32x64xf32>, vector<64x256xf32>, vector<32x256xf32> -> vector<32x256xf32>
    %c0_41 = arith.constant 0 : index
    %c0_42 = arith.constant 0 : index
    %156 = vector.load %arg9[%c0_41, %c0_42] : memref<32x1xf32, #tpu.memory_space<vmem>>, vector<32x1xf32>
    %157 = vector.broadcast %156 : vector<32x1xf32> to vector<32x256xf32>
    %158 = arith.addf %155, %157 : vector<32x256xf32>
    %159 = arith.addf %1, %158 : vector<32x256xf32>
    %c0_43 = arith.constant 0 : index
    %c0_44 = arith.constant 0 : index
    %c0_45 = arith.constant 0 : index
    %160 = vector.load %arg11[%c0_43, %c0_44, %c0_45] : memref<1x32x256xf32, #tpu.memory_space<vmem>>, vector<1x32x256xf32>
    %161 = vector.shape_cast %160 : vector<1x32x256xf32> to vector<32x256xf32>
    %162 = vector.shape_cast %159 : vector<32x256xf32> to vector<1x32x256xf32>
    tpu.vector_store %arg11[%c0_43, %c0_44, %c0_45], %162 {strides = array<i32>} : memref<1x32x256xf32, #tpu.memory_space<vmem>>, vector<1x32x256xf32>,
    return
  }
  func.func @transform_0(%arg0: i32) -> (i32, i32, i32) {
    %c0_i32 = arith.constant 0 : i32
    %c0_i32_0 = arith.constant 0 : i32
    %c0_i32_1 = arith.constant 0 : i32
    return %arg0, %c0_i32, %c0_i32_0 : i32, i32, i32
  }
  func.func @transform_1(%arg0: i32) -> (i32, i32) {
    %c0_i32 = arith.constant 0 : i32
    %c0_i32_0 = arith.constant 0 : i32
    %c0_i32_1 = arith.constant 0 : i32
    return %c0_i32, %c0_i32_0 : i32, i32
  }
  func.func @transform_2(%arg0: i32) -> (i32, i32) {
    %c0_i32 = arith.constant 0 : i32
    %c0_i32_0 = arith.constant 0 : i32
    %c0_i32_1 = arith.constant 0 : i32
    return %c0_i32, %c0_i32_0 : i32, i32
  }
  func.func @transform_3(%arg0: i32) -> (i32, i32) {
    %c0_i32 = arith.constant 0 : i32
    %c0_i32_0 = arith.constant 0 : i32
    %c0_i32_1 = arith.constant 0 : i32
    return %c0_i32, %c0_i32_0 : i32, i32
  }
  func.func @transform_4(%arg0: i32) -> (i32, i32) {
    %c0_i32 = arith.constant 0 : i32
    %c0_i32_0 = arith.constant 0 : i32
    %c0_i32_1 = arith.constant 0 : i32
    return %c0_i32, %c0_i32_0 : i32, i32
  }
  func.func @transform_5(%arg0: i32) -> (i32, i32) {
    %c0_i32 = arith.constant 0 : i32
    %c0_i32_0 = arith.constant 0 : i32
    %c0_i32_1 = arith.constant 0 : i32
    return %c0_i32, %c0_i32_0 : i32, i32
  }
  func.func @transform_6(%arg0: i32) -> (i32, i32) {
    %c0_i32 = arith.constant 0 : i32
    %c0_i32_0 = arith.constant 0 : i32
    %c0_i32_1 = arith.constant 0 : i32
    return %c0_i32, %c0_i32_0 : i32, i32
  }
  func.func @transform_7(%arg0: i32) -> (i32, i32) {
    %c0_i32 = arith.constant 0 : i32
    %c0_i32_0 = arith.constant 0 : i32
    %c0_i32_1 = arith.constant 0 : i32
    return %c0_i32, %c0_i32_0 : i32, i32
  }
  func.func @transform_8(%arg0: i32) -> (i32, i32) {
    %c0_i32 = arith.constant 0 : i32
    %c0_i32_0 = arith.constant 0 : i32
    %c0_i32_1 = arith.constant 0 : i32
    return %c0_i32, %c0_i32_0 : i32, i32
  }
  func.func @transform_9(%arg0: i32) -> (i32, i32) {
    %c0_i32 = arith.constant 0 : i32
    %c0_i32_0 = arith.constant 0 : i32
    %c0_i32_1 = arith.constant 0 : i32
    return %c0_i32, %c0_i32_0 : i32, i32
  }
  func.func @transform_10(%arg0: i32) -> (i32, i32, i32) {
    %c0_i32 = arith.constant 0 : i32
    %c0_i32_0 = arith.constant 0 : i32
    %c0_i32_1 = arith.constant 0 : i32
    return %arg0, %c0_i32, %c0_i32_0 : i32, i32, i32
  }
}

</mosaic_0001>

<bundles_post_ra>
// kernel: transformer_block.2
= control target key start
LH: loop header
LB: loop body
LE: loop exit
PB: predicated region body
PF: predicated region fallthrough
CT: control target
= control target key end

     0   :  { %s3490_s21 = smov 0   ;;  %s6556_s0 = inlined_call_operand.vmem [shape: f32[2,32,256], index: 0, kind: input, shape index: {}]   ;;  %s6557_s1 = inlined_call_operand.vmem [shape: f32[32,1], index: 1, kind: input, shape index: {}]   ;;  %s6558_s2 = inlined_call_operand.vmem [shape: f32[32,1], index: 2, kind: input, shape index: {}]   ;;  %s6559_s3 = inlined_call_operand.vmem [shape: f32[96,32], index: 3, kind: input, shape index: {}]   ;;  %s6560_s4 = inlined_call_operand.vmem [shape: f32[96,1], index: 4, kind: input, shape index: {}]   ;;  %s6561_s5 = inlined_call_operand.vmem [shape: f32[96,9], index: 5, kind: input, shape index: {}]   ;;  %s6562_s6 = inlined_call_operand.vmem [shape: f32[96,1], index: 6, kind: input, shape index: {}]   ;;  %s6563_s7 = inlined_call_operand.vmem [shape: f32[32,1], index: 7, kind: input, shape index: {}]   ;;  %s6564_s8 = inlined_call_operand.vmem [shape: f32[32,32], index: 8, kind: input, shape index: {}]   ;;  %s6565_s9 = inlined_call_operand.vmem [shape: f32[32,32], index: 9, kind: input, shape index: {}]   ;;  %s6566_s10 = inlined_call_operand.vmem [shape: f32[32,1], index: 10, kind: input, shape index: {}]   ;;  %s6567_s11 = inlined_call_operand.vmem [shape: f32[9,256], index: 11, kind: input, shape index: {}]   ;;  %s6568_s12 = inlined_call_operand.vmem [shape: f32[2,32,256], index: 12, kind: output, shape index: {}]  }
   0x1 LB: > { %s3195_s22 = sadd.s32 4294967295, %s3405_s21   ;;  %p3199_p0 = scmp.ge.s32.totalorder %s3405_s21, 1  ;;  %s3405_s21 = sphi %s3490_s21, %s22_s21  }
   0x2   : > { %p362_p1 = scmp.lt.s32.totalorder %s3405_s21, 3 }
   0x4   : > { %p363_p2 = pnand %p3199_p0, %p362_p1 }
   0x6   : > { %366 = sbr.rel (%p363_p2) target bundleno = 1970 (0x7b2), region = 68 }
   0xb   : > { %v426_v0 = vld [vmem:[%s6558_s2] sm:$0xff]  ;;  %v424_v1 = vld [vmem:[%s6557_s1 + $0x10] sm:$0xff]  ;;  %v6569_v3 = vmov 0   ;;  %p404_p3 = scmp.lt.s32.totalorder %s3195_s22, 1  ;;  %v427_v4 = vld [vmem:[%s6558_s2 + $0x8] sm:$0xff]  ;;  %v3408_v19 = vmov 32.0  }
   0xc   : > { %v422_v2 = vld [vmem:[%s6557_s1] sm:$0xff]  ;;  %3276 = vset.pattern.permute.xlu2 %v6569_v3  ;;  %3275 = vset.pattern.permute.xlu1 %v6569_v3  ;;  %v425_v5 = vld [vmem:[%s6557_s1 + $0x18] sm:$0xff]  ;;  %v423_v6 = vld [vmem:[%s6557_s1 + $0x8] sm:$0xff]  ;;  %3336 = vrcp.f32 %v3408_v19  ;;  %vm663_vm7 = vcmask 261120   ;;  %s3411_s29 = smov 1   ;;  %s3412_s30 = smov 15  }
   0xd   : > { %3274 = vset.pattern.permute.xlu0 %v6569_v3  ;;  %553 = vperm.xlu2 %3276, %v426_v0   ;;  %s7286_s22 = smov (!%p404_p3, %s3195_s22), 1  ;;  %v591_v7 = vld [vmem:[%s6560_s4] sm:$0xff]  ;;  %v429_v8 = vld [vmem:[%s6558_s2 + $0x18] sm:$0xff]  ;;  %v428_v9 = vld [vmem:[%s6558_s2 + $0x10] sm:$0xff]  ;;  %s3413_s13 = smov 17  }
   0xe   : > { %535 = vperm.xlu1 %3275, %v424_v1   ;;  %525 = vperm.xlu0 %3274, %v422_v2   ;;  %s3246_s17 = sshll.u32 %s7286_s22, 6  ;;  %v594_v20 = vld [vmem:[%s6560_s4 + $0x18] sm:$0xff]  ;;  %v593_v24 = vld [vmem:[%s6560_s4 + $0x10] sm:$0xff]  ;;  %v592_v25 = vld [vmem:[%s6560_s4 + $0x8] sm:$0xff]  ;;  %s3414_s14 = smov 16  }
   0xf   : > { %s3536_s28 = scalar_lea.vmem %s6556_s0, %s3246_s17  ;;  %v597_v35 = vld [vmem:[%s6560_s4 + $0x30] sm:$0xff]  ;;  %v596_v38 = vld [vmem:[%s6560_s4 + $0x28] sm:$0xff]  ;;  %v595_v39 = vld [vmem:[%s6560_s4 + $0x20] sm:$0xff]  ;;  %s3417_s15 = smov 127  }
  0x10   : > { %v414_v10 = vld [vmem:[%s3536_s28] sm:$0xff]  ;;  %v416_v11 = vld [vmem:[%s3536_s28 + $0x10] sm:$0xff]  ;;  %v415_v13 = vld [vmem:[%s3536_s28 + $0x8] sm:$0xff]  ;;  %s3419_s23 = smov 112   ;;  %s3420_s24 = smov 113  }
  0x11   : > { %v430_v12 = vadd.f32 %v416_v11, %v414_v10  ;;  %v417_v14 = vld [vmem:[%s3536_s28 + $0x18] sm:$0xff]  ;;  %v418_v15 = vld [vmem:[%s3536_s28 + $0x20] sm:$0xff]  ;;  %v419_v16 = vld [vmem:[%s3536_s28 + $0x28] sm:$0xff]  ;;  %s3423_s25 = smov 111  }
  0x12   : > { %v439_v17 = vadd.f32 %v417_v14, %v415_v13  ;;  %v420_v21 = vld [vmem:[%s3536_s28 + $0x30] sm:$0xff]  ;;  %v421_v22 = vld [vmem:[%s3536_s28 + $0x38] sm:$0xff]  ;;  %v3337_v30 = vpop.eup %3336  ;;  %v600_v49 = vld [vmem:[%s6560_s4 + $0x48] sm:$0xff] }
  0x13   : > { %v431_v18 = vadd.f32 %v430_v12, %v418_v15  ;;  %v449_v32 = vmul.f32 32.0, %v3337_v30  ;;  %vm453_vm0 = vweird.f32 %v3337_v30  ;;  %v599_v50 = vld [vmem:[%s6560_s4 + $0x40] sm:$0xff]  ;;  %v598_v51 = vld [vmem:[%s6560_s4 + $0x38] sm:$0xff]  ;;  %v601_v60 = vld [vmem:[%s6560_s4 + $0x50] sm:$0xff] }
  0x14   : > { %v440_v23 = vadd.f32 %v439_v17, %v419_v16  ;;  %v3588_v58 = vld [vmem:[%s6561_s5] sm:$0xff]  ;;  %v602_v59 = vld [vmem:[%s6560_s4 + $0x58] sm:$0xff]  ;;  %v3641_v19 = vld [vmem:[%s6561_s5 + $0x28] sm:$0xff] }
  0x15   : > { %558 = vperm.xlu2 %3276, %v427_v4   ;;  %v432_v26 = vadd.f32 %v431_v18, %v420_v21  ;;  %v450_v36 = vsub.f32 1.0, %v449_v32  ;;  %v3636_v18 = vld [vmem:[%s6561_s5 + $0x30] sm:$0xff] }
  0x16   : > { %540 = vperm.xlu1 %3275, %v425_v5   ;;  %530 = vperm.xlu0 %3274, %v423_v6   ;;  %v441_v27 = vadd.f32 %v440_v23, %v421_v22 }
  0x17   : > { %v433_v28 = vrot.slane %v432_v26, 4  ;;  %v451_v41 = vmul.f32 %v3337_v30, %v450_v36 }
  0x18   : > { %v442_v29 = vrot.slane %v441_v27, 4 }
  0x19   : > { %v434_v31 = vadd.f32 %v433_v28, %v432_v26  ;;  %v452_v44 = vadd.f32 %v3337_v30, %v451_v41 }
  0x1a   : > { %v443_v33 = vadd.f32 %v442_v29, %v441_v27 }
  0x1b   : > { %v435_v34 = vrot.slane %v434_v31, 2  ;;  %v3564_v47 = vsel %vm453_vm0, %v3337_v30, %v452_v44  ;;  %v3660_v30 = vld [vmem:[%s6561_s5 + $0x58] sm:$0xff] }
  0x1c   : > { %v444_v37 = vrot.slane %v443_v33, 2 }
  0x1d   : > { %605 = vperm.xlu2 %3276, %v591_v7   ;;  %v436_v40 = vadd.f32 %v435_v34, %v434_v31 }
  0x1e   : > { %568 = vperm.xlu1 %3275, %v429_v8   ;;  %563 = vperm.xlu0 %3274, %v428_v9   ;;  %v445_v42 = vadd.f32 %v444_v37, %v443_v33 }
  0x1f   : > { %v437_v43 = vrot.slane %v436_v40, 1 }
  0x20   : > { %v446_v45 = vrot.slane %v445_v42, 1 }
  0x21   : > { %v438_v46 = vadd.f32 %v437_v43, %v436_v40 }
  0x22   : > { %v447_v48 = vadd.f32 %v446_v45, %v445_v42 }
  0x23   : > { %v455_v52 = vmul.f32 %v3564_v47, %v438_v46 }
  0x24   : > { %v456_v53 = vmul.f32 %v3564_v47, %v447_v48 }
  0x25   : > { %620 = vperm.xlu2 %3276, %v594_v20   ;;  %v3577_v54 = vsub.f32 %v414_v10, %v455_v52  ;;  %v3579_v55 = vsub.f32 %v416_v11, %v455_v52  ;;  %v3596_v61 = vsub.f32 %v418_v15, %v455_v52  ;;  %v3609_v4 = vsub.f32 %v420_v21, %v455_v52  ;;  %v3620_v10 = vld [vmem:[%s6561_s5 + $0x18] sm:$0xff]  ;;  %v3625_v11 = vld [vmem:[%s6561_s5 + $0x10] sm:$0xff] }
  0x26   : > { %615 = vperm.xlu1 %3275, %v593_v24   ;;  %610 = vperm.xlu0 %3274, %v592_v25   ;;  %v3581_v56 = vsub.f32 %v415_v13, %v456_v53  ;;  %v3583_v57 = vsub.f32 %v417_v14, %v456_v53  ;;  %v3602_v0 = vsub.f32 %v419_v16, %v456_v53  ;;  %v3648_v24 = vld [vmem:[%s6561_s5 + $0x48] sm:$0xff]  ;;  %v3653_v25 = vld [vmem:[%s6561_s5 + $0x40] sm:$0xff] }
  0x27   : > { %v465_v62 = vmul.f32 %v3577_v54, %v3577_v54  ;;  %v467_v63 = vmul.f32 %v3579_v55, %v3579_v55  ;;  %v469_v5 = vmul.f32 %v3596_v61, %v3596_v61  ;;  %v3613_v7 = vsub.f32 %v421_v22, %v456_v53 }
  0x28   : > { %v466_v1 = vmul.f32 %v3581_v56, %v3581_v56  ;;  %v468_v2 = vmul.f32 %v3583_v57, %v3583_v57  ;;  %v470_v8 = vmul.f32 %v3602_v0, %v3602_v0  ;;  %v471_v12 = vmul.f32 %v3609_v4, %v3609_v4 }
  0x29   : > { %v473_v6 = vadd.f32 %v467_v63, %v465_v62  ;;  %v472_v14 = vmul.f32 %v3613_v7, %v3613_v7 }
  0x2a   : > { %v482_v9 = vadd.f32 %v468_v2, %v466_v1 }
  0x2b   : > { %v474_v13 = vadd.f32 %v473_v6, %v469_v5 }
  0x2c   : > { %v483_v15 = vadd.f32 %v482_v9, %v470_v8 }
  0x2d   : > { %635 = vperm.xlu2 %3276, %v597_v35   ;;  %v475_v16 = vadd.f32 %v474_v13, %v471_v12 }
  0x2e   : > { %630 = vperm.xlu1 %3275, %v596_v38   ;;  %625 = vperm.xlu0 %3274, %v595_v39   ;;  %v484_v17 = vadd.f32 %v483_v15, %v472_v14 }
  0x2f   : > { %v476_v20 = vrot.slane %v475_v16, 4 }
  0x30   : > { %v485_v21 = vrot.slane %v484_v17, 4 }
  0x31   : > { %v477_v22 = vadd.f32 %v476_v20, %v475_v16 }
  0x32   : > { %v486_v23 = vadd.f32 %v485_v21, %v484_v17 }
  0x33   : > { %v478_v26 = vrot.slane %v477_v22, 2 }
  0x34   : > { %v487_v27 = vrot.slane %v486_v23, 2 }
  0x35   : > { %650 = vperm.xlu2 %3276, %v600_v49   ;;  %v479_v28 = vadd.f32 %v478_v26, %v477_v22 }
  0x36   : > { %645 = vperm.xlu1 %3275, %v599_v50   ;;  %640 = vperm.xlu0 %3274, %v598_v51   ;;  %v488_v29 = vadd.f32 %v487_v27, %v486_v23 }
  0x37   : > { %v480_v31 = vrot.slane %v479_v28, 1 }
  0x38   : > { %v489_v32 = vrot.slane %v488_v29, 1 }
  0x39   : > { %v481_v33 = vadd.f32 %v480_v31, %v479_v28  ;;  %v3409_v31 = vmov 1  }
  0x3a   : > { %v490_v34 = vadd.f32 %v489_v32, %v488_v29  ;;  %v579_v29 = vld [vmem:[%s6559_s3] sm:$0xff]  ;;  %v580_v32 = vld [vmem:[%s6559_s3 + $0x8] sm:$0xff] }
  0x3b   : > { %v491_v35 = vmul.f32 %v481_v33, %v3564_v47  ;;  %v581_v33 = vld [vmem:[%s6559_s3 + $0x10] sm:$0xff] }
  0x3c   : > { %v492_v36 = vmul.f32 %v490_v34, %v3564_v47  ;;  %v3692_v34 = vld [vmem:[%s6561_s5 + $0x20] sm:$0xff] }
  0x3d   : > { %937 = vperm.xlu2 %3276, %v3588_v58   ;;  %v493_v37 = vadd.f32 1e-05, %v491_v35  ;;  %v582_v35 = vld [vmem:[%s6559_s3 + $0x18] sm:$0xff] }
  0x3e   : > { %660 = vperm.xlu1 %3275, %v602_v59   ;;  %655 = vperm.xlu0 %3274, %v601_v60   ;;  %v494_v38 = vadd.f32 1e-05, %v492_v36  ;;  %v3704_v36 = vld [vmem:[%s6561_s5 + $0x38] sm:$0xff] }
  0x3f   : > { %3338 = vrsqrt.f32 %v493_v37  ;;  %vm501_vm1 = vweird.f32 %v493_v37 }
  0x40   : > { %3340 = vrsqrt.f32 %v494_v38  ;;  %vm511_vm3 = vweird.f32 %v494_v38 }
  0x45   : > { %952 = vperm.xlu2 %3276, %v3620_v10   ;;  %v3339_v39 = vpop.eup %3338 }
  0x46   : > { %947 = vperm.xlu1 %3275, %v3625_v11   ;;  %v3341_v40 = vpop.eup %3340  ;;  %v496_v41 = vmul.f32 %v3339_v39, %v493_v37  ;;  %vm502_vm2 = vweird.f32 %v3339_v39  ;;  %3278 = vset.pattern.permute.xlu0 %v3409_v31  ;;  %v3712_v37 = vld [vmem:[%s6561_s5 + $0x8] sm:$0xff] }
  0x47   : > { %v506_v42 = vmul.f32 %v3341_v40, %v494_v38  ;;  %vm512_vm4 = vweird.f32 %v3341_v40  ;;  %vm503_vm5 = vmor %vm501_vm1, %vm502_vm2  ;;  %1147 = vperm.xlu0 %3278, %v3712_v37   ;;  %v3719_v38 = vld [vmem:[%s6561_s5 + $0x50] sm:$0xff] }
  0x48   : > { %v497_v43 = vmul.f32 %v3339_v39, %v496_v41  ;;  %vm513_vm6 = vmor %vm511_vm3, %vm512_vm4  ;;  %v3410_v41 = vmov 2  }
  0x49   : > { %v507_v44 = vmul.f32 %v3341_v40, %v506_v42  ;;  %v585_v42 = vld [vmem:[%s6559_s3 + $0x30] sm:$0xff] }
  0x4a   : > { %v498_v45 = vmul.f32 0.5, %v497_v43  ;;  %v586_v43 = vld [vmem:[%s6559_s3 + $0x38] sm:$0xff] }
  0x4b   : > { %v508_v46 = vmul.f32 0.5, %v507_v44 }
  0x4c   : > { %v499_v50 = vsub.f32 1.5, %v498_v45  ;;  %v587_v45 = vld [vmem:[%s6559_s3 + $0x40] sm:$0xff] }
  0x4d   : > { %967 = vperm.xlu2 %3276, %v3636_v18   ;;  %v509_v51 = vsub.f32 1.5, %v508_v46 }
  0x4e   : > { %962 = vperm.xlu1 %3275, %v3641_v19   ;;  %v500_v47 = vmul.f32 %v3339_v39, %v499_v50  ;;  %v589_v50 = vld [vmem:[%s6559_s3 + $0x50] sm:$0xff] }
  0x4f   : > { %v510_v52 = vmul.f32 %v3341_v40, %v509_v51  ;;  %1167 = vperm.xlu0 %3278, %v3636_v18  }
  0x50   : > { %v504_v60 = vsel %vm503_vm5, %v3339_v39, %v500_v47  ;;  %v583_v39 = vld [vmem:[%s6559_s3 + $0x20] sm:$0xff]  ;;  %v590_v47 = vld [vmem:[%s6559_s3 + $0x58] sm:$0xff] }
  0x51   : > { %v514_v62 = vsel %vm513_vm6, %v3341_v40, %v510_v52  ;;  %v521_v1 = vmul.f32 %v504_v60, %v3609_v4  ;;  %v519_v5 = vmul.f32 %v504_v60, %v3596_v61  ;;  %v517_v8 = vmul.f32 %v504_v60, %v3579_v55  ;;  %v584_v40 = vld [vmem:[%s6559_s3 + $0x28] sm:$0xff] }
  0x52   : > { %v522_v2 = vmul.f32 %v514_v62, %v3613_v7  ;;  %v520_v6 = vmul.f32 %v514_v62, %v3602_v0  ;;  %v518_v9 = vmul.f32 %v514_v62, %v3583_v57  ;;  %v515_v12 = vmul.f32 %v504_v60, %v3577_v54 }
  0x53   : > { %v516_v15 = vmul.f32 %v514_v62, %v3581_v56 }
  0x55   : > { %982 = vperm.xlu2 %3276, %v3648_v24  }
  0x56   : > { %977 = vperm.xlu1 %3275, %v3653_v25  }
  0x57   : > { %1179 = vperm.xlu0 %3278, %v3648_v24  }
  0x5d   : > { %3277 = vset.pattern.permute.xlu2 %v3409_v31 }
  0x5e   : > { %992 = vperm.xlu1 %3275, %v3660_v30   ;;  %1143 = vperm.xlu2 %3277, %v3588_v58  }
  0x5f   : > { %3280 = vset.pattern.permute.xlu0 %v3410_v41 }
  0x60   : > { %1338 = vperm.xlu0 %3280, %v3588_v58  }
  0x66   : > { %3279 = vset.pattern.permute.xlu1 %v3409_v31  ;;  %1155 = vperm.xlu2 %3277, %v3620_v10  }
  0x67   : > { %v554_v63 = vpop.permute.xlu2 %553  ;;  %1151 = vperm.xlu1 %3279, %v3625_v11  }
  0x68   : > { %1358 = vperm.xlu0 %3280, %v3641_v19  }
  0x6e   : > { %1163 = vperm.xlu2 %3277, %v3641_v19  }
  0x6f   : > { %v559_v26 = vpop.permute.xlu2 %558  ;;  %1159 = vperm.xlu1 %3279, %v3692_v34  }
  0x70   : > { %1370 = vperm.xlu0 %3280, %v3653_v25  }
  0x76   : > { %1175 = vperm.xlu2 %3277, %v3653_v25  }
  0x77   : > { %1171 = vperm.xlu1 %3279, %v3704_v36   ;;  %v606_v44 = vpop.permute.xlu2 %605 }
  0x78   : > { %1382 = vperm.xlu0 %3280, %v3660_v30  }
  0x7e   : > { %1187 = vperm.xlu2 %3277, %v3660_v30  }
  0x7f   : > { %1183 = vperm.xlu1 %3279, %v3719_v38   ;;  %v3758_v46 = vpop.permute.xlu2 %620 }
  0x80   : > { %v536_v48 = vpop.permute.xlu1 %535  ;;  %v526_v49 = vpop.permute.xlu0 %525 }
  0x81   : > { %v547_v20 = vmul.f32 %v536_v48, %v519_v5  ;;  %v548_v4 = vmul.f32 %v536_v48, %v520_v6  ;;  %v543_v23 = vmul.f32 %v526_v49, %v515_v12  ;;  %v544_v57 = vmul.f32 %v526_v49, %v516_v15  ;;  %v588_v48 = vld [vmem:[%s6559_s3 + $0x48] sm:$0xff] }
  0x83   : > { %v571_v56 = vadd.f32 %v554_v63, %v543_v23  ;;  %v572_v28 = vadd.f32 %v554_v63, %v544_v57 }
  0x86   : > { %3282 = vset.pattern.permute.xlu2 %v3410_v41 }
  0x87   : > { %3281 = vset.pattern.permute.xlu1 %v3410_v41  ;;  %1346 = vperm.xlu2 %3282, %v3625_v11   ;;  %v3769_v49 = vpop.permute.xlu2 %635 }
  0x88   : > { %v541_v53 = vpop.permute.xlu1 %540  ;;  %v531_v59 = vpop.permute.xlu0 %530  ;;  %1342 = vperm.xlu1 %3281, %v3712_v37  }
  0x89   : > { %v549_v13 = vmul.f32 %v541_v53, %v521_v1  ;;  %v550_v14 = vmul.f32 %v541_v53, %v522_v2  ;;  %v545_v22 = vmul.f32 %v531_v59, %v517_v8  ;;  %v546_v61 = vmul.f32 %v531_v59, %v518_v9 }
  0x8b   : > { %v573_v54 = vadd.f32 %v559_v26, %v545_v22  ;;  %v574_v27 = vadd.f32 %v559_v26, %v546_v61 }
  0x8f   : > { %1354 = vperm.xlu2 %3282, %v3692_v34   ;;  %v3776_v51 = vpop.permute.xlu2 %650 }
  0x90   : > { %v569_v16 = vpop.permute.xlu1 %568  ;;  %v564_v17 = vpop.permute.xlu0 %563  ;;  %1350 = vperm.xlu1 %3281, %v3620_v10  }
  0x91   : > { %v577_v21 = vadd.f32 %v569_v16, %v549_v13  ;;  %v578_v7 = vadd.f32 %v569_v16, %v550_v14  ;;  %v575_v55 = vadd.f32 %v564_v17, %v547_v20  ;;  %v576_v0 = vadd.f32 %v564_v17, %v548_v4 }
  0x93   : > { %712 = vmatpush.msra.mxu0 %v577_v21  ;;  %765 = vmatpush.msra.mxu1 %v578_v7 }
  0x95   : > { %713 = vmatpush.msra.mxu0 %v575_v55  ;;  %766 = vmatpush.msra.mxu1 %v576_v0 }
  0x97   : > { %714 = vmatpush.msra.mxu0 %v573_v54  ;;  %767 = vmatpush.msra.mxu1 %v574_v27  ;;  %v3783_v53 = vpop.permute.xlu2 %937 }
  0x98   : > { %1362 = vperm.xlu1 %3281, %v3636_v18   ;;  %1366 = vperm.xlu2 %3282, %v3704_v36   ;;  %v616_v52 = vpop.permute.xlu1 %615  ;;  %6808 = vst [vmem:[#allocation2_spill] sm:$0xff] %v3783_v53  ;;  %v611_v12 = vpop.permute.xlu0 %610 }
  0x99   : > { %715 = vmatpush.msra.mxu0 %v571_v56  ;;  %768 = vmatpush.msra.mxu1 %v572_v28 }
  0x9a   : > { %3204 = vmatmul.msk.f32.vlgmr.msra.gmra.mxu0 %vm663_vm7, %v579_v29  ;;  %3216 = vmatmul.msk.f32.vlgmr.msra.gmra.mxu1 %vm663_vm7, %v579_v29 }
  0x9f   : > { %v3787_v60 = vpop.permute.xlu2 %952 }
  0xa0   : > { %1374 = vperm.xlu1 %3281, %v3648_v24   ;;  %1378 = vperm.xlu2 %3282, %v3719_v38   ;;  %v3785_v59 = vpop.permute.xlu1 %630  ;;  %6809 = vst [vmem:[#allocation3_spill] sm:$0xff] %v3787_v60  ;;  %v626_v7 = vpop.permute.xlu0 %625 }
  0xa2   : > { %3205 = vmatmul.msk.f32.gmra.mxu0 %vm663_vm7, %v580_v32  ;;  %3217 = vmatmul.msk.f32.gmra.mxu1 %vm663_vm7, %v580_v32 }
  0xa7   : > { %v3791_v63 = vpop.permute.xlu2 %967 }
  0xa8   : > { %v3789_v62 = vpop.permute.xlu1 %645  ;;  %6810 = vst [vmem:[#allocation4_spill] sm:$0xff] %v3791_v63  ;;  %v3843_v57 = vpop.permute.xlu0 %640 }
  0xaa   : > { %3206 = vmatmul.msk.f32.gmra.mxu0 %vm663_vm7, %v581_v33  ;;  %3218 = vmatmul.msk.f32.gmra.mxu1 %vm663_vm7, %v581_v33 }
  0xaf   : > { %v3795_v2 = vpop.permute.xlu2 %982 }
  0xb0   : > { %v3793_v1 = vpop.permute.xlu1 %660  ;;  %6811 = vst [vmem:[#allocation5_spill] sm:$0xff] %v3795_v2  ;;  %v3859_v28 = vpop.permute.xlu0 %655 }
  0xb2   : > { %3207 = vmatmul.msk.f32.gmra.mxu0 %vm663_vm7, %v582_v35  ;;  %3219 = vmatmul.msk.f32.gmra.mxu1 %vm663_vm7, %v582_v35 }
  0xb8   : > { %v3797_v6 = vpop.permute.xlu1 %947  ;;  %v3807_v13 = vpop.permute.xlu2 %1143 }
  0xb9   : > { %6812 = vst [vmem:[#allocation6_spill] sm:$0xff] %v3797_v6  ;;  %v3871_v33 = vpop.permute.xlu0 %1147 }
  0xba   : > { %3208 = vmatmul.msk.f32.gmra.mxu0 %vm663_vm7, %v583_v39  ;;  %3220 = vmatmul.msk.f32.gmra.mxu1 %vm663_vm7, %v583_v39  ;;  %6814 = vst [vmem:[#allocation8_spill] sm:$0xff] %v3807_v13 }
  0xbb   : > { %6827 = vst [vmem:[#allocation21_spill] sm:$0xff] %v3871_v33 }
  0xc0   : > { %v3813_v17 = vpop.permute.xlu1 %962  ;;  %v3823_v21 = vpop.permute.xlu2 %1155 }
  0xc1   : > { %6818 = vst [vmem:[#allocation12_spill] sm:$0xff] %v3823_v21 }
  0xc2   : > { %3209 = vmatmul.msk.f32.gmra.mxu0 %vm663_vm7, %v584_v40  ;;  %3221 = vmatmul.msk.f32.gmra.mxu1 %vm663_vm7, %v584_v40 }
  0xc8   : > { %v3831_v22 = vpop.permute.xlu1 %977  ;;  %v3839_v55 = vpop.permute.xlu2 %1163 }
  0xc9   : > { %6819 = vst [vmem:[#allocation13_spill] sm:$0xff] %v3831_v22 }
  0xca   : > { %3210 = vmatmul.msk.f32.gmra.mxu0 %vm663_vm7, %v585_v42  ;;  %3222 = vmatmul.msk.f32.gmra.mxu1 %vm663_vm7, %v585_v42 }
  0xd0   : > { %v3845_v26 = vpop.permute.xlu1 %992  ;;  %v3855_v27 = vpop.permute.xlu2 %1175 }
  0xd1   : > { %6821 = vst [vmem:[#allocation15_spill] sm:$0xff] %v3845_v26 }
  0xd2   : > { %3211 = vmatmul.msk.f32.gmra.mxu0 %vm663_vm7, %v586_v43  ;;  %3223 = vmatmul.msk.f32.gmra.mxu1 %vm663_vm7, %v586_v43  ;;  %6823 = vst [vmem:[#allocation17_spill] sm:$0xff] %v3855_v27 }
  0xd8   : > { %v3867_v31 = vpop.permute.xlu2 %1187 }
  0xd9   : > { %v3857_v56 = vpop.permute.xlu1 %1151  ;;  %6825 = vst [vmem:[#allocation19_spill] sm:$0xff] %v3867_v31 }
  0xda   : > { %3212 = vmatmul.msk.f32.gmra.mxu0 %vm663_vm7, %v587_v45  ;;  %3224 = vmatmul.msk.f32.gmra.mxu1 %vm663_vm7, %v587_v45  ;;  %6824 = vst [vmem:[#allocation18_spill] sm:$0xff] %v3857_v56 }
  0xe1   : > { %v3869_v32 = vpop.permute.xlu1 %1159  ;;  %v3879_v40 = vpop.permute.xlu2 %1346 }
  0xe2   : > { %3213 = vmatmul.msk.f32.gmra.mxu0 %vm663_vm7, %v588_v48  ;;  %3225 = vmatmul.msk.f32.gmra.mxu1 %vm663_vm7, %v588_v48  ;;  %6826 = vst [vmem:[#allocation20_spill] sm:$0xff] %v3869_v32  ;;  %v3416_v32 = vmov 4  }
  0xe3   : > { %6828 = vst [vmem:[#allocation22_spill] sm:$0xff] %v3879_v40 }
  0xe9   : > { %v3886_v43 = vpop.permute.xlu1 %1171 }
  0xea   : > { %3214 = vmatmul.msk.f32.gmra.mxu0 %vm663_vm7, %v589_v50  ;;  %3226 = vmatmul.msk.f32.gmra.mxu1 %vm663_vm7, %v589_v50  ;;  %6830 = vst [vmem:[#allocation24_spill] sm:$0xff] %v3886_v43 }
  0xf2   : > { %3215 = vmatmul.msk.f32.gmra.mxu0 %vm663_vm7, %v590_v47  ;;  %3227 = vmatmul.msk.f32.gmra.mxu1 %vm663_vm7, %v590_v47  ;;  %v3901_v47 = vpop.permute.xlu2 %1354 }
 0x117   : > { %v717_v5 = vpop.f32.mrf.mxu0  ;;  %v770_v9 = vpop.f32.mrf.mxu1 }
 0x118   : > { %v3799_v8 = vadd.f32 %v717_v5, %v606_v44  ;;  %v3809_v15 = vadd.f32 %v770_v9, %v606_v44  ;;  %v3888_v44 = vpop.permute.xlu0 %1167 }
 0x119   : > { %6831 = vst [vmem:[#allocation25_spill] sm:$0xff] %v3888_v44 }
 0x11a   : > { %6813 = vst [vmem:[#allocation7_spill] sm:$0xff] %v3799_v8  ;;  %1433 = vrot.lane.b32.xlu1 %v3799_v8, %s3411_s29  ;;  %1238 = vrot.lane.b32.xlu0 %v3799_v8, %s3412_s30 }
 0x11b   : > { %834 = vrot.lane.b32.xlu2 %v3799_v8, %s3413_s13  ;;  %6815 = vst [vmem:[#allocation9_spill] sm:$0xff] %v3809_v15 }
 0x11f   : > { %v720_v14 = vpop.f32.mrf.mxu0  ;;  %v773_v20 = vpop.f32.mrf.mxu1 }
 0x120   : > { %v3811_v16 = vadd.f32 %v720_v14, %v611_v12  ;;  %v3821_v4 = vadd.f32 %v773_v20, %v611_v12  ;;  %v3911_v5 = vpop.permute.xlu0 %1179  ;;  %v3920_v12 = vpop.permute.xlu2 %1366 }
 0x121   : > { %6834 = vst [vmem:[#allocation28_spill] sm:$0xff] %v3911_v5 }
 0x122   : > { %6816 = vst [vmem:[#allocation10_spill] sm:$0xff] %v3811_v16  ;;  %1240 = vrot.lane.b32.xlu1 %v3811_v16, %s3412_s30  ;;  %1262 = vrot.lane.b32.xlu0 %v3809_v15, %s3412_s30 }
 0x123   : > { %858 = vrot.lane.b32.xlu2 %v3809_v15, %s3413_s13  ;;  %6817 = vst [vmem:[#allocation11_spill] sm:$0xff] %v3821_v4 }
 0x124   : > { %6835 = vst [vmem:[#allocation29_spill] sm:$0xff] %v3920_v12 }
 0x127   : > { %v723_v61 = vpop.f32.mrf.mxu0  ;;  %v776_v0 = vpop.f32.mrf.mxu1 }
 0x128   : > { %v3833_v23 = vadd.f32 %v723_v61, %v616_v52  ;;  %v3847_v54 = vadd.f32 %v776_v0, %v616_v52  ;;  %v3909_v52 = vpop.permute.xlu1 %1183  ;;  %v3937_v0 = vpop.permute.xlu2 %1378 }
 0x129   : > { %6833 = vst [vmem:[#allocation27_spill] sm:$0xff] %v3909_v52 }
 0x12a   : > { %1264 = vrot.lane.b32.xlu1 %v3821_v4, %s3412_s30  ;;  %836 = vrot.lane.b32.xlu0 %v3811_v16, %s3413_s13  ;;  %6820 = vst [vmem:[#allocation14_spill] sm:$0xff] %v3833_v23 }
 0x12b   : > { %1043 = vrot.lane.b32.xlu2 %v3799_v8, %s3414_s14  ;;  %6822 = vst [vmem:[#allocation16_spill] sm:$0xff] %v3847_v54 }
 0x12c   : > { %6838 = vst [vmem:[#allocation32_spill] sm:$0xff] %v3937_v0 }
 0x12f   : > { %v726_v29 = vpop.f32.mrf.mxu0  ;;  %v779_v35 = vpop.f32.mrf.mxu1 }
 0x130   : > { %v3882_v41 = vadd.f32 %v726_v29, %v3758_v46  ;;  %v3897_v48 = vadd.f32 %v779_v35, %v3758_v46  ;;  %v3924_v20 = vpop.permute.xlu1 %1342 }
 0x131   : > { %6836 = vst [vmem:[#allocation30_spill] sm:$0xff] %v3924_v20 }
 0x132   : > { %838 = vrot.lane.b32.xlu1 %v3833_v23, %s3413_s13  ;;  %860 = vrot.lane.b32.xlu0 %v3821_v4, %s3413_s13  ;;  %6829 = vst [vmem:[#allocation23_spill] sm:$0xff] %v3882_v41 }
 0x133   : > { %1067 = vrot.lane.b32.xlu2 %v3809_v15, %s3414_s14  ;;  %6832 = vst [vmem:[#allocation26_spill] sm:$0xff] %v3897_v48 }
 0x137   : > { %v729_v39 = vpop.f32.mrf.mxu0  ;;  %v782_v45 = vpop.f32.mrf.mxu1 }
 0x138   : > { %v3884_v42 = vadd.f32 %v729_v39, %v626_v7  ;;  %v3899_v50 = vadd.f32 %v782_v45, %v626_v7  ;;  %v3926_v7 = vpop.permute.xlu0 %1338  ;;  %v3939_v29 = vpop.permute.xlu1 %1350 }
 0x139   : > { %6837 = vst [vmem:[#allocation31_spill] sm:$0xff] %v3926_v7 }
 0x13a   : > { %862 = vrot.lane.b32.xlu1 %v3847_v54, %s3413_s13  ;;  %1045 = vrot.lane.b32.xlu0 %v3811_v16, %s3414_s14  ;;  %6839 = vst [vmem:[#allocation33_spill] sm:$0xff] %v3939_v29 }
 0x13b   : > { %1435 = vrot.lane.b32.xlu2 %v3811_v16, %s3411_s29 }
 0x13f   : > { %v732_v9 = vpop.f32.mrf.mxu0  ;;  %v785_v14 = vpop.f32.mrf.mxu1 }
 0x140   : > { %v3914_v46 = vadd.f32 %v732_v9, %v3785_v59  ;;  %v3929_v61 = vadd.f32 %v785_v14, %v3785_v59  ;;  %v3941_v35 = vpop.permute.xlu0 %1358  ;;  %v3951_v45 = vpop.permute.xlu1 %1362 }
 0x141   : > { %6841 = vst [vmem:[#allocation35_spill] sm:$0xff] %v3951_v45 }
 0x142   : > { %1047 = vrot.lane.b32.xlu1 %v3833_v23, %s3414_s14  ;;  %1069 = vrot.lane.b32.xlu0 %v3821_v4, %s3414_s14 }
 0x143   : > { %1242 = vrot.lane.b32.xlu2 %v3833_v23, %s3412_s30 }
 0x147   : > { %v735_v59 = vpop.f32.mrf.mxu0  ;;  %v788_v14 = vpop.f32.mrf.mxu1 }
 0x148   : > { %v3953_v9 = vpop.permute.xlu0 %1370  ;;  %v3964_v27 = vadd.f32 %v735_v59, %v3769_v49  ;;  %v3982_v59 = vadd.f32 %v788_v14, %v3769_v49 }
 0x149   : > { %6842 = vst [vmem:[#allocation36_spill] sm:$0xff] %v3953_v9  ;;  %v3975_v9 = vpop.permute.xlu1 %1374 }
 0x14a   : > { %1071 = vrot.lane.b32.xlu1 %v3847_v54, %s3414_s14  ;;  %1437 = vrot.lane.b32.xlu0 %v3833_v23, %s3411_s29  ;;  %6844 = vst [vmem:[#allocation38_spill] sm:$0xff] %v3964_v27 }
 0x14b   : > { %1266 = vrot.lane.b32.xlu2 %v3847_v54, %s3412_s30  ;;  %6845 = vst [vmem:[#allocation39_spill] sm:$0xff] %v3975_v9 }
 0x14c   : > { %6848 = vst [vmem:[#allocation42_spill] sm:$0xff] %v3982_v59 }
 0x14f   : > { %v738_v3 = vpop.f32.mrf.mxu0  ;;  %v791_v2 = vpop.f32.mrf.mxu1 }
 0x150   : > { %v3967_v26 = vadd.f32 %v738_v3, %v3843_v57  ;;  %v3977_v31 = vpop.permute.xlu0 %1382  ;;  %v3985_v3 = vadd.f32 %v791_v2, %v3843_v57 }
 0x151   : > { %6846 = vst [vmem:[#allocation40_spill] sm:$0xff] %v3977_v31 }
 0x152   : > { %1246 = vrot.lane.b32.xlu1 %v3884_v42, %s3412_s30  ;;  %1244 = vrot.lane.b32.xlu0 %v3882_v41, %s3412_s30 }
 0x153   : > { %840 = vrot.lane.b32.xlu2 %v3882_v41, %s3413_s13 }
 0x157   : > { %v741_v40 = vpop.f32.mrf.mxu0  ;;  %v794_v14 = vpop.f32.mrf.mxu1 }
 0x158   : > { %v4000_v49 = vadd.f32 %v741_v40, %v3789_v62  ;;  %v4015_v20 = vadd.f32 %v794_v14, %v3789_v62 }
 0x15a   : > { %1270 = vrot.lane.b32.xlu1 %v3899_v50, %s3412_s30  ;;  %1268 = vrot.lane.b32.xlu0 %v3897_v48, %s3412_s30  ;;  %6852 = vst [vmem:[#allocation46_spill] sm:$0xff] %v4000_v49 }
 0x15b   : > { %864 = vrot.lane.b32.xlu2 %v3897_v48, %s3413_s13  ;;  %6856 = vst [vmem:[#allocation50_spill] sm:$0xff] %v4015_v20 }
 0x15f   : > { %v744_v62 = vpop.f32.mrf.mxu0 }
 0x162   : > { %844 = vrot.lane.b32.xlu1 %v3914_v46, %s3413_s13  ;;  %842 = vrot.lane.b32.xlu0 %v3884_v42, %s3413_s13 }
 0x163   : > { %1049 = vrot.lane.b32.xlu2 %v3882_v41, %s3414_s14 }
 0x16a   : > { %868 = vrot.lane.b32.xlu1 %v3929_v61, %s3413_s13  ;;  %866 = vrot.lane.b32.xlu0 %v3899_v50, %s3413_s13 }
 0x16b   : > { %1073 = vrot.lane.b32.xlu2 %v3897_v48, %s3414_s14 }
 0x172   : > { %1053 = vrot.lane.b32.xlu1 %v3914_v46, %s3414_s14  ;;  %1051 = vrot.lane.b32.xlu0 %v3884_v42, %s3414_s14 }
 0x173   : > { %1248 = vrot.lane.b32.xlu2 %v3914_v46, %s3412_s30 }
 0x175   : > { %v3949_v39 = vpop.permute.xlu2 %834 }
 0x176   : > { %6840 = vst [vmem:[#allocation34_spill] sm:$0xff] %v3949_v39 }
 0x17a   : > { %1077 = vrot.lane.b32.xlu1 %v3929_v61, %s3414_s14  ;;  %1075 = vrot.lane.b32.xlu0 %v3899_v50, %s3414_s14 }
 0x17b   : > { %1272 = vrot.lane.b32.xlu2 %v3929_v61, %s3412_s30 }
 0x17d   : > { %v3961_v22 = vpop.permute.xlu2 %858 }
 0x17e   : > { %6843 = vst [vmem:[#allocation37_spill] sm:$0xff] %v3961_v22 }
 0x182   : > { %1252 = vrot.lane.b32.xlu1 %v3967_v26, %s3412_s30  ;;  %1250 = vrot.lane.b32.xlu0 %v3964_v27, %s3412_s30 }
 0x183   : > { %846 = vrot.lane.b32.xlu2 %v3964_v27, %s3413_s13 }
 0x185   : > { %v3979_v5 = vpop.permute.xlu2 %1043 }
 0x186   : > { %6847 = vst [vmem:[#allocation41_spill] sm:$0xff] %v3979_v5 }
 0x18a   : > { %1276 = vrot.lane.b32.xlu1 %v3985_v3, %s3412_s30  ;;  %1274 = vrot.lane.b32.xlu0 %v3982_v59, %s3412_s30 }
 0x18b   : > { %870 = vrot.lane.b32.xlu2 %v3982_v59, %s3413_s13 }
 0x18c   : > { %v3993_v9 = vpop.permute.xlu1 %1433  ;;  %v3995_v31 = vpop.permute.xlu0 %1238 }
 0x18d   : > { %6849 = vst [vmem:[#allocation43_spill] sm:$0xff] %v3993_v9  ;;  %v3997_v6 = vpop.permute.xlu2 %1067 }
 0x18e   : > { %6850 = vst [vmem:[#allocation44_spill] sm:$0xff] %v3995_v31 }
 0x18f   : > { %6851 = vst [vmem:[#allocation45_spill] sm:$0xff] %v3997_v6 }
 0x192   : > { %850 = vrot.lane.b32.xlu1 %v4000_v49, %s3413_s13  ;;  %848 = vrot.lane.b32.xlu0 %v3967_v26, %s3413_s13 }
 0x193   : > { %1055 = vrot.lane.b32.xlu2 %v3964_v27, %s3414_s14 }
 0x194   : > { %v4008_v2 = vpop.permute.xlu1 %1240  ;;  %v4010_v57 = vpop.permute.xlu0 %1262 }
 0x195   : > { %6853 = vst [vmem:[#allocation47_spill] sm:$0xff] %v4008_v2  ;;  %v4012_v56 = vpop.permute.xlu2 %1435 }
 0x196   : > { %6854 = vst [vmem:[#allocation48_spill] sm:$0xff] %v4010_v57 }
 0x197   : > { %6855 = vst [vmem:[#allocation49_spill] sm:$0xff] %v4012_v56 }
 0x19a   : > { %874 = vrot.lane.b32.xlu1 %v4015_v20, %s3413_s13  ;;  %872 = vrot.lane.b32.xlu0 %v3985_v3, %s3413_s13 }
 0x19b   : > { %1079 = vrot.lane.b32.xlu2 %v3982_v59, %s3414_s14 }
 0x19c   : > { %v4023_v40 = vpop.permute.xlu1 %1264  ;;  %v4025_v33 = vpop.permute.xlu0 %836 }
 0x19d   : > { %6857 = vst [vmem:[#allocation51_spill] sm:$0xff] %v4023_v40  ;;  %v4027_v29 = vpop.permute.xlu2 %1242  ;;  %v747_v40 = vpop.f32.mrf.mxu0 }
 0x19e   : > { %6858 = vst [vmem:[#allocation52_spill] sm:$0xff] %v4025_v33  ;;  %v4054_v33 = vadd.f32 %v744_v62, %v3776_v51 }
 0x19f   : > { %6859 = vst [vmem:[#allocation53_spill] sm:$0xff] %v4027_v29  ;;  %v797_v29 = vpop.f32.mrf.mxu1 }
 0x1a0   : > { %6866 = vst [vmem:[#allocation60_spill] sm:$0xff] %v4054_v33  ;;  %v4072_v62 = vadd.f32 %v797_v29, %v3776_v51 }
 0x1a2   : > { %1059 = vrot.lane.b32.xlu1 %v4000_v49, %s3414_s14  ;;  %1057 = vrot.lane.b32.xlu0 %v3967_v26, %s3414_s14  ;;  %6871 = vst [vmem:[#allocation65_spill] sm:$0xff] %v4072_v62 }
 0x1a3   : > { %1254 = vrot.lane.b32.xlu2 %v4000_v49, %s3412_s30 }
 0x1a4   : > { %v4035_v14 = vpop.permute.xlu1 %838  ;;  %v4037_v56 = vpop.permute.xlu0 %860 }
 0x1a5   : > { %6860 = vst [vmem:[#allocation54_spill] sm:$0xff] %v4035_v14  ;;  %v4039_v60 = vpop.permute.xlu2 %1266 }
 0x1a6   : > { %6861 = vst [vmem:[#allocation55_spill] sm:$0xff] %v4037_v56 }
 0x1a7   : > { %6862 = vst [vmem:[#allocation56_spill] sm:$0xff] %v4039_v60  ;;  %v4057_v60 = vadd.f32 %v747_v40, %v3859_v28 }
 0x1a9   : > { %6867 = vst [vmem:[#allocation61_spill] sm:$0xff] %v4057_v60 }
 0x1aa   : > { %1083 = vrot.lane.b32.xlu1 %v4015_v20, %s3414_s14  ;;  %1081 = vrot.lane.b32.xlu0 %v3985_v3, %s3414_s14 }
 0x1ab   : > { %1278 = vrot.lane.b32.xlu2 %v4015_v20, %s3412_s30 }
 0x1ac   : > { %v4047_v21 = vpop.permute.xlu1 %862  ;;  %v4049_v2 = vpop.permute.xlu0 %1045 }
 0x1ad   : > { %6863 = vst [vmem:[#allocation57_spill] sm:$0xff] %v4047_v21  ;;  %v4051_v14 = vpop.permute.xlu2 %840 }
 0x1ae   : > { %6864 = vst [vmem:[#allocation58_spill] sm:$0xff] %v4049_v2 }
 0x1af   : > { %6865 = vst [vmem:[#allocation59_spill] sm:$0xff] %v4051_v14  ;;  %v800_v14 = vpop.f32.mrf.mxu1 }
 0x1b0   : > { %v4075_v40 = vadd.f32 %v800_v14, %v3859_v28 }
 0x1b2   : > { %1258 = vrot.lane.b32.xlu1 %v4057_v60, %s3412_s30  ;;  %1256 = vrot.lane.b32.xlu0 %v4054_v33, %s3412_s30  ;;  %6872 = vst [vmem:[#allocation66_spill] sm:$0xff] %v4075_v40 }
 0x1b3   : > { %852 = vrot.lane.b32.xlu2 %v4054_v33, %s3413_s13 }
 0x1b4   : > { %v4065_v21 = vpop.permute.xlu1 %1047  ;;  %v4067_v2 = vpop.permute.xlu0 %1069 }
 0x1b5   : > { %6868 = vst [vmem:[#allocation62_spill] sm:$0xff] %v4065_v21  ;;  %v4069_v56 = vpop.permute.xlu2 %864 }
 0x1b6   : > { %6869 = vst [vmem:[#allocation63_spill] sm:$0xff] %v4067_v2 }
 0x1b7   : > { %6870 = vst [vmem:[#allocation64_spill] sm:$0xff] %v4069_v56  ;;  %v750_v56 = vpop.f32.mrf.mxu0  ;;  %v803_v14 = vpop.f32.mrf.mxu1 }
 0x1b8   : > { %v4090_v51 = vadd.f32 %v750_v56, %v3793_v1 }
 0x1ba   : > { %1282 = vrot.lane.b32.xlu1 %v4075_v40, %s3412_s30  ;;  %1280 = vrot.lane.b32.xlu0 %v4072_v62, %s3412_s30  ;;  %6875 = vst [vmem:[#allocation69_spill] sm:$0xff] %v4090_v51 }
 0x1bb   : > { %876 = vrot.lane.b32.xlu2 %v4072_v62, %s3413_s13 }
 0x1bc   : > { %v4083_v21 = vpop.permute.xlu1 %1071  ;;  %v4085_v2 = vpop.permute.xlu0 %1437 }
 0x1bd   : > { %6873 = vst [vmem:[#allocation67_spill] sm:$0xff] %v4083_v21  ;;  %v4087_v45 = vpop.permute.xlu2 %1049 }
 0x1be   : > { %6874 = vst [vmem:[#allocation68_spill] sm:$0xff] %v4087_v45  ;;  %v4105_v45 = vadd.f32 %v803_v14, %v3793_v1 }
 0x1c0   : > { %6878 = vst [vmem:[#allocation72_spill] sm:$0xff] %v4105_v45 }
 0x1c2   : > { %856 = vrot.lane.b32.xlu1 %v4090_v51, %s3413_s13  ;;  %854 = vrot.lane.b32.xlu0 %v4057_v60, %s3413_s13 }
 0x1c3   : > { %1061 = vrot.lane.b32.xlu2 %v4054_v33, %s3414_s14 }
 0x1c4   : > { %v4098_v28 = vpop.permute.xlu1 %1246  ;;  %v4100_v29 = vpop.permute.xlu0 %1244 }
 0x1c5   : > { %6876 = vst [vmem:[#allocation70_spill] sm:$0xff] %v4100_v29  ;;  %v4102_v21 = vpop.permute.xlu2 %1073 }
 0x1c6   : > { %6877 = vst [vmem:[#allocation71_spill] sm:$0xff] %v4102_v21 }
 0x1ca   : > { %880 = vrot.lane.b32.xlu1 %v4105_v45, %s3413_s13  ;;  %878 = vrot.lane.b32.xlu0 %v4075_v40, %s3413_s13 }
 0x1cb   : > { %1085 = vrot.lane.b32.xlu2 %v4072_v62, %s3414_s14 }
 0x1cc   : > { %v4113_v56 = vpop.permute.xlu1 %1270  ;;  %v4115_v9 = vpop.permute.xlu0 %1268 }
 0x1cd   : > { %6879 = vst [vmem:[#allocation73_spill] sm:$0xff] %v4115_v9  ;;  %v4117_v29 = vpop.permute.xlu2 %1248 }
 0x1d2   : > { %1065 = vrot.lane.b32.xlu1 %v4090_v51, %s3414_s14  ;;  %1063 = vrot.lane.b32.xlu0 %v4057_v60, %s3414_s14 }
 0x1d3   : > { %1260 = vrot.lane.b32.xlu2 %v4090_v51, %s3412_s30 }
 0x1d4   : > { %v4125_v1 = vpop.permute.xlu1 %844  ;;  %v4127_v14 = vpop.permute.xlu0 %842 }
 0x1d5   : > { %v4129_v21 = vpop.permute.xlu2 %1272 }
 0x1da   : > { %1089 = vrot.lane.b32.xlu1 %v4105_v45, %s3414_s14  ;;  %1087 = vrot.lane.b32.xlu0 %v4075_v40, %s3414_s14 }
 0x1db   : > { %1284 = vrot.lane.b32.xlu2 %v4105_v45, %s3412_s30 }
 0x1dc   : > { %v4137_v9 = vpop.permute.xlu1 %868  ;;  %v4139_v63 = vpop.permute.xlu0 %866 }
 0x1dd   : > { %v4141_v44 = vpop.permute.xlu2 %846 }
 0x1de   : > { %6880 = vst [vmem:[#allocation74_spill] sm:$0xff] %v4141_v44 }
 0x1e2   : > { %1439 = vrot.lane.b32.xlu1 %v3882_v41, %s3411_s29  ;;  %1443 = vrot.lane.b32.xlu0 %v3914_v46, %s3411_s29 }
 0x1e3   : > { %1441 = vrot.lane.b32.xlu2 %v3884_v42, %s3411_s29 }
 0x1e4   : > { %v4149_v7 = vpop.permute.xlu1 %1053  ;;  %v4151_v13 = vpop.permute.xlu0 %1051 }
 0x1e5   : > { %v4153_v53 = vpop.permute.xlu2 %870 }
 0x1e6   : > { %6881 = vst [vmem:[#allocation75_spill] sm:$0xff] %v4153_v53 }
 0x1ea   : > { %1445 = vrot.lane.b32.xlu1 %v3964_v27, %s3411_s29  ;;  %1449 = vrot.lane.b32.xlu0 %v4000_v49, %s3411_s29 }
 0x1eb   : > { %1447 = vrot.lane.b32.xlu2 %v3967_v26, %s3411_s29 }
 0x1ec   : > { %v4161_v44 = vpop.permute.xlu1 %1077  ;;  %v4163_v57 = vpop.permute.xlu0 %1075 }
 0x1ed   : > { %v4165_v31 = vpop.permute.xlu2 %1055 }
 0x1ee   : > { %6882 = vst [vmem:[#allocation76_spill] sm:$0xff] %v4165_v31  ;;  %v3415_v31 = vmov 3  }
 0x1ef   : > { %3283 = vset.pattern.permute.xlu1 %v3415_v31  ;;  %3284 = vset.pattern.permute.xlu2 %v3415_v31 }
 0x1f0   : > { %3285 = vset.pattern.permute.xlu0 %v3415_v31 }
 0x1f2   : > { %1451 = vrot.lane.b32.xlu1 %v4054_v33, %s3411_s29  ;;  %1455 = vrot.lane.b32.xlu0 %v4090_v51, %s3411_s29 }
 0x1f3   : > { %1453 = vrot.lane.b32.xlu2 %v4057_v60, %s3411_s29 }
 0x1f4   : > { %v4173_v53 = vpop.permute.xlu1 %1252  ;;  %v4175_v6 = vpop.permute.xlu0 %1250 }
 0x1f5   : > { %6883 = vst [vmem:[#allocation77_spill] sm:$0xff] %v4175_v6  ;;  %v4177_v5 = vpop.permute.xlu2 %1079 }
 0x1f6   : > { %6884 = vst [vmem:[#allocation78_spill] sm:$0xff] %v4177_v5 }
 0x1fa   : > { %1457 = vrot.lane.b32.xlu1 %v3809_v15, %s3411_s29  ;;  %1461 = vrot.lane.b32.xlu0 %v3847_v54, %s3411_s29 }
 0x1fb   : > { %1459 = vrot.lane.b32.xlu2 %v3821_v4, %s3411_s29 }
 0x1fc   : > { %v4185_v22 = vpop.permute.xlu1 %1276  ;;  %v4187_v39 = vpop.permute.xlu0 %1274 }
 0x1fd   : > { %6885 = vst [vmem:[#allocation79_spill] sm:$0xff] %v4187_v39  ;;  %v4189_v6 = vpop.permute.xlu2 %1254 }
 0x1fe   : > { %6886 = vst [vmem:[#allocation80_spill] sm:$0xff] %v4189_v6 }
 0x202   : > { %1463 = vrot.lane.b32.xlu1 %v3897_v48, %s3411_s29  ;;  %1467 = vrot.lane.b32.xlu0 %v3929_v61, %s3411_s29 }
 0x203   : > { %1465 = vrot.lane.b32.xlu2 %v3899_v50, %s3411_s29 }
 0x204   : > { %v4197_v5 = vpop.permute.xlu1 %850  ;;  %v4199_v52 = vpop.permute.xlu0 %848 }
 0x205   : > { %6887 = vst [vmem:[#allocation81_spill] sm:$0xff] %v4197_v5  ;;  %v4201_v0 = vpop.permute.xlu2 %1278 }
 0x206   : > { %6888 = vst [vmem:[#allocation82_spill] sm:$0xff] %v4199_v52 }
 0x207   : > { %6889 = vst [vmem:[#allocation83_spill] sm:$0xff] %v4201_v0 }
 0x20a   : > { %1469 = vrot.lane.b32.xlu1 %v3982_v59, %s3411_s29  ;;  %1473 = vrot.lane.b32.xlu0 %v4015_v20, %s3411_s29 }
 0x20b   : > { %1471 = vrot.lane.b32.xlu2 %v3985_v3, %s3411_s29 }
 0x20c   : > { %v4209_v31 = vpop.permute.xlu1 %874  ;;  %v4211_v6 = vpop.permute.xlu0 %872 }
 0x20d   : > { %6890 = vst [vmem:[#allocation84_spill] sm:$0xff] %v4209_v31  ;;  %v4213_v39 = vpop.permute.xlu2 %852 }
 0x20e   : > { %6891 = vst [vmem:[#allocation85_spill] sm:$0xff] %v4211_v6 }
 0x20f   : > { %6892 = vst [vmem:[#allocation86_spill] sm:$0xff] %v4213_v39 }
 0x212   : > { %1475 = vrot.lane.b32.xlu1 %v4072_v62, %s3411_s29  ;;  %1479 = vrot.lane.b32.xlu0 %v4105_v45, %s3411_s29 }
 0x213   : > { %1477 = vrot.lane.b32.xlu2 %v4075_v40, %s3411_s29 }
 0x214   : > { %v4221_v0 = vpop.permute.xlu1 %1059  ;;  %v4223_v5 = vpop.permute.xlu0 %1057 }
 0x215   : > { %6893 = vst [vmem:[#allocation87_spill] sm:$0xff] %v4221_v0  ;;  %v4225_v43 = vpop.permute.xlu2 %876 }
 0x216   : > { %6894 = vst [vmem:[#allocation88_spill] sm:$0xff] %v4223_v5 }
 0x217   : > { %6895 = vst [vmem:[#allocation89_spill] sm:$0xff] %v4225_v43 }
 0x21a   : > { %1533 = vperm.xlu1 %3283, %v3588_v58   ;;  %1541 = vperm.xlu0 %3285, %v3625_v11  }
 0x21b   : > { %1537 = vperm.xlu2 %3284, %v3712_v37  }
 0x21c   : > { %v4230_v31 = vpop.permute.xlu1 %1083  ;;  %v4232_v39 = vpop.permute.xlu0 %1081 }
 0x21d   : > { %6896 = vst [vmem:[#allocation90_spill] sm:$0xff] %v4230_v31  ;;  %v4234_v12 = vpop.permute.xlu2 %1061 }
 0x21e   : > { %6897 = vst [vmem:[#allocation91_spill] sm:$0xff] %v4232_v39 }
 0x21f   : > { %6898 = vst [vmem:[#allocation92_spill] sm:$0xff] %v4234_v12 }
 0x222   : > { %1545 = vperm.xlu1 %3283, %v3620_v10   ;;  %1561 = vperm.xlu0 %3285, %v3704_v36  }
 0x223   : > { %1549 = vperm.xlu2 %3284, %v3692_v34  }
 0x224   : > { %v4239_v0 = vpop.permute.xlu1 %1258  ;;  %v4241_v43 = vpop.permute.xlu0 %1256 }
 0x225   : > { %6899 = vst [vmem:[#allocation93_spill] sm:$0xff] %v4239_v0  ;;  %v4243_v52 = vpop.permute.xlu2 %1085 }
 0x226   : > { %6900 = vst [vmem:[#allocation94_spill] sm:$0xff] %v4241_v43 }
 0x227   : > { %6901 = vst [vmem:[#allocation95_spill] sm:$0xff] %v4243_v52 }
 0x22a   : > { %1553 = vperm.xlu1 %3283, %v3641_v19   ;;  %1573 = vperm.xlu0 %3285, %v3719_v38  }
 0x22b   : > { %1557 = vperm.xlu2 %3284, %v3636_v18  }
 0x22c   : > { %v4248_v31 = vpop.permute.xlu1 %1282  ;;  %v4250_v12 = vpop.permute.xlu0 %1280 }
 0x22d   : > { %6902 = vst [vmem:[#allocation96_spill] sm:$0xff] %v4248_v31  ;;  %v4252_v6 = vpop.permute.xlu2 %1260 }
 0x22e   : > { %6903 = vst [vmem:[#allocation97_spill] sm:$0xff] %v4250_v12 }
 0x22f   : > { %6904 = vst [vmem:[#allocation98_spill] sm:$0xff] %v4252_v6 }
 0x232   : > { %1565 = vperm.xlu1 %3283, %v3653_v25   ;;  %3287 = vset.pattern.permute.xlu0 %v3416_v32 }
 0x233   : > { %1569 = vperm.xlu2 %3284, %v3648_v24   ;;  %1659 = vperm.xlu0 %3287, %v3712_v37  }
 0x234   : > { %v4257_v43 = vpop.permute.xlu1 %856  ;;  %v4259_v52 = vpop.permute.xlu0 %854 }
 0x235   : > { %6905 = vst [vmem:[#allocation99_spill] sm:$0xff] %v4257_v43  ;;  %v4261_v0 = vpop.permute.xlu2 %1284 }
 0x236   : > { %6906 = vst [vmem:[#allocation100_spill] sm:$0xff] %v4259_v52 }
 0x237   : > { %6907 = vst [vmem:[#allocation101_spill] sm:$0xff] %v4261_v0 }
 0x23a   : > { %1577 = vperm.xlu1 %3283, %v3660_v30  }
 0x23b   : > { %3286 = vset.pattern.permute.xlu2 %v3416_v32  ;;  %1679 = vperm.xlu0 %3287, %v3636_v18  }
 0x23c   : > { %1655 = vperm.xlu2 %3286, %v3588_v58   ;;  %v4266_v6 = vpop.permute.xlu1 %880  ;;  %v4268_v12 = vpop.permute.xlu0 %878 }
 0x23d   : > { %6908 = vst [vmem:[#allocation102_spill] sm:$0xff] %v4266_v6  ;;  %v4270_v31 = vpop.permute.xlu2 %1441 }
 0x23e   : > { %6909 = vst [vmem:[#allocation103_spill] sm:$0xff] %v4268_v12 }
 0x23f   : > { %6910 = vst [vmem:[#allocation104_spill] sm:$0xff] %v4270_v31 }
 0x242   : > { %3288 = vset.pattern.permute.xlu1 %v3416_v32 }
 0x243   : > { %1663 = vperm.xlu1 %3288, %v3625_v11   ;;  %1691 = vperm.xlu0 %3287, %v3648_v24  }
 0x244   : > { %1667 = vperm.xlu2 %3286, %v3620_v10   ;;  %v4275_v0 = vpop.permute.xlu1 %1065  ;;  %v4277_v43 = vpop.permute.xlu0 %1063 }
 0x245   : > { %6911 = vst [vmem:[#allocation105_spill] sm:$0xff] %v4275_v0  ;;  %v4279_v18 = vpop.permute.xlu2 %1447 }
 0x246   : > { %6912 = vst [vmem:[#allocation106_spill] sm:$0xff] %v4277_v43 }
 0x247   : > { %6913 = vst [vmem:[#allocation107_spill] sm:$0xff] %v4279_v18  ;;  %v4323_v18 = vld [vmem:[%s6567_s11 + $0x8] sm:$0xff] }
 0x24b   : > { %1671 = vperm.xlu1 %3288, %v3692_v34   ;;  %1750 = vrot.lane.b32.xlu0 %v3799_v8, %s3417_s15 }
 0x24c   : > { %1675 = vperm.xlu2 %3286, %v3641_v19   ;;  %v4285_v58 = vpop.permute.xlu1 %1089  ;;  %v4287_v11 = vpop.permute.xlu0 %1087 }
 0x24d   : > { %6914 = vst [vmem:[#allocation108_spill] sm:$0xff] %v4285_v58  ;;  %v1454_v24 = vpop.permute.xlu2 %1453 }
 0x24e   : > { %6915 = vst [vmem:[#allocation109_spill] sm:$0xff] %v4287_v11 }
 0x253   : > { %1683 = vperm.xlu1 %3288, %v3704_v36   ;;  %1756 = vrot.lane.b32.xlu0 %v3882_v41, %s3417_s15  ;;  %v882_v41 = vlaneseq }
 0x254   : > { %1687 = vperm.xlu2 %3286, %v3653_v25   ;;  %v1440_v10 = vpop.permute.xlu1 %1439  ;;  %v4293_v32 = vpop.permute.xlu0 %1443 }
 0x255   : > { %6916 = vst [vmem:[#allocation110_spill] sm:$0xff] %v4293_v32  ;;  %v4295_v6 = vpop.permute.xlu2 %1459 }
 0x256   : > { %6917 = vst [vmem:[#allocation111_spill] sm:$0xff] %v4295_v6 }
 0x25b   : > { %1695 = vperm.xlu1 %3288, %v3719_v38   ;;  %1762 = vrot.lane.b32.xlu0 %v3964_v27, %s3417_s15 }
 0x25c   : > { %1699 = vperm.xlu2 %3286, %v3660_v30   ;;  %v4301_v19 = vpop.permute.xlu1 %1445  ;;  %v1450_v0 = vpop.permute.xlu0 %1449  ;;  %v4313_v30 = vand.u32 127, %v882_v41 }
 0x25d   : > { %6918 = vst [vmem:[#allocation112_spill] sm:$0xff] %v4301_v19  ;;  %v4303_v58 = vpop.permute.xlu2 %1465  ;;  %v4318_v19 = vld [vmem:[%s6567_s11] sm:$0xff] }
 0x25e   : > { %6919 = vst [vmem:[#allocation113_spill] sm:$0xff] %v4303_v58  ;;  %vm1481_vm8 = vcmp.lt.s32.totalorder %v4313_v30, 1  ;;  %v4331_v41 = vperm.slane %v4318_v19, 3  ;;  %vm1798_vm9 = vcmp.lt.s32.totalorder %v4313_v30, 127  ;;  %vm1091_vm10 = vcmp.lt.s32.totalorder %v4313_v30, 16 }
 0x25f   : > { %vm1286_vm11 = vcmp.lt.s32.totalorder %v4313_v30, 15  ;;  %vm884_vm12 = vcmp.lt.s32.totalorder %v4313_v30, 17  ;;  %vm1993_vm13 = vcmp.lt.s32.totalorder %v4313_v30, 113  ;;  %vm2188_vm14 = vcmp.lt.s32.totalorder %v4313_v30, 112 }
 0x260   : > { %6921 = vst [vmem:[#allocation115_spill] sm:$0xff] %v4331_v41  ;;  %vm2383_vm15 = vcmp.lt.s32.totalorder %v4313_v30, 111 }
 0x263   : > { %1752 = vrot.lane.b32.xlu1 %v3811_v16, %s3417_s15  ;;  %1768 = vrot.lane.b32.xlu0 %v4054_v33, %s3417_s15  ;;  %v4334_v33 = vperm.slane %v4323_v18, 3 }
 0x264   : > { %1754 = vrot.lane.b32.xlu2 %v3833_v23, %s3417_s15  ;;  %v1452_v25 = vpop.permute.xlu1 %1451  ;;  %v1456_v38 = vpop.permute.xlu0 %1455 }
 0x265   : > { %v4311_v6 = vpop.permute.xlu2 %1471  ;;  %6922 = vst [vmem:[#allocation116_spill] sm:$0xff] %v4334_v33 }
 0x266   : > { %6920 = vst [vmem:[#allocation114_spill] sm:$0xff] %v4311_v6 }
 0x26b   : > { %1758 = vrot.lane.b32.xlu1 %v3884_v42, %s3417_s15  ;;  %1774 = vrot.lane.b32.xlu0 %v3809_v15, %s3417_s15 }
 0x26c   : > { %1760 = vrot.lane.b32.xlu2 %v3914_v46, %s3417_s15  ;;  %v4338_v6 = vpop.permute.xlu1 %1457  ;;  %v1462_v58 = vpop.permute.xlu0 %1461 }
 0x26d   : > { %6923 = vst [vmem:[#allocation117_spill] sm:$0xff] %v4338_v6  ;;  %v1484_v31 = vsel %vm1481_vm8, %v4085_v2, %v1462_v58  ;;  %v1496_v12 = vsel %vm1481_vm8, %v1462_v58, %v4085_v2  ;;  %v1478_v52 = vpop.permute.xlu2 %1477 }
 0x26e   : > { %v4347_v32 = vmul.f32 %v4331_v41, %v1496_v12  ;;  %v4350_v43 = vmul.f32 %v4334_v33, %v1484_v31  ;;  %v1492_v11 = vsel %vm1481_vm8, %v1454_v24, %v1478_v52  ;;  %v1504_v6 = vsel %vm1481_vm8, %v1478_v52, %v1454_v24 }
 0x26f   : > { %v4357_v39 = vmul.f32 %v4331_v41, %v1504_v6  ;;  %v4360_v5 = vmul.f32 %v4334_v33, %v1492_v11 }
 0x270   : > { %6924 = vst [vmem:[#allocation118_spill] sm:$0xff] %v4347_v32 }
 0x271   : > { %6925 = vst [vmem:[#allocation119_spill] sm:$0xff] %v4350_v43 }
 0x272   : > { %6926 = vst [vmem:[#allocation120_spill] sm:$0xff] %v4360_v5  ;;  %v3377_v5 = vld [vmem:[%s6561_s5 + $0x38] sm:$0xff] }
 0x273   : > { %1764 = vrot.lane.b32.xlu1 %v3967_v26, %s3417_s15  ;;  %1780 = vrot.lane.b32.xlu0 %v3897_v48, %s3417_s15 }
 0x274   : > { %1766 = vrot.lane.b32.xlu2 %v4000_v49, %s3417_s15  ;;  %v1464_v12 = vpop.permute.xlu1 %1463  ;;  %v4368_v2 = vpop.permute.xlu0 %1467 }
 0x275   : > { %v1485_v52 = vsel %vm1481_vm8, %v1440_v10, %v1464_v12  ;;  %v1497_v6 = vsel %vm1481_vm8, %v1464_v12, %v1440_v10  ;;  %v4374_v31 = vpop.permute.xlu2 %1537 }
 0x276   : > { %6927 = vst [vmem:[#allocation121_spill] sm:$0xff] %v4374_v31  ;;  %v4377_v58 = vmul.f32 %v4331_v41, %v1497_v6  ;;  %v4380_v11 = vmul.f32 %v4334_v33, %v1485_v52 }
 0x278   : > { %6928 = vst [vmem:[#allocation122_spill] sm:$0xff] %v4377_v58 }
 0x279   : > { %6929 = vst [vmem:[#allocation123_spill] sm:$0xff] %v4380_v11  ;;  %v6957_v11 = vmov 6  }
 0x27b   : > { %1770 = vrot.lane.b32.xlu1 %v4057_v60, %s3417_s15  ;;  %1786 = vrot.lane.b32.xlu0 %v3982_v59, %s3417_s15 }
 0x27c   : > { %1772 = vrot.lane.b32.xlu2 %v4090_v51, %s3417_s15  ;;  %v4388_v24 = vpop.permute.xlu1 %1469  ;;  %v1474_v10 = vpop.permute.xlu0 %1473 }
 0x27d   : > { %6930 = vst [vmem:[#allocation124_spill] sm:$0xff] %v4388_v24  ;;  %v1490_v12 = vsel %vm1481_vm8, %v1450_v0, %v1474_v10  ;;  %v1502_v6 = vsel %vm1481_vm8, %v1474_v10, %v1450_v0  ;;  %v4394_v52 = vpop.permute.xlu2 %1549 }
 0x27e   : > { %v4397_v49 = vmul.f32 %v4331_v41, %v1502_v6  ;;  %v4400_v60 = vmul.f32 %v4334_v33, %v1490_v12 }
 0x280   : > { %6931 = vst [vmem:[#allocation125_spill] sm:$0xff] %v4397_v49 }
 0x281   : > { %6932 = vst [vmem:[#allocation126_spill] sm:$0xff] %v4400_v60 }
 0x283   : > { %1776 = vrot.lane.b32.xlu1 %v3821_v4, %s3417_s15  ;;  %1792 = vrot.lane.b32.xlu0 %v4072_v62, %s3417_s15 }
 0x284   : > { %1778 = vrot.lane.b32.xlu2 %v3847_v54, %s3417_s15  ;;  %v1476_v51 = vpop.permute.xlu1 %1475  ;;  %v1480_v43 = vpop.permute.xlu0 %1479 }
 0x285   : > { %v1491_v0 = vsel %vm1481_vm8, %v1452_v25, %v1476_v51  ;;  %v1503_v10 = vsel %vm1481_vm8, %v1476_v51, %v1452_v25  ;;  %v1493_v12 = vsel %vm1481_vm8, %v1456_v38, %v1480_v43  ;;  %v1505_v6 = vsel %vm1481_vm8, %v1480_v43, %v1456_v38  ;;  %v4416_v60 = vpop.permute.xlu2 %1557 }
 0x286   : > { %6933 = vst [vmem:[#allocation127_spill] sm:$0xff] %v4416_v60  ;;  %v4419_v49 = vmul.f32 %v4331_v41, %v1503_v10  ;;  %v4422_v62 = vmul.f32 %v4334_v33, %v1491_v0  ;;  %v4425_v32 = vmul.f32 %v4331_v41, %v1505_v6  ;;  %v4428_v31 = vmul.f32 %v4334_v33, %v1493_v12 }
 0x287   : > { %v6680_v51 = vmov 5  }
 0x288   : > { %6934 = vst [vmem:[#allocation128_spill] sm:$0xff] %v4419_v49  ;;  %3289 = vset.pattern.permute.xlu1 %v6680_v51 }
 0x289   : > { %6935 = vst [vmem:[#allocation129_spill] sm:$0xff] %v4422_v62 }
 0x28a   : > { %6936 = vst [vmem:[#allocation130_spill] sm:$0xff] %v4425_v32  ;;  %v6685_v32 = vmov 7  }
 0x28b   : > { %6937 = vst [vmem:[#allocation131_spill] sm:$0xff] %v4428_v31  ;;  %1782 = vrot.lane.b32.xlu1 %v3899_v50, %s3417_s15  ;;  %2178 = vrot.lane.b32.xlu0 %v3985_v3, %s3419_s23 }
 0x28c   : > { %1784 = vrot.lane.b32.xlu2 %v3929_v61, %s3417_s15  ;;  %v4437_v43 = vpop.permute.xlu1 %1533  ;;  %v4439_v25 = vpop.permute.xlu0 %1541  ;;  %3302 = vset.pattern.permute.xlu0 %v6685_v32 }
 0x28d   : > { %6938 = vst [vmem:[#allocation132_spill] sm:$0xff] %v4437_v43  ;;  %v4441_v38 = vpop.permute.xlu2 %1569  ;;  %v6961_v43 = vmov 5  }
 0x28e   : > { %6939 = vst [vmem:[#allocation133_spill] sm:$0xff] %v4439_v25 }
 0x28f   : > { %6940 = vst [vmem:[#allocation134_spill] sm:$0xff] %v4441_v38 }
 0x293   : > { %1788 = vrot.lane.b32.xlu1 %v3985_v3, %s3417_s15  ;;  %1981 = vrot.lane.b32.xlu0 %v3982_v59, %s3420_s24 }
 0x294   : > { %1790 = vrot.lane.b32.xlu2 %v4015_v20, %s3417_s15  ;;  %v4449_v0 = vpop.permute.xlu1 %1545  ;;  %v4451_v10 = vpop.permute.xlu0 %1561 }
 0x295   : > { %6941 = vst [vmem:[#allocation135_spill] sm:$0xff] %v4449_v0  ;;  %v4531_v0 = vld [vmem:[%s6561_s5 + $0x30] sm:$0xff] }
 0x296   : > { %v4453_v12 = vpop.permute.xlu2 %1655 }
 0x297   : > { %6942 = vst [vmem:[#allocation136_spill] sm:$0xff] %v4453_v12 }
 0x29b   : > { %1794 = vrot.lane.b32.xlu1 %v4075_v40, %s3417_s15  ;;  %2176 = vrot.lane.b32.xlu0 %v3982_v59, %s3419_s23  ;;  %v6692_v40 = vmov 8  }
 0x29c   : > { %1796 = vrot.lane.b32.xlu2 %v4105_v45, %s3417_s15  ;;  %v4461_v6 = vpop.permute.xlu1 %1553  ;;  %v4463_v51 = vpop.permute.xlu0 %1573  ;;  %v6696_v45 = vmov 6  }
 0x29d   : > { %6943 = vst [vmem:[#allocation137_spill] sm:$0xff] %v4463_v51  ;;  %3293 = vset.pattern.permute.xlu2 %v6692_v40 }
 0x29e   : > { %v4465_v31 = vpop.permute.xlu2 %1667 }
 0x29f   : > { %6944 = vst [vmem:[#allocation138_spill] sm:$0xff] %v4465_v31 }
 0x2a3   : > { %1959 = vrot.lane.b32.xlu1 %v3967_v26, %s3420_s24  ;;  %1955 = vrot.lane.b32.xlu0 %v3914_v46, %s3420_s24 }
 0x2a4   : > { %1983 = vrot.lane.b32.xlu2 %v3985_v3, %s3420_s24  ;;  %v4474_v62 = vpop.permute.xlu1 %1565 }
 0x2a5   : > { %6945 = vst [vmem:[#allocation139_spill] sm:$0xff] %v4474_v62  ;;  %v4476_v38 = vpop.permute.xlu0 %1659 }
 0x2a6   : > { %6946 = vst [vmem:[#allocation140_spill] sm:$0xff] %v4476_v38  ;;  %v4478_v49 = vpop.permute.xlu2 %1675  ;;  %v6955_v38 = vmov 7  }
 0x2ab   : > { %1878 = vperm.xlu1 %3289, %v3704_v36   ;;  %2371 = vrot.lane.b32.xlu0 %v3982_v59, %s3423_s25 }
 0x2ac   : > { %2154 = vrot.lane.b32.xlu2 %v3967_v26, %s3419_s23  ;;  %v4486_v32 = vpop.permute.xlu1 %1577 }
 0x2ad   : > { %6947 = vst [vmem:[#allocation141_spill] sm:$0xff] %v4486_v32  ;;  %v4488_v20 = vpop.permute.xlu0 %1679 }
 0x2ae   : > { %6948 = vst [vmem:[#allocation142_spill] sm:$0xff] %v4488_v20  ;;  %v4490_v62 = vpop.permute.xlu2 %1687 }
 0x2af   : > { %6949 = vst [vmem:[#allocation143_spill] sm:$0xff] %v4490_v62 }
 0x2b3   : > { %3290 = vset.pattern.permute.xlu1 %v6696_v45  ;;  %2150 = vrot.lane.b32.xlu0 %v3914_v46, %s3419_s23 }
 0x2b4   : > { %1957 = vrot.lane.b32.xlu2 %v3964_v27, %s3420_s24  ;;  %2073 = vperm.xlu1 %3290, %v3704_v36  }
 0x2b5   : > { %v4498_v40 = vpop.permute.xlu1 %1663  ;;  %v4500_v25 = vpop.permute.xlu0 %1691 }
 0x2b6   : > { %6950 = vst [vmem:[#allocation144_spill] sm:$0xff] %v4498_v40  ;;  %v4502_v32 = vpop.permute.xlu2 %1699 }
 0x2b7   : > { %6951 = vst [vmem:[#allocation145_spill] sm:$0xff] %v4500_v25 }
 0x2b8   : > { %6952 = vst [vmem:[#allocation146_spill] sm:$0xff] %v4502_v32 }
 0x2bb   : > { %2369 = vrot.lane.b32.xlu0 %v3929_v61, %s3423_s25 }
 0x2bc   : > { %2373 = vrot.lane.b32.xlu2 %v3985_v3, %s3423_s25  ;;  %2349 = vrot.lane.b32.xlu1 %v3967_v26, %s3423_s25 }
 0x2bd   : > { %v4510_v45 = vpop.permute.xlu1 %1671  ;;  %v4512_v62 = vpop.permute.xlu0 %1750  ;;  %3291 = vset.pattern.permute.xlu1 %v6955_v38 }
 0x2be   : > { %6953 = vst [vmem:[#allocation147_spill] sm:$0xff] %v4510_v45  ;;  %v1755_v40 = vpop.permute.xlu2 %1754 }
 0x2bf   : > { %6954 = vst [vmem:[#allocation148_spill] sm:$0xff] %v4512_v62 }
 0x2c3   : > { %2148 = vrot.lane.b32.xlu0 %v3884_v42, %s3419_s23 }
 0x2c4   : > { %2152 = vrot.lane.b32.xlu2 %v3964_v27, %s3419_s23  ;;  %2268 = vperm.xlu1 %3291, %v3704_v36  }
 0x2c5   : > { %v4520_v32 = vpop.permute.xlu1 %1683  ;;  %v1757_v25 = vpop.permute.xlu0 %1756 }
 0x2c6   : > { %6956 = vst [vmem:[#allocation149_spill] sm:$0xff] %v4520_v32  ;;  %v4522_v31 = vpop.permute.xlu2 %1760 }
 0x2cb   : > { %1969 = vrot.lane.b32.xlu0 %v3809_v15, %s3420_s24 }
 0x2cc   : > { %2463 = vperm.xlu2 %3293, %v3704_v36   ;;  %3292 = vset.pattern.permute.xlu1 %v6957_v11 }
 0x2cd   : > { %2069 = vperm.xlu1 %3292, %v4531_v0   ;;  %v4534_v58 = vpop.permute.xlu1 %1695  ;;  %v4536_v62 = vpop.permute.xlu0 %1762 }
 0x2ce   : > { %6958 = vst [vmem:[#allocation150_spill] sm:$0xff] %v4534_v58  ;;  %v1767_v12 = vpop.permute.xlu2 %1766  ;;  %v6962_v58 = vmov 0  }
 0x2cf   : > { %6959 = vst [vmem:[#allocation151_spill] sm:$0xff] %v4536_v62  ;;  %v4555_v62 = vperm.slane %v4323_v18, 5 }
 0x2d3   : > { %2256 = vperm.xlu0 %3302, %v3692_v34   ;;  %v4552_v34 = vperm.slane %v4318_v19, 5 }
 0x2d4   : > { %2347 = vrot.lane.b32.xlu2 %v3964_v27, %s3423_s25 }
 0x2d5   : > { %1979 = vrot.lane.b32.xlu1 %v3929_v61, %s3420_s24  ;;  %v4543_v36 = vpop.permute.xlu1 %1752  ;;  %v1769_v20 = vpop.permute.xlu0 %1768  ;;  %3295 = vset.pattern.permute.xlu2 %v6955_v38 }
 0x2d6   : > { %6960 = vst [vmem:[#allocation152_spill] sm:$0xff] %v4543_v36  ;;  %v1773_v59 = vpop.permute.xlu2 %1772  ;;  %3294 = vset.pattern.permute.xlu1 %v6961_v43  ;;  %v4560_v36 = vld [vmem:[%s6561_s5 + $0x28] sm:$0xff] }
 0x2db   : > { %3303 = vset.pattern.permute.xlu0 %v6962_v58 }
 0x2dc   : > { %2264 = vperm.xlu2 %3295, %v4531_v0   ;;  %942 = vperm.xlu0 %3303, %v3712_v37  }
 0x2dd   : > { %1870 = vperm.xlu1 %3294, %v4560_v36   ;;  %v4563_v27 = vpop.permute.xlu1 %1758  ;;  %v4565_v60 = vpop.permute.xlu0 %1774 }
 0x2de   : > { %6963 = vst [vmem:[#allocation153_spill] sm:$0xff] %v4563_v27  ;;  %v1779_v37 = vpop.permute.xlu2 %1778  ;;  %v4581_v27 = vld [vmem:[%s6561_s5 + $0x20] sm:$0xff] }
 0x2df   : > { %6964 = vst [vmem:[#allocation154_spill] sm:$0xff] %v4565_v60  ;;  %v1801_v48 = vsel %vm1798_vm9, %v1755_v40, %v1779_v37  ;;  %v1813_v24 = vsel %vm1798_vm9, %v1779_v37, %v1755_v40 }
 0x2e0   : > { %v4572_v32 = vmul.f32 %v4552_v34, %v1801_v48  ;;  %v4575_v45 = vmul.f32 %v4555_v62, %v1813_v24 }
 0x2e2   : > { %6965 = vst [vmem:[#allocation155_spill] sm:$0xff] %v4572_v32 }
 0x2e3   : > { %6966 = vst [vmem:[#allocation156_spill] sm:$0xff] %v4575_v45 }
 0x2e4   : > { %3296 = vset.pattern.permute.xlu2 %v6957_v11  ;;  %957 = vperm.xlu0 %3303, %v4581_v27  }
 0x2e5   : > { %2065 = vperm.xlu2 %3296, %v4560_v36   ;;  %2174 = vrot.lane.b32.xlu1 %v3929_v61, %s3419_s23  ;;  %v4587_v40 = vpop.permute.xlu1 %1764  ;;  %v1781_v48 = vpop.permute.xlu0 %1780 }
 0x2e6   : > { %6967 = vst [vmem:[#allocation157_spill] sm:$0xff] %v4587_v40  ;;  %v1802_v24 = vsel %vm1798_vm9, %v1757_v25, %v1781_v48  ;;  %v1814_v37 = vsel %vm1798_vm9, %v1781_v48, %v1757_v25  ;;  %v4593_v45 = vpop.permute.xlu2 %1784  ;;  %3297 = vset.pattern.permute.xlu1 %v6962_v58  ;;  %v825_v40 = vld [vmem:[%s6562_s6 + $0x38] sm:$0xff] }
 0x2e7   : > { %v4597_v32 = vmul.f32 %v4552_v34, %v1802_v24  ;;  %v4600_v60 = vmul.f32 %v4555_v62, %v1814_v37 }
 0x2e9   : > { %6968 = vst [vmem:[#allocation158_spill] sm:$0xff] %v4597_v32 }
 0x2ea   : > { %6969 = vst [vmem:[#allocation159_spill] sm:$0xff] %v4600_v60 }
 0x2ec   : > { %972 = vperm.xlu0 %3303, %v3377_v5  }
 0x2ed   : > { %1953 = vrot.lane.b32.xlu2 %v3884_v42, %s3420_s24  ;;  %2567 = vperm.xlu1 %3297, %v825_v40   ;;  %v1771_v25 = vpop.permute.xlu1 %1770  ;;  %v4610_v48 = vpop.permute.xlu0 %1786  ;;  %v3378_v40 = vld [vmem:[%s6561_s5 + $0x50] sm:$0xff] }
 0x2ee   : > { %6970 = vst [vmem:[#allocation160_spill] sm:$0xff] %v4610_v48  ;;  %v1791_v24 = vpop.permute.xlu2 %1790  ;;  %3299 = vset.pattern.permute.xlu2 %v6955_v38 }
 0x2ef   : > { %v1807_v37 = vsel %vm1798_vm9, %v1767_v12, %v1791_v24  ;;  %v1819_v60 = vsel %vm1798_vm9, %v1791_v24, %v1767_v12 }
 0x2f0   : > { %v4618_v32 = vmul.f32 %v4552_v34, %v1807_v37  ;;  %v4621_v5 = vmul.f32 %v4555_v62, %v1819_v60 }
 0x2f2   : > { %6971 = vst [vmem:[#allocation161_spill] sm:$0xff] %v4618_v32 }
 0x2f3   : > { %6972 = vst [vmem:[#allocation162_spill] sm:$0xff] %v4621_v5 }
 0x2f4   : > { %987 = vperm.xlu0 %3303, %v3378_v40  }
 0x2f5   : > { %2345 = vrot.lane.b32.xlu2 %v3914_v46, %s3423_s25  ;;  %1977 = vrot.lane.b32.xlu1 %v3899_v50, %s3420_s24  ;;  %v4630_v48 = vpop.permute.xlu1 %1776  ;;  %v1793_v12 = vpop.permute.xlu0 %1792 }
 0x2f6   : > { %6973 = vst [vmem:[#allocation163_spill] sm:$0xff] %v4630_v48  ;;  %v1808_v24 = vsel %vm1798_vm9, %v1769_v20, %v1793_v12  ;;  %v1820_v60 = vsel %vm1798_vm9, %v1793_v12, %v1769_v20  ;;  %v1797_v37 = vpop.permute.xlu2 %1796  ;;  %3298 = vset.pattern.permute.xlu1 %v6961_v43  ;;  %v824_v12 = vld [vmem:[%s6562_s6 + $0x30] sm:$0xff] }
 0x2f7   : > { %v4638_v40 = vmul.f32 %v4552_v34, %v1808_v24  ;;  %v4641_v5 = vmul.f32 %v4555_v62, %v1820_v60  ;;  %v1810_v32 = vsel %vm1798_vm9, %v1773_v59, %v1797_v37  ;;  %v1822_v48 = vsel %vm1798_vm9, %v1797_v37, %v1773_v59 }
 0x2f8   : > { %v4648_v51 = vmul.f32 %v4552_v34, %v1810_v32  ;;  %v4651_v20 = vmul.f32 %v4555_v62, %v1822_v48  ;;  %v823_v32 = vld [vmem:[%s6562_s6 + $0x28] sm:$0xff] }
 0x2f9   : > { %6974 = vst [vmem:[#allocation164_spill] sm:$0xff] %v4638_v40 }
 0x2fa   : > { %6975 = vst [vmem:[#allocation165_spill] sm:$0xff] %v4641_v5 }
 0x2fb   : > { %6976 = vst [vmem:[#allocation166_spill] sm:$0xff] %v4648_v51 }
 0x2fc   : > { %6977 = vst [vmem:[#allocation167_spill] sm:$0xff] %v4651_v20  ;;  %2562 = vperm.xlu0 %3303, %v824_v12   ;;  %v6984_v20 = vmov 8  }
 0x2fd   : > { %2260 = vperm.xlu2 %3299, %v4560_v36   ;;  %1866 = vperm.xlu1 %3298, %v4581_v27   ;;  %v4658_v24 = vpop.permute.xlu1 %1782  ;;  %v4660_v60 = vpop.permute.xlu0 %2178 }
 0x2fe   : > { %6978 = vst [vmem:[#allocation168_spill] sm:$0xff] %v4658_v24  ;;  %v4662_v59 = vpop.permute.xlu2 %1983 }
 0x2ff   : > { %6979 = vst [vmem:[#allocation169_spill] sm:$0xff] %v4660_v60  ;;  %v4808_v60 = vperm.slane %v4323_v18, 0 }
 0x300   : > { %6980 = vst [vmem:[#allocation170_spill] sm:$0xff] %v4662_v59 }
 0x301   : > { %7008 = vst [vmem:[#allocation197_spill] sm:$0xff] %v4808_v60 }
 0x304   : > { %2557 = vperm.xlu0 %3303, %v823_v32   ;;  %v822_v32 = vld [vmem:[%s6562_s6 + $0x20] sm:$0xff] }
 0x305   : > { %1945 = vrot.lane.b32.xlu2 %v3799_v8, %s3420_s24  ;;  %2172 = vrot.lane.b32.xlu1 %v3899_v50, %s3419_s23  ;;  %v4671_v48 = vpop.permute.xlu1 %1788  ;;  %v4673_v37 = vpop.permute.xlu0 %1981 }
 0x306   : > { %6981 = vst [vmem:[#allocation171_spill] sm:$0xff] %v4671_v48  ;;  %v4675_v12 = vpop.permute.xlu2 %2154  ;;  %3301 = vset.pattern.permute.xlu2 %v6984_v20  ;;  %3300 = vset.pattern.permute.xlu1 %v6957_v11 }
 0x307   : > { %6982 = vst [vmem:[#allocation172_spill] sm:$0xff] %v4673_v37 }
 0x308   : > { %6983 = vst [vmem:[#allocation173_spill] sm:$0xff] %v4675_v12 }
 0x30c   : > { %2552 = vperm.xlu0 %3303, %v822_v32  }
 0x30d   : > { %2455 = vperm.xlu2 %3301, %v4560_v36   ;;  %2061 = vperm.xlu1 %3300, %v4581_v27   ;;  %v1795_v51 = vpop.permute.xlu1 %1794  ;;  %v4684_v5 = vpop.permute.xlu0 %2176 }
 0x30e   : > { %6985 = vst [vmem:[#allocation174_spill] sm:$0xff] %v4684_v5  ;;  %v1809_v40 = vsel %vm1798_vm9, %v1771_v25, %v1795_v51  ;;  %v1821_v37 = vsel %vm1798_vm9, %v1795_v51, %v1771_v25  ;;  %v4690_v59 = vpop.permute.xlu2 %1957  ;;  %v3379_v51 = vld [vmem:[%s6561_s5] sm:$0xff] }
 0x30f   : > { %6986 = vst [vmem:[#allocation175_spill] sm:$0xff] %v4690_v59  ;;  %v4693_v24 = vmul.f32 %v4552_v34, %v1809_v40  ;;  %v4696_v32 = vmul.f32 %v4555_v62, %v1821_v37 }
 0x311   : > { %6987 = vst [vmem:[#allocation176_spill] sm:$0xff] %v4693_v24 }
 0x312   : > { %6988 = vst [vmem:[#allocation177_spill] sm:$0xff] %v4696_v32 }
 0x314   : > { %3305 = vset.pattern.permute.xlu0 %v6961_v43 }
 0x315   : > { %2367 = vrot.lane.b32.xlu2 %v3899_v50, %s3423_s25  ;;  %2343 = vrot.lane.b32.xlu1 %v3884_v42, %s3423_s25  ;;  %v4703_v36 = vpop.permute.xlu1 %1959  ;;  %v4705_v5 = vpop.permute.xlu0 %1955 }
 0x316   : > { %6989 = vst [vmem:[#allocation178_spill] sm:$0xff] %v4703_v36  ;;  %1850 = vperm.xlu0 %3305, %v3379_v51   ;;  %v4710_v25 = vpop.permute.xlu2 %2373  ;;  %v4796_v36 = vperm.slane %v4323_v18, 1 }
 0x317   : > { %6990 = vst [vmem:[#allocation179_spill] sm:$0xff] %v4710_v25 }
 0x318   : > { %7007 = vst [vmem:[#allocation196_spill] sm:$0xff] %v4796_v36 }
 0x31d   : > { %2164 = vrot.lane.b32.xlu2 %v3809_v15, %s3419_s23  ;;  %2140 = vrot.lane.b32.xlu1 %v3799_v8, %s3419_s23  ;;  %v4716_v40 = vpop.permute.xlu1 %1878  ;;  %v4718_v37 = vpop.permute.xlu0 %2371 }
 0x31e   : > { %6991 = vst [vmem:[#allocation180_spill] sm:$0xff] %v4716_v40  ;;  %1874 = vperm.xlu0 %3305, %v4531_v0   ;;  %v4721_v32 = vpop.permute.xlu2 %2152  ;;  %v902_v40 = vsel %vm884_vm12, %v4137_v9, %v4125_v1 }
 0x31f   : > { %6992 = vst [vmem:[#allocation181_spill] sm:$0xff] %v4718_v37 }
 0x320   : > { %6993 = vst [vmem:[#allocation182_spill] sm:$0xff] %v4721_v32 }
 0x325   : > { %2335 = vrot.lane.b32.xlu2 %v3799_v8, %s3423_s25  ;;  %2045 = vperm.xlu1 %3300, %v3379_v51   ;;  %v4725_v24 = vpop.permute.xlu0 %2150 }
 0x326   : > { %2166 = vrot.lane.b32.xlu0 %v3821_v4, %s3419_s23  ;;  %v4729_v59 = vpop.permute.xlu2 %2463  ;;  %v4731_v25 = vpop.permute.xlu1 %2073 }
 0x327   : > { %6994 = vst [vmem:[#allocation183_spill] sm:$0xff] %v4729_v59  ;;  %v4746_v59 = vperm.slane %v4318_v19, 4 }
 0x328   : > { %6995 = vst [vmem:[#allocation184_spill] sm:$0xff] %v4731_v25 }
 0x329   : > { %6999 = vst [vmem:[#allocation188_spill] sm:$0xff] %v4746_v59  ;;  %v4816_v48 = vmul.f32 %v4746_v59, %v3914_v46 }
 0x32d   : > { %2451 = vperm.xlu2 %3301, %v4581_v27   ;;  %2359 = vrot.lane.b32.xlu1 %v3809_v15, %s3423_s25  ;;  %v4736_v37 = vpop.permute.xlu0 %2369  ;;  %v4752_v15 = vperm.slane %v4323_v18, 4 }
 0x32e   : > { %6996 = vst [vmem:[#allocation185_spill] sm:$0xff] %v4736_v37  ;;  %2337 = vrot.lane.b32.xlu0 %v3811_v16, %s3423_s25  ;;  %v4740_v32 = vpop.permute.xlu2 %2347  ;;  %v4742_v8 = vpop.permute.xlu1 %2349  ;;  %3304 = vset.pattern.permute.xlu1 %v6955_v38  ;;  %v4771_v37 = vperm.slane %v4318_v19, 1 }
 0x32f   : > { %6997 = vst [vmem:[#allocation186_spill] sm:$0xff] %v4740_v32  ;;  %v4832_v46 = vmul.f32 %v4752_v15, %v3929_v61 }
 0x330   : > { %6998 = vst [vmem:[#allocation187_spill] sm:$0xff] %v4742_v8  ;;  %v4782_v8 = vperm.slane %v4318_v19, 0 }
 0x331   : > { %7001 = vst [vmem:[#allocation190_spill] sm:$0xff] %v4752_v15 }
 0x335   : > { %2435 = vperm.xlu2 %3301, %v3379_v51   ;;  %2240 = vperm.xlu1 %3304, %v3379_v51   ;;  %v4748_v27 = vpop.permute.xlu0 %2148  ;;  %v1109_v51 = vsel %vm1091_vm10, %v4161_v44, %v4149_v7 }
 0x336   : > { %7000 = vst [vmem:[#allocation189_spill] sm:$0xff] %v4748_v27  ;;  %2168 = vrot.lane.b32.xlu0 %v3847_v54, %s3419_s23  ;;  %v4756_v32 = vpop.permute.xlu2 %2264  ;;  %v4758_v25 = vpop.permute.xlu1 %2268  ;;  %v4767_v27 = vmul.f32 %v4746_v59, %v3884_v42  ;;  %v4785_v42 = vperm.slane %v4318_v19, 2  ;;  %v1097_v54 = vsel %vm1091_vm10, %v4149_v7, %v4161_v44  ;;  %v1128_v12 = vmul.f32 %v4771_v37, %v1109_v51 }
 0x337   : > { %7002 = vst [vmem:[#allocation191_spill] sm:$0xff] %v4756_v32  ;;  %v1303_v32 = vsel %vm1286_vm11, %v4113_v56, %v4098_v28  ;;  %v4811_v44 = vperm.slane %v4323_v18, 2 }
 0x338   : > { %7003 = vst [vmem:[#allocation192_spill] sm:$0xff] %v4758_v25  ;;  %v4779_v25 = vmul.f32 %v4752_v15, %v3899_v50  ;;  %v1291_v50 = vsel %vm1286_vm11, %v4098_v28, %v4113_v56  ;;  %v1321_v7 = vmul.f32 %v4785_v42, %v1303_v32  ;;  %v1292_v28 = vsel %vm1286_vm11, %v4117_v29, %v4129_v21 }
 0x339   : > { %7004 = vst [vmem:[#allocation193_spill] sm:$0xff] %v4767_v27  ;;  %v921_v56 = vmul.f32 %v4782_v8, %v902_v40  ;;  %v1322_v32 = vmul.f32 %v4811_v44, %v1291_v50  ;;  %v4860_v40 = vmul.f32 %v4752_v15, %v3985_v3 }
 0x33a   : > { %7005 = vst [vmem:[#allocation194_spill] sm:$0xff] %v4779_v25  ;;  %v890_v25 = vsel %vm884_vm12, %v4125_v1, %v4137_v9  ;;  %v1304_v9 = vsel %vm1286_vm11, %v4129_v21, %v4117_v29  ;;  %v1129_v1 = vmul.f32 %v4796_v36, %v1097_v54  ;;  %v1200_v21 = vmul.f32 %v3839_v55, %v1128_v12 }
 0x33b   : > { %7006 = vst [vmem:[#allocation195_spill] sm:$0xff] %v4785_v42  ;;  %v922_v51 = vmul.f32 %v4808_v60, %v890_v25  ;;  %v1108_v54 = vsel %vm1091_vm10, %v4163_v57, %v4151_v13  ;;  %v4847_v29 = vmul.f32 %v4746_v59, %v3967_v26  ;;  %v1323_v61 = vmul.f32 %v4785_v42, %v1304_v9 }
 0x33c   : > { %7009 = vst [vmem:[#allocation198_spill] sm:$0xff] %v4811_v44  ;;  %v1324_v25 = vmul.f32 %v4811_v44, %v1292_v28  ;;  %v1096_v12 = vsel %vm1091_vm10, %v4151_v13, %v4163_v57  ;;  %v4868_v59 = vmul.f32 %v3901_v47, %v1321_v7  ;;  %v1005_v28 = vmul.f32 %v3813_v17, %v921_v56 }
 0x33d   : > { %1971 = vrot.lane.b32.xlu2 %v3821_v4, %s3420_s24  ;;  %1947 = vrot.lane.b32.xlu1 %v3811_v16, %s3420_s24  ;;  %v4838_v27 = vpop.permute.xlu0 %1969  ;;  %v901_v13 = vsel %vm884_vm12, %v4139_v63, %v4127_v14  ;;  %v1201_v57 = vmul.f32 %v3839_v55, %v1129_v1  ;;  %v4877_v3 = vmul.f32 %v3901_v47, %v1322_v32 }
 0x33e   : > { %2339 = vrot.lane.b32.xlu0 %v3833_v23, %s3423_s25  ;;  %3306 = vset.pattern.permute.xlu1 %v6961_v43  ;;  %7011 = vst [vmem:[#allocation200_spill] sm:$0xff] %v4868_v59  ;;  %v1006_v9 = vmul.f32 %v3813_v17, %v922_v51  ;;  %v889_v7 = vsel %vm884_vm12, %v4127_v14, %v4139_v63  ;;  %v7013_v63 = vld [vmem:[#allocation88_spill] sm:$0xff]  ;;  %v7014_v14 = vld [vmem:[#allocation91_spill] sm:$0xff] }
 0x33f   : > { %v4862_v26 = vpop.permute.xlu2 %2065  ;;  %v4864_v50 = vpop.permute.xlu1 %2069  ;;  %3308 = vset.pattern.permute.xlu2 %v6962_v58  ;;  %7012 = vst [vmem:[#allocation201_spill] sm:$0xff] %v4877_v3  ;;  %v1224_v56 = vadd.f32 %v1200_v21, %v1005_v28  ;;  %v1127_v15 = vmul.f32 %v4796_v36, %v1096_v12  ;;  %v1294_v55 = vsel %vm1286_vm11, %v4173_v53, %v4185_v22  ;;  %v7015_v12 = vld [vmem:[#allocation93_spill] sm:$0xff] }
 0x340   : > { %7010 = vst [vmem:[#allocation199_spill] sm:$0xff] %v4864_v50  ;;  %v1126_v50 = vmul.f32 %v4771_v37, %v1108_v54  ;;  %v1306_v17 = vsel %vm1286_vm11, %v4185_v22, %v4173_v53  ;;  %v1395_v47 = vmul.f32 %v3941_v35, %v1323_v61  ;;  %v1396_v1 = vmul.f32 %v3941_v35, %v1324_v25  ;;  %v7016_v53 = vld [vmem:[#allocation96_spill] sm:$0xff] }
 0x341   : > { %v1111_v32 = vsel %vm1091_vm10, %v7014_v14, %v7013_v63  ;;  %v4901_v51 = vmul.f32 %v4782_v8, %v901_v13  ;;  %v1225_v21 = vadd.f32 %v1201_v57, %v1006_v9  ;;  %v1099_v54 = vsel %vm1091_vm10, %v7013_v63, %v7014_v14  ;;  %v4925_v13 = vld [vmem:[%s6561_s5 + $0x8] sm:$0xff] }
 0x342   : > { %v1309_v22 = vsel %vm1286_vm11, %v7016_v53, %v7015_v12  ;;  %v4912_v35 = vmul.f32 %v4808_v60, %v889_v7  ;;  %v1327_v61 = vmul.f32 %v4785_v42, %v1306_v17  ;;  %v1328_v25 = vmul.f32 %v4811_v44, %v1294_v55  ;;  %v4934_v55 = vld [vmem:[%s6561_s5 + $0x18] sm:$0xff]  ;;  %v7019_v17 = vld [vmem:[#allocation20_spill] sm:$0xff] }
 0x343   : > { %v1297_v28 = vsel %vm1286_vm11, %v7015_v12, %v7016_v53  ;;  %v1132_v9 = vmul.f32 %v4771_v37, %v1111_v32  ;;  %v1419_v7 = vadd.f32 %v1395_v47, %v1224_v56  ;;  %7018 = vst [vmem:[#allocation91_spill] sm:$0xff] %v4934_v55  ;;  %v4938_v63 = vmul.f32 %v7019_v17, %v1126_v50  ;;  %v7022_v12 = vld [vmem:[#allocation85_spill] sm:$0xff]  ;;  %v7023_v53 = vld [vmem:[#allocation82_spill] sm:$0xff] }
 0x344   : > { %v4941_v14 = vmul.f32 %v7019_v17, %v1127_v15  ;;  %v904_v56 = vsel %vm884_vm12, %v7022_v12, %v7023_v53  ;;  %v1133_v47 = vmul.f32 %v4796_v36, %v1099_v54  ;;  %v1333_v32 = vmul.f32 %v4785_v42, %v1309_v22  ;;  %v7025_v17 = vld [vmem:[#allocation109_spill] sm:$0xff]  ;;  %v7031_v42 = vld [vmem:[#allocation100_spill] sm:$0xff] }
 0x345   : > { %2142 = vrot.lane.b32.xlu2 %v3811_v16, %s3419_s23  ;;  %1854 = vperm.xlu1 %3306, %v4925_v13   ;;  %v4928_v57 = vpop.permute.xlu0 %2256  ;;  %7020 = vst [vmem:[#allocation93_spill] sm:$0xff] %v4938_v63  ;;  %v892_v16 = vsel %vm884_vm12, %v7023_v53, %v7022_v12  ;;  %v1334_v15 = vmul.f32 %v4811_v44, %v1297_v28  ;;  %v7027_v12 = vld [vmem:[#allocation110_spill] sm:$0xff]  ;;  %v7028_v22 = vld [vmem:[#allocation29_spill] sm:$0xff] }
 0x346   : > { %7017 = vst [vmem:[#allocation88_spill] sm:$0xff] %v4928_v57  ;;  %1862 = vperm.xlu0 %3305, %v4934_v55   ;;  %v7026_v55 = vld [vmem:[#allocation106_spill] sm:$0xff]  ;;  %v1499_v54 = vsel %vm1481_vm8, %v4368_v2, %v7027_v12  ;;  %v4969_v53 = vmul.f32 %v7028_v22, %v1327_v61  ;;  %v4972_v28 = vmul.f32 %v7028_v22, %v1328_v25  ;;  %v7033_v22 = vld [vmem:[#allocation24_spill] sm:$0xff] }
 0x347   : > { %7021 = vst [vmem:[#allocation96_spill] sm:$0xff] %v4941_v14  ;;  %v4953_v57 = vpop.permute.xlu2 %1953  ;;  %v1980_v50 = vpop.permute.xlu1 %1979  ;;  %v1102_v3 = vsel %vm1091_vm10, %v7026_v55, %v7025_v17  ;;  %v1114_v59 = vsel %vm1091_vm10, %v7025_v17, %v7026_v55  ;;  %v1487_v44 = vsel %vm1481_vm8, %v7027_v12, %v4368_v2  ;;  %v7032_v14 = vld [vmem:[#allocation103_spill] sm:$0xff]  ;;  %v818_v17 = vld [vmem:[%s6562_s6] sm:$0xff]  ;;  %v4986_v61 = vmul.f32 %v4782_v8, %v904_v56 }
 0x348   : > { %7024 = vst [vmem:[#allocation20_spill] sm:$0xff] %v4953_v57  ;;  %v1420_v57 = vadd.f32 %v1396_v1, %v1225_v21  ;;  %v907_v55 = vsel %vm884_vm12, %v7032_v14, %v7031_v42  ;;  %v4989_v25 = vmul.f32 %v4808_v60, %v892_v16  ;;  %v4992_v63 = vmul.f32 %v7033_v22, %v1132_v9  ;;  %v7035_v9 = vld [vmem:[#allocation104_spill] sm:$0xff] }
 0x349   : > { %7029 = vst [vmem:[#allocation85_spill] sm:$0xff] %v4969_v53  ;;  %v1138_v2 = vmul.f32 %v4771_v37, %v1114_v59  ;;  %v1139_v1 = vmul.f32 %v4796_v36, %v1102_v3  ;;  %v1518_v21 = vmul.f32 %v4331_v41, %v1499_v54  ;;  %v4998_v12 = vmul.f32 %v7033_v22, %v1133_v47  ;;  %v7036_v3 = vld [vmem:[#allocation113_spill] sm:$0xff] }
 0x34a   : > { %7030 = vst [vmem:[#allocation82_spill] sm:$0xff] %v4972_v28  ;;  %v7034_v28 = vld [vmem:[#allocation32_spill] sm:$0xff]  ;;  %v895_v16 = vsel %vm884_vm12, %v7031_v42, %v7032_v14  ;;  %v1519_v59 = vmul.f32 %v4334_v33, %v1487_v44  ;;  %v1498_v54 = vsel %vm1481_vm8, %v7036_v3, %v7035_v9  ;;  %v1804_v42 = vsel %vm1798_vm9, %v4522_v31, %v4593_v45 }
 0x34b   : > { %v5001_v53 = vmul.f32 %v7034_v28, %v1333_v32  ;;  %v5004_v56 = vmul.f32 %v7034_v28, %v1334_v15  ;;  %v1590_v47 = vmul.f32 %v4461_v6, %v1518_v21  ;;  %v5018_v32 = vmul.f32 %v4782_v8, %v907_v55 }
 0x34c   : > { %v1591_v15 = vmul.f32 %v4461_v6, %v1519_v59  ;;  %v1816_v44 = vsel %vm1798_vm9, %v4593_v45, %v4522_v31  ;;  %v1486_v6 = vsel %vm1481_vm8, %v7035_v9, %v7036_v3  ;;  %v7038_v45 = vld [vmem:[#allocation27_spill] sm:$0xff]  ;;  %v1516_v21 = vmul.f32 %v4331_v41, %v1498_v54  ;;  %v7039_v59 = vld [vmem:[#allocation114_spill] sm:$0xff] }
 0x34d   : > { %2532 = vperm.xlu2 %3308, %v818_v17   ;;  %3307 = vset.pattern.permute.xlu1 %v6957_v11  ;;  %v5041_v17 = vmul.f32 %v4808_v60, %v895_v16  ;;  %v5044_v31 = vmul.f32 %v7038_v45, %v1138_v2  ;;  %v5047_v22 = vmul.f32 %v7038_v45, %v1139_v1 }
 0x34e   : > { %3314 = vset.pattern.permute.xlu0 %v6984_v20  ;;  %2049 = vperm.xlu1 %3307, %v4925_v13   ;;  %v5031_v14 = vpop.permute.xlu0 %942  ;;  %v7040_v20 = vld [vmem:[#allocation107_spill] sm:$0xff]  ;;  %v1712_v16 = vmul.f32 %v4478_v49, %v4816_v48  ;;  %v1713_v2 = vmul.f32 %v4478_v49, %v4832_v46  ;;  %v1835_v1 = vmul.f32 %v4552_v34, %v1804_v42  ;;  %v5072_v48 = vperm.slane %v4318_v19, 6 }
 0x34f   : > { %7037 = vst [vmem:[#allocation109_spill] sm:$0xff] %v5031_v14  ;;  %2459 = vperm.xlu0 %3314, %v4531_v0   ;;  %v5038_v28 = vpop.permute.xlu2 %2345  ;;  %v1871_v55 = vpop.permute.xlu1 %1870  ;;  %v1489_v9 = vsel %vm1481_vm8, %v7040_v20, %v7039_v59  ;;  %v1501_v0 = vsel %vm1481_vm8, %v7039_v59, %v7040_v20  ;;  %v1836_v3 = vmul.f32 %v4555_v62, %v1816_v44  ;;  %v5075_v49 = vperm.slane %v4323_v18, 6 }
 0x350   : > { %v1614_v54 = vadd.f32 %v1590_v47, %v1419_v7  ;;  %v1615_v45 = vadd.f32 %v1591_v15, %v1420_v57  ;;  %v1999_v14 = vsel %vm1993_vm13, %v4705_v5, %v1980_v50  ;;  %v2011_v20 = vsel %vm1993_vm13, %v1980_v50, %v4705_v5  ;;  %7041 = vst [vmem:[#allocation106_spill] sm:$0xff] %v5072_v48 }
 0x351   : > { %7042 = vst [vmem:[#allocation110_spill] sm:$0xff] %v5075_v49  ;;  %v1907_v46 = vmul.f32 %v1871_v55, %v1835_v1  ;;  %v1908_v42 = vmul.f32 %v1871_v55, %v1836_v3  ;;  %v1517_v44 = vmul.f32 %v4334_v33, %v1486_v6  ;;  %v1522_v57 = vmul.f32 %v4331_v41, %v1501_v0 }
 0x352   : > { %v1523_v7 = vmul.f32 %v4334_v33, %v1489_v9  ;;  %v5081_v47 = vmul.f32 %v4394_v52, %v1516_v21  ;;  %v1736_v15 = vadd.f32 %v1712_v16, %v1614_v54  ;;  %v1737_v59 = vadd.f32 %v1713_v2, %v1615_v45  ;;  %v7045_v2 = vld [vmem:[#allocation137_spill] sm:$0xff]  ;;  %v7046_v54 = vld [vmem:[#allocation120_spill] sm:$0xff] }
 0x353   : > { %v2030_v5 = vmul.f32 %v5072_v48, %v1999_v14  ;;  %v2031_v50 = vmul.f32 %v5075_v49, %v2011_v20  ;;  %v5087_v1 = vmul.f32 %v4394_v52, %v1517_v44  ;;  %v5090_v6 = vmul.f32 %v4451_v10, %v1522_v57  ;;  %v7048_v44 = vld [vmem:[#allocation147_spill] sm:$0xff]  ;;  %v7055_v33 = vld [vmem:[#allocation153_spill] sm:$0xff] }
 0x354   : > { %v5093_v55 = vmul.f32 %v4451_v10, %v1523_v7  ;;  %v5100_v21 = vperm.slane %v4318_v19, 7  ;;  %v5103_v52 = vperm.slane %v4323_v18, 7  ;;  %v1931_v9 = vadd.f32 %v1907_v46, %v1736_v15  ;;  %v7049_v7 = vld [vmem:[#allocation171_spill] sm:$0xff]  ;;  %v7050_v15 = vld [vmem:[#allocation157_spill] sm:$0xff] }
 0x355   : > { %3309 = vset.pattern.permute.xlu2 %v6955_v38  ;;  %v1932_v0 = vadd.f32 %v1908_v42, %v1737_v59  ;;  %v5109_v3 = vmul.f32 %v7045_v2, %v4357_v39  ;;  %v5113_v45 = vmul.f32 %v7045_v2, %v7046_v54  ;;  %v2103_v20 = vmul.f32 %v4862_v26, %v2031_v50  ;;  %v7047_v42 = vld [vmem:[#allocation193_spill] sm:$0xff] }
 0x356   : > { %2244 = vperm.xlu2 %3309, %v4925_v13   ;;  %2361 = vrot.lane.b32.xlu1 %v3821_v4, %s3423_s25  ;;  %v958_v14 = vpop.permute.xlu0 %957  ;;  %7043 = vst [vmem:[#allocation29_spill] sm:$0xff] %v5100_v21  ;;  %v5127_v57 = vmul.f32 %v7048_v44, %v7047_v42  ;;  %v1806_v59 = vsel %vm1798_vm9, %v7050_v15, %v7049_v7  ;;  %v7054_v4 = vld [vmem:[#allocation168_spill] sm:$0xff] }
 0x357   : > { %7044 = vst [vmem:[#allocation100_spill] sm:$0xff] %v5103_v52  ;;  %2439 = vperm.xlu0 %3314, %v4925_v13   ;;  %v2261_v10 = vpop.permute.xlu2 %2260  ;;  %v2175_v16 = vpop.permute.xlu1 %2174  ;;  %3310 = vset.pattern.permute.xlu1 %v6961_v43  ;;  %v2102_v13 = vmul.f32 %v4862_v26, %v2030_v5  ;;  %v7051_v5 = vld [vmem:[#allocation169_spill] sm:$0xff]  ;;  %v2127_v2 = vadd.f32 %v2103_v20, %v1932_v0 }
 0x358   : > { %v2194_v18 = vsel %vm2188_vm14, %v4725_v24, %v2175_v16  ;;  %v2206_v19 = vsel %vm2188_vm14, %v2175_v16, %v4725_v24  ;;  %v1818_v24 = vsel %vm1798_vm9, %v7049_v7, %v7050_v15  ;;  %v7052_v26 = vld [vmem:[#allocation173_spill] sm:$0xff]  ;;  %v5149_v7 = vsel %vm1798_vm9, %v7055_v33, %v7054_v4 }
 0x359   : > { %v2225_v46 = vmul.f32 %v5100_v21, %v2194_v18  ;;  %v2226_v39 = vmul.f32 %v5103_v52, %v2206_v19  ;;  %v2196_v50 = vsel %vm2188_vm14, %v7052_v26, %v7051_v5  ;;  %v2126_v16 = vadd.f32 %v2102_v13, %v1931_v9  ;;  %v7053_v19 = vld [vmem:[#allocation149_spill] sm:$0xff] }
 0x35a   : > { %v1716_v42 = vmul.f32 %v7053_v19, %v4847_v29  ;;  %v1717_v43 = vmul.f32 %v7053_v19, %v4860_v40  ;;  %v5155_v9 = vsel %vm1798_vm9, %v7054_v4, %v7055_v33  ;;  %v1839_v0 = vmul.f32 %v4552_v34, %v1806_v59  ;;  %v7058_v33 = vld [vmem:[#allocation16_spill] sm:$0xff] }
 0x35b   : > { %v2297_v54 = vmul.f32 %v2261_v10, %v2225_v46  ;;  %v2298_v18 = vmul.f32 %v2261_v10, %v2226_v39  ;;  %v1840_v10 = vmul.f32 %v4555_v62, %v1818_v24  ;;  %v2208_v40 = vsel %vm2188_vm14, %v7051_v5, %v7052_v26  ;;  %v7056_v46 = vld [vmem:[#allocation170_spill] sm:$0xff]  ;;  %v5184_v24 = vld [vmem:[%s6561_s5 + $0x10] sm:$0xff] }
 0x35c   : > { %v2229_v20 = vmul.f32 %v5100_v21, %v2196_v50  ;;  %v7057_v39 = vld [vmem:[#allocation178_spill] sm:$0xff] }
 0x35d   : > { %v5159_v29 = vadd.f32 %v2297_v54, %v2126_v16  ;;  %v5161_v13 = vadd.f32 %v2298_v18, %v2127_v2  ;;  %v2001_v4 = vsel %vm1993_vm13, %v7057_v39, %v7056_v46  ;;  %v2013_v59 = vsel %vm1993_vm13, %v7056_v46, %v7057_v39  ;;  %v7061_v39 = vld [vmem:[#allocation180_spill] sm:$0xff] }
 0x35e   : > { %1973 = vrot.lane.b32.xlu2 %v7058_v33, %s3420_s24  ;;  %1949 = vrot.lane.b32.xlu1 %v3833_v23, %s3420_s24  ;;  %v973_v15 = vpop.permute.xlu0 %972  ;;  %v1003_v2 = vmul.f32 %v958_v14, %v4901_v51  ;;  %v1004_v54 = vmul.f32 %v958_v14, %v4912_v35  ;;  %v2034_v19 = vmul.f32 %v5072_v48, %v2001_v4  ;;  %v5209_v51 = vld [vmem:[%s6567_s11 + $0x10] ss:$0 sm:$0xff]  ;;  %v7063_v4 = vld [vmem:[#allocation187_spill] sm:$0xff] }
 0x35f   : > { %2443 = vperm.xlu0 %3314, %v5184_v24   ;;  %v1009_v5 = vmul.f32 %v973_v15, %v4986_v61  ;;  %v1010_v26 = vmul.f32 %v973_v15, %v4989_v25  ;;  %v1946_v50 = vpop.permute.xlu2 %1945  ;;  %v5189_v16 = vpop.permute.xlu1 %2567  ;;  %3312 = vset.pattern.permute.xlu2 %v6962_v58  ;;  %v2230_v25 = vmul.f32 %v5103_v52, %v2208_v40  ;;  %v7062_v40 = vld [vmem:[#allocation179_spill] sm:$0xff]  ;;  %v7068_v52 = vld [vmem:[#allocation93_spill] sm:$0xff] }
 0x360   : > { %v5197_v18 = vsel %vm1993_vm13, %v1946_v50, %v4838_v27  ;;  %v5202_v61 = vsel %vm1993_vm13, %v4838_v27, %v1946_v50  ;;  %v2035_v46 = vmul.f32 %v5075_v49, %v2013_v59  ;;  %v1911_v15 = vmul.f32 %v7061_v39, %v1839_v0  ;;  %v5218_v27 = vld [vmem:[%s6567_s11 + $0x18] ss:$0 sm:$0xff]  ;;  %v7067_v49 = vld [vmem:[#allocation184_spill] sm:$0xff] }
 0x361   : > { %7059 = vst [vmem:[#allocation103_spill] sm:$0xff] %v5197_v18  ;;  %v1228_v35 = vadd.f32 %v4992_v63, %v1009_v5  ;;  %v1229_v14 = vadd.f32 %v4998_v12, %v1010_v26  ;;  %v2391_v50 = vsel %vm2383_vm15, %v7063_v4, %v7062_v40  ;;  %v2403_v63 = vsel %vm2383_vm15, %v7062_v40, %v7063_v4  ;;  %v7064_v12 = vld [vmem:[#allocation185_spill] sm:$0xff]  ;;  %v7069_v4 = vld [vmem:[#allocation96_spill] sm:$0xff] }
 0x362   : > { %7060 = vst [vmem:[#allocation24_spill] sm:$0xff] %v5202_v61  ;;  %v2389_v0 = vsel %vm2383_vm15, %v5038_v28, %v7064_v12  ;;  %v2401_v59 = vsel %vm2383_vm15, %v7064_v12, %v5038_v28  ;;  %v7065_v5 = vld [vmem:[#allocation85_spill] sm:$0xff]  ;;  %v7066_v61 = vld [vmem:[#allocation82_spill] sm:$0xff]  ;;  %v1912_v41 = vmul.f32 %v7061_v39, %v1840_v10  ;;  %v2106_v48 = vmul.f32 %v7067_v49, %v2034_v19 }
 0x363   : > { %v1423_v26 = vadd.f32 %v7065_v5, %v1228_v35  ;;  %v1424_v18 = vadd.f32 %v7066_v61, %v1229_v14  ;;  %v1222_v40 = vadd.f32 %v7068_v52, %v1003_v2  ;;  %v1223_v21 = vadd.f32 %v7069_v4, %v1004_v54  ;;  %v7070_v54 = vld [vmem:[#allocation23_spill] sm:$0xff]  ;;  %v7071_v14 = vld [vmem:[#allocation200_spill] sm:$0xff]  ;;  %v7072_v39 = vld [vmem:[#allocation201_spill] sm:$0xff] }
 0x364   : > { %v2107_v58 = vmul.f32 %v7067_v49, %v2035_v46  ;;  %v2424_v33 = vmul.f32 %v5209_v51, %v2391_v50  ;;  %v2425_v35 = vmul.f32 %v5218_v27, %v2403_v63  ;;  %v2420_v61 = vmul.f32 %v5209_v51, %v2389_v0 }
 0x365   : > { %v1618_v36 = vadd.f32 %v5090_v6, %v1423_v26  ;;  %v1619_v28 = vadd.f32 %v5093_v55, %v1424_v18  ;;  %v2421_v10 = vmul.f32 %v5218_v27, %v2401_v59  ;;  %v1417_v46 = vadd.f32 %v7071_v14, %v1222_v40 }
 0x366   : > { %2144 = vrot.lane.b32.xlu2 %v3833_v23, %s3419_s23  ;;  %1858 = vperm.xlu1 %3310, %v5184_v24   ;;  %v988_v52 = vpop.permute.xlu0 %987  ;;  %v1418_v50 = vadd.f32 %v7072_v39, %v1223_v21 }
 0x367   : > { %v1740_v2 = vadd.f32 %v1716_v42, %v1618_v36  ;;  %v1741_v49 = vadd.f32 %v1717_v43, %v1619_v28  ;;  %2341 = vrot.lane.b32.xlu0 %v7070_v54, %s3423_s25  ;;  %v1015_v6 = vmul.f32 %v988_v52, %v5018_v32  ;;  %v1016_v55 = vmul.f32 %v988_v52, %v5041_v17  ;;  %v2456_v18 = vpop.permute.xlu2 %2455  ;;  %v5256_v19 = vpop.permute.xlu1 %1977  ;;  %v7073_v42 = vld [vmem:[#allocation192_spill] sm:$0xff]  ;;  %v7081_v52 = vld [vmem:[#allocation91_spill] sm:$0xff] }
 0x368   : > { %v2492_v63 = vmul.f32 %v2456_v18, %v2420_v61  ;;  %v2493_v12 = vmul.f32 %v2456_v18, %v2421_v10  ;;  %v2301_v5 = vmul.f32 %v7073_v42, %v2229_v20  ;;  %v2302_v32 = vmul.f32 %v7073_v42, %v2230_v25  ;;  %v7083_v18 = vld [vmem:[#allocation45_spill] sm:$0xff] }
 0x369   : > { %v1935_v0 = vadd.f32 %v1911_v15, %v1740_v2  ;;  %v1936_v59 = vadd.f32 %v1912_v41, %v1741_v49  ;;  %v1234_v43 = vadd.f32 %v5044_v31, %v1015_v6  ;;  %v1235_v36 = vadd.f32 %v5047_v22, %v1016_v55  ;;  %v819_v31 = vld [vmem:[%s6562_s6 + $0x8] sm:$0xff] }
 0x36a   : > { %v5265_v17 = vadd.f32 %v2492_v63, %v5159_v29  ;;  %v5268_v26 = vadd.f32 %v2493_v12, %v5161_v13  ;;  %v7074_v22 = vld [vmem:[#allocation183_spill] sm:$0xff]  ;;  %v1612_v29 = vadd.f32 %v5081_v47, %v1417_v46  ;;  %v1613_v15 = vadd.f32 %v5087_v1, %v1418_v50 }
 0x36b   : > { %v2130_v40 = vadd.f32 %v2106_v48, %v1935_v0  ;;  %v2131_v21 = vadd.f32 %v2107_v58, %v1936_v59  ;;  %v1429_v4 = vadd.f32 %v5001_v53, %v1234_v43  ;;  %v1430_v41 = vadd.f32 %v5004_v56, %v1235_v36  ;;  %v7077_v56 = vld [vmem:[#allocation194_spill] sm:$0xff]  ;;  %v7086_v43 = vld [vmem:[#allocation44_spill] sm:$0xff] }
 0x36c   : > { %v2496_v20 = vmul.f32 %v7074_v22, %v2424_v33  ;;  %v2497_v25 = vmul.f32 %v7074_v22, %v2425_v35  ;;  %v1711_v48 = vmul.f32 %v7048_v44, %v7077_v56  ;;  %v1833_v47 = vmul.f32 %v4552_v34, %v5149_v7  ;;  %v7079_v35 = vld [vmem:[#allocation34_spill] sm:$0xff]  ;;  %v7087_v36 = vld [vmem:[#allocation48_spill] sm:$0xff] }
 0x36d   : > { %v2325_v13 = vadd.f32 %v2301_v5, %v2130_v40  ;;  %v2326_v28 = vadd.f32 %v2302_v32, %v2131_v21  ;;  %v5280_v58 = vadd.f32 %v5109_v3, %v1429_v4  ;;  %v5283_v53 = vadd.f32 %v5113_v45, %v1430_v41  ;;  %v7080_v3 = vld [vmem:[#allocation37_spill] sm:$0xff]  ;;  %v7089_v32 = vld [vmem:[#allocation190_spill] sm:$0xff]  ;;  %v7090_v21 = vld [vmem:[#allocation7_spill] sm:$0xff] }
 0x36e   : > { %2537 = vperm.xlu2 %3312, %v819_v31   ;;  %3311 = vset.pattern.permute.xlu1 %v6957_v11  ;;  %v5288_v33 = vpop.permute.xlu0 %2562  ;;  %v1834_v1 = vmul.f32 %v4555_v62, %v5155_v9  ;;  %v897_v45 = vsel %vm884_vm12, %v7080_v3, %v7079_v35  ;;  %v1734_v49 = vadd.f32 %v5127_v57, %v1612_v29  ;;  %v7082_v9 = vld [vmem:[#allocation41_spill] sm:$0xff]  ;;  %v7091_v4 = vld [vmem:[#allocation188_spill] sm:$0xff]  ;;  %v7092_v22 = vld [vmem:[#allocation2_spill] sm:$0xff] }
 0x36f   : > { %7075 = vst [vmem:[#allocation32_spill] sm:$0xff] %v5280_v58  ;;  %v2520_v61 = vadd.f32 %v2496_v20, %v2325_v13  ;;  %v2521_v10 = vadd.f32 %v2497_v25, %v2326_v28  ;;  %2447 = vperm.xlu0 %3314, %v7081_v52   ;;  %v5299_v44 = vpop.permute.xlu2 %2367  ;;  %2053 = vperm.xlu1 %3311, %v5184_v24   ;;  %v1867_v2 = vpop.permute.xlu1 %1866  ;;  %v7088_v5 = vld [vmem:[#allocation9_spill] sm:$0xff]  ;;  %v7093_v25 = vld [vmem:[#allocation196_spill] sm:$0xff]  ;;  %v7095_v13 = vld [vmem:[#allocation78_spill] sm:$0xff] }
 0x370   : > { %7076 = vst [vmem:[#allocation104_spill] sm:$0xff] %v5283_v53  ;;  %v1735_v7 = vadd.f32 %v1711_v48, %v1613_v15  ;;  %v1905_v6 = vmul.f32 %v1867_v2, %v1833_v47  ;;  %v1906_v55 = vmul.f32 %v1867_v2, %v1834_v1  ;;  %v1104_v14 = vsel %vm1091_vm10, %v7083_v18, %v7082_v9  ;;  %v7094_v15 = vld [vmem:[#allocation76_spill] sm:$0xff]  ;;  %v7100_v2 = vld [vmem:[#allocation195_spill] sm:$0xff]  ;;  %v7113_v11 = vld [vmem:[#allocation25_spill] sm:$0xff] }
 0x371   : > { %7078 = vst [vmem:[#allocation113_spill] sm:$0xff] %v5288_v33  ;;  %v5308_v46 = vadd.f32 %v5189_v16, %v2520_v61  ;;  %v5311_v39 = vadd.f32 %v5189_v16, %v2521_v10  ;;  %v885_v57 = vsel %vm884_vm12, %v7079_v35, %v7080_v3  ;;  %v911_v12 = vmul.f32 %v4782_v8, %v897_v45  ;;  %v7096_v48 = vld [vmem:[#allocation16_spill] sm:$0xff]  ;;  %v7098_v45 = vld [vmem:[#allocation189_spill] sm:$0xff] }
 0x372   : > { %v5313_v50 = vadd.f32 %v1905_v6, %v1734_v49  ;;  %v5315_v63 = vadd.f32 %v1906_v55, %v1735_v7  ;;  %v1092_v0 = vsel %vm1091_vm10, %v7082_v9, %v7083_v18  ;;  %v1118_v59 = vmul.f32 %v4771_v37, %v1104_v14  ;;  %v7097_v1 = vld [vmem:[#allocation8_spill] sm:$0xff]  ;;  %v7101_v7 = vld [vmem:[#allocation75_spill] sm:$0xff]  ;;  %v7102_v6 = vld [vmem:[#allocation74_spill] sm:$0xff] }
 0x373   : > { %7084 = vst [vmem:[#allocation27_spill] sm:$0xff] %v5308_v46  ;;  %v912_v16 = vmul.f32 %v4808_v60, %v885_v57  ;;  %v1299_v42 = vsel %vm1286_vm11, %v7087_v36, %v7086_v43  ;;  %v5334_v40 = vmul.f32 %v7089_v32, %v7088_v5  ;;  %v5338_v41 = vmul.f32 %v7091_v4, %v7090_v21  ;;  %v7103_v9 = vld [vmem:[#allocation29_spill] sm:$0xff]  ;;  %v7104_v14 = vld [vmem:[#allocation100_spill] sm:$0xff] }
 0x374   : > { %7085 = vst [vmem:[#allocation114_spill] sm:$0xff] %v5311_v39  ;;  %v995_v20 = vmul.f32 %v7092_v22, %v911_v12  ;;  %v1119_v29 = vmul.f32 %v7093_v25, %v1092_v0  ;;  %v1110_v28 = vsel %vm1091_vm10, %v7095_v13, %v7094_v15  ;;  %v1190_v35 = vmul.f32 %v7097_v1, %v1118_v59  ;;  %v7107_v5 = vld [vmem:[#allocation20_spill] sm:$0xff]  ;;  %v7119_v39 = vld [vmem:[#allocation43_spill] sm:$0xff]  ;;  %v7120_v46 = vld [vmem:[#allocation117_spill] sm:$0xff] }
 0x375   : > { %v1287_v3 = vsel %vm1286_vm11, %v7086_v43, %v7087_v36  ;;  %v7099_v10 = vmov 0   ;;  %v1313_v49 = vmul.f32 %v7100_v2, %v1299_v42  ;;  %v891_v55 = vsel %vm884_vm12, %v7102_v6, %v7101_v7  ;;  %v7105_v43 = vld [vmem:[#allocation77_spill] sm:$0xff]  ;;  %v7106_v36 = vld [vmem:[#allocation79_spill] sm:$0xff] }
 0x376   : > { %3313 = vset.pattern.permute.xlu2 %v6955_v38  ;;  %v5341_v31 = vpop.permute.xlu0 %2557  ;;  %v903_v12 = vsel %vm884_vm12, %v7101_v7, %v7102_v6  ;;  %v1098_v0 = vsel %vm1091_vm10, %v7094_v15, %v7095_v13  ;;  %v1130_v59 = vmul.f32 %v4771_v37, %v1110_v28  ;;  %v1305_v42 = vsel %vm1286_vm11, %v7106_v36, %v7105_v43 }
 0x377   : > { %2248 = vperm.xlu2 %3313, %v5184_v24   ;;  %v5350_v56 = vpop.permute.xlu2 %2164  ;;  %2363 = vrot.lane.b32.xlu1 %v7096_v48, %s3423_s25  ;;  %v2173_v47 = vpop.permute.xlu1 %2172  ;;  %v1998_v21 = vsel %vm1993_vm13, %v7107_v5, %v5256_v19  ;;  %v996_v13 = vmul.f32 %v7092_v22, %v912_v16  ;;  %v1191_v28 = vmul.f32 %v7097_v1, %v1119_v29  ;;  %v7111_v22 = vld [vmem:[#allocation106_spill] sm:$0xff] }
 0x378   : > { %v2193_v61 = vsel %vm2188_vm14, %v7098_v45, %v2173_v47  ;;  %v2205_v24 = vsel %vm2188_vm14, %v2173_v47, %v7098_v45  ;;  %3319 = vset.pattern.permute.xlu0 %v7099_v10  ;;  %v2010_v47 = vsel %vm1993_vm13, %v5256_v19, %v7107_v5  ;;  %v7108_v45 = vld [vmem:[#allocation88_spill] sm:$0xff]  ;;  %v1293_v6 = vsel %vm1286_vm11, %v7105_v43, %v7106_v36  ;;  %v7110_v5 = vld [vmem:[#allocation31_spill] sm:$0xff]  ;;  %v7112_v1 = vld [vmem:[#allocation110_spill] sm:$0xff] }
 0x379   : > { %v2223_v18 = vmul.f32 %v7103_v9, %v2193_v61  ;;  %v2224_v57 = vmul.f32 %v7104_v14, %v2205_v24  ;;  %v7109_v24 = vld [vmem:[#allocation198_spill] sm:$0xff]  ;;  %v1214_v53 = vadd.f32 %v1190_v35, %v995_v20  ;;  %v923_v58 = vmul.f32 %v4782_v8, %v903_v12  ;;  %v7114_v35 = vld [vmem:[#allocation112_spill] sm:$0xff] }
 0x37a   : > { %v1314_v7 = vmul.f32 %v7109_v24, %v1287_v3  ;;  %v924_v19 = vmul.f32 %v4808_v60, %v891_v55  ;;  %v1325_v16 = vmul.f32 %v7100_v2, %v1305_v42  ;;  %v2028_v29 = vmul.f32 %v7111_v22, %v1998_v21  ;;  %v7115_v12 = vld [vmem:[#allocation124_spill] sm:$0xff] }
 0x37b   : > { %v2295_v61 = vmul.f32 %v7108_v45, %v2223_v18  ;;  %v2296_v15 = vmul.f32 %v7108_v45, %v2224_v57  ;;  %v1131_v18 = vmul.f32 %v7093_v25, %v1098_v0  ;;  %v1385_v57 = vmul.f32 %v7110_v5, %v1313_v49  ;;  %v7116_v0 = vld [vmem:[#allocation26_spill] sm:$0xff] }
 0x37c   : > { %v2029_v3 = vmul.f32 %v7112_v1, %v2010_v47  ;;  %v1202_v48 = vmul.f32 %v7113_v11, %v1130_v59  ;;  %v1326_v20 = vmul.f32 %v7109_v24, %v1293_v6  ;;  %v1500_v55 = vsel %vm1481_vm8, %v7115_v12, %v7114_v35  ;;  %v7118_v47 = vld [vmem:[#allocation4_spill] sm:$0xff]  ;;  %v7122_v24 = vld [vmem:[#allocation115_spill] sm:$0xff] }
 0x37d   : > { %v1386_v36 = vmul.f32 %v7110_v5, %v1314_v7  ;;  %v1488_v59 = vsel %vm1481_vm8, %v7114_v35, %v7115_v12  ;;  %v1007_v6 = vmul.f32 %v7118_v47, %v923_v58  ;;  %v1008_v23 = vmul.f32 %v7118_v47, %v924_v19  ;;  %v7121_v5 = vld [vmem:[#allocation35_spill] sm:$0xff]  ;;  %v7123_v19 = vld [vmem:[#allocation116_spill] sm:$0xff] }
 0x37e   : > { %v5410_v45 = vpop.permute.xlu0 %2552  ;;  %v1203_v33 = vmul.f32 %v7113_v11, %v1131_v18  ;;  %v1494_v7 = vsel %vm1481_vm8, %v7120_v46, %v7119_v39  ;;  %v1520_v2 = vmul.f32 %v7122_v24, %v1500_v55  ;;  %v1398_v58 = vmul.f32 %v7121_v5, %v1326_v20 }
 0x37f   : > { %1975 = vrot.lane.b32.xlu2 %v7116_v0, %s3420_s24  ;;  %v5420_v49 = vpop.permute.xlu2 %2335  ;;  %1951 = vrot.lane.b32.xlu1 %v7070_v54, %s3420_s24  ;;  %v2062_v43 = vpop.permute.xlu1 %2061  ;;  %v1226_v35 = vadd.f32 %v1202_v48, %v1007_v6  ;;  %v1482_v11 = vsel %vm1481_vm8, %v7119_v39, %v7120_v46  ;;  %v1521_v18 = vmul.f32 %v7123_v19, %v1488_v59  ;;  %v7125_v48 = vld [vmem:[#allocation38_spill] sm:$0xff]  ;;  %v7126_v6 = vld [vmem:[#allocation132_spill] sm:$0xff] }
 0x380   : > { %7117 = vst [vmem:[#allocation107_spill] sm:$0xff] %v5420_v49  ;;  %v2100_v42 = vmul.f32 %v2062_v43, %v2028_v29  ;;  %v2101_v21 = vmul.f32 %v2062_v43, %v2029_v3  ;;  %3315 = vset.pattern.permute.xlu2 %v7099_v10  ;;  %v1397_v49 = vmul.f32 %v7121_v5, %v1325_v16  ;;  %v7124_v43 = vld [vmem:[#allocation127_spill] sm:$0xff]  ;;  %v7127_v46 = vld [vmem:[#allocation42_spill] sm:$0xff] }
 0x381   : > { %v1508_v12 = vmul.f32 %v7122_v24, %v1494_v7  ;;  %v1592_v16 = vmul.f32 %v7124_v43, %v1520_v2  ;;  %v1215_v60 = vadd.f32 %v1191_v28, %v996_v13  ;;  %v1642_v20 = vmul.f32 %v7091_v4, %v7125_v48 }
 0x382   : > { %v2124_v29 = vadd.f32 %v2100_v42, %v5313_v50  ;;  %v2125_v3 = vadd.f32 %v2101_v21, %v5315_v63  ;;  %v1227_v50 = vadd.f32 %v1203_v33, %v1008_v23  ;;  %v1593_v63 = vmul.f32 %v7124_v43, %v1521_v18  ;;  %v7131_v18 = vld [vmem:[#allocation136_spill] sm:$0xff] }
 0x383   : > { %v1421_v42 = vadd.f32 %v1397_v49, %v1226_v35  ;;  %v1409_v21 = vadd.f32 %v1385_v57, %v1214_v53  ;;  %v1580_v5 = vmul.f32 %v7126_v6, %v1508_v12  ;;  %v1643_v39 = vmul.f32 %v7089_v32, %v7127_v46  ;;  %v7129_v49 = vld [vmem:[#allocation160_spill] sm:$0xff] }
 0x384   : > { %v2319_v47 = vadd.f32 %v2295_v61, %v2124_v29  ;;  %v2320_v55 = vadd.f32 %v2296_v15, %v2125_v3  ;;  %v1509_v59 = vmul.f32 %v7123_v19, %v1482_v11  ;;  %v1422_v7 = vadd.f32 %v1398_v58, %v1227_v50  ;;  %v7128_v15 = vld [vmem:[#allocation142_spill] sm:$0xff]  ;;  %v7134_v46 = vld [vmem:[#allocation172_spill] sm:$0xff] }
 0x385   : > { %v1410_v2 = vadd.f32 %v1386_v36, %v1215_v60  ;;  %v1616_v61 = vadd.f32 %v1592_v16, %v1421_v42  ;;  %v1714_v53 = vmul.f32 %v7128_v15, %v1642_v20  ;;  %v7130_v36 = vld [vmem:[#allocation151_spill] sm:$0xff]  ;;  %v1604_v11 = vadd.f32 %v1580_v5, %v1409_v21  ;;  %v7132_v20 = vld [vmem:[#allocation154_spill] sm:$0xff]  ;;  %v7133_v42 = vld [vmem:[#allocation148_spill] sm:$0xff] }
 0x386   : > { %v1617_v57 = vadd.f32 %v1593_v63, %v1422_v7  ;;  %v1805_v29 = vsel %vm1798_vm9, %v7130_v36, %v7129_v49  ;;  %v1581_v58 = vmul.f32 %v7126_v6, %v1509_v59  ;;  %v1702_v12 = vmul.f32 %v7131_v18, %v5338_v41 }
 0x387   : > { %2170 = vrot.lane.b32.xlu2 %v7116_v0, %s3419_s23  ;;  %v2452_v23 = vpop.permute.xlu2 %2451  ;;  %2146 = vrot.lane.b32.xlu1 %v7070_v54, %s3419_s23  ;;  %v2344_v33 = vpop.permute.xlu1 %2343  ;;  %v1703_v43 = vmul.f32 %v7131_v18, %v5334_v40  ;;  %v1715_v16 = vmul.f32 %v7128_v15, %v1643_v39  ;;  %v1738_v48 = vadd.f32 %v1714_v53, %v1616_v61  ;;  %v820_v40 = vld [vmem:[%s6562_s6 + $0x10] sm:$0xff]  ;;  %v7135_v39 = vld [vmem:[#allocation175_spill] sm:$0xff]  ;;  %v7136_v61 = vld [vmem:[#allocation174_spill] sm:$0xff] }
 0x388   : > { %v2388_v13 = vsel %vm2383_vm15, %v2344_v33, %v5299_v44  ;;  %v2400_v28 = vsel %vm2383_vm15, %v5299_v44, %v2344_v33  ;;  %v1851_v60 = vpop.permute.xlu0 %1850  ;;  %v1817_v44 = vsel %vm1798_vm9, %v7129_v49, %v7130_v36  ;;  %v1799_v21 = vsel %vm1798_vm9, %v7133_v42, %v7132_v20  ;;  %v7137_v15 = vld [vmem:[#allocation182_spill] sm:$0xff] }
 0x389   : > { %v2418_v3 = vmul.f32 %v5209_v51, %v2388_v13  ;;  %v2419_v35 = vmul.f32 %v5218_v27, %v2400_v28  ;;  %v1811_v41 = vsel %vm1798_vm9, %v7132_v20, %v7133_v42  ;;  %v1837_v6 = vmul.f32 %v4552_v34, %v1805_v29  ;;  %v7140_v42 = vld [vmem:[#allocation199_spill] sm:$0xff] }
 0x38a   : > { %v1838_v5 = vmul.f32 %v4555_v62, %v1817_v44  ;;  %v2000_v59 = vsel %vm1993_vm13, %v7135_v39, %v7134_v46  ;;  %v2012_v33 = vsel %vm1993_vm13, %v7134_v46, %v7135_v39  ;;  %v2195_v53 = vsel %vm2188_vm14, %v7137_v15, %v7136_v61 }
 0x38b   : > { %v2490_v50 = vmul.f32 %v2452_v23, %v2418_v3  ;;  %v2491_v63 = vmul.f32 %v2452_v23, %v2419_v35  ;;  %v5510_v13 = vadd.f32 %v5341_v31, %v5265_v17  ;;  %v5514_v28 = vadd.f32 %v5341_v31, %v5268_v26 }
 0x38c   : > { %v1739_v29 = vadd.f32 %v1715_v16, %v1617_v57  ;;  %v1825_v26 = vmul.f32 %v4552_v34, %v1799_v21  ;;  %v1826_v31 = vmul.f32 %v4555_v62, %v1811_v41  ;;  %v2032_v3 = vmul.f32 %v7111_v22, %v2000_v59 }
 0x38d   : > { %v2514_v7 = vadd.f32 %v2490_v50, %v2319_v47  ;;  %v2515_v23 = vadd.f32 %v2491_v63, %v2320_v55  ;;  %7138 = vst [vmem:[#allocation137_spill] sm:$0xff] %v5510_v13  ;;  %v2207_v47 = vsel %vm2188_vm14, %v7136_v61, %v7137_v15  ;;  %v2033_v18 = vmul.f32 %v7112_v1, %v2012_v33 }
 0x38e   : > { %7139 = vst [vmem:[#allocation120_spill] sm:$0xff] %v5514_v28  ;;  %v2227_v44 = vmul.f32 %v7103_v9, %v2195_v53  ;;  %v2228_v20 = vmul.f32 %v7104_v14, %v2207_v47  ;;  %v2689_v57 = vmul.f32 %v5514_v28, %v5514_v28  ;;  %v1897_v21 = vmul.f32 %v1851_v60, %v1825_v26  ;;  %v7142_v53 = vld [vmem:[#allocation103_spill] sm:$0xff] }
 0x38f   : > { %2542 = vperm.xlu2 %3315, %v820_v40   ;;  %v5520_v55 = vpop.permute.xlu2 %2435  ;;  %2057 = vperm.xlu1 %3311, %v7081_v52   ;;  %v2141_v49 = vpop.permute.xlu1 %2140  ;;  %v5524_v36 = vadd.f32 %v5410_v45, %v2514_v7  ;;  %v5527_v17 = vadd.f32 %v5410_v45, %v2515_v23  ;;  %v2104_v40 = vmul.f32 %v7140_v42, %v2032_v3  ;;  %v7143_v3 = vld [vmem:[#allocation24_spill] sm:$0xff] }
 0x390   : > { %v1875_v35 = vpop.permute.xlu0 %1874  ;;  %v2688_v45 = vmul.f32 %v5510_v13, %v5510_v13  ;;  %v2105_v16 = vmul.f32 %v7140_v42, %v2033_v18  ;;  %v1605_v39 = vadd.f32 %v1581_v58, %v1410_v2  ;;  %v1726_v59 = vadd.f32 %v1702_v12, %v1604_v11 }
 0x391   : > { %v1909_v50 = vmul.f32 %v1875_v35, %v1837_v6  ;;  %v1910_v63 = vmul.f32 %v1875_v35, %v1838_v5  ;;  %v1898_v7 = vmul.f32 %v1851_v60, %v1826_v31  ;;  %v7141_v6 = vld [vmem:[#allocation191_spill] sm:$0xff]  ;;  %v2020_v47 = vmul.f32 %v7111_v22, %v7142_v53 }
 0x392   : > { %v2299_v5 = vmul.f32 %v7141_v6, %v2227_v44  ;;  %v2300_v23 = vmul.f32 %v7141_v6, %v2228_v20  ;;  %v1727_v15 = vadd.f32 %v1703_v43, %v1605_v39  ;;  %v2021_v35 = vmul.f32 %v7112_v1, %v7143_v3  ;;  %v7147_v6 = vld [vmem:[#allocation52_spill] sm:$0xff] }
 0x393   : > { %v1933_v41 = vadd.f32 %v1909_v50, %v1738_v48  ;;  %v1934_v46 = vadd.f32 %v1910_v63, %v1739_v29  ;;  %v2697_v18 = vadd.f32 %v2689_v57, %v2688_v45  ;;  %v1921_v26 = vadd.f32 %v1897_v21, %v1726_v59  ;;  %v821_v50 = vld [vmem:[%s6562_s6 + $0x18] sm:$0xff]  ;;  %v7144_v45 = vld [vmem:[#allocation71_spill] sm:$0xff]  ;;  %v7145_v57 = vld [vmem:[#allocation68_spill] sm:$0xff] }
 0x394   : > { %v1922_v12 = vadd.f32 %v1898_v7, %v1727_v15  ;;  %v1107_v21 = vsel %vm1091_vm10, %v7144_v45, %v7145_v57  ;;  %v7146_v7 = vld [vmem:[#allocation55_spill] sm:$0xff] }
 0x395   : > { %v2128_v33 = vadd.f32 %v2104_v40, %v1933_v41  ;;  %v2129_v61 = vadd.f32 %v2105_v16, %v1934_v46  ;;  %v2201_v40 = vsel %vm2188_vm14, %v5350_v56, %v2141_v49  ;;  %v1095_v16 = vsel %vm1091_vm10, %v7145_v57, %v7144_v45  ;;  %v7150_v15 = vld [vmem:[#allocation59_spill] sm:$0xff] }
 0x396   : > { %v2216_v46 = vmul.f32 %v7104_v14, %v2201_v40  ;;  %v1124_v3 = vmul.f32 %v4771_v37, %v1107_v21  ;;  %v7155_v57 = vld [vmem:[#allocation51_spill] sm:$0xff] }
 0x397   : > { %3316 = vset.pattern.permute.xlu2 %v6955_v38  ;;  %v5548_v2 = vpop.permute.xlu2 %1971  ;;  %2365 = vrot.lane.b32.xlu1 %v7116_v0, %s3423_s25  ;;  %v2046_v60 = vpop.permute.xlu1 %2045  ;;  %v5552_v58 = vadd.f32 %v2299_v5, %v2128_v33  ;;  %v5554_v11 = vadd.f32 %v2300_v23, %v2129_v61  ;;  %v7149_v61 = vld [vmem:[#allocation64_spill] sm:$0xff]  ;;  %v1637_v38 = vmul.f32 %v7089_v32, %v7116_v0  ;;  %v7171_v0 = vld [vmem:[#allocation123_spill] sm:$0xff] }
 0x398   : > { %v2092_v43 = vmul.f32 %v2046_v60, %v2020_v47  ;;  %v2093_v48 = vmul.f32 %v2046_v60, %v2021_v35  ;;  %v5556_v29 = vpop.permute.xlu0 %2166  ;;  %2252 = vperm.xlu2 %3316, %v7081_v52   ;;  %3317 = vset.pattern.permute.xlu1 %v7099_v10  ;;  %v2189_v52 = vsel %vm2188_vm14, %v2141_v49, %v5350_v56 }
 0x399   : > { %2698 = vadd.xlane.f32.xlu0 %v2697_v18  ;;  %v2215_v41 = vmul.f32 %v7103_v9, %v2189_v52  ;;  %v886_v56 = vsel %vm884_vm12, %v7147_v6, %v7146_v7  ;;  %v898_v49 = vsel %vm884_vm12, %v7146_v7, %v7147_v6  ;;  %v888_v53 = vsel %vm884_vm12, %v7150_v15, %v7149_v61  ;;  %v7151_v18 = vld [vmem:[#allocation73_spill] sm:$0xff]  ;;  %v7154_v52 = vld [vmem:[#allocation58_spill] sm:$0xff] }
 0x39a   : > { %v2116_v31 = vadd.f32 %v2092_v43, %v1921_v26  ;;  %v2117_v44 = vadd.f32 %v2093_v48, %v1922_v12  ;;  %v900_v47 = vsel %vm884_vm12, %v7149_v61, %v7150_v15  ;;  %v1125_v35 = vmul.f32 %v7093_v25, %v1095_v16  ;;  %v7152_v26 = vld [vmem:[#allocation70_spill] sm:$0xff]  ;;  %v7156_v16 = vld [vmem:[#allocation47_spill] sm:$0xff] }
 0x39b   : > { %v1290_v60 = vsel %vm1286_vm11, %v7152_v26, %v7151_v18  ;;  %v1302_v12 = vsel %vm1286_vm11, %v7151_v18, %v7152_v26  ;;  %v1288_v21 = vsel %vm1286_vm11, %v7156_v16, %v7155_v57  ;;  %v7159_v6 = vld [vmem:[#allocation198_spill] sm:$0xff]  ;;  %v7160_v26 = vld [vmem:[#allocation12_spill] sm:$0xff] }
 0x39f   : > { %v5563_v63 = vpop.permute.xlu2 %2142  ;;  %2547 = vperm.xlu1 %3317, %v821_v50   ;;  %v5565_v20 = vpop.permute.xlu1 %2359  ;;  %v7153_v50 = vld [vmem:[#allocation63_spill] sm:$0xff] }
 0x3a0   : > { %v5567_v42 = vpop.permute.xlu0 %2337  ;;  %3318 = vset.pattern.permute.xlu2 %v7099_v10  ;;  %v1093_v40 = vsel %vm1091_vm10, %v7154_v52, %v7153_v50  ;;  %v1105_v45 = vsel %vm1091_vm10, %v7153_v50, %v7154_v52  ;;  %v1196_v50 = vmul.f32 %v7160_v26, %v1124_v3  ;;  %v1197_v52 = vmul.f32 %v7160_v26, %v1125_v35 }
 0x3a1   : > { %v1120_v15 = vmul.f32 %v4771_v37, %v1105_v45  ;;  %v1121_v18 = vmul.f32 %v7093_v25, %v1093_v40 }
 0x3a7   : > { %v2241_v39 = vpop.permute.xlu1 %2240  ;;  %v5586_v59 = vpop.permute.xlu2 %2532 }
 0x3a8   : > { %v2287_v5 = vmul.f32 %v2241_v39, %v2215_v41  ;;  %v2288_v23 = vmul.f32 %v2241_v39, %v2216_v46  ;;  %v5596_v33 = vpop.permute.xlu0 %2168  ;;  %v7157_v41 = vld [vmem:[#allocation197_spill] sm:$0xff]  ;;  %v7158_v39 = vld [vmem:[#allocation195_spill] sm:$0xff] }
 0x3a9   : > { %7148 = vst [vmem:[#allocation193_spill] sm:$0xff] %v5596_v33  ;;  %v918_v46 = vmul.f32 %v7157_v41, %v888_v53  ;;  %v1319_v7 = vmul.f32 %v7158_v39, %v1302_v12  ;;  %v914_v61 = vmul.f32 %v7157_v41, %v886_v56  ;;  %v1636_v53 = vmul.f32 %v7091_v4, %v7070_v54  ;;  %v7161_v12 = vld [vmem:[#allocation10_spill] sm:$0xff]  ;;  %v7165_v54 = vld [vmem:[#allocation33_spill] sm:$0xff] }
 0x3aa   : > { %v5616_v43 = vadd.f32 %v2287_v5, %v2116_v31  ;;  %v5618_v48 = vadd.f32 %v2288_v23, %v2117_v44  ;;  %v1300_v31 = vsel %vm1286_vm11, %v7155_v57, %v7156_v16  ;;  %v917_v44 = vmul.f32 %v4782_v8, %v900_v47  ;;  %v7163_v16 = vld [vmem:[#allocation109_spill] sm:$0xff] }
 0x3ab   : > { %v1320_v5 = vmul.f32 %v7159_v6, %v1290_v60  ;;  %v913_v23 = vmul.f32 %v4782_v8, %v898_v49  ;;  %v1315_v47 = vmul.f32 %v7158_v39, %v1300_v31  ;;  %v1632_v60 = vmul.f32 %v7091_v4, %v7161_v12  ;;  %v7162_v49 = vld [vmem:[#allocation3_spill] sm:$0xff]  ;;  %v7174_v4 = vld [vmem:[#allocation138_spill] sm:$0xff] }
 0x3ac   : > { %v1001_v56 = vmul.f32 %v7162_v49, %v917_v44  ;;  %v1002_v45 = vmul.f32 %v7162_v49, %v918_v46  ;;  %v998_v3 = vmul.f32 %v7163_v16, %v914_v61  ;;  %v1316_v31 = vmul.f32 %v7159_v6, %v1288_v21  ;;  %v7166_v46 = vld [vmem:[#allocation21_spill] sm:$0xff]  ;;  %v7167_v61 = vld [vmem:[#allocation111_spill] sm:$0xff] }
 0x3ad   : > { %v997_v40 = vmul.f32 %v7163_v16, %v913_v23  ;;  %v1391_v26 = vmul.f32 %v7165_v54, %v1319_v7  ;;  %v1392_v12 = vmul.f32 %v7165_v54, %v1320_v5  ;;  %v1192_v49 = vmul.f32 %v7166_v46, %v1120_v15  ;;  %v7168_v16 = vld [vmem:[#allocation49_spill] sm:$0xff]  ;;  %v7169_v7 = vld [vmem:[#allocation122_spill] sm:$0xff]  ;;  %v7170_v5 = vld [vmem:[#allocation135_spill] sm:$0xff] }
 0x3ae   : > { %v1220_v44 = vadd.f32 %v1196_v50, %v1001_v56  ;;  %v1221_v28 = vadd.f32 %v1197_v52, %v1002_v45  ;;  %v1193_v23 = vmul.f32 %v7166_v46, %v1121_v18  ;;  %v1483_v13 = vsel %vm1481_vm8, %v7168_v16, %v7167_v61  ;;  %v7172_v52 = vld [vmem:[#allocation30_spill] sm:$0xff]  ;;  %v7173_v56 = vld [vmem:[#allocation11_spill] sm:$0xff] }
 0x3af   : > { %v5651_v57 = vpop.permute.xlu1 %1947  ;;  %v1495_v21 = vsel %vm1481_vm8, %v7167_v61, %v7168_v16  ;;  %v1586_v54 = vmul.f32 %v7170_v5, %v7169_v7  ;;  %v1587_v50 = vmul.f32 %v7170_v5, %v7171_v0  ;;  %v1387_v15 = vmul.f32 %v7172_v52, %v1315_v47  ;;  %v7175_v16 = vld [vmem:[#allocation56_spill] sm:$0xff]  ;;  %v7176_v7 = vld [vmem:[#allocation53_spill] sm:$0xff] }
 0x3b0   : > { %v5657_v10 = vpop.permute.xlu0 %2339  ;;  %v5659_v35 = vpop.permute.xlu2 %2244  ;;  %v1633_v18 = vmul.f32 %v7089_v32, %v7173_v56  ;;  %v1216_v45 = vadd.f32 %v1192_v49, %v997_v40  ;;  %v1217_v46 = vadd.f32 %v1193_v23, %v998_v3  ;;  %v1416_v33 = vadd.f32 %v1392_v12, %v1221_v28  ;;  %v7183_v32 = vld [vmem:[#allocation163_spill] sm:$0xff] }
 0x3b1   : > { %7164 = vst [vmem:[#allocation147_spill] sm:$0xff] %v5657_v10  ;;  %v1415_v10 = vadd.f32 %v1391_v26, %v1220_v44  ;;  %v1708_v6 = vmul.f32 %v7174_v4, %v1636_v53  ;;  %v1709_v39 = vmul.f32 %v7174_v4, %v1637_v38  ;;  %v1388_v61 = vmul.f32 %v7172_v52, %v1316_v31  ;;  %v7178_v53 = vld [vmem:[#allocation57_spill] sm:$0xff]  ;;  %v7179_v38 = vld [vmem:[#allocation54_spill] sm:$0xff] }
 0x3b2   : > { %v5690_v5 = vsel %vm1286_vm11, %v7176_v7, %v7175_v16  ;;  %v1510_v47 = vmul.f32 %v7122_v24, %v1495_v21  ;;  %v1511_v0 = vmul.f32 %v7123_v19, %v1483_v13  ;;  %v5698_v28 = vsel %vm1286_vm11, %v7175_v16, %v7176_v7  ;;  %v7180_v26 = vld [vmem:[#allocation121_spill] sm:$0xff]  ;;  %v7181_v52 = vld [vmem:[#allocation158_spill] sm:$0xff]  ;;  %v7182_v16 = vld [vmem:[#allocation159_spill] sm:$0xff] }
 0x3b3   : > { %7177 = vst [vmem:[#allocation171_spill] sm:$0xff] %v5690_v5  ;;  %v5704_v4 = vsel %vm884_vm12, %v7179_v38, %v7178_v53  ;;  %v1610_v40 = vadd.f32 %v1586_v54, %v1415_v10  ;;  %v1611_v3 = vadd.f32 %v1587_v50, %v1416_v33  ;;  %v1411_v19 = vadd.f32 %v1387_v15, %v1216_v45  ;;  %v7184_v5 = vld [vmem:[#allocation152_spill] sm:$0xff]  ;;  %v7185_v54 = vld [vmem:[#allocation107_spill] sm:$0xff]  ;;  %v7187_v45 = vld [vmem:[#allocation114_spill] sm:$0xff] }
 0x3b4   : > { %v1582_v12 = vmul.f32 %v7180_v26, %v1510_v47  ;;  %v1583_v24 = vmul.f32 %v7180_v26, %v1511_v0  ;;  %v1412_v13 = vadd.f32 %v1388_v61, %v1217_v46  ;;  %v1800_v10 = vsel %vm1798_vm9, %v7184_v5, %v7183_v32  ;;  %v7186_v50 = vld [vmem:[#allocation27_spill] sm:$0xff]  ;;  %v7190_v26 = vld [vmem:[#allocation62_spill] sm:$0xff] }
 0x3b5   : > { %v1732_v23 = vadd.f32 %v1708_v6, %v1610_v40  ;;  %v1733_v21 = vadd.f32 %v1709_v39, %v1611_v3  ;;  %v1812_v33 = vsel %vm1798_vm9, %v7183_v32, %v7184_v5  ;;  %v2384_v6 = vsel %vm2383_vm15, %v7185_v54, %v5565_v20  ;;  %v7188_v32 = vld [vmem:[#allocation181_spill] sm:$0xff]  ;;  %v7189_v5 = vld [vmem:[#allocation186_spill] sm:$0xff] }
 0x3b6   : > { %v2396_v39 = vsel %vm2383_vm15, %v5565_v20, %v7185_v54  ;;  %v2692_v15 = vmul.f32 %v7186_v50, %v7186_v50  ;;  %v2693_v46 = vmul.f32 %v7187_v45, %v7187_v45  ;;  %v2390_v0 = vsel %vm2383_vm15, %v7189_v5, %v7188_v32 }
 0x3b7   : > { %v1855_v31 = vpop.permute.xlu1 %1854  ;;  %v2402_v20 = vsel %vm2383_vm15, %v7188_v32, %v7189_v5  ;;  %v1606_v40 = vadd.f32 %v1582_v12, %v1411_v19  ;;  %v1607_v3 = vadd.f32 %v1583_v24, %v1412_v13  ;;  %v1995_v54 = vsel %vm1993_vm13, %v5651_v57, %v5548_v2 }
 0x3b8   : > { %v1863_v44 = vpop.permute.xlu0 %1862  ;;  %v5708_v49 = vpop.permute.xlu2 %1973  ;;  %v2007_v12 = vsel %vm1993_vm13, %v5548_v2, %v5651_v57  ;;  %v1827_v24 = vmul.f32 %v4552_v34, %v1800_v10  ;;  %v2422_v19 = vmul.f32 %v5209_v51, %v2390_v0  ;;  %v2423_v13 = vmul.f32 %v5218_v27, %v2402_v20 }
 0x3b9   : > { %v1903_v56 = vmul.f32 %v1863_v44, %v7181_v52  ;;  %v1904_v7 = vmul.f32 %v1863_v44, %v7182_v16  ;;  %v7191_v44 = vld [vmem:[#allocation67_spill] sm:$0xff]  ;;  %v7192_v52 = vld [vmem:[#allocation140_spill] sm:$0xff]  ;;  %v2411_v16 = vmul.f32 %v5218_v27, %v2396_v39  ;;  %v2687_v2 = vmul.f32 %v5527_v17, %v5527_v17 }
 0x3ba   : > { %v2022_v57 = vmul.f32 %v7111_v22, %v1995_v54  ;;  %v2023_v10 = vmul.f32 %v7112_v1, %v2007_v12  ;;  %v899_v54 = vsel %vm884_vm12, %v7178_v53, %v7179_v38 }
 0x3bb   : > { %v5732_v61 = vadd.f32 %v1903_v56, %v1732_v23  ;;  %v5734_v47 = vadd.f32 %v1904_v7, %v1733_v21  ;;  %v1106_v23 = vsel %vm1091_vm10, %v7191_v44, %v7190_v26  ;;  %v1704_v21 = vmul.f32 %v7192_v52, %v1632_v60 }
 0x3bc   : > { %v2410_v56 = vmul.f32 %v5209_v51, %v2384_v6  ;;  %v1705_v7 = vmul.f32 %v7192_v52, %v1633_v18  ;;  %v1828_v60 = vmul.f32 %v4555_v62, %v1812_v33  ;;  %v2703_v6 = vadd.f32 %v2693_v46, %v2692_v15 }
 0x3bd   : > { %v1728_v18 = vadd.f32 %v1704_v21, %v1606_v40  ;;  %v2686_v52 = vmul.f32 %v5524_v36, %v5524_v36  ;;  %v2483_v62 = vmul.f32 %v5520_v55, %v2411_v16  ;;  %v1899_v15 = vmul.f32 %v1855_v31, %v1827_v24  ;;  %v7193_v24 = vld [vmem:[#allocation113_spill] sm:$0xff] }
 0x3be   : > { %v1729_v39 = vadd.f32 %v1705_v7, %v1607_v3  ;;  %v2482_v34 = vmul.f32 %v5520_v55, %v2410_v56  ;;  %v1900_v46 = vmul.f32 %v1855_v31, %v1828_v60  ;;  %v2190_v40 = vsel %vm2188_vm14, %v5563_v63, %v5556_v29 }
 0x3bf   : > { %v2202_v55 = vsel %vm2188_vm14, %v5556_v29, %v5563_v63  ;;  %v2507_v3 = vadd.f32 %v2483_v62, %v5618_v48  ;;  %v1094_v29 = vsel %vm1091_vm10, %v7190_v26, %v7191_v44  ;;  %v1122_v63 = vmul.f32 %v4771_v37, %v1106_v23 }
 0x3c0   : > { %v5764_v32 = vpop.permute.xlu2 %2144  ;;  %v2050_v5 = vpop.permute.xlu1 %2049  ;;  %v2506_v21 = vadd.f32 %v2482_v34, %v5616_v43  ;;  %v2694_v48 = vadd.f32 %v2687_v2, %v2686_v52  ;;  %v1923_v43 = vadd.f32 %v1899_v15, %v1728_v18  ;;  %v1924_v12 = vadd.f32 %v1900_v46, %v1729_v39 }
 0x3c1   : > { %v2460_v33 = vpop.permute.xlu0 %2459  ;;  %2704 = vadd.xlane.f32.xlu2 %v2703_v6  ;;  %v2094_v56 = vmul.f32 %v2050_v5, %v2022_v57  ;;  %v2095_v16 = vmul.f32 %v2050_v5, %v2023_v10  ;;  %v2218_v53 = vmul.f32 %v7104_v14, %v2202_v55  ;;  %v5807_v26 = vadd.f32 %v5586_v59, %v2507_v3  ;;  %v7194_v55 = vld [vmem:[#allocation18_spill] sm:$0xff] }
 0x3c2   : > { %v2494_v0 = vmul.f32 %v2460_v33, %v2422_v19  ;;  %v2495_v20 = vmul.f32 %v2460_v33, %v2423_v13  ;;  %v5804_v38 = vadd.f32 %v5586_v59, %v2506_v21  ;;  %v1123_v18 = vmul.f32 %v7093_v25, %v1094_v29 }
 0x3c3   : > { %v2118_v44 = vadd.f32 %v2094_v56, %v1923_v43  ;;  %v2119_v23 = vadd.f32 %v2095_v16, %v1924_v12  ;;  %v2290_v2 = vmul.f32 %v5659_v35, %v2218_v53  ;;  %v915_v10 = vmul.f32 %v4782_v8, %v899_v54  ;;  %v7195_v56 = vld [vmem:[#allocation195_spill] sm:$0xff]  ;;  %v7197_v54 = vld [vmem:[#allocation198_spill] sm:$0xff] }
 0x3c4   : > { %v2518_v31 = vadd.f32 %v2494_v0, %v5552_v58  ;;  %v2519_v7 = vadd.f32 %v2495_v20, %v5554_v11  ;;  %v2217_v11 = vmul.f32 %v7103_v9, %v2190_v40  ;;  %v916_v33 = vmul.f32 %v7157_v41, %v5704_v4 }
 0x3c5   : > { %v2614_v15 = vmul.f32 %v5804_v38, %v5804_v38  ;;  %v2314_v40 = vadd.f32 %v2290_v2, %v2119_v23  ;;  %v1194_v3 = vmul.f32 %v7194_v55, %v1122_v63  ;;  %v1195_v21 = vmul.f32 %v7194_v55, %v1123_v18  ;;  %v7202_v18 = vld [vmem:[#allocation190_spill] sm:$0xff] }
 0x3c6   : > { %v5796_v60 = vadd.f32 %v7193_v24, %v2518_v31  ;;  %v5799_v58 = vadd.f32 %v7193_v24, %v2519_v7  ;;  %v2289_v39 = vmul.f32 %v5659_v35, %v2217_v11  ;;  %v1317_v16 = vmul.f32 %v7195_v56, %v5698_v28  ;;  %v7196_v7 = vld [vmem:[#allocation171_spill] sm:$0xff]  ;;  %v7200_v28 = vld [vmem:[#allocation188_spill] sm:$0xff]  ;;  %v7203_v2 = vld [vmem:[#allocation22_spill] sm:$0xff] }
 0x3c7   : > { %v1318_v29 = vmul.f32 %v7197_v54, %v7196_v7  ;;  %v7208_v7 = vld [vmem:[#allocation155_spill] sm:$0xff] }
 0x3c8   : > { %v2362_v19 = vpop.permute.xlu1 %2361  ;;  %v2690_v13 = vmul.f32 %v5796_v60, %v5796_v60  ;;  %v2691_v6 = vmul.f32 %v5799_v58, %v5799_v58  ;;  %v2538_v52 = vpop.permute.xlu2 %2537  ;;  %v2313_v35 = vadd.f32 %v2289_v39, %v2118_v44 }
 0x3c9   : > { %v2385_v5 = vsel %vm2383_vm15, %v5567_v42, %v2362_v19  ;;  %v2397_v59 = vsel %vm2383_vm15, %v2362_v19, %v5567_v42  ;;  %2695 = vadd.xlane.f32.xlu2 %v2694_v48  ;;  %v2615_v42 = vmul.f32 %v5807_v26, %v5807_v26  ;;  %v2440_v46 = vpop.permute.xlu0 %2439  ;;  %v7198_v48 = vld [vmem:[#allocation6_spill] sm:$0xff] }
 0x3ca   : > { %v2412_v34 = vmul.f32 %v5209_v51, %v2385_v5  ;;  %v2413_v62 = vmul.f32 %v5218_v27, %v2397_v59  ;;  %v2700_v57 = vadd.f32 %v2691_v6, %v2690_v13  ;;  %v999_v43 = vmul.f32 %v7198_v48, %v915_v10  ;;  %v7199_v19 = vld [vmem:[#allocation14_spill] sm:$0xff]  ;;  %v7201_v6 = vld [vmem:[#allocation16_spill] sm:$0xff] }
 0x3cb   : > { %v1000_v12 = vmul.f32 %v7198_v48, %v916_v33  ;;  %v2622_v24 = vadd.f32 %v2615_v42, %v2614_v15  ;;  %v1634_v13 = vmul.f32 %v7200_v28, %v7199_v19  ;;  %v1635_v39 = vmul.f32 %v7202_v18, %v7201_v6  ;;  %v7206_v33 = vld [vmem:[#allocation119_spill] sm:$0xff]  ;;  %v7209_v48 = vld [vmem:[#allocation156_spill] sm:$0xff] }
 0x3cc   : > { %v2484_v0 = vmul.f32 %v2440_v46, %v2412_v34  ;;  %v2485_v20 = vmul.f32 %v2440_v46, %v2413_v62  ;;  %2701 = vadd.xlane.f32.xlu1 %v2700_v57  ;;  %v1218_v44 = vadd.f32 %v1194_v3, %v999_v43  ;;  %v1389_v34 = vmul.f32 %v7203_v2, %v1317_v16  ;;  %v7204_v62 = vld [vmem:[#allocation118_spill] sm:$0xff]  ;;  %v7205_v57 = vld [vmem:[#allocation133_spill] sm:$0xff] }
 0x3cd   : > { %v1219_v23 = vadd.f32 %v1195_v21, %v1000_v12  ;;  %v1584_v10 = vmul.f32 %v7205_v57, %v7204_v62  ;;  %v1585_v15 = vmul.f32 %v7205_v57, %v7206_v33 }
 0x3ce   : > { %v2508_v4 = vadd.f32 %v2484_v0, %v2313_v35  ;;  %v2509_v31 = vadd.f32 %v2485_v20, %v2314_v40  ;;  %v1413_v0 = vadd.f32 %v1389_v34, %v1218_v44  ;;  %v7207_v35 = vld [vmem:[#allocation144_spill] sm:$0xff] }
 0x3cf   : > { %v1706_v40 = vmul.f32 %v7207_v35, %v1634_v13  ;;  %v1707_v55 = vmul.f32 %v7207_v35, %v1635_v39 }
 0x3d0   : > { %v5839_v11 = vadd.f32 %v2538_v52, %v2508_v4  ;;  %v5841_v53 = vadd.f32 %v2538_v52, %v2509_v31  ;;  %v1950_v63 = vpop.permute.xlu1 %1949  ;;  %v1390_v52 = vmul.f32 %v7203_v2, %v1318_v29  ;;  %v1608_v3 = vadd.f32 %v1584_v10, %v1413_v0  ;;  %v7210_v2 = vld [vmem:[#allocation193_spill] sm:$0xff] }
 0x3d1   : > { %2623 = vadd.xlane.f32.xlu2 %v2622_v24  ;;  %v2249_v42 = vpop.permute.xlu2 %2248  ;;  %v1996_v44 = vsel %vm1993_vm13, %v1950_v63, %v5708_v49  ;;  %v2191_v34 = vsel %vm2188_vm14, %v5764_v32, %v7210_v2 }
 0x3d2   : > { %v2616_v5 = vmul.f32 %v5839_v11, %v5839_v11  ;;  %v2617_v59 = vmul.f32 %v5841_v53, %v5841_v53  ;;  %v1414_v20 = vadd.f32 %v1390_v52, %v1219_v23  ;;  %v1730_v4 = vadd.f32 %v1706_v40, %v1608_v3  ;;  %v2444_v3 = vpop.permute.xlu0 %2443 }
 0x3d3   : > { %v2008_v23 = vsel %vm1993_vm13, %v5708_v49, %v1950_v63  ;;  %v2024_v6 = vmul.f32 %v7111_v22, %v1996_v44  ;;  %v2203_v52 = vsel %vm2188_vm14, %v7210_v2, %v5764_v32  ;;  %v2219_v49 = vmul.f32 %v7103_v9, %v2191_v34 }
 0x3d4   : > { %v2625_v46 = vadd.f32 %v2617_v59, %v2616_v5  ;;  %v1609_v21 = vadd.f32 %v1585_v15, %v1414_v20  ;;  %v2025_v39 = vmul.f32 %v7112_v1, %v2008_v23  ;;  %v2220_v63 = vmul.f32 %v7104_v14, %v2203_v52  ;;  %v7211_v15 = vld [vmem:[#allocation147_spill] sm:$0xff] }
 0x3d5   : > { %v2291_v20 = vmul.f32 %v2249_v42, %v2219_v49 }
 0x3d6   : > { %2626 = vadd.xlane.f32.xlu1 %v2625_v46  ;;  %v1731_v31 = vadd.f32 %v1707_v55, %v1609_v21  ;;  %v2292_v35 = vmul.f32 %v2249_v42, %v2220_v63  ;;  %v2816_v55 = vld [vmem:[%s6563_s7] sm:$0xff] }
 0x3d8   : > { %v1859_v16 = vpop.permute.xlu1 %1858 }
 0x3d9   : > { %v1901_v29 = vmul.f32 %v1859_v16, %v7208_v7  ;;  %v1902_v43 = vmul.f32 %v1859_v16, %v7209_v48  ;;  %v1976_v19 = vpop.permute.xlu2 %1975 }
 0x3db   : > { %v1925_v12 = vadd.f32 %v1901_v29, %v1730_v4  ;;  %v1926_v24 = vadd.f32 %v1902_v43, %v1731_v31 }
 0x3e1   : > { %v2054_v13 = vpop.permute.xlu1 %2053  ;;  %v2171_v62 = vpop.permute.xlu2 %2170 }
 0x3e2   : > { %v2096_v5 = vmul.f32 %v2054_v13, %v2024_v6  ;;  %v2097_v59 = vmul.f32 %v2054_v13, %v2025_v39  ;;  %v7212_v13 = vmov 5  }
 0x3e4   : > { %v2120_v57 = vadd.f32 %v2096_v5, %v1925_v12  ;;  %v2121_v10 = vadd.f32 %v2097_v59, %v1926_v24  ;;  %v2819_v24 = vld [vmem:[%s6563_s7 + $0x18] sm:$0xff]  ;;  %v2342_v59 = vpop.permute.xlu0 %2341 }
 0x3e6   : > { %v2315_v4 = vadd.f32 %v2291_v20, %v2120_v57  ;;  %v2316_v31 = vadd.f32 %v2292_v35, %v2121_v10 }
 0x3e9   : > { %v2364_v33 = vpop.permute.xlu1 %2363  ;;  %v2543_v7 = vpop.permute.xlu2 %2542 }
 0x3ea   : > { %v2386_v46 = vsel %vm2383_vm15, %v7211_v15, %v2364_v33  ;;  %v2398_v0 = vsel %vm2383_vm15, %v2364_v33, %v7211_v15 }
 0x3eb   : > { %v2414_v32 = vmul.f32 %v5209_v51, %v2386_v46  ;;  %v2415_v40 = vmul.f32 %v5218_v27, %v2398_v0 }
 0x3ed   : > { %v2486_v21 = vmul.f32 %v2444_v3, %v2414_v32  ;;  %v2487_v16 = vmul.f32 %v2444_v3, %v2415_v40  ;;  %v5923_v40 = vld [vmem:[%s6567_s11 + $0x10] ss:$0 sm:$0xff]  ;;  %v2448_v3 = vpop.permute.xlu0 %2447 }
 0x3ef   : > { %2822 = vperm.xlu1 %3317, %v2816_v55   ;;  %v2510_v29 = vadd.f32 %v2486_v21, %v2315_v4  ;;  %v2511_v48 = vadd.f32 %v2487_v16, %v2316_v31 }
 0x3f1   : > { %v5890_v43 = vadd.f32 %v2543_v7, %v2510_v29  ;;  %v5892_v42 = vadd.f32 %v2543_v7, %v2511_v48  ;;  %v1952_v51 = vpop.permute.xlu1 %1951 }
 0x3f2   : > { %v1997_v6 = vsel %vm1993_vm13, %v1952_v51, %v1976_v19  ;;  %v2009_v39 = vsel %vm1993_vm13, %v1976_v19, %v1952_v51  ;;  %v2253_v15 = vpop.permute.xlu2 %2252 }
 0x3f3   : > { %v2618_v27 = vmul.f32 %v5890_v43, %v5890_v43  ;;  %v2619_v12 = vmul.f32 %v5892_v42, %v5892_v42  ;;  %v2026_v2 = vmul.f32 %v7111_v22, %v1997_v6  ;;  %v2027_v34 = vmul.f32 %v7112_v1, %v2009_v39 }
 0x3f5   : > { %v2628_v44 = vadd.f32 %v2619_v12, %v2618_v27 }
 0x3f7   : > { %2837 = vperm.xlu1 %3317, %v2819_v24   ;;  %2629 = vadd.xlane.f32.xlu2 %v2628_v44 }
 0x3f9   : > { %v2147_v23 = vpop.permute.xlu1 %2146 }
 0x3fa   : > { %v2192_v52 = vsel %vm2188_vm14, %v2147_v23, %v2171_v62  ;;  %v2204_v49 = vsel %vm2188_vm14, %v2171_v62, %v2147_v23 }
 0x3fb   : > { %v2221_v10 = vmul.f32 %v7103_v9, %v2192_v52  ;;  %v2222_v33 = vmul.f32 %v7104_v14, %v2204_v49 }
 0x3fd   : > { %v2293_v32 = vmul.f32 %v2253_v15, %v2221_v10  ;;  %v2294_v62 = vmul.f32 %v2253_v15, %v2222_v33 }
 0x3ff   : > { %3320 = vset.pattern.permute.xlu1 %v7212_v13 }
 0x401   : > { %v2058_v5 = vpop.permute.xlu1 %2057 }
 0x402   : > { %v2098_v63 = vmul.f32 %v2058_v5, %v2026_v2  ;;  %v2099_v57 = vmul.f32 %v2058_v5, %v2027_v34 }
 0x404   : > { %v2122_v19 = vadd.f32 %v2098_v63, %v5732_v61  ;;  %v2123_v46 = vadd.f32 %v2099_v57, %v5734_v47  ;;  %v5929_v61 = vld [vmem:[%s6567_s11 + $0x18] ss:$0 sm:$0xff] }
 0x406   : > { %v2317_v4 = vadd.f32 %v2293_v32, %v2122_v19  ;;  %v2318_v31 = vadd.f32 %v2294_v62, %v2123_v46 }
 0x409   : > { %v2366_v0 = vpop.permute.xlu1 %2365 }
 0x40a   : > { %v2387_v20 = vsel %vm2383_vm15, %v2342_v59, %v2366_v0  ;;  %v2399_v35 = vsel %vm2383_vm15, %v2366_v0, %v2342_v59 }
 0x40b   : > { %v2416_v55 = vmul.f32 %v5923_v40, %v2387_v20  ;;  %v2417_v47 = vmul.f32 %v5929_v61, %v2399_v35 }
 0x40c   : > { %v2699_v23 = vpop.xlane.xlu0 %2698 }
 0x40d   : > { %v2488_v21 = vmul.f32 %v2448_v3, %v2416_v55  ;;  %v2489_v16 = vmul.f32 %v2448_v3, %v2417_v47  ;;  %v2707_v6 = vmax.f32 %v2699_v23, 1e-24 }
 0x40f   : > { %v2512_v7 = vadd.f32 %v2488_v21, %v2317_v4  ;;  %v2513_v29 = vadd.f32 %v2489_v16, %v2318_v31  ;;  %3342 = vrsqrt.f32 %v2707_v6  ;;  %vm2726_vm6 = vweird.f32 %v2707_v6 }
 0x411   : > { %v2548_v48 = vpop.permute.xlu1 %2547 }
 0x412   : > { %v5932_v51 = vadd.f32 %v2548_v48, %v2512_v7  ;;  %v5934_v27 = vadd.f32 %v2548_v48, %v2513_v29 }
 0x414   : > { %v2620_v12 = vmul.f32 %v5932_v51, %v5932_v51  ;;  %v2621_v24 = vmul.f32 %v5934_v27, %v5934_v27 }
 0x415   : > { %v3343_v59 = vpop.eup %3342 }
 0x416   : > { %v2631_v44 = vadd.f32 %v2621_v24, %v2620_v12  ;;  %v2721_v57 = vmul.f32 %v3343_v59, %v2707_v6  ;;  %vm2727_vm4 = vweird.f32 %v3343_v59 }
 0x417   : > { %vm2728_vm9 = vmor %vm2726_vm6, %vm2727_vm4 }
 0x418   : > { %2632 = vadd.xlane.f32.xlu0 %v2631_v44  ;;  %v2722_v19 = vmul.f32 %v3343_v59, %v2721_v57 }
 0x41a   : > { %v2723_v47 = vmul.f32 0.5, %v2722_v19 }
 0x41c   : > { %v2724_v12 = vsub.f32 1.5, %v2723_v47 }
 0x434   : > { %v2705_v39 = vpop.xlane.xlu2 %2704 }
 0x435   : > { %v2709_v5 = vmax.f32 %v2705_v39, 1e-24 }
 0x437   : > { %3344 = vrsqrt.f32 %v2709_v5  ;;  %vm2746_vm1 = vweird.f32 %v2709_v5 }
 0x43c   : > { %v2696_v2 = vpop.xlane.xlu2 %2695 }
 0x43d   : > { %v3345_v34 = vpop.eup %3344  ;;  %v5940_v52 = vmax.f32 %v2696_v2, 1e-24 }
 0x43e   : > { %v2741_v49 = vmul.f32 %v3345_v34, %v2709_v5  ;;  %vm2747_vm0 = vweird.f32 %v3345_v34 }
 0x43f   : > { %3346 = vrsqrt.f32 %v5940_v52  ;;  %v2702_v63 = vpop.xlane.xlu1 %2701  ;;  %vm2748_vm2 = vmor %vm2746_vm1, %vm2747_vm0  ;;  %vm2716_vm1 = vweird.f32 %v5940_v52 }
 0x440   : > { %v2742_v10 = vmul.f32 %v3345_v34, %v2741_v49  ;;  %v2708_v33 = vmax.f32 %v2702_v63, 1e-24 }
 0x442   : > { %v2743_v15 = vmul.f32 0.5, %v2742_v10  ;;  %3348 = vrsqrt.f32 %v2708_v33  ;;  %vm2736_vm5 = vweird.f32 %v2708_v33 }
 0x444   : > { %v2624_v46 = vpop.xlane.xlu2 %2623  ;;  %v2744_v0 = vsub.f32 1.5, %v2743_v15 }
 0x445   : > { %v3347_v20 = vpop.eup %3346  ;;  %v2634_v35 = vmax.f32 %v2624_v46, 1e-24 }
 0x446   : > { %v2711_v32 = vmul.f32 %v3347_v20, %v5940_v52  ;;  %v2745_v62 = vmul.f32 %v3345_v34, %v2744_v0  ;;  %vm2717_vm0 = vweird.f32 %v3347_v20 }
 0x447   : > { %3350 = vrsqrt.f32 %v2634_v35  ;;  %vm2644_vm4 = vweird.f32 %v2634_v35 }
 0x448   : > { %v3349_v55 = vpop.eup %3348  ;;  %v2749_v3 = vsel %vm2748_vm2, %v3345_v34, %v2745_v62  ;;  %v2712_v21 = vmul.f32 %v3347_v20, %v2711_v32  ;;  %v2725_v34 = vmul.f32 %v3343_v59, %v2724_v12  ;;  %vm2718_vm2 = vmor %vm2716_vm1, %vm2717_vm0 }
 0x449   : > { %v2731_v16 = vmul.f32 %v3349_v55, %v2708_v33  ;;  %v2627_v4 = vpop.xlane.xlu1 %2626  ;;  %v2756_v31 = vmul.f32 %v2749_v3, %v7186_v50  ;;  %v2757_v7 = vmul.f32 %v2749_v3, %v7187_v45  ;;  %vm2737_vm3 = vweird.f32 %v3349_v55  ;;  %v7213_v33 = vld [vmem:[#allocation137_spill] sm:$0xff]  ;;  %v7214_v3 = vld [vmem:[#allocation120_spill] sm:$0xff] }
 0x44a   : > { %v2635_v29 = vmax.f32 %v2627_v4, 1e-24  ;;  %v2713_v44 = vmul.f32 0.5, %v2712_v21  ;;  %vm2738_vm8 = vmor %vm2736_vm5, %vm2737_vm3  ;;  %v2729_v0 = vsel %vm2728_vm9, %v3343_v59, %v2725_v34 }
 0x44b   : > { %v2732_v48 = vmul.f32 %v3349_v55, %v2731_v16  ;;  %2770 = vmatpush.xpose.msra.mxu2 %v2756_v31  ;;  %2799 = vmatpush.xpose.msra.mxu3 %v2757_v7  ;;  %v2752_v6 = vmul.f32 %v2729_v0, %v7213_v33  ;;  %v2753_v21 = vmul.f32 %v2729_v0, %v7214_v3 }
 0x44c   : > { %3352 = vrsqrt.f32 %v2635_v29  ;;  %v2714_v49 = vsub.f32 1.5, %v2713_v44 }
 0x44d   : > { %v3351_v24 = vpop.eup %3350  ;;  %v2733_v23 = vmul.f32 0.5, %v2732_v48 }
 0x44e   : > { %v2639_v39 = vmul.f32 %v3351_v24, %v2634_v35  ;;  %v2715_v62 = vmul.f32 %v3347_v20, %v2714_v49  ;;  %vm2645_vm3 = vweird.f32 %v3351_v24 }
 0x44f   : > { %v2734_v5 = vsub.f32 1.5, %v2733_v23  ;;  %vm2646_vm5 = vmor %vm2644_vm4, %vm2645_vm3  ;;  %v7215_v23 = vmov 6  }
 0x450   : > { %v2640_v2 = vmul.f32 %v3351_v24, %v2639_v39  ;;  %v2719_v16 = vsel %vm2718_vm2, %v3347_v20, %v2715_v62 }
 0x451   : > { %v2735_v50 = vmul.f32 %v3349_v55, %v2734_v5  ;;  %v2751_v59 = vmul.f32 %v2719_v16, %v5527_v17 }
 0x452   : > { %v3353_v63 = vpop.eup %3352  ;;  %v2641_v45 = vmul.f32 0.5, %v2640_v2 }
 0x453   : > { %v2649_v57 = vmul.f32 %v3353_v63, %v2635_v29  ;;  %v2739_v10 = vsel %vm2738_vm8, %v3349_v55, %v2735_v50  ;;  %vm2655_vm6 = vweird.f32 %v3353_v63  ;;  %vm2654_vm8 = vweird.f32 %v2635_v29  ;;  %v2818_v29 = vld [vmem:[%s6563_s7 + $0x10] sm:$0xff] }
 0x454   : > { %v2642_v15 = vsub.f32 1.5, %v2641_v45  ;;  %v2754_v19 = vmul.f32 %v2739_v10, %v5796_v60  ;;  %v2755_v46 = vmul.f32 %v2739_v10, %v5799_v58  ;;  %v2750_v58 = vmul.f32 %v2719_v16, %v5524_v36  ;;  %vm2656_vm9 = vmor %vm2654_vm8, %vm2655_vm6  ;;  %2832 = vperm.xlu0 %3319, %v2818_v29  }
 0x455   : > { %v2650_v32 = vmul.f32 %v3353_v63, %v2649_v57 }
 0x456   : > { %2771 = vmatpush.xpose.msra.mxu2 %v2754_v19  ;;  %2800 = vmatpush.xpose.msra.mxu3 %v2755_v46  ;;  %v2643_v55 = vmul.f32 %v3351_v24, %v2642_v15 }
 0x457   : > { %v2651_v47 = vmul.f32 0.5, %v2650_v32 }
 0x458   : > { %v2647_v4 = vsel %vm2646_vm5, %v3351_v24, %v2643_v55 }
 0x459   : > { %v2652_v60 = vsub.f32 1.5, %v2651_v47  ;;  %v2678_v52 = vmul.f32 %v2647_v4, %v5804_v38  ;;  %v2679_v31 = vmul.f32 %v2647_v4, %v5807_v26  ;;  %v2817_v38 = vld [vmem:[%s6563_s7 + $0x8] sm:$0xff]  ;;  %v5989_v4 = vld [vmem:[%s6564_s8 + $0x10] sm:$0xff] }
 0x45a   : > { %2772 = vmatpush.xpose.msra.mxu2 %v2752_v6  ;;  %2801 = vmatpush.xpose.msra.mxu3 %v2753_v21 }
 0x45b   : > { %v2653_v7 = vmul.f32 %v3353_v63, %v2652_v60  ;;  %2827 = vperm.xlu2 %3318, %v2817_v38   ;;  %v6005_v38 = vld [vmem:[%s6561_s5 + $0x50] sm:$0xff] }
 0x45c   : > { %3323 = vset.pattern.permute.xlu0 %v7215_v23 }
 0x45d   : > { %v2657_v20 = vsel %vm2656_vm9, %v3353_v63, %v2653_v7  ;;  %vm2850_vm9 = vcmp.gt.f32.partialorder %v5989_v4, 0.5 }
 0x45e   : > { %2773 = vmatpush.xpose.msra.mxu2 %v2750_v58  ;;  %2802 = vmatpush.xpose.msra.mxu3 %v2751_v59  ;;  %v2680_v35 = vmul.f32 %v2657_v20, %v5839_v11  ;;  %v2681_v36 = vmul.f32 %v2657_v20, %v5841_v53 }
 0x461   : > { %2774 = vmatmul.f32.vlgmr.msra.gmra.mxu2 %v2678_v52  ;;  %2803 = vmatmul.f32.vlgmr.msra.gmra.mxu3 %v2679_v31  ;;  %v2823_v33 = vpop.permute.xlu1 %2822 }
 0x463   : > { %3321 = vset.pattern.permute.xlu2 %v7215_v23 }
 0x469   : > { %2777 = vmatmul.f32.gmra.mxu2 %v2680_v35  ;;  %2806 = vmatmul.f32.gmra.mxu3 %v2681_v36 }
 0x46a   : > { %v2630_v17 = vpop.xlane.xlu2 %2629 }
 0x46b   : > { %v2636_v48 = vmax.f32 %v2630_v17, 1e-24 }
 0x46d   : > { %3354 = vrsqrt.f32 %v2636_v48  ;;  %vm2664_vm1 = vweird.f32 %v2636_v48 }
 0x473   : > { %v3355_v12 = vpop.eup %3354 }
 0x474   : > { %v2659_v26 = vmul.f32 %v3355_v12, %v2636_v48  ;;  %vm2665_vm0 = vweird.f32 %v3355_v12  ;;  %v7216_v48 = vld [vmem:[#allocation69_spill] sm:$0xff] }
 0x475   : > { %vm2666_vm2 = vmor %vm2664_vm1, %vm2665_vm0 }
 0x476   : > { %v2660_v11 = vmul.f32 %v3355_v12, %v2659_v26  ;;  %v6011_v26 = vld [vmem:[%s6564_s8 + $0x18] sm:$0xff] }
 0x477   : > { %vm2851_vm0 = vcmp.gt.f32.partialorder %v6011_v26, 0.5 }
 0x478   : > { %v2661_v24 = vmul.f32 0.5, %v2660_v11 }
 0x47a   : > { %v2662_v53 = vsub.f32 1.5, %v2661_v24 }
 0x47c   : > { %v2663_v44 = vmul.f32 %v3355_v12, %v2662_v53  ;;  %v2838_v53 = vpop.permute.xlu1 %2837 }
 0x47e   : > { %v2667_v39 = vsel %vm2666_vm2, %v3355_v12, %v2663_v44  ;;  %v7217_v12 = vld [vmem:[#allocation61_spill] sm:$0xff] }
 0x47f   : > { %v2682_v5 = vmul.f32 %v2667_v39, %v5890_v43  ;;  %v2683_v2 = vmul.f32 %v2667_v39, %v5892_v42  ;;  %v5972_v42 = vld [vmem:[%s6564_s8] sm:$0xff] }
 0x480   : > { %vm2848_vm6 = vcmp.gt.f32.partialorder %v5972_v42, 0.5 }
 0x481   : > { %2780 = vmatmul.f32.gmra.mxu2 %v2682_v5  ;;  %2809 = vmatmul.f32.gmra.mxu3 %v2683_v2  ;;  %v7218_v5 = vld [vmem:[#allocation60_spill] sm:$0xff] }
 0x48b   : > { %v2633_v34 = vpop.xlane.xlu0 %2632 }
 0x48c   : > { %v2637_v49 = vmax.f32 %v2633_v34, 1e-24  ;;  %v7219_v34 = vmov 7  }
 0x48e   : > { %3356 = vrsqrt.f32 %v2637_v49  ;;  %vm2674_vm4 = vweird.f32 %v2637_v49 }
 0x494   : > { %v3357_v50 = vpop.eup %3356 }
 0x495   : > { %v2669_v63 = vmul.f32 %v3357_v50, %v2637_v49  ;;  %vm2675_vm3 = vweird.f32 %v3357_v50  ;;  %v7220_v49 = vld [vmem:[#allocation72_spill] sm:$0xff] }
 0x496   : > { %vm2676_vm5 = vmor %vm2674_vm4, %vm2675_vm3 }
 0x497   : > { %v2670_v45 = vmul.f32 %v3357_v50, %v2669_v63  ;;  %v7221_v63 = vld [vmem:[#allocation50_spill] sm:$0xff] }
 0x499   : > { %v2671_v57 = vmul.f32 0.5, %v2670_v45  ;;  %v7222_v45 = vld [vmem:[#allocation66_spill] sm:$0xff] }
 0x49b   : > { %v2672_v10 = vsub.f32 1.5, %v2671_v57  ;;  %v6042_v57 = vld [vmem:[%s6561_s5 + $0x48] sm:$0xff] }
 0x49d   : > { %v2673_v15 = vmul.f32 %v3357_v50, %v2672_v10 }
 0x49f   : > { %v2677_v19 = vsel %vm2676_vm5, %v3357_v50, %v2673_v15  ;;  %v3386_v50 = vld [vmem:[%s6561_s5 + $0x58] sm:$0xff] }
 0x4a0   : > { %v2684_v46 = vmul.f32 %v2677_v19, %v5932_v51  ;;  %v2685_v43 = vmul.f32 %v2677_v19, %v5934_v27  ;;  %v5979_v51 = vld [vmem:[%s6564_s8 + $0x8] sm:$0xff] }
 0x4a1   : > { %vm2849_vm8 = vcmp.gt.f32.partialorder %v5979_v51, 0.5 }
 0x4a2   : > { %2783 = vmatmul.f32.gmra.mxu2 %v2684_v46  ;;  %2812 = vmatmul.f32.gmra.mxu3 %v2685_v43  ;;  %v7223_v46 = vmov 8   ;;  %v7224_v43 = vld [vmem:[#allocation65_spill] sm:$0xff] }
 0x4b5   : > { %v2828_v27 = vpop.permute.xlu2 %2827 }
 0x4c6   : > { %v2833_v52 = vpop.permute.xlu0 %2832 }
 0x4e4   : > { %v2775_v0 = vpop.f32.mrf.mxu2  ;;  %v2804_v32 = vpop.f32.mrf.mxu3 }
 0x4e5   : > { %v2805_v62 = vadd.f32 %v2804_v32, %v2775_v0 }
 0x4e7   : > { %v2840_v6 = vmul.f32 %v2823_v33, %v2805_v62  ;;  %v3388_v33 = vld [vmem:[%s6561_s5 + $0x40] sm:$0xff] }
 0x4e9   : > { %v2852_v47 = vsel %vm2848_vm6, %v2840_v6, -1e+30  ;;  %v7226_v6 = vld [vmem:[#allocation46_spill] sm:$0xff] }
 0x4ea   : > { %v2856_v3 = vsel %vm663_vm7, %v2852_v47, -inf }
 0x4eb   : > { %2857 = vmax.xlane.f32.xlu2 %v2856_v3 }
 0x4ec   : > { %v2778_v21 = vpop.f32.mrf.mxu2  ;;  %v2807_v55 = vpop.f32.mrf.mxu3 }
 0x4ed   : > { %v2808_v16 = vadd.f32 %v2807_v55, %v2778_v21  ;;  %v1651_v21 = vmul.f32 %v7202_v18, %v7222_v45  ;;  %v7227_v55 = vld [vmem:[#allocation150_spill] sm:$0xff] }
 0x4ef   : > { %v2841_v60 = vmul.f32 %v2828_v27, %v2808_v16  ;;  %v1650_v27 = vmul.f32 %v7200_v28, %v7217_v12 }
 0x4f1   : > { %v5982_v58 = vsel %vm2849_vm8, %v2841_v60, -1e+30  ;;  %v1722_v16 = vmul.f32 %v7227_v55, %v1650_v27  ;;  %v1723_v60 = vmul.f32 %v7227_v55, %v1651_v21 }
 0x4f2   : > { %v2859_v59 = vsel %vm663_vm7, %v5982_v58, -inf }
 0x4f3   : > { %2860 = vmax.xlane.f32.xlu1 %v2859_v59 }
 0x504   : > { %v2781_v31 = vpop.f32.mrf.mxu2  ;;  %v2810_v7 = vpop.f32.mrf.mxu3 }
 0x505   : > { %v2811_v20 = vadd.f32 %v2810_v7, %v2781_v31  ;;  %v7229_v7 = vld [vmem:[#allocation104_spill] sm:$0xff] }
 0x507   : > { %v2842_v35 = vmul.f32 %v2833_v52, %v2811_v20  ;;  %v7228_v52 = vld [vmem:[#allocation32_spill] sm:$0xff]  ;;  %v1747_v20 = vadd.f32 %v1723_v60, %v7229_v7 }
 0x508   : > { %v1746_v31 = vadd.f32 %v1722_v16, %v7228_v52 }
 0x509   : > { %v5992_v36 = vsel %vm2850_vm9, %v2842_v35, -1e+30 }
 0x50a   : > { %v2862_v17 = vsel %vm663_vm7, %v5992_v36, -inf }
 0x50b   : > { %2863 = vmax.xlane.f32.xlu0 %v2862_v17  ;;  %v7231_v17 = vld [vmem:[#allocation177_spill] sm:$0xff] }
 0x50c   : > { %1967 = vrot.lane.b32.xlu1 %v7216_v48, %s3420_s24 }
 0x514   : > { %1965 = vrot.lane.b32.xlu1 %v7217_v12, %s3420_s24 }
 0x51c   : > { %2162 = vrot.lane.b32.xlu1 %v7216_v48, %s3419_s23 }
 0x524   : > { %1890 = vperm.xlu1 %3320, %v6005_v38  }
 0x525   : > { %v2784_v29 = vpop.f32.mrf.mxu2  ;;  %v2813_v11 = vpop.f32.mrf.mxu3 }
 0x526   : > { %v2814_v24 = vadd.f32 %v2813_v11, %v2784_v29 }
 0x528   : > { %v2843_v44 = vmul.f32 %v2838_v53, %v2814_v24  ;;  %v7232_v24 = vmov 0  }
 0x52a   : > { %v6014_v39 = vsel %vm2851_vm0, %v2843_v44, -1e+30 }
 0x52b   : > { %v2865_v2 = vsel %vm663_vm7, %v6014_v39, -inf }
 0x52c   : > { %1963 = vrot.lane.b32.xlu1 %v7218_v5, %s3420_s24  ;;  %2866 = vmax.xlane.f32.xlu2 %v2865_v2 }
 0x52d   : > { %3325 = vset.pattern.permute.xlu1 %v7219_v34 }
 0x534   : > { %2160 = vrot.lane.b32.xlu1 %v7217_v12, %s3419_s23 }
 0x53c   : > { %2381 = vrot.lane.b32.xlu1 %v7220_v49, %s3423_s25 }
 0x544   : > { %2284 = vperm.xlu1 %3325, %v3386_v50   ;;  %1991 = vrot.lane.b32.xlu2 %v7220_v49, %s3420_s24 }
 0x54c   : > { %1985 = vrot.lane.b32.xlu1 %v7221_v63, %s3420_s24  ;;  %1989 = vrot.lane.b32.xlu2 %v7222_v45, %s3420_s24 }
 0x54d   : > { %3326 = vset.pattern.permute.xlu1 %v7215_v23 }
 0x554   : > { %2355 = vrot.lane.b32.xlu1 %v7217_v12, %s3423_s25  ;;  %2186 = vrot.lane.b32.xlu2 %v7220_v49, %s3419_s23 }
 0x55c   : > { %2081 = vperm.xlu1 %3326, %v6042_v57   ;;  %2089 = vperm.xlu2 %3321, %v3386_v50  }
 0x55e   : > { %v2858_v10 = vpop.xlane.xlu2 %2857 }
 0x55f   : > { %v2868_v15 = vsub.f32 %v2852_v47, %v2858_v10 }
 0x561   : > { %v2872_v19 = vmul.f32 1.442695, %v2868_v15 }
 0x563   : > { %3358 = vpow2.f32 %v2872_v19 }
 0x564   : > { %3328 = vset.pattern.permute.xlu1 %v7223_v46  ;;  %1987 = vrot.lane.b32.xlu2 %v7224_v43, %s3420_s24 }
 0x565   : > { %2479 = vperm.xlu1 %3328, %v3386_v50   ;;  %3322 = vset.pattern.permute.xlu2 %v7212_v13 }
 0x569   : > { %v3359_v0 = vpop.eup %3358 }
 0x56a   : > { %v6050_v32 = vmul.f32 %v3359_v0, %v5972_v42  ;;  %v6063_v42 = vpop.xlane.xlu1 %2860 }
 0x56b   : > { %v2869_v16 = vsub.f32 %v5982_v58, %v6063_v42  ;;  %v7235_v42 = vld [vmem:[#allocation95_spill] sm:$0xff] }
 0x56c   : > { %7225 = vst [vmem:[#allocation157_spill] sm:$0xff] %v6050_v32  ;;  %v2884_v62 = vsel %vm663_vm7, %v6050_v32, 0.0  ;;  %2184 = vrot.lane.b32.xlu2 %v7222_v45, %s3419_s23 }
 0x56d   : > { %2353 = vrot.lane.b32.xlu1 %v7218_v5, %s3423_s25  ;;  %2885 = vadd.xlane.f32.xlu0 %v2884_v62 }
 0x56e   : > { %3329 = vset.pattern.permute.xlu1 %v7215_v23 }
 0x574   : > { %1886 = vperm.xlu2 %3322, %v6042_v57  }
 0x575   : > { %2077 = vperm.xlu1 %3329, %v3388_v33  }
 0x57c   : > { %1961 = vrot.lane.b32.xlu2 %v7226_v6, %s3420_s24 }
 0x57d   : > { %3330 = vset.pattern.permute.xlu1 %v7223_v46  ;;  %3327 = vset.pattern.permute.xlu2 %v7219_v34 }
 0x57e   : > { %2475 = vperm.xlu1 %3330, %v6005_v38   ;;  %v1968_v47 = vpop.permute.xlu1 %1967  ;;  %v2864_v2 = vpop.xlane.xlu0 %2863 }
 0x57f   : > { %v2870_v10 = vsub.f32 %v5992_v36, %v2864_v2  ;;  %v7238_v2 = vld [vmem:[#allocation86_spill] sm:$0xff] }
 0x581   : > { %2357 = vrot.lane.b32.xlu0 %v7216_v48, %s3423_s25  ;;  %v2876_v15 = vmul.f32 1.442695, %v2870_v10  ;;  %v7239_v10 = vld [vmem:[#allocation97_spill] sm:$0xff] }
 0x583   : > { %3360 = vpow2.f32 %v2876_v15  ;;  %v7240_v15 = vld [vmem:[#allocation94_spill] sm:$0xff] }
 0x584   : > { %2158 = vrot.lane.b32.xlu2 %v7218_v5, %s3419_s23 }
 0x586   : > { %2375 = vrot.lane.b32.xlu1 %v7221_v63, %s3423_s25  ;;  %v1966_v23 = vpop.permute.xlu1 %1965 }
 0x589   : > { %2085 = vperm.xlu0 %3323, %v6005_v38  }
 0x58c   : > { %2379 = vrot.lane.b32.xlu2 %v7222_v45, %s3423_s25 }
 0x58e   : > { %2471 = vperm.xlu1 %3330, %v6042_v57   ;;  %v2163_v3 = vpop.permute.xlu1 %2162 }
 0x591   : > { %3324 = vset.pattern.permute.xlu0 %v7212_v13  ;;  %v7230_v13 = vld [vmem:[#allocation176_spill] sm:$0xff] }
 0x592   : > { %1894 = vperm.xlu0 %3324, %v3386_v50  }
 0x594   : > { %2280 = vperm.xlu2 %3327, %v6005_v38  }
 0x596   : > { %2467 = vperm.xlu1 %3330, %v3388_v33   ;;  %v1891_v59 = vpop.permute.xlu1 %1890 }
 0x597   : > { %v1917_v35 = vmul.f32 %v1891_v59, %v7230_v13  ;;  %v1918_v12 = vmul.f32 %v1891_v59, %v7231_v17 }
 0x599   : > { %v6092_v29 = vadd.f32 %v1917_v35, %v1746_v31  ;;  %v6094_v11 = vadd.f32 %v1918_v12, %v1747_v20  ;;  %v7236_v20 = vld [vmem:[#allocation92_spill] sm:$0xff]  ;;  %v7237_v12 = vld [vmem:[#allocation89_spill] sm:$0xff] }
 0x59a   : > { %2182 = vrot.lane.b32.xlu0 %v7224_v43, %s3419_s23  ;;  %v1101_v13 = vsel %vm1091_vm10, %v7236_v20, %v7235_v42  ;;  %v1113_v35 = vsel %vm1091_vm10, %v7235_v42, %v7236_v20 }
 0x59c   : > { %2156 = vrot.lane.b32.xlu2 %v7226_v6, %s3419_s23 }
 0x59e   : > { %v1964_v38 = vpop.permute.xlu1 %1963  ;;  %3333 = vset.pattern.permute.xlu1 %v7232_v24 }
 0x59f   : > { %v6101_v53 = vpop.xlane.xlu2 %2866 }
 0x5a2   : > { %1882 = vperm.xlu0 %3324, %v3388_v33  }
 0x5a4   : > { %2377 = vrot.lane.b32.xlu2 %v7224_v43, %s3423_s25 }
 0x5a6   : > { %v6105_v44 = vpop.permute.xlu1 %2160 }
 0x5a7   : > { %v1992_v34 = vpop.permute.xlu2 %1991 }
 0x5a8   : > { %v2005_v50 = vsel %vm1993_vm13, %v1968_v47, %v1992_v34  ;;  %v2017_v45 = vsel %vm1993_vm13, %v1992_v34, %v1968_v47  ;;  %v3361_v47 = vpop.eup %3360  ;;  %v906_v34 = vsel %vm884_vm12, %v7237_v12, %v7238_v2 }
 0x5a9   : > { %v6139_v55 = vmul.f32 %v3361_v47, %v5989_v4  ;;  %v2042_v60 = vmul.f32 %v7111_v22, %v2005_v50  ;;  %v2043_v59 = vmul.f32 %v7112_v1, %v2017_v45  ;;  %v2874_v4 = vmul.f32 1.442695, %v2869_v16 }
 0x5aa   : > { %2180 = vrot.lane.b32.xlu0 %v7221_v63, %s3419_s23  ;;  %v1308_v47 = vsel %vm1286_vm11, %v7239_v10, %v7240_v15  ;;  %v1137_v16 = vmul.f32 %v7093_v25, %v1101_v13  ;;  %v7241_v13 = vld [vmem:[#allocation28_spill] sm:$0xff] }
 0x5ab   : > { %3332 = vset.pattern.permute.xlu0 %v7232_v24  ;;  %7233 = vst [vmem:[#allocation169_spill] sm:$0xff] %v6139_v55  ;;  %v2890_v52 = vsel %vm663_vm7, %v6139_v55, 0.0  ;;  %3362 = vpow2.f32 %v2874_v4 }
 0x5ac   : > { %2276 = vperm.xlu2 %3327, %v6042_v57  }
 0x5ae   : > { %v6116_v19 = vpop.permute.xlu1 %2381 }
 0x5af   : > { %v1990_v46 = vpop.permute.xlu2 %1989 }
 0x5b0   : > { %v6120_v0 = vsel %vm1993_vm13, %v1966_v23, %v1990_v46  ;;  %v6124_v62 = vsel %vm1993_vm13, %v1990_v46, %v1966_v23  ;;  %v1296_v46 = vsel %vm1286_vm11, %v7240_v15, %v7239_v10 }
 0x5b1   : > { %v1332_v4 = vmul.f32 %v7197_v54, %v1296_v46  ;;  %v7244_v46 = vld [vmem:[#allocation39_spill] sm:$0xff] }
 0x5b4   : > { %2351 = vrot.lane.b32.xlu2 %v7226_v6, %s3423_s25  ;;  %s6535_s25 = scalar_lea.vmem %s6568_s12, %s3246_s17 }
 0x5b6   : > { %v6128_v36 = vpop.permute.xlu1 %2284 }
 0x5b7   : > { %v2187_v57 = vpop.permute.xlu2 %2186 }
 0x5b8   : > { %v6132_v27 = vsel %vm2188_vm14, %v2163_v3, %v2187_v57  ;;  %v6136_v21 = vsel %vm2188_vm14, %v2187_v57, %v2163_v3  ;;  %v1136_v57 = vmul.f32 %v4771_v37, %v1113_v35 }
 0x5ba   : > { %v1208_v35 = vmul.f32 %v7241_v13, %v1136_v57 }
 0x5bc   : > { %2272 = vperm.xlu2 %3327, %v3388_v33   ;;  %v829_v33 = vld [vmem:[%s6562_s6 + $0x58] sm:$0xff] }
 0x5be   : > { %v6141_v23 = vpop.permute.xlu1 %1985 }
 0x5bf   : > { %v2090_v31 = vpop.permute.xlu2 %2089 }
 0x5c0   : > { %2891 = vadd.xlane.f32.xlu1 %v2890_v52  ;;  %v6149_v3 = vmul.f32 %v2090_v31, %v2042_v60  ;;  %v6151_v7 = vmul.f32 %v2090_v31, %v2043_v59  ;;  %v828_v60 = vld [vmem:[%s6562_s6 + $0x50] sm:$0xff]  ;;  %v3363_v52 = vpop.eup %3362  ;;  %v1331_v31 = vmul.f32 %v7195_v56, %v1308_v47 }
 0x5c1   : > { %v6203_v47 = vmul.f32 %v3363_v52, %v5979_v51  ;;  %v1649_v51 = vmul.f32 %v7202_v18, %v7224_v43  ;;  %v7245_v52 = vld [vmem:[#allocation128_spill] sm:$0xff] }
 0x5c3   : > { %7243 = vst [vmem:[#allocation149_spill] sm:$0xff] %v6203_v47 }
 0x5c4   : > { %3331 = vset.pattern.permute.xlu2 %v7232_v24  ;;  %v894_v24 = vsel %vm884_vm12, %v7238_v2, %v7237_v12 }
 0x5c5   : > { %2587 = vperm.xlu2 %3331, %v829_v33   ;;  %v930_v59 = vmul.f32 %v7157_v41, %v894_v24 }
 0x5c6   : > { %v6157_v58 = vpop.permute.xlu1 %2355 }
 0x5c7   : > { %7234 = vst [vmem:[#allocation173_spill] sm:$0xff] %v6157_v58  ;;  %v1988_v17 = vpop.permute.xlu2 %1987 }
 0x5c8   : > { %v2003_v50 = vsel %vm1993_vm13, %v1964_v38, %v1988_v17  ;;  %v2015_v45 = vsel %vm1993_vm13, %v1988_v17, %v1964_v38  ;;  %v929_v38 = vmul.f32 %v4782_v8, %v906_v34  ;;  %v1209_v17 = vmul.f32 %v7241_v13, %v1137_v16  ;;  %v7242_v34 = vld [vmem:[#allocation5_spill] sm:$0xff] }
 0x5c9   : > { %v2038_v33 = vmul.f32 %v7111_v22, %v2003_v50  ;;  %v2039_v42 = vmul.f32 %v7112_v1, %v2015_v45  ;;  %v1014_v24 = vmul.f32 %v7242_v34, %v930_v59  ;;  %v1403_v50 = vmul.f32 %v7244_v46, %v1331_v31  ;;  %v7246_v31 = vld [vmem:[#allocation134_spill] sm:$0xff] }
 0x5ca   : > { %v1013_v10 = vmul.f32 %v7242_v34, %v929_v38  ;;  %v1404_v45 = vmul.f32 %v7244_v46, %v1332_v4  ;;  %v1598_v4 = vmul.f32 %v7246_v31, %v7245_v52  ;;  %v7248_v34 = vld [vmem:[#allocation145_spill] sm:$0xff]  ;;  %v7249_v52 = vld [vmem:[#allocation164_spill] sm:$0xff] }
 0x5cb   : > { %v1233_v59 = vadd.f32 %v1209_v17, %v1014_v24  ;;  %v1721_v43 = vmul.f32 %v7248_v34, %v1649_v51 }
 0x5cc   : > { %v1232_v38 = vadd.f32 %v1208_v35, %v1013_v10 }
 0x5cd   : > { %2582 = vperm.xlu2 %3331, %v828_v60   ;;  %v1648_v60 = vmul.f32 %v7200_v28, %v7218_v5  ;;  %v1428_v5 = vadd.f32 %v1404_v45, %v1233_v59 }
 0x5ce   : > { %v2082_v20 = vpop.permute.xlu1 %2081  ;;  %v1427_v13 = vadd.f32 %v1403_v50, %v1232_v38 }
 0x5cf   : > { %v2110_v12 = vmul.f32 %v2082_v20, %v2038_v33  ;;  %v2111_v2 = vmul.f32 %v2082_v20, %v2039_v42  ;;  %v2185_v15 = vpop.permute.xlu2 %2184  ;;  %v7247_v33 = vld [vmem:[#allocation129_spill] sm:$0xff]  ;;  %v826_v20 = vld [vmem:[%s6562_s6 + $0x40] sm:$0xff] }
 0x5d0   : > { %v6210_v57 = vsel %vm2188_vm14, %v6105_v44, %v2185_v15  ;;  %v6215_v16 = vsel %vm2188_vm14, %v2185_v15, %v6105_v44  ;;  %v1599_v42 = vmul.f32 %v7246_v31, %v7247_v33  ;;  %v2887_v44 = vsel %vm663_vm7, %v6203_v47, 0.0  ;;  %v7250_v33 = vld [vmem:[#allocation165_spill] sm:$0xff] }
 0x5d1   : > { %v1720_v15 = vmul.f32 %v7248_v34, %v1648_v60  ;;  %v1622_v35 = vadd.f32 %v1598_v4, %v1427_v13  ;;  %v7254_v13 = vld [vmem:[#allocation99_spill] sm:$0xff] }
 0x5d2   : > { %v1623_v17 = vadd.f32 %v1599_v42, %v1428_v5  ;;  %v7251_v42 = vld [vmem:[#allocation108_spill] sm:$0xff] }
 0x5d3   : > { %v1744_v24 = vadd.f32 %v1720_v15, %v1622_v35 }
 0x5d4   : > { %2888 = vadd.xlane.f32.xlu0 %v2887_v44  ;;  %v1745_v46 = vadd.f32 %v1721_v43, %v1623_v17 }
 0x5d5   : > { %2572 = vperm.xlu2 %3331, %v826_v20   ;;  %v7252_v20 = vld [vmem:[#allocation105_spill] sm:$0xff] }
 0x5d6   : > { %v1103_v44 = vsel %vm1091_vm10, %v7252_v20, %v7251_v42 }
 0x5d7   : > { %v1887_v10 = vpop.permute.xlu2 %1886  ;;  %v6238_v45 = vpop.permute.xlu1 %2479  ;;  %v1141_v43 = vmul.f32 %v7093_v25, %v1103_v44 }
 0x5d8   : > { %v1915_v31 = vmul.f32 %v1887_v10, %v7249_v52  ;;  %v1916_v55 = vmul.f32 %v1887_v10, %v7250_v33  ;;  %v7255_v10 = vld [vmem:[#allocation98_spill] sm:$0xff]  ;;  %v3032_v33 = vld [vmem:[%s6566_s10 + $0x10] sm:$0xff] }
 0x5da   : > { %v1939_v32 = vadd.f32 %v1915_v31, %v1744_v24  ;;  %v1940_v58 = vadd.f32 %v1916_v55, %v1745_v46  ;;  %v7256_v24 = vld [vmem:[#allocation101_spill] sm:$0xff] }
 0x5db   : > { %v1310_v46 = vsel %vm1286_vm11, %v7256_v24, %v7255_v10 }
 0x5dc   : > { %v6234_v47 = vadd.f32 %v2110_v12, %v1939_v32  ;;  %v6236_v50 = vadd.f32 %v2111_v2, %v1940_v58  ;;  %v827_v32 = vld [vmem:[%s6562_s6 + $0x48] sm:$0xff]  ;;  %v2871_v58 = vsub.f32 %v6014_v39, %v6101_v53  ;;  %v1115_v39 = vsel %vm1091_vm10, %v7251_v42, %v7252_v20  ;;  %v7253_v53 = vld [vmem:[#allocation102_spill] sm:$0xff] }
 0x5dd   : > { %v896_v5 = vsel %vm884_vm12, %v7254_v13, %v7253_v53  ;;  %v908_v34 = vsel %vm884_vm12, %v7253_v53, %v7254_v13  ;;  %v1140_v15 = vmul.f32 %v4771_v37, %v1115_v39  ;;  %v7258_v39 = vld [vmem:[#allocation15_spill] sm:$0xff] }
 0x5de   : > { %v2878_v59 = vmul.f32 1.442695, %v2871_v58  ;;  %v933_v52 = vmul.f32 %v4782_v8, %v908_v34  ;;  %v934_v31 = vmul.f32 %v7157_v41, %v896_v5  ;;  %v1335_v58 = vmul.f32 %v7195_v56, %v1310_v46 }
 0x5df   : > { %v1962_v60 = vpop.permute.xlu2 %1961  ;;  %v6257_v12 = vpop.permute.xlu1 %2353  ;;  %v1652_v34 = vmul.f32 %v7200_v28, %v7216_v48  ;;  %v2236_v48 = vmul.f32 %v7104_v14, %v6215_v16 }
 0x5e0   : > { %v6243_v51 = vsel %vm1993_vm13, %v1962_v60, %v6141_v23  ;;  %v6248_v38 = vsel %vm1993_vm13, %v6141_v23, %v1962_v60  ;;  %v6259_v2 = vpop.xlane.xlu0 %2885  ;;  %v3030_v23 = vld [vmem:[%s6566_s10] sm:$0xff]  ;;  %3364 = vpow2.f32 %v2878_v59  ;;  %v7257_v59 = vld [vmem:[#allocation19_spill] sm:$0xff]  ;;  %v1017_v53 = vmul.f32 %v7258_v39, %v933_v52 }
 0x5e1   : > { %v1213_v42 = vmul.f32 %v7257_v59, %v1141_v43  ;;  %v1018_v13 = vmul.f32 %v7258_v39, %v934_v31  ;;  %v7259_v43 = vld [vmem:[#allocation40_spill] sm:$0xff]  ;;  %v1653_v52 = vmul.f32 %v7202_v18, %v7220_v49  ;;  %3366 = vrcp.f32 %v6259_v2 }
 0x5e6   : > { %v3365_v60 = vpop.eup %3364 }
 0x5e7   : > { %v6253_v55 = vpop.permute.xlu2 %2158  ;;  %v6284_v35 = vpop.permute.xlu1 %2077  ;;  %v6308_v5 = vmul.f32 %v3365_v60, %v6011_v26  ;;  %v2235_v26 = vmul.f32 %v7103_v9, %v6210_v57 }
 0x5e8   : > { %2577 = vperm.xlu0 %3332, %v827_v32   ;;  %v1298_v32 = vsel %vm1286_vm11, %v7255_v10, %v7256_v24  ;;  %v2040_v10 = vmul.f32 %v7111_v22, %v6120_v0  ;;  %v1407_v24 = vmul.f32 %v7259_v43, %v1335_v58  ;;  %v7262_v58 = vld [vmem:[#allocation131_spill] sm:$0xff] }
 0x5e9   : > { %v1336_v44 = vmul.f32 %v7197_v54, %v1298_v32  ;;  %v2893_v49 = vsel %vm663_vm7, %v6308_v5, 0.0 }
 0x5eb   : > { %v1408_v0 = vmul.f32 %v7259_v43, %v1336_v44  ;;  %v7264_v44 = vld [vmem:[#allocation87_spill] sm:$0xff] }
 0x5ef   : > { %v6264_v4 = vpop.permute.xlu2 %2379 }
 0x5f0   : > { %3036 = vperm.xlu0 %3332, %v3030_v23   ;;  %v1212_v23 = vmul.f32 %v7257_v59, %v1140_v15  ;;  %v2041_v15 = vmul.f32 %v7112_v1, %v6124_v62  ;;  %v7260_v59 = vld [vmem:[#allocation130_spill] sm:$0xff]  ;;  %v7261_v62 = vld [vmem:[#allocation141_spill] sm:$0xff] }
 0x5f1   : > { %v1602_v39 = vmul.f32 %v7261_v62, %v7260_v59 }
 0x5f2   : > { %v1236_v46 = vadd.f32 %v1212_v23, %v1017_v53  ;;  %v1603_v23 = vmul.f32 %v7261_v62, %v7262_v58 }
 0x5f3   : > { %v6286_v17 = vpop.permute.xlu0 %2357 }
 0x5f7   : > { %v2281_v20 = vpop.permute.xlu2 %2280 }
 0x5f8   : > { %3046 = vperm.xlu0 %3332, %v3032_v33   ;;  %v1237_v33 = vadd.f32 %v1213_v42, %v1018_v13  ;;  %v6328_v42 = vpop.permute.xlu1 %2475  ;;  %v2307_v53 = vmul.f32 %v2281_v20, %v2235_v26  ;;  %v2308_v57 = vmul.f32 %v2281_v20, %v2236_v48  ;;  %v7265_v20 = vld [vmem:[#allocation146_spill] sm:$0xff] }
 0x5f9   : > { %v1724_v26 = vmul.f32 %v7265_v20, %v1652_v34 }
 0x5fa   : > { %v1432_v59 = vadd.f32 %v1408_v0, %v1237_v33  ;;  %v7268_v0 = vld [vmem:[#allocation83_spill] sm:$0xff] }
 0x5fb   : > { %v2086_v31 = vpop.permute.xlu0 %2085 }
 0x5fc   : > { %v2112_v60 = vmul.f32 %v2086_v31, %v2040_v10  ;;  %v2113_v32 = vmul.f32 %v2086_v31, %v2041_v15  ;;  %v7263_v10 = vld [vmem:[#allocation90_spill] sm:$0xff]  ;;  %v1431_v31 = vadd.f32 %v1407_v24, %v1236_v46 }
 0x5fd   : > { %v1100_v15 = vsel %vm1091_vm10, %v7264_v44, %v7263_v10  ;;  %v1112_v43 = vsel %vm1091_vm10, %v7263_v10, %v7264_v44 }
 0x5fe   : > { %v2136_v13 = vadd.f32 %v2112_v60, %v6092_v29  ;;  %v2137_v16 = vadd.f32 %v2113_v32, %v6094_v11  ;;  %2894 = vadd.xlane.f32.xlu2 %v2893_v49  ;;  %v1725_v29 = vmul.f32 %v7265_v20, %v1653_v52  ;;  %v7266_v60 = vld [vmem:[#allocation84_spill] sm:$0xff]  ;;  %v7267_v32 = vld [vmem:[#allocation81_spill] sm:$0xff]  ;;  %v1134_v46 = vmul.f32 %v4771_v37, %v1112_v43  ;;  %v7271_v43 = vld [vmem:[#allocation167_spill] sm:$0xff] }
 0x5ff   : > { %v6342_v62 = vpop.permute.xlu2 %2156  ;;  %v893_v58 = vsel %vm884_vm12, %v7267_v32, %v7266_v60  ;;  %v905_v24 = vsel %vm884_vm12, %v7266_v60, %v7267_v32  ;;  %v1135_v34 = vmul.f32 %v7093_v25, %v1100_v15  ;;  %v1626_v33 = vadd.f32 %v1602_v39, %v1431_v31  ;;  %v7269_v49 = vld [vmem:[#allocation80_spill] sm:$0xff] }
 0x600   : > { %v6346_v11 = vadd.f32 %v2307_v53, %v2136_v13  ;;  %v6348_v48 = vadd.f32 %v2308_v57, %v2137_v16  ;;  %v1627_v52 = vadd.f32 %v1603_v23, %v1432_v59  ;;  %v1295_v53 = vsel %vm1286_vm11, %v7269_v49, %v7268_v0  ;;  %v7270_v23 = vld [vmem:[#allocation166_spill] sm:$0xff]  ;;  %v7272_v59 = vld [vmem:[#allocation17_spill] sm:$0xff] }
 0x601   : > { %v1307_v57 = vsel %vm1286_vm11, %v7268_v0, %v7269_v49  ;;  %v927_v13 = vmul.f32 %v4782_v8, %v905_v24  ;;  %v928_v16 = vmul.f32 %v7157_v41, %v893_v58  ;;  %v1748_v10 = vadd.f32 %v1724_v26, %v1626_v33  ;;  %v6378_v8 = vpop.permute.xlu1 %2375  ;;  %v7273_v58 = vld [vmem:[#allocation13_spill] sm:$0xff] }
 0x602   : > { %v1749_v37 = vadd.f32 %v1725_v29, %v1627_v52  ;;  %v2237_v25 = vmul.f32 %v7103_v9, %v6132_v27  ;;  %v2238_v39 = vmul.f32 %v7104_v14, %v6136_v21  ;;  %v1206_v20 = vmul.f32 %v7272_v59, %v1134_v46 }
 0x603   : > { %v1207_v60 = vmul.f32 %v7272_v59, %v1135_v34  ;;  %v1329_v32 = vmul.f32 %v7195_v56, %v1307_v57  ;;  %v1330_v27 = vmul.f32 %v7197_v54, %v1295_v53  ;;  %v1011_v24 = vmul.f32 %v7273_v58, %v927_v13  ;;  %v7274_v13 = vld [vmem:[#allocation36_spill] sm:$0xff] }
 0x604   : > { %v1895_v44 = vpop.permute.xlu0 %1894  ;;  %v1012_v21 = vmul.f32 %v7273_v58, %v928_v16  ;;  %v2309_v33 = vmul.f32 %v6128_v36, %v2237_v25  ;;  %v2310_v52 = vmul.f32 %v6128_v36, %v2238_v39  ;;  %v1647_v16 = vmul.f32 %v7202_v18, %v7221_v63  ;;  %v7277_v39 = vld [vmem:[#allocation126_spill] sm:$0xff] }
 0x605   : > { %v1919_v15 = vmul.f32 %v1895_v44, %v7270_v23  ;;  %v1920_v31 = vmul.f32 %v1895_v44, %v7271_v43  ;;  %v1230_v0 = vadd.f32 %v1206_v20, %v1011_v24  ;;  %v1401_v36 = vmul.f32 %v7274_v13, %v1329_v32  ;;  %v7276_v44 = vld [vmem:[#allocation139_spill] sm:$0xff] }
 0x606   : > { %v1231_v49 = vadd.f32 %v1207_v60, %v1012_v21  ;;  %v7278_v60 = vld [vmem:[#allocation143_spill] sm:$0xff]  ;;  %v3033_v21 = vld [vmem:[%s6566_s10 + $0x18] sm:$0xff]  ;;  %vm2901_vm11 = vweird.f32 %v6259_v2 }
 0x607   : > { %v1943_v41 = vadd.f32 %v1919_v15, %v1748_v10  ;;  %v1944_v26 = vadd.f32 %v1920_v31, %v1749_v37  ;;  %v2378_v29 = vpop.permute.xlu2 %2377  ;;  %v7275_v37 = vld [vmem:[#allocation125_spill] sm:$0xff]  ;;  %v1425_v43 = vadd.f32 %v1401_v36, %v1230_v0 }
 0x608   : > { %v2393_v56 = vsel %vm2383_vm15, %v6257_v12, %v2378_v29  ;;  %v2405_v54 = vsel %vm2383_vm15, %v2378_v29, %v6257_v12  ;;  %v1596_v25 = vmul.f32 %v7276_v44, %v7275_v37  ;;  %v1597_v12 = vmul.f32 %v7276_v44, %v7277_v39 }
 0x609   : > { %v2138_v46 = vadd.f32 %v6149_v3, %v1943_v41  ;;  %v2139_v34 = vadd.f32 %v6151_v7, %v1944_v26  ;;  %v1402_v3 = vmul.f32 %v7274_v13, %v1330_v27  ;;  %v1646_v7 = vmul.f32 %v7200_v28, %v7226_v6  ;;  %v2472_v59 = vpop.permute.xlu1 %2471 }
 0x60a   : > { %v2428_v28 = vmul.f32 %v5923_v40, %v2393_v56  ;;  %v2429_v6 = vmul.f32 %v5929_v61, %v2405_v54  ;;  %v1719_v26 = vmul.f32 %v7278_v60, %v1647_v16  ;;  %v1620_v27 = vadd.f32 %v1596_v25, %v1425_v43 }
 0x60b   : > { %v6394_v53 = vadd.f32 %v2309_v33, %v2138_v46  ;;  %v6396_v57 = vadd.f32 %v2310_v52, %v2139_v34  ;;  %v1426_v31 = vadd.f32 %v1402_v3, %v1231_v49  ;;  %v1718_v41 = vmul.f32 %v7278_v60, %v1646_v7 }
 0x60c   : > { %v2183_v10 = vpop.permute.xlu0 %2182  ;;  %v2500_v58 = vmul.f32 %v2472_v59, %v2428_v28  ;;  %v2501_v40 = vmul.f32 %v2472_v59, %v2429_v6  ;;  %v2036_v49 = vmul.f32 %v7111_v22, %v6243_v51  ;;  %v2037_v56 = vmul.f32 %v7112_v1, %v6248_v38 }
 0x60d   : > { %v2198_v23 = vsel %vm2188_vm14, %v6253_v55, %v2183_v10  ;;  %v2210_v15 = vsel %vm2188_vm14, %v2183_v10, %v6253_v55  ;;  %v1621_v55 = vadd.f32 %v1597_v12, %v1426_v31  ;;  %v1742_v33 = vadd.f32 %v1718_v41, %v1620_v27 }
 0x60e   : > { %v2233_v18 = vmul.f32 %v7103_v9, %v2198_v23  ;;  %v2234_v63 = vmul.f32 %v7104_v14, %v2210_v15  ;;  %v2108_v36 = vmul.f32 %v6284_v35, %v2036_v49  ;;  %v2109_v3 = vmul.f32 %v6284_v35, %v2037_v56  ;;  %v3389_v23 = vld [vmem:[%s6567_s11 + $0x10] ss:$0 sm:$0xff] }
 0x60f   : > { %v2277_v20 = vpop.permute.xlu2 %2276  ;;  %v1743_v52 = vadd.f32 %v1719_v26, %v1621_v55  ;;  %v2395_v22 = vsel %vm2383_vm15, %v6286_v17, %v6116_v19  ;;  %v2407_v1 = vsel %vm2383_vm15, %v6116_v19, %v6286_v17  ;;  %v3390_v19 = vld [vmem:[%s6567_s11 + $0x18] ss:$0 sm:$0xff] }
 0x610   : > { %v2305_v29 = vmul.f32 %v2277_v20, %v2233_v18  ;;  %v2306_v32 = vmul.f32 %v2277_v20, %v2234_v63  ;;  %v2432_v15 = vmul.f32 %v3389_v23, %v2395_v22  ;;  %v2433_v17 = vmul.f32 %v3390_v19, %v2407_v1 }
 0x612   : > { %v2329_v61 = vadd.f32 %v2305_v29, %v6234_v47  ;;  %v2330_v24 = vadd.f32 %v2306_v32, %v6236_v50  ;;  %v7279_v47 = vld [vmem:[#allocation161_spill] sm:$0xff]  ;;  %v7280_v50 = vld [vmem:[#allocation162_spill] sm:$0xff] }
 0x614   : > { %v1883_v46 = vpop.permute.xlu0 %1882  ;;  %v6425_v34 = vadd.f32 %v2500_v58, %v2329_v61  ;;  %v6427_v0 = vadd.f32 %v2501_v40, %v2330_v24  ;;  %v2468_v61 = vpop.permute.xlu1 %2467 }
 0x615   : > { %v1913_v54 = vmul.f32 %v1883_v46, %v7279_v47  ;;  %v1914_v13 = vmul.f32 %v1883_v46, %v7280_v50  ;;  %v2907_v47 = vand.u32 2147483648, %v6259_v2 }
 0x616   : > { %3051 = vperm.xlu2 %3331, %v3033_v21  }
 0x617   : > { %v1937_v7 = vadd.f32 %v1913_v54, %v1742_v33  ;;  %v1938_v16 = vadd.f32 %v1914_v13, %v1743_v52  ;;  %v2352_v10 = vpop.permute.xlu2 %2351  ;;  %v2905_v13 = vand.u32 2147483647, %v6259_v2 }
 0x618   : > { %v2392_v46 = vsel %vm2383_vm15, %v2352_v10, %v6378_v8  ;;  %v2404_v49 = vsel %vm2383_vm15, %v6378_v8, %v2352_v10 }
 0x619   : > { %v2132_v37 = vadd.f32 %v2108_v36, %v1937_v7  ;;  %v2133_v44 = vadd.f32 %v2109_v3, %v1938_v16  ;;  %v2426_v36 = vmul.f32 %v3389_v23, %v2392_v46  ;;  %v2427_v3 = vmul.f32 %v3390_v19, %v2404_v49  ;;  %v3031_v49 = vld [vmem:[%s6566_s10 + $0x8] sm:$0xff] }
 0x61a   : > { %v2908_v16 = vor.u32 1.1754944e-38, %v2907_v47  ;;  %vm2906_vm13 = vcmp.eq.f32.partialorder %v2905_v13, 8.507059e+37  ;;  %3041 = vperm.xlu1 %3333, %v3031_v49   ;;  %v3028_v47 = vld [vmem:[%s6565_s9 + $0x10] sm:$0xff] }
 0x61b   : > { %v2498_v30 = vmul.f32 %v2468_v61, %v2426_v36  ;;  %v2499_v8 = vmul.f32 %v2468_v61, %v2427_v3 }
 0x61c   : > { %v2181_v25 = vpop.permute.xlu0 %2180 }
 0x61d   : > { %v2197_v51 = vsel %vm2188_vm14, %v6342_v62, %v2181_v25  ;;  %v2209_v38 = vsel %vm2188_vm14, %v2181_v25, %v6342_v62  ;;  %v2504_v62 = vmul.f32 %v6238_v45, %v2432_v15 }
 0x61e   : > { %v2231_v35 = vmul.f32 %v7103_v9, %v2197_v51  ;;  %v2232_v39 = vmul.f32 %v7104_v14, %v2209_v38  ;;  %v2505_v9 = vmul.f32 %v6238_v45, %v2433_v17  ;;  %v7281_v14 = vld [vmem:[#allocation173_spill] sm:$0xff] }
 0x61f   : > { %v2273_v12 = vpop.permute.xlu2 %2272  ;;  %v2394_v43 = vsel %vm2383_vm15, %v7281_v14, %v6264_v4  ;;  %v2406_v31 = vsel %vm2383_vm15, %v6264_v4, %v7281_v14  ;;  %v2528_v59 = vadd.f32 %v2504_v62, %v6394_v53 }
 0x620   : > { %v2303_v28 = vmul.f32 %v2273_v12, %v2231_v35  ;;  %v2304_v6 = vmul.f32 %v2273_v12, %v2232_v39  ;;  %v2529_v20 = vadd.f32 %v2505_v9, %v6396_v57  ;;  %v2430_v41 = vmul.f32 %v3389_v23, %v2394_v43  ;;  %v3367_v57 = vpop.eup %3366  ;;  %v7283_v9 = vld [vmem:[#allocation149_spill] sm:$0xff] }
 0x621   : > { %v2431_v26 = vmul.f32 %v3390_v19, %v2406_v31  ;;  %v2897_v24 = vmul.f32 %v3367_v57, %v6259_v2  ;;  %vm2902_vm10 = vweird.f32 %v3367_v57  ;;  %v7282_v19 = vld [vmem:[#allocation157_spill] sm:$0xff] }
 0x622   : > { %v2327_v18 = vadd.f32 %v2303_v28, %v2132_v37  ;;  %v2328_v63 = vadd.f32 %v2304_v6, %v2133_v44  ;;  %v2502_v45 = vmul.f32 %v6328_v42, %v2430_v41  ;;  %vm2903_vm12 = vmor %vm2901_vm11, %vm2902_vm10 }
 0x623   : > { %v2503_v27 = vmul.f32 %v6328_v42, %v2431_v26  ;;  %v2898_v33 = vsub.f32 1.0, %v2897_v24 }
 0x624   : > { %v2526_v55 = vadd.f32 %v2502_v45, %v6346_v11  ;;  %v2522_v38 = vadd.f32 %v2498_v30, %v2327_v18  ;;  %v2523_v2 = vadd.f32 %v2499_v8, %v2328_v63 }
 0x625   : > { %v2527_v58 = vadd.f32 %v2503_v27, %v6348_v48  ;;  %v2899_v11 = vmul.f32 %v3367_v57, %v2898_v33 }
 0x627   : > { %v2588_v60 = vpop.permute.xlu2 %2587  ;;  %v2900_v56 = vadd.f32 %v3367_v57, %v2899_v11 }
 0x628   : > { %v2612_v29 = vadd.f32 %v2588_v60, %v2528_v59  ;;  %v2613_v32 = vadd.f32 %v2588_v60, %v2529_v20  ;;  %v7284_v60 = vld [vmem:[#allocation169_spill] sm:$0xff] }
 0x629   : > { %v2904_v7 = vsel %vm2903_vm12, %v3367_v57, %v2900_v56  ;;  %v3027_v56 = vld [vmem:[%s6565_s9 + $0x8] sm:$0xff] }
 0x62a   : > { %2980 = vmatpush.msrb.mxu2 %v2612_v29  ;;  %3009 = vmatpush.msrb.mxu3 %v2613_v32  ;;  %v2909_v22 = vsel %vm2906_vm13, %v2908_v16, %v2904_v7  ;;  %v3391_v16 = vld [vmem:[%s3536_s28] sm:$0xff] }
 0x62b   : > { %v2910_v17 = vmul.f32 %v2909_v22, %v7282_v19 }
 0x62f   : > { %v2583_v4 = vpop.permute.xlu2 %2582 }
 0x630   : > { %v2610_v40 = vadd.f32 %v2583_v4, %v2526_v55  ;;  %v2611_v53 = vadd.f32 %v2583_v4, %v2527_v58 }
 0x632   : > { %2981 = vmatpush.msrb.mxu2 %v2610_v40  ;;  %3010 = vmatpush.msrb.mxu3 %v2611_v53 }
 0x633   : > { %v6477_v52 = vpop.xlane.xlu1 %2891 }
 0x634   : > { %v2937_v62 = vand.u32 2147483648, %v6477_v52  ;;  %vm2931_vm4 = vweird.f32 %v6477_v52  ;;  %v2935_v43 = vand.u32 2147483647, %v6477_v52 }
 0x636   : > { %v2938_v59 = vor.u32 1.1754944e-38, %v2937_v62  ;;  %vm2936_vm6 = vcmp.eq.f32.partialorder %v2935_v43, 8.507059e+37 }
 0x637   : > { %v2573_v10 = vpop.permute.xlu2 %2572 }
 0x638   : > { %v2606_v23 = vadd.f32 %v2573_v10, %v2522_v38  ;;  %v2607_v15 = vadd.f32 %v2573_v10, %v2523_v2  ;;  %v3394_v2 = vld [vmem:[%s3536_s28 + $0x18] sm:$0xff] }
 0x647   : > { %v2889_v21 = vpop.xlane.xlu0 %2888 }
 0x648   : > { %3368 = vrcp.f32 %v2889_v21  ;;  %v2922_v12 = vand.u32 2147483648, %v2889_v21  ;;  %vm2916_vm15 = vweird.f32 %v2889_v21  ;;  %v2920_v28 = vand.u32 2147483647, %v2889_v21 }
 0x649   : > { %3370 = vrcp.f32 %v6477_v52 }
 0x64a   : > { %v2923_v6 = vor.u32 1.1754944e-38, %v2922_v12  ;;  %vm2921_vm2 = vcmp.eq.f32.partialorder %v2920_v28, 8.507059e+37 }
 0x64e   : > { %v3369_v42 = vpop.eup %3368 }
 0x64f   : > { %v2912_v48 = vmul.f32 %v3369_v42, %v2889_v21  ;;  %v3371_v50 = vpop.eup %3370  ;;  %vm2917_vm14 = vweird.f32 %v3369_v42 }
 0x650   : > { %v2927_v37 = vmul.f32 %v3371_v50, %v6477_v52  ;;  %vm2918_vm1 = vmor %vm2916_vm15, %vm2917_vm14  ;;  %vm2932_vm3 = vweird.f32 %v3371_v50 }
 0x651   : > { %v2913_v54 = vsub.f32 1.0, %v2912_v48  ;;  %vm2933_vm5 = vmor %vm2931_vm4, %vm2932_vm3 }
 0x652   : > { %v2928_v35 = vsub.f32 1.0, %v2927_v37 }
 0x653   : > { %v2914_v44 = vmul.f32 %v3369_v42, %v2913_v54  ;;  %v3029_v54 = vld [vmem:[%s6565_s9 + $0x18] sm:$0xff] }
 0x655   : > { %v2915_v39 = vadd.f32 %v3369_v42, %v2914_v44  ;;  %v3392_v44 = vld [vmem:[%s3536_s28 + $0x8] sm:$0xff] }
 0x65a   : > { %v2578_v25 = vpop.permute.xlu0 %2577 }
 0x65b   : > { %v2608_v1 = vadd.f32 %v2578_v25, %v6425_v34  ;;  %v2609_v51 = vadd.f32 %v2578_v25, %v6427_v0  ;;  %v2929_v34 = vmul.f32 %v3371_v50, %v2928_v35  ;;  %v2919_v0 = vsel %vm2918_vm1, %v3369_v42, %v2915_v39 }
 0x65c   : > { %v2924_v18 = vsel %vm2921_vm2, %v2923_v6, %v2919_v0 }
 0x65d   : > { %2982 = vmatpush.msrb.mxu2 %v2608_v1  ;;  %3011 = vmatpush.msrb.mxu3 %v2609_v51  ;;  %v2930_v63 = vadd.f32 %v3371_v50, %v2929_v34  ;;  %v2925_v14 = vmul.f32 %v2924_v18, %v7283_v9  ;;  %v3393_v51 = vld [vmem:[%s3536_s28 + $0x10] sm:$0xff]  ;;  %v3396_v34 = vld [vmem:[%s3536_s28 + $0x28] sm:$0xff] }
 0x65f   : > { %2983 = vmatpush.msrb.mxu2 %v2606_v23  ;;  %3012 = vmatpush.msrb.mxu3 %v2607_v15  ;;  %v2934_v31 = vsel %vm2933_vm5, %v3371_v50, %v2930_v63 }
 0x660   : > { %3228 = vmatmul.msk.f32.vlgmr.msrb.gmra.mxu2 %vm663_vm7, %v2910_v17  ;;  %3232 = vmatmul.msk.f32.vlgmr.msrb.gmra.mxu3 %vm663_vm7, %v2910_v17  ;;  %v2939_v20 = vsel %vm2936_vm6, %v2938_v59, %v2934_v31  ;;  %v3395_v17 = vld [vmem:[%s3536_s28 + $0x20] sm:$0xff]  ;;  %v3398_v31 = vld [vmem:[%s3536_s28 + $0x38] sm:$0xff] }
 0x661   : > { %v2940_v41 = vmul.f32 %v2939_v20, %v7284_v60 }
 0x662   : > { %v3037_v50 = vpop.permute.xlu0 %3036 }
 0x668   : > { %3229 = vmatmul.msk.f32.gmra.mxu2 %vm663_vm7, %v2925_v14  ;;  %3233 = vmatmul.msk.f32.gmra.mxu3 %vm663_vm7, %v2925_v14  ;;  %v3397_v14 = vld [vmem:[%s3536_s28 + $0x30] sm:$0xff] }
 0x66a   : > { %v3047_v39 = vpop.permute.xlu0 %3046 }
 0x670   : > { %3230 = vmatmul.msk.f32.gmra.mxu2 %vm663_vm7, %v2940_v41  ;;  %3234 = vmatmul.msk.f32.gmra.mxu3 %vm663_vm7, %v2940_v41 }
 0x671   : > { %v2895_v26 = vpop.xlane.xlu2 %2894 }
 0x672   : > { %3372 = vrcp.f32 %v2895_v26  ;;  %v2952_v27 = vand.u32 2147483648, %v2895_v26  ;;  %v2950_v58 = vand.u32 2147483647, %v2895_v26  ;;  %vm2946_vm9 = vweird.f32 %v2895_v26 }
 0x674   : > { %v2953_v40 = vor.u32 1.1754944e-38, %v2952_v27  ;;  %vm2951_vm10 = vcmp.eq.f32.partialorder %v2950_v58, 8.507059e+37 }
 0x678   : > { %v3373_v29 = vpop.eup %3372 }
 0x679   : > { %v2942_v32 = vmul.f32 %v3373_v29, %v2895_v26  ;;  %vm2947_vm8 = vweird.f32 %v3373_v29  ;;  %v3052_v6 = vpop.permute.xlu2 %3051 }
 0x67a   : > { %vm2948_vm0 = vmor %vm2946_vm9, %vm2947_vm8 }
 0x67b   : > { %v2943_v45 = vsub.f32 1.0, %v2942_v32 }
 0x67d   : > { %v2944_v55 = vmul.f32 %v3373_v29, %v2943_v45 }
 0x67f   : > { %v2945_v4 = vadd.f32 %v3373_v29, %v2944_v55 }
 0x681   : > { %v2949_v53 = vsel %vm2948_vm0, %v3373_v29, %v2945_v4 }
 0x682   : > { %v2954_v57 = vsel %vm2951_vm10, %v2953_v40, %v2949_v53 }
 0x683   : > { %v2955_v61 = vmul.f32 %v2954_v57, %v6308_v5  ;;  %v3026_v5 = vld [vmem:[%s6565_s9] sm:$0xff] }
 0x685   : > { %3231 = vmatmul.msk.f32.gmra.mxu2 %vm663_vm7, %v2955_v61  ;;  %3235 = vmatmul.msk.f32.gmra.mxu3 %vm663_vm7, %v2955_v61 }
 0x68c   : > { %v3042_v8 = vpop.permute.xlu1 %3041 }
 0x6e3   : > { %v2985_v24 = vpop.f32.mrf.mxu2  ;;  %v3014_v21 = vpop.f32.mrf.mxu3 }
 0x6eb   : > { %v2988_v33 = vpop.f32.mrf.mxu2  ;;  %v3017_v52 = vpop.f32.mrf.mxu3 }
 0x6f3   : > { %v2991_v42 = vpop.f32.mrf.mxu2  ;;  %v3020_v11 = vpop.f32.mrf.mxu3 }
 0x708   : > { %v2994_v48 = vpop.f32.mrf.mxu2  ;;  %v3023_v46 = vpop.f32.mrf.mxu3 }
 0x709   : > { %3078 = vmatpush.msra.mxu2 %v2994_v48  ;;  %3107 = vmatpush.msra.mxu3 %v3023_v46 }
 0x70b   : > { %3079 = vmatpush.msra.mxu2 %v2991_v42  ;;  %3108 = vmatpush.msra.mxu3 %v3020_v11 }
 0x70d   : > { %3080 = vmatpush.msra.mxu2 %v2988_v33  ;;  %3109 = vmatpush.msra.mxu3 %v3017_v52 }
 0x70f   : > { %3081 = vmatpush.msra.mxu2 %v2985_v24  ;;  %3110 = vmatpush.msra.mxu3 %v3014_v21 }
 0x710   : > { %3236 = vmatmul.msk.f32.vlgmr.msra.gmra.mxu2 %vm663_vm7, %v3026_v5  ;;  %3240 = vmatmul.msk.f32.vlgmr.msra.gmra.mxu3 %vm663_vm7, %v3026_v5 }
 0x718   : > { %3237 = vmatmul.msk.f32.gmra.mxu2 %vm663_vm7, %v3027_v56  ;;  %3241 = vmatmul.msk.f32.gmra.mxu3 %vm663_vm7, %v3027_v56 }
 0x720   : > { %3238 = vmatmul.msk.f32.gmra.mxu2 %vm663_vm7, %v3028_v47  ;;  %3242 = vmatmul.msk.f32.gmra.mxu3 %vm663_vm7, %v3028_v47 }
 0x728   : > { %3239 = vmatmul.msk.f32.gmra.mxu2 %vm663_vm7, %v3029_v54  ;;  %3243 = vmatmul.msk.f32.gmra.mxu3 %vm663_vm7, %v3029_v54 }
 0x793   : > { %v3083_v13 = vpop.f32.mrf.mxu2  ;;  %v3112_v36 = vpop.f32.mrf.mxu3 }
 0x794   : > { %v3084_v3 = vadd.f32 %v3083_v13, %v3037_v50  ;;  %v3113_v7 = vadd.f32 %v3112_v36, %v3037_v50 }
 0x796   : > { %v3124_v37 = vadd.f32 %v3391_v16, %v3084_v3  ;;  %v3125_v30 = vadd.f32 %v3392_v44, %v3113_v7 }
 0x798   : > { %3132 = vst [vmem:[%s6535_s25] sm:$0xff] %v3124_v37 }
 0x799   : > { %3133 = vst [vmem:[%s6535_s25 + $0x8] sm:$0xff] %v3125_v30 }
 0x79b   : > { %v3086_v10 = vpop.f32.mrf.mxu2  ;;  %v3115_v25 = vpop.f32.mrf.mxu3 }
 0x79c   : > { %v3087_v22 = vadd.f32 %v3086_v10, %v3042_v8  ;;  %v3116_v1 = vadd.f32 %v3115_v25, %v3042_v8 }
 0x79e   : > { %v3126_v38 = vadd.f32 %v3393_v51, %v3087_v22  ;;  %v3127_v35 = vadd.f32 %v3394_v2, %v3116_v1 }
 0x7a0   : > { %3134 = vst [vmem:[%s6535_s25 + $0x10] sm:$0xff] %v3126_v38 }
 0x7a1   : > { %3135 = vst [vmem:[%s6535_s25 + $0x18] sm:$0xff] %v3127_v35 }
 0x7a3   : > { %v3089_v12 = vpop.f32.mrf.mxu2  ;;  %v3118_v23 = vpop.f32.mrf.mxu3 }
 0x7a4   : > { %v3090_v15 = vadd.f32 %v3089_v12, %v3047_v39  ;;  %v3119_v19 = vadd.f32 %v3118_v23, %v3047_v39 }
 0x7a6   : > { %v3128_v28 = vadd.f32 %v3395_v17, %v3090_v15  ;;  %v3129_v0 = vadd.f32 %v3396_v34, %v3119_v19 }
 0x7a8   : > { %3136 = vst [vmem:[%s6535_s25 + $0x20] sm:$0xff] %v3128_v28 }
 0x7a9   : > { %3137 = vst [vmem:[%s6535_s25 + $0x28] sm:$0xff] %v3129_v0 }
 0x7ab   : > { %v3092_v18 = vpop.f32.mrf.mxu2  ;;  %v3121_v63 = vpop.f32.mrf.mxu3 }
 0x7ac   : > { %v3093_v62 = vadd.f32 %v3092_v18, %v3052_v6  ;;  %v3122_v9 = vadd.f32 %v3121_v63, %v3052_v6 }
 0x7ae   : > { %v3130_v43 = vadd.f32 %v3397_v14, %v3093_v62  ;;  %v3131_v59 = vadd.f32 %v3398_v31, %v3122_v9 }
 0x7b0   : > { %3138 = vst [vmem:[%s6535_s25 + $0x30] sm:$0xff] %v3130_v43 }
 0x7b1   : > { %3139 = vst [vmem:[%s6535_s25 + $0x38] sm:$0xff] %v3131_v59 }
 0x7b2 PF: > { %s22_s21 = sadd.s32 1, %s3405_s21  }
 0x7b3   : > { %p19_p4 = scmp.ge.s32.totalorder %s22_s21, 4  }
 0x7b5   :  { %21 = sbr.rel (!%p19_p4) target bundleno = 1 (0x1), region = 98 }

// kernel: transformer_block.3
= control target key start
LH: loop header
LB: loop body
LE: loop exit
PB: predicated region body
PF: predicated region fallthrough
CT: control target
= control target key end

     0   :  { %s4364_s13 = smov 0   ;;  %s9435_s0 = inlined_call_operand.vmem [shape: f32[2,32,256], index: 0, kind: input, shape index: {}]   ;;  %s9436_s1 = inlined_call_operand.vmem [shape: f32[32,1], index: 1, kind: input, shape index: {}]   ;;  %s9437_s2 = inlined_call_operand.vmem [shape: f32[32,1], index: 2, kind: input, shape index: {}]   ;;  %s9438_s3 = inlined_call_operand.vmem [shape: f32[128,32], index: 3, kind: input, shape index: {}]   ;;  %s9439_s4 = inlined_call_operand.vmem [shape: f32[128,1], index: 4, kind: input, shape index: {}]   ;;  %s9440_s5 = inlined_call_operand.vmem [shape: f32[128,9], index: 5, kind: input, shape index: {}]   ;;  %s9441_s6 = inlined_call_operand.vmem [shape: f32[128,1], index: 6, kind: input, shape index: {}]   ;;  %s9442_s7 = inlined_call_operand.vmem [shape: f32[32,64], index: 7, kind: input, shape index: {}]   ;;  %s9443_s8 = inlined_call_operand.vmem [shape: f32[32,1], index: 8, kind: input, shape index: {}]   ;;  %s9444_s9 = inlined_call_operand.vmem [shape: f32[9,256], index: 9, kind: input, shape index: {}]   ;;  %s9445_s10 = inlined_call_operand.vmem [shape: f32[2,32,256], index: 10, kind: output, shape index: {}]  }
   0x1 LB: > { %s4042_s14 = sadd.s32 4294967295, %s4288_s13   ;;  %p4046_p0 = scmp.ge.s32.totalorder %s4288_s13, 1  ;;  %s4288_s13 = sphi %s4364_s13, %s20_s13  }
   0x2   : > { %p312_p1 = scmp.lt.s32.totalorder %s4288_s13, 3 }
   0x4   : > { %p313_p2 = pnand %p4046_p0, %p312_p1 }
   0x6   : > { %316 = sbr.rel (%p313_p2) target bundleno = 1734 (0x6c6), region = 60 }
   0xb   : > { %v372_v0 = vld [vmem:[%s9437_s2] sm:$0xff]  ;;  %v370_v1 = vld [vmem:[%s9436_s1 + $0x10] sm:$0xff]  ;;  %v9446_v3 = vmov 0   ;;  %p350_p3 = scmp.lt.s32.totalorder %s4042_s14, 1  ;;  %v373_v4 = vld [vmem:[%s9437_s2 + $0x8] sm:$0xff]  ;;  %v4291_v19 = vmov 32.0  }
   0xc   : > { %v368_v2 = vld [vmem:[%s9436_s1] sm:$0xff]  ;;  %4132 = vset.pattern.permute.xlu2 %v9446_v3  ;;  %4131 = vset.pattern.permute.xlu1 %v9446_v3  ;;  %v371_v5 = vld [vmem:[%s9436_s1 + $0x18] sm:$0xff]  ;;  %v369_v6 = vld [vmem:[%s9436_s1 + $0x8] sm:$0xff]  ;;  %4166 = vrcp.f32 %v4291_v19  ;;  %vm637_vm7 = vcmask 261120   ;;  %s4293_s16 = smov 17   ;;  %s4294_s17 = smov 16  }
   0xd   : > { %4130 = vset.pattern.permute.xlu0 %v9446_v3  ;;  %499 = vperm.xlu2 %4132, %v372_v0   ;;  %s10883_s14 = smov (!%p350_p3, %s4042_s14), 1  ;;  %v541_v7 = vld [vmem:[%s9439_s4] sm:$0xff]  ;;  %v375_v8 = vld [vmem:[%s9437_s2 + $0x18] sm:$0xff]  ;;  %v374_v9 = vld [vmem:[%s9437_s2 + $0x10] sm:$0xff]  ;;  %s4295_s19 = smov 15  }
   0xe   : > { %481 = vperm.xlu1 %4131, %v370_v1   ;;  %471 = vperm.xlu0 %4130, %v368_v2   ;;  %s4093_s27 = sshll.u32 %s10883_s14, 6  ;;  %v544_v20 = vld [vmem:[%s9439_s4 + $0x18] sm:$0xff]  ;;  %v543_v24 = vld [vmem:[%s9439_s4 + $0x10] sm:$0xff]  ;;  %v542_v25 = vld [vmem:[%s9439_s4 + $0x8] sm:$0xff]  ;;  %s4297_s20 = smov 1  }
   0xf   : > { %s4410_s18 = scalar_lea.vmem %s9435_s0, %s4093_s27  ;;  %v547_v35 = vld [vmem:[%s9439_s4 + $0x30] sm:$0xff]  ;;  %v546_v38 = vld [vmem:[%s9439_s4 + $0x28] sm:$0xff]  ;;  %v545_v39 = vld [vmem:[%s9439_s4 + $0x20] sm:$0xff]  ;;  %s4300_s28 = smov 127  }
  0x10   : > { %v360_v10 = vld [vmem:[%s4410_s18] sm:$0xff]  ;;  %v362_v11 = vld [vmem:[%s4410_s18 + $0x10] sm:$0xff]  ;;  %v361_v13 = vld [vmem:[%s4410_s18 + $0x8] sm:$0xff]  ;;  %s4302_s22 = smov 113   ;;  %s4304_s23 = smov 112  }
  0x11   : > { %v376_v12 = vadd.f32 %v362_v11, %v360_v10  ;;  %v363_v14 = vld [vmem:[%s4410_s18 + $0x18] sm:$0xff]  ;;  %v364_v15 = vld [vmem:[%s4410_s18 + $0x20] sm:$0xff]  ;;  %v365_v16 = vld [vmem:[%s4410_s18 + $0x28] sm:$0xff]  ;;  %s4306_s29 = smov 111  }
  0x12   : > { %v385_v17 = vadd.f32 %v363_v14, %v361_v13  ;;  %v366_v21 = vld [vmem:[%s4410_s18 + $0x30] sm:$0xff]  ;;  %v367_v22 = vld [vmem:[%s4410_s18 + $0x38] sm:$0xff]  ;;  %v4167_v30 = vpop.eup %4166  ;;  %v550_v49 = vld [vmem:[%s9439_s4 + $0x48] sm:$0xff] }
  0x13   : > { %v377_v18 = vadd.f32 %v376_v12, %v364_v15  ;;  %v395_v32 = vmul.f32 32.0, %v4167_v30  ;;  %vm399_vm0 = vweird.f32 %v4167_v30  ;;  %v549_v50 = vld [vmem:[%s9439_s4 + $0x40] sm:$0xff]  ;;  %v548_v51 = vld [vmem:[%s9439_s4 + $0x38] sm:$0xff]  ;;  %v551_v60 = vld [vmem:[%s9439_s4 + $0x50] sm:$0xff] }
  0x14   : > { %v386_v23 = vadd.f32 %v385_v17, %v365_v16  ;;  %v553_v58 = vld [vmem:[%s9439_s4 + $0x60] sm:$0xff]  ;;  %v552_v59 = vld [vmem:[%s9439_s4 + $0x58] sm:$0xff]  ;;  %v554_v12 = vld [vmem:[%s9439_s4 + $0x68] sm:$0xff] }
  0x15   : > { %504 = vperm.xlu2 %4132, %v373_v4   ;;  %v378_v26 = vadd.f32 %v377_v18, %v366_v21  ;;  %v396_v36 = vsub.f32 1.0, %v395_v32  ;;  %v4504_v19 = vld [vmem:[%s9440_s5] sm:$0xff] }
  0x16   : > { %486 = vperm.xlu1 %4131, %v371_v5   ;;  %476 = vperm.xlu0 %4130, %v369_v6   ;;  %v387_v27 = vadd.f32 %v386_v23, %v367_v22  ;;  %v4533_v32 = vld [vmem:[%s9440_s5 + $0x40] sm:$0xff] }
  0x17   : > { %v379_v28 = vrot.slane %v378_v26, 4  ;;  %v397_v41 = vmul.f32 %v4167_v30, %v396_v36 }
  0x18   : > { %v388_v29 = vrot.slane %v387_v27, 4 }
  0x19   : > { %v380_v31 = vadd.f32 %v379_v28, %v378_v26  ;;  %v398_v44 = vadd.f32 %v4167_v30, %v397_v41  ;;  %v4521_v26 = vld [vmem:[%s9440_s5 + $0x28] sm:$0xff] }
  0x1a   : > { %v389_v33 = vadd.f32 %v388_v29, %v387_v27 }
  0x1b   : > { %v381_v34 = vrot.slane %v380_v31, 2  ;;  %v4438_v47 = vsel %vm399_vm0, %v4167_v30, %v398_v44  ;;  %v4559_v44 = vld [vmem:[%s9440_s5 + $0x70] sm:$0xff] }
  0x1c   : > { %v390_v37 = vrot.slane %v389_v33, 2 }
  0x1d   : > { %559 = vperm.xlu2 %4132, %v541_v7   ;;  %v382_v40 = vadd.f32 %v381_v34, %v380_v31  ;;  %v4528_v31 = vld [vmem:[%s9440_s5 + $0x30] sm:$0xff] }
  0x1e   : > { %514 = vperm.xlu1 %4131, %v375_v8   ;;  %509 = vperm.xlu0 %4130, %v374_v9   ;;  %v391_v42 = vadd.f32 %v390_v37, %v389_v33  ;;  %v4540_v37 = vld [vmem:[%s9440_s5 + $0x48] sm:$0xff] }
  0x1f   : > { %v383_v43 = vrot.slane %v382_v40, 1 }
  0x20   : > { %v392_v45 = vrot.slane %v391_v42, 1 }
  0x21   : > { %v384_v46 = vadd.f32 %v383_v43, %v382_v40  ;;  %v4554_v43 = vld [vmem:[%s9440_s5 + $0x60] sm:$0xff] }
  0x22   : > { %v393_v48 = vadd.f32 %v392_v45, %v391_v42 }
  0x23   : > { %v401_v52 = vmul.f32 %v4438_v47, %v384_v46  ;;  %v4566_v46 = vld [vmem:[%s9440_s5 + $0x78] sm:$0xff] }
  0x24   : > { %v402_v53 = vmul.f32 %v4438_v47, %v393_v48 }
  0x25   : > { %574 = vperm.xlu2 %4132, %v544_v20   ;;  %v4451_v54 = vsub.f32 %v360_v10, %v401_v52  ;;  %v4453_v55 = vsub.f32 %v362_v11, %v401_v52  ;;  %v4468_v61 = vsub.f32 %v364_v15, %v401_v52  ;;  %v4480_v4 = vsub.f32 %v366_v21, %v401_v52  ;;  %v556_v10 = vld [vmem:[%s9439_s4 + $0x78] sm:$0xff]  ;;  %v555_v11 = vld [vmem:[%s9439_s4 + $0x70] sm:$0xff] }
  0x26   : > { %569 = vperm.xlu1 %4131, %v543_v24   ;;  %564 = vperm.xlu0 %4130, %v542_v25   ;;  %v4455_v56 = vsub.f32 %v361_v13, %v402_v53  ;;  %v4457_v57 = vsub.f32 %v363_v14, %v402_v53  ;;  %v4474_v0 = vsub.f32 %v365_v16, %v402_v53  ;;  %v4509_v20 = vld [vmem:[%s9440_s5 + $0x10] sm:$0xff]  ;;  %v4516_v25 = vld [vmem:[%s9440_s5 + $0x18] sm:$0xff] }
  0x27   : > { %v411_v62 = vmul.f32 %v4451_v54, %v4451_v54  ;;  %v413_v63 = vmul.f32 %v4453_v55, %v4453_v55  ;;  %v415_v5 = vmul.f32 %v4468_v61, %v4468_v61  ;;  %v4484_v7 = vsub.f32 %v367_v22, %v402_v53 }
  0x28   : > { %v412_v1 = vmul.f32 %v4455_v56, %v4455_v56  ;;  %v414_v2 = vmul.f32 %v4457_v57, %v4457_v57  ;;  %v416_v8 = vmul.f32 %v4474_v0, %v4474_v0  ;;  %v417_v13 = vmul.f32 %v4480_v4, %v4480_v4 }
  0x29   : > { %v419_v6 = vadd.f32 %v413_v63, %v411_v62  ;;  %v418_v15 = vmul.f32 %v4484_v7, %v4484_v7 }
  0x2a   : > { %v428_v9 = vadd.f32 %v414_v2, %v412_v1 }
  0x2b   : > { %v420_v14 = vadd.f32 %v419_v6, %v415_v5 }
  0x2c   : > { %v429_v16 = vadd.f32 %v428_v9, %v416_v8 }
  0x2d   : > { %589 = vperm.xlu2 %4132, %v547_v35   ;;  %v421_v17 = vadd.f32 %v420_v14, %v417_v13 }
  0x2e   : > { %584 = vperm.xlu1 %4131, %v546_v38   ;;  %579 = vperm.xlu0 %4130, %v545_v39   ;;  %v430_v18 = vadd.f32 %v429_v16, %v418_v15  ;;  %v4545_v38 = vld [vmem:[%s9440_s5 + $0x58] sm:$0xff] }
  0x2f   : > { %v422_v21 = vrot.slane %v421_v17, 4 }
  0x30   : > { %v431_v22 = vrot.slane %v430_v18, 4 }
  0x31   : > { %v423_v23 = vadd.f32 %v422_v21, %v421_v17 }
  0x32   : > { %v432_v24 = vadd.f32 %v431_v22, %v430_v18 }
  0x33   : > { %v424_v27 = vrot.slane %v423_v23, 2 }
  0x34   : > { %v433_v28 = vrot.slane %v432_v24, 2 }
  0x35   : > { %604 = vperm.xlu2 %4132, %v550_v49   ;;  %v425_v29 = vadd.f32 %v424_v27, %v423_v23 }
  0x36   : > { %599 = vperm.xlu1 %4131, %v549_v50   ;;  %594 = vperm.xlu0 %4130, %v548_v51   ;;  %v434_v30 = vadd.f32 %v433_v28, %v432_v24 }
  0x37   : > { %v426_v33 = vrot.slane %v425_v29, 1 }
  0x38   : > { %v435_v34 = vrot.slane %v434_v30, 1 }
  0x39   : > { %v427_v35 = vadd.f32 %v426_v33, %v425_v29 }
  0x3a   : > { %v436_v36 = vadd.f32 %v435_v34, %v434_v30 }
  0x3b   : > { %v437_v39 = vmul.f32 %v427_v35, %v4438_v47  ;;  %v525_v35 = vld [vmem:[%s9438_s3] sm:$0xff] }
  0x3c   : > { %v438_v40 = vmul.f32 %v436_v36, %v4438_v47  ;;  %v536_v36 = vld [vmem:[%s9438_s3 + $0x58] sm:$0xff] }
  0x3d   : > { %619 = vperm.xlu2 %4132, %v553_v58   ;;  %v439_v41 = vadd.f32 1e-05, %v437_v39  ;;  %v4586_v39 = vld [vmem:[%s9438_s3 + $0x50] sm:$0xff] }
  0x3e   : > { %614 = vperm.xlu1 %4131, %v552_v59   ;;  %609 = vperm.xlu0 %4130, %v551_v60   ;;  %v440_v42 = vadd.f32 1e-05, %v438_v40  ;;  %v526_v40 = vld [vmem:[%s9438_s3 + $0x8] sm:$0xff] }
  0x3f   : > { %4168 = vrsqrt.f32 %v439_v41  ;;  %vm447_vm1 = vweird.f32 %v439_v41 }
  0x40   : > { %4170 = vrsqrt.f32 %v440_v42  ;;  %vm457_vm3 = vweird.f32 %v440_v42 }
  0x45   : > { %634 = vperm.xlu2 %4132, %v556_v10   ;;  %v4169_v45 = vpop.eup %4168 }
  0x46   : > { %629 = vperm.xlu1 %4131, %v555_v11   ;;  %624 = vperm.xlu0 %4130, %v554_v12   ;;  %v4171_v47 = vpop.eup %4170  ;;  %v442_v48 = vmul.f32 %v4169_v45, %v439_v41  ;;  %vm448_vm2 = vweird.f32 %v4169_v45  ;;  %v537_v41 = vld [vmem:[%s9438_s3 + $0x60] sm:$0xff] }
  0x47   : > { %v452_v49 = vmul.f32 %v4171_v47, %v440_v42  ;;  %vm458_vm4 = vweird.f32 %v4171_v47  ;;  %vm449_vm5 = vmor %vm447_vm1, %vm448_vm2  ;;  %v527_v42 = vld [vmem:[%s9438_s3 + $0x10] sm:$0xff] }
  0x48   : > { %v443_v50 = vmul.f32 %v4169_v45, %v442_v48  ;;  %vm459_vm6 = vmor %vm457_vm3, %vm458_vm4  ;;  %v539_v48 = vld [vmem:[%s9438_s3 + $0x70] sm:$0xff] }
  0x49   : > { %v453_v51 = vmul.f32 %v4171_v47, %v452_v49  ;;  %v4292_v49 = vmov 1  }
  0x4a   : > { %v444_v52 = vmul.f32 0.5, %v443_v50  ;;  %v529_v50 = vld [vmem:[%s9438_s3 + $0x20] sm:$0xff] }
  0x4b   : > { %v454_v53 = vmul.f32 0.5, %v453_v51  ;;  %v540_v51 = vld [vmem:[%s9438_s3 + $0x78] sm:$0xff] }
  0x4c   : > { %v445_v60 = vsub.f32 1.5, %v444_v52  ;;  %v4634_v52 = vld [vmem:[%s9440_s5 + $0x20] sm:$0xff] }
  0x4d   : > { %987 = vperm.xlu2 %4132, %v4504_v19   ;;  %v455_v62 = vsub.f32 1.5, %v454_v53  ;;  %v530_v53 = vld [vmem:[%s9438_s3 + $0x28] sm:$0xff] }
  0x4e   : > { %997 = vperm.xlu1 %4131, %v4509_v20   ;;  %v446_v63 = vmul.f32 %v4169_v45, %v445_v60  ;;  %4134 = vset.pattern.permute.xlu0 %v4292_v49  ;;  %v4664_v60 = vld [vmem:[%s9440_s5 + $0x50] sm:$0xff] }
  0x4f   : > { %v456_v1 = vmul.f32 %v4171_v47, %v455_v62  ;;  %v531_v62 = vld [vmem:[%s9438_s3 + $0x30] sm:$0xff] }
  0x50   : > { %v450_v8 = vsel %vm449_vm5, %v4169_v45, %v446_v63  ;;  %v538_v45 = vld [vmem:[%s9438_s3 + $0x68] sm:$0xff] }
  0x51   : > { %v460_v9 = vsel %vm459_vm6, %v4171_v47, %v456_v1  ;;  %v467_v10 = vmul.f32 %v450_v8, %v4480_v4  ;;  %v465_v12 = vmul.f32 %v450_v8, %v4468_v61  ;;  %v463_v13 = vmul.f32 %v450_v8, %v4453_v55  ;;  %v528_v47 = vld [vmem:[%s9438_s3 + $0x18] sm:$0xff]  ;;  %v4677_v1 = vld [vmem:[%s9440_s5 + $0x68] sm:$0xff] }
  0x52   : > { %v468_v11 = vmul.f32 %v460_v9, %v4484_v7  ;;  %v466_v14 = vmul.f32 %v460_v9, %v4474_v0  ;;  %v464_v15 = vmul.f32 %v460_v9, %v4457_v57  ;;  %v461_v18 = vmul.f32 %v450_v8, %v4451_v54 }
  0x53   : > { %v462_v23 = vmul.f32 %v460_v9, %v4455_v56  ;;  %v534_v9 = vld [vmem:[%s9438_s3 + $0x48] sm:$0xff] }
  0x55   : > { %1002 = vperm.xlu2 %4132, %v4516_v25  }
  0x56   : > { %1012 = vperm.xlu1 %4131, %v4521_v26  }
  0x5d   : > { %1017 = vperm.xlu2 %4132, %v4528_v31  }
  0x5e   : > { %1027 = vperm.xlu1 %4131, %v4533_v32  }
  0x65   : > { %1032 = vperm.xlu2 %4132, %v4540_v37  }
  0x66   : > { %1042 = vperm.xlu1 %4131, %v4545_v38  }
  0x67   : > { %v500_v6 = vpop.permute.xlu2 %499 }
  0x6d   : > { %1047 = vperm.xlu2 %4132, %v4554_v43  }
  0x6e   : > { %1057 = vperm.xlu1 %4131, %v4559_v44  }
  0x6f   : > { %v505_v29 = vpop.permute.xlu2 %504 }
  0x75   : > { %1062 = vperm.xlu2 %4132, %v4566_v46  }
  0x76   : > { %4135 = vset.pattern.permute.xlu1 %v4292_v49 }
  0x77   : > { %1269 = vperm.xlu1 %4135, %v4509_v20   ;;  %v560_v63 = vpop.permute.xlu2 %559 }
  0x7d   : > { %4133 = vset.pattern.permute.xlu2 %v4292_v49 }
  0x7e   : > { %1261 = vperm.xlu2 %4133, %v4504_v19  }
  0x7f   : > { %1277 = vperm.xlu1 %4135, %v4634_v52  }
  0x80   : > { %v482_v58 = vpop.permute.xlu1 %481  ;;  %v472_v59 = vpop.permute.xlu0 %471 }
  0x81   : > { %v493_v27 = vmul.f32 %v482_v58, %v465_v12  ;;  %v494_v28 = vmul.f32 %v482_v58, %v466_v14  ;;  %v489_v0 = vmul.f32 %v472_v59, %v461_v18  ;;  %v490_v30 = vmul.f32 %v472_v59, %v462_v23  ;;  %v4648_v58 = vld [vmem:[%s9440_s5 + $0x8] sm:$0xff]  ;;  %v4653_v59 = vld [vmem:[%s9440_s5 + $0x38] sm:$0xff] }
  0x82   : > { %1265 = vperm.xlu0 %4134, %v4648_v58  }
  0x83   : > { %v517_v33 = vadd.f32 %v500_v6, %v489_v0  ;;  %v518_v34 = vadd.f32 %v500_v6, %v490_v30  ;;  %v533_v6 = vld [vmem:[%s9438_s3 + $0x40] sm:$0xff] }
  0x86   : > { %1273 = vperm.xlu2 %4133, %v4516_v25  }
  0x87   : > { %1289 = vperm.xlu1 %4135, %v4653_v59  }
  0x88   : > { %v487_v2 = vpop.permute.xlu1 %486  ;;  %v477_v5 = vpop.permute.xlu0 %476 }
  0x89   : > { %v495_v16 = vmul.f32 %v487_v2, %v467_v10  ;;  %v496_v17 = vmul.f32 %v487_v2, %v468_v11  ;;  %v491_v7 = vmul.f32 %v477_v5, %v463_v13  ;;  %v492_v61 = vmul.f32 %v477_v5, %v464_v15  ;;  %v532_v2 = vld [vmem:[%s9438_s3 + $0x38] sm:$0xff]  ;;  %v4686_v5 = vpop.permute.xlu2 %574 }
  0x8a   : > { %1285 = vperm.xlu0 %4134, %v4528_v31  }
  0x8b   : > { %v519_v54 = vadd.f32 %v505_v29, %v491_v7  ;;  %v520_v56 = vadd.f32 %v505_v29, %v492_v61 }
  0x8e   : > { %1281 = vperm.xlu2 %4133, %v4521_v26  }
  0x8f   : > { %1301 = vperm.xlu1 %4135, %v4664_v60  }
  0x90   : > { %v515_v21 = vpop.permute.xlu1 %514  ;;  %v510_v22 = vpop.permute.xlu0 %509 }
  0x91   : > { %v523_v24 = vadd.f32 %v515_v21, %v495_v16  ;;  %v524_v4 = vadd.f32 %v515_v21, %v496_v17  ;;  %v521_v55 = vadd.f32 %v510_v22, %v493_v27  ;;  %v522_v57 = vadd.f32 %v510_v22, %v494_v28  ;;  %v4696_v8 = vpop.permute.xlu2 %589 }
  0x92   : > { %1297 = vperm.xlu0 %4134, %v4540_v37  }
  0x93   : > { %698 = vmatpush.msra.mxu0 %v523_v24  ;;  %4095 = vmatpush.msra.mxu2 %v523_v24 }
  0x94   : > { %763 = vmatpush.msra.mxu1 %v524_v4  ;;  %4099 = vmatpush.msra.mxu3 %v524_v4 }
  0x95   : > { %699 = vmatpush.msra.mxu0 %v521_v55  ;;  %4096 = vmatpush.msra.mxu2 %v521_v55 }
  0x96   : > { %764 = vmatpush.msra.mxu1 %v522_v57  ;;  %4100 = vmatpush.msra.mxu3 %v522_v57 }
  0x97   : > { %700 = vmatpush.msra.mxu0 %v519_v54  ;;  %4097 = vmatpush.msra.mxu2 %v519_v54 }
  0x98   : > { %765 = vmatpush.msra.mxu1 %v520_v56  ;;  %4101 = vmatpush.msra.mxu3 %v520_v56  ;;  %v4710_v12 = vpop.permute.xlu1 %569  ;;  %v565_v16 = vpop.permute.xlu0 %564 }
  0x99   : > { %701 = vmatpush.msra.mxu0 %v517_v33  ;;  %4098 = vmatpush.msra.mxu2 %v517_v33  ;;  %v4704_v10 = vpop.permute.xlu2 %604 }
  0x9a   : > { %766 = vmatpush.msra.mxu1 %v518_v34  ;;  %4102 = vmatpush.msra.mxu3 %v518_v34 }
  0x9b   : > { %4051 = vmatmul.msk.f32.vlgmr.msra.gmra.mxu0 %vm637_vm7, %v525_v35  ;;  %4062 = vmatmul.msk.f32.vlgmr.msra.gmra.mxu2 %vm637_vm7, %v536_v36 }
  0x9c   : > { %4067 = vmatmul.msk.f32.vlgmr.msra.gmra.mxu1 %vm637_vm7, %v525_v35  ;;  %4077 = vmatmul.msk.f32.vlgmr.msra.gmra.mxu3 %vm637_vm7, %v4586_v39 }
  0x9d   : > { %1293 = vperm.xlu2 %4133, %v4533_v32   ;;  %1313 = vperm.xlu1 %4135, %v4677_v1  }
  0x9e   : > { %1309 = vperm.xlu0 %4134, %v4554_v43  }
  0xa0   : > { %v4714_v14 = vpop.permute.xlu1 %584  ;;  %v4722_v21 = vpop.permute.xlu0 %579 }
  0xa1   : > { %v4708_v11 = vpop.permute.xlu2 %619 }
  0xa3   : > { %4052 = vmatmul.msk.f32.gmra.mxu0 %vm637_vm7, %v526_v40  ;;  %4063 = vmatmul.msk.f32.gmra.mxu2 %vm637_vm7, %v537_v41 }
  0xa4   : > { %4068 = vmatmul.msk.f32.gmra.mxu1 %vm637_vm7, %v526_v40  ;;  %4078 = vmatmul.msk.f32.gmra.mxu3 %vm637_vm7, %v536_v36 }
  0xa5   : > { %1305 = vperm.xlu2 %4133, %v4545_v38  }
  0xa6   : > { %1321 = vperm.xlu0 %4134, %v4566_v46  }
  0xa8   : > { %v4718_v17 = vpop.permute.xlu1 %599  ;;  %v4732_v28 = vpop.permute.xlu0 %594 }
  0xa9   : > { %v4712_v13 = vpop.permute.xlu2 %634 }
  0xab   : > { %4053 = vmatmul.msk.f32.gmra.mxu0 %vm637_vm7, %v527_v42  ;;  %4064 = vmatmul.msk.f32.gmra.mxu2 %vm637_vm7, %v538_v45 }
  0xac   : > { %4069 = vmatmul.msk.f32.gmra.mxu1 %vm637_vm7, %v527_v42  ;;  %4079 = vmatmul.msk.f32.gmra.mxu3 %vm637_vm7, %v537_v41 }
  0xad   : > { %1317 = vperm.xlu2 %4133, %v4559_v44  }
  0xb0   : > { %v615_v4 = vpop.permute.xlu1 %614  ;;  %v4748_v30 = vpop.permute.xlu0 %609 }
  0xb1   : > { %v4716_v15 = vpop.permute.xlu2 %987 }
  0xb2   : > { %9807 = vst [vmem:[#allocation2_spill] sm:$0xff] %v4716_v15 }
  0xb3   : > { %4054 = vmatmul.msk.f32.gmra.mxu0 %vm637_vm7, %v528_v47  ;;  %4065 = vmatmul.msk.f32.gmra.mxu2 %vm637_vm7, %v539_v48 }
  0xb4   : > { %4070 = vmatmul.msk.f32.gmra.mxu1 %vm637_vm7, %v528_v47  ;;  %4080 = vmatmul.msk.f32.gmra.mxu3 %vm637_vm7, %v538_v45 }
  0xb8   : > { %v4742_v0 = vpop.permute.xlu1 %629 }
  0xb9   : > { %v4720_v18 = vpop.permute.xlu2 %1002 }
  0xba   : > { %9808 = vst [vmem:[#allocation3_spill] sm:$0xff] %v4720_v18 }
  0xbb   : > { %4055 = vmatmul.msk.f32.gmra.mxu0 %vm637_vm7, %v529_v50  ;;  %4066 = vmatmul.msk.f32.gmra.mxu2 %vm637_vm7, %v540_v51 }
  0xbc   : > { %4071 = vmatmul.msk.f32.gmra.mxu1 %vm637_vm7, %v529_v50  ;;  %4081 = vmatmul.msk.f32.gmra.mxu3 %vm637_vm7, %v539_v48  ;;  %v625_v50 = vpop.permute.xlu0 %624 }
  0xc0   : > { %v4762_v34 = vpop.permute.xlu1 %997 }
  0xc1   : > { %v4728_v7 = vpop.permute.xlu2 %1017  ;;  %9815 = vst [vmem:[#allocation10_spill] sm:$0xff] %v4762_v34 }
  0xc2   : > { %9810 = vst [vmem:[#allocation5_spill] sm:$0xff] %v4728_v7 }
  0xc3   : > { %4056 = vmatmul.msk.f32.gmra.mxu0 %vm637_vm7, %v530_v53 }
  0xc4   : > { %4072 = vmatmul.msk.f32.gmra.mxu1 %vm637_vm7, %v530_v53  ;;  %4082 = vmatmul.msk.f32.gmra.mxu3 %vm637_vm7, %v540_v51 }
  0xc8   : > { %v4776_v42 = vpop.permute.xlu1 %1012 }
  0xc9   : > { %v4746_v57 = vpop.permute.xlu2 %1032  ;;  %9818 = vst [vmem:[#allocation13_spill] sm:$0xff] %v4776_v42 }
  0xca   : > { %9812 = vst [vmem:[#allocation7_spill] sm:$0xff] %v4746_v57 }
  0xcb   : > { %4057 = vmatmul.msk.f32.gmra.mxu0 %vm637_vm7, %v531_v62 }
  0xcc   : > { %4073 = vmatmul.msk.f32.gmra.mxu1 %vm637_vm7, %v531_v62 }
  0xd0   : > { %v4792_v53 = vpop.permute.xlu1 %1027 }
  0xd1   : > { %v4764_v36 = vpop.permute.xlu2 %1047  ;;  %9822 = vst [vmem:[#allocation17_spill] sm:$0xff] %v4792_v53 }
  0xd2   : > { %9816 = vst [vmem:[#allocation11_spill] sm:$0xff] %v4764_v36 }
  0xd3   : > { %4058 = vmatmul.msk.f32.gmra.mxu0 %vm637_vm7, %v532_v2 }
  0xd4   : > { %4074 = vmatmul.msk.f32.gmra.mxu1 %vm637_vm7, %v532_v2 }
  0xd9   : > { %v4778_v45 = vpop.permute.xlu2 %1062 }
  0xda   : > { %9819 = vst [vmem:[#allocation14_spill] sm:$0xff] %v4778_v45 }
  0xdb   : > { %4059 = vmatmul.msk.f32.gmra.mxu0 %vm637_vm7, %v533_v6 }
  0xdc   : > { %4075 = vmatmul.msk.f32.gmra.mxu1 %vm637_vm7, %v533_v6 }
  0xe1   : > { %v4788_v51 = vpop.permute.xlu2 %1261 }
  0xe2   : > { %9821 = vst [vmem:[#allocation16_spill] sm:$0xff] %v4788_v51 }
  0xe3   : > { %4060 = vmatmul.msk.f32.gmra.mxu0 %vm637_vm7, %v534_v9 }
  0xe4   : > { %4076 = vmatmul.msk.f32.gmra.mxu1 %vm637_vm7, %v534_v9 }
  0xeb   : > { %4061 = vmatmul.msk.f32.gmra.mxu0 %vm637_vm7, %v4586_v39 }
 0x118   : > { %v703_v22 = vpop.f32.mrf.mxu0 }
 0x119   : > { %v4724_v23 = vadd.f32 %v703_v22, %v560_v63  ;;  %v768_v24 = vpop.f32.mrf.mxu1  ;;  %v4812_v22 = vpop.permute.xlu1 %1042 }
 0x11a   : > { %v4726_v27 = vadd.f32 %v768_v24, %v560_v63  ;;  %9827 = vst [vmem:[#allocation22_spill] sm:$0xff] %v4812_v22 }
 0x11b   : > { %852 = vrot.lane.b32.xlu0 %v4724_v23, %s4293_s16 }
 0x11c   : > { %9809 = vst [vmem:[#allocation4_spill] sm:$0xff] %v4726_v27  ;;  %884 = vrot.lane.b32.xlu1 %v4726_v27, %s4293_s16 }
 0x11e   : > { %v736_v61 = vpop.f32.mrf.mxu2 }
 0x11f   : > { %v4736_v55 = vadd.f32 %v736_v61, %v615_v4  ;;  %v798_v29 = vpop.f32.mrf.mxu3 }
 0x120   : > { %v4751_v56 = vadd.f32 %v798_v29, %v4748_v30  ;;  %v706_v39 = vpop.f32.mrf.mxu0  ;;  %v4835_v29 = vpop.permute.xlu0 %1265 }
 0x121   : > { %9811 = vst [vmem:[#allocation6_spill] sm:$0xff] %v4736_v55  ;;  %874 = vrot.lane.b32.xlu2 %v4736_v55, %s4293_s16  ;;  %v4770_v41 = vadd.f32 %v706_v39, %v565_v16  ;;  %v771_v47 = vpop.f32.mrf.mxu1 }
 0x122   : > { %9813 = vst [vmem:[#allocation8_spill] sm:$0xff] %v4751_v56  ;;  %v4786_v48 = vadd.f32 %v771_v47, %v565_v16  ;;  %v4808_v16 = vpop.permute.xlu2 %1273 }
 0x123   : > { %1129 = vrot.lane.b32.xlu0 %v4724_v23, %s4294_s17  ;;  %9826 = vst [vmem:[#allocation21_spill] sm:$0xff] %v4808_v16 }
 0x124   : > { %1161 = vrot.lane.b32.xlu1 %v4726_v27, %s4294_s17  ;;  %9820 = vst [vmem:[#allocation15_spill] sm:$0xff] %v4786_v48 }
 0x125   : > { %9830 = vst [vmem:[#allocation25_spill] sm:$0xff] %v4835_v29 }
 0x126   : > { %v739_v54 = vpop.f32.mrf.mxu2 }
 0x127   : > { %v4754_v33 = vadd.f32 %v739_v54, %v4708_v11  ;;  %v801_v35 = vpop.f32.mrf.mxu3 }
 0x128   : > { %v4766_v40 = vadd.f32 %v801_v35, %v615_v4  ;;  %v709_v24 = vpop.f32.mrf.mxu0  ;;  %v4824_v4 = vpop.permute.xlu1 %1057 }
 0x129   : > { %9814 = vst [vmem:[#allocation9_spill] sm:$0xff] %v4754_v33  ;;  %904 = vrot.lane.b32.xlu2 %v4751_v56, %s4293_s16  ;;  %v774_v63 = vpop.f32.mrf.mxu1  ;;  %v4827_v61 = vadd.f32 %v709_v24, %v4710_v12  ;;  %v4856_v24 = vpop.permute.xlu0 %1285 }
 0x12a   : > { %9817 = vst [vmem:[#allocation12_spill] sm:$0xff] %v4766_v40  ;;  %v4801_v6 = vadd.f32 %v774_v63, %v4710_v12 }
 0x12b   : > { %876 = vrot.lane.b32.xlu0 %v4754_v33, %s4293_s16  ;;  %9829 = vst [vmem:[#allocation24_spill] sm:$0xff] %v4824_v4 }
 0x12c   : > { %1388 = vrot.lane.b32.xlu1 %v4724_v23, %s4295_s19  ;;  %9824 = vst [vmem:[#allocation19_spill] sm:$0xff] %v4801_v6 }
 0x12d   : > { %9835 = vst [vmem:[#allocation30_spill] sm:$0xff] %v4856_v24 }
 0x12e   : > { %v742_v49 = vpop.f32.mrf.mxu2 }
 0x12f   : > { %v4794_v62 = vadd.f32 %v742_v49, %v625_v50  ;;  %v804_v2 = vpop.f32.mrf.mxu3 }
 0x130   : > { %v4806_v9 = vadd.f32 %v804_v2, %v4708_v11  ;;  %v4822_v11 = vpop.permute.xlu2 %1281  ;;  %v712_v54 = vpop.f32.mrf.mxu0 }
 0x131   : > { %1151 = vrot.lane.b32.xlu2 %v4736_v55, %s4294_s17  ;;  %9823 = vst [vmem:[#allocation18_spill] sm:$0xff] %v4794_v62  ;;  %v4837_v35 = vpop.permute.xlu1 %1269  ;;  %v777_v39 = vpop.f32.mrf.mxu1  ;;  %v4842_v12 = vadd.f32 %v712_v54, %v4686_v5 }
 0x132   : > { %9825 = vst [vmem:[#allocation20_spill] sm:$0xff] %v4806_v9  ;;  %v4847_v49 = vadd.f32 %v777_v39, %v4686_v5 }
 0x133   : > { %906 = vrot.lane.b32.xlu0 %v4766_v40, %s4293_s16  ;;  %9828 = vst [vmem:[#allocation23_spill] sm:$0xff] %v4822_v11 }
 0x134   : > { %854 = vrot.lane.b32.xlu1 %v4770_v41, %s4293_s16  ;;  %9831 = vst [vmem:[#allocation26_spill] sm:$0xff] %v4837_v35 }
 0x135   : > { %9833 = vst [vmem:[#allocation28_spill] sm:$0xff] %v4847_v49 }
 0x136   : > { %v745_v63 = vpop.f32.mrf.mxu2 }
 0x137   : > { %v4854_v2 = vadd.f32 %v745_v63, %v4742_v0  ;;  %v807_v5 = vpop.f32.mrf.mxu3 }
 0x138   : > { %v4839_v47 = vpop.permute.xlu2 %1293  ;;  %v4868_v53 = vadd.f32 %v807_v5, %v625_v50  ;;  %v715_v5 = vpop.f32.mrf.mxu0 }
 0x139   : > { %1181 = vrot.lane.b32.xlu2 %v4751_v56, %s4294_s17  ;;  %9832 = vst [vmem:[#allocation27_spill] sm:$0xff] %v4839_v47  ;;  %v4858_v54 = vpop.permute.xlu1 %1277  ;;  %v4873_v47 = vpop.permute.xlu0 %1297 }
 0x13a   : > { %9834 = vst [vmem:[#allocation29_spill] sm:$0xff] %v4854_v2 }
 0x13b   : > { %1153 = vrot.lane.b32.xlu0 %v4754_v33, %s4294_s17  ;;  %9836 = vst [vmem:[#allocation31_spill] sm:$0xff] %v4858_v54 }
 0x13c   : > { %1131 = vrot.lane.b32.xlu1 %v4770_v41, %s4294_s17  ;;  %9838 = vst [vmem:[#allocation33_spill] sm:$0xff] %v4868_v53 }
 0x13d   : > { %9840 = vst [vmem:[#allocation35_spill] sm:$0xff] %v4873_v47  ;;  %v4891_v47 = vadd.f32 %v715_v5, %v4722_v21 }
 0x13e   : > { %v748_v39 = vpop.f32.mrf.mxu2 }
 0x13f   : > { %v4871_v63 = vadd.f32 %v748_v39, %v4712_v13  ;;  %v810_v50 = vpop.f32.mrf.mxu3 }
 0x140   : > { %v4860_v3 = vpop.permute.xlu2 %1305  ;;  %v4886_v39 = vadd.f32 %v810_v50, %v4742_v0  ;;  %v780_v0 = vpop.f32.mrf.mxu1 }
 0x141   : > { %886 = vrot.lane.b32.xlu2 %v4786_v48, %s4293_s16  ;;  %9837 = vst [vmem:[#allocation32_spill] sm:$0xff] %v4860_v3  ;;  %v4877_v57 = vpop.permute.xlu1 %1289 }
 0x142   : > { %9839 = vst [vmem:[#allocation34_spill] sm:$0xff] %v4871_v63 }
 0x143   : > { %1183 = vrot.lane.b32.xlu0 %v4766_v40, %s4294_s17  ;;  %9841 = vst [vmem:[#allocation36_spill] sm:$0xff] %v4877_v57  ;;  %v4893_v57 = vpop.permute.xlu0 %1309 }
 0x144   : > { %878 = vrot.lane.b32.xlu1 %v4794_v62, %s4293_s16  ;;  %9843 = vst [vmem:[#allocation38_spill] sm:$0xff] %v4886_v39 }
 0x145   : > { %9844 = vst [vmem:[#allocation39_spill] sm:$0xff] %v4893_v57 }
 0x147   : > { %v813_v11 = vpop.f32.mrf.mxu3 }
 0x148   : > { %v4879_v7 = vpop.permute.xlu2 %1317  ;;  %v4921_v45 = vadd.f32 %v813_v11, %v4712_v13  ;;  %v718_v13 = vpop.f32.mrf.mxu0 }
 0x149   : > { %1163 = vrot.lane.b32.xlu2 %v4786_v48, %s4294_s17  ;;  %9842 = vst [vmem:[#allocation37_spill] sm:$0xff] %v4879_v7  ;;  %v4899_v54 = vpop.permute.xlu1 %1301  ;;  %v4949_v18 = vadd.f32 %v718_v13, %v4714_v14 }
 0x14a   : > { %9845 = vst [vmem:[#allocation40_spill] sm:$0xff] %v4899_v54  ;;  %v4916_v54 = vadd.f32 %v780_v0, %v4722_v21 }
 0x14b   : > { %888 = vrot.lane.b32.xlu0 %v4801_v6, %s4293_s16  ;;  %v4911_v5 = vpop.permute.xlu0 %1321  ;;  %9850 = vst [vmem:[#allocation45_spill] sm:$0xff] %v4921_v45 }
 0x14c   : > { %908 = vrot.lane.b32.xlu1 %v4806_v9, %s4293_s16  ;;  %9847 = vst [vmem:[#allocation42_spill] sm:$0xff] %v4911_v5  ;;  %v783_v5 = vpop.f32.mrf.mxu1 }
 0x14d   : > { %9849 = vst [vmem:[#allocation44_spill] sm:$0xff] %v4916_v54  ;;  %v4934_v0 = vadd.f32 %v783_v5, %v4714_v14 }
 0x150   : > { %v721_v57 = vpop.f32.mrf.mxu0 }
 0x151   : > { %1390 = vrot.lane.b32.xlu2 %v4770_v41, %s4295_s19  ;;  %v4913_v42 = vpop.permute.xlu1 %1313  ;;  %v4967_v13 = vadd.f32 %v721_v57, %v4696_v8 }
 0x152   : > { %9848 = vst [vmem:[#allocation43_spill] sm:$0xff] %v4913_v42 }
 0x153   : > { %1165 = vrot.lane.b32.xlu0 %v4801_v6, %s4294_s17 }
 0x154   : > { %1155 = vrot.lane.b32.xlu1 %v4794_v62, %s4294_s17  ;;  %v786_v5 = vpop.f32.mrf.mxu1 }
 0x155   : > { %v4954_v16 = vadd.f32 %v786_v5, %v4696_v8 }
 0x159   : > { %856 = vrot.lane.b32.xlu2 %v4827_v61, %s4293_s16 }
 0x15b   : > { %1392 = vrot.lane.b32.xlu0 %v4827_v61, %s4295_s19 }
 0x15c   : > { %1185 = vrot.lane.b32.xlu1 %v4806_v9, %s4294_s17  ;;  %v789_v35 = vpop.f32.mrf.mxu1 }
 0x15d   : > { %v4982_v8 = vadd.f32 %v789_v35, %v4732_v28 }
 0x161   : > { %1133 = vrot.lane.b32.xlu2 %v4827_v61, %s4294_s17 }
 0x163   : > { %858 = vrot.lane.b32.xlu0 %v4842_v12, %s4293_s16 }
 0x164   : > { %890 = vrot.lane.b32.xlu1 %v4847_v49, %s4293_s16 }
 0x169   : > { %880 = vrot.lane.b32.xlu2 %v4854_v2, %s4293_s16 }
 0x16b   : > { %1135 = vrot.lane.b32.xlu0 %v4842_v12, %s4294_s17 }
 0x16c   : > { %1167 = vrot.lane.b32.xlu1 %v4847_v49, %s4294_s17 }
 0x171   : > { %910 = vrot.lane.b32.xlu2 %v4868_v53, %s4293_s16 }
 0x173   : > { %882 = vrot.lane.b32.xlu0 %v4871_v63, %s4293_s16 }
 0x174   : > { %1394 = vrot.lane.b32.xlu1 %v4842_v12, %s4295_s19 }
 0x179   : > { %1157 = vrot.lane.b32.xlu2 %v4854_v2, %s4294_s17 }
 0x17b   : > { %v4895_v24 = vpop.permute.xlu2 %874  ;;  %912 = vrot.lane.b32.xlu0 %v4886_v39, %s4293_s16 }
 0x17c   : > { %860 = vrot.lane.b32.xlu1 %v4891_v47, %s4293_s16 }
 0x181   : > { %1187 = vrot.lane.b32.xlu2 %v4868_v53, %s4294_s17 }
 0x183   : > { %v4905_v50 = vpop.permute.xlu2 %904  ;;  %1159 = vrot.lane.b32.xlu0 %v4871_v63, %s4294_s17 }
 0x184   : > { %9846 = vst [vmem:[#allocation41_spill] sm:$0xff] %v4905_v50  ;;  %1137 = vrot.lane.b32.xlu1 %v4891_v47, %s4294_s17 }
 0x189   : > { %892 = vrot.lane.b32.xlu2 %v4916_v54, %s4293_s16 }
 0x18b   : > { %v4923_v50 = vpop.permute.xlu2 %1151  ;;  %1189 = vrot.lane.b32.xlu0 %v4886_v39, %s4294_s17 }
 0x18c   : > { %9851 = vst [vmem:[#allocation46_spill] sm:$0xff] %v4923_v50  ;;  %914 = vrot.lane.b32.xlu1 %v4921_v45, %s4293_s16 }
 0x18d   : > { %v4929_v7 = vpop.permute.xlu0 %852 }
 0x18e   : > { %v4931_v21 = vpop.permute.xlu1 %884 }
 0x191   : > { %1169 = vrot.lane.b32.xlu2 %v4916_v54, %s4294_s17 }
 0x193   : > { %v4938_v11 = vpop.permute.xlu2 %1181  ;;  %894 = vrot.lane.b32.xlu0 %v4934_v0, %s4293_s16 }
 0x194   : > { %9852 = vst [vmem:[#allocation47_spill] sm:$0xff] %v4938_v11  ;;  %1191 = vrot.lane.b32.xlu1 %v4921_v45, %s4294_s17 }
 0x195   : > { %v4944_v4 = vpop.permute.xlu0 %1129 }
 0x196   : > { %v4946_v42 = vpop.permute.xlu1 %1161 }
 0x199   : > { %862 = vrot.lane.b32.xlu2 %v4949_v18, %s4293_s16 }
 0x19b   : > { %v4956_v11 = vpop.permute.xlu2 %886  ;;  %1171 = vrot.lane.b32.xlu0 %v4934_v0, %s4294_s17 }
 0x19c   : > { %9853 = vst [vmem:[#allocation48_spill] sm:$0xff] %v4956_v11  ;;  %896 = vrot.lane.b32.xlu1 %v4954_v16, %s4293_s16 }
 0x19d   : > { %v4962_v36 = vpop.permute.xlu0 %876 }
 0x19e   : > { %9854 = vst [vmem:[#allocation49_spill] sm:$0xff] %v4962_v36  ;;  %v4964_v14 = vpop.permute.xlu1 %1388  ;;  %v792_v36 = vpop.f32.mrf.mxu1 }
 0x19f   : > { %9855 = vst [vmem:[#allocation50_spill] sm:$0xff] %v4964_v14  ;;  %v724_v14 = vpop.f32.mrf.mxu0  ;;  %v5000_v35 = vadd.f32 %v792_v36, %v4718_v17 }
 0x1a0   : > { %v4987_v57 = vadd.f32 %v724_v14, %v4732_v28 }
 0x1a1   : > { %1139 = vrot.lane.b32.xlu2 %v4949_v18, %s4294_s17  ;;  %9861 = vst [vmem:[#allocation56_spill] sm:$0xff] %v5000_v35 }
 0x1a3   : > { %v4971_v5 = vpop.permute.xlu2 %1163  ;;  %864 = vrot.lane.b32.xlu0 %v4967_v13, %s4293_s16 }
 0x1a4   : > { %9856 = vst [vmem:[#allocation51_spill] sm:$0xff] %v4971_v5  ;;  %1173 = vrot.lane.b32.xlu1 %v4954_v16, %s4294_s17 }
 0x1a5   : > { %v4977_v34 = vpop.permute.xlu0 %906 }
 0x1a6   : > { %v4979_v29 = vpop.permute.xlu1 %854 }
 0x1a7   : > { %9857 = vst [vmem:[#allocation52_spill] sm:$0xff] %v4979_v29  ;;  %v727_v14 = vpop.f32.mrf.mxu0  ;;  %v795_v29 = vpop.f32.mrf.mxu1 }
 0x1a9   : > { %898 = vrot.lane.b32.xlu2 %v4982_v8, %s4293_s16 }
 0x1ab   : > { %v4989_v3 = vpop.permute.xlu2 %1390  ;;  %1141 = vrot.lane.b32.xlu0 %v4967_v13, %s4294_s17 }
 0x1ac   : > { %9858 = vst [vmem:[#allocation53_spill] sm:$0xff] %v4989_v3  ;;  %866 = vrot.lane.b32.xlu1 %v4987_v57, %s4293_s16 }
 0x1ad   : > { %v4995_v22 = vpop.permute.xlu0 %1153 }
 0x1ae   : > { %9859 = vst [vmem:[#allocation54_spill] sm:$0xff] %v4995_v22  ;;  %v4997_v5 = vpop.permute.xlu1 %1131 }
 0x1af   : > { %9860 = vst [vmem:[#allocation55_spill] sm:$0xff] %v4997_v5  ;;  %v5015_v5 = vadd.f32 %v727_v14, %v4718_v17  ;;  %v5032_v17 = vadd.f32 %v795_v29, %v4704_v10 }
 0x1b1   : > { %1175 = vrot.lane.b32.xlu2 %v4982_v8, %s4294_s17  ;;  %9865 = vst [vmem:[#allocation60_spill] sm:$0xff] %v5015_v5 }
 0x1b2   : > { %9869 = vst [vmem:[#allocation64_spill] sm:$0xff] %v5032_v17 }
 0x1b3   : > { %v5004_v28 = vpop.permute.xlu2 %856  ;;  %900 = vrot.lane.b32.xlu0 %v5000_v35, %s4293_s16 }
 0x1b4   : > { %9862 = vst [vmem:[#allocation57_spill] sm:$0xff] %v5004_v28  ;;  %1143 = vrot.lane.b32.xlu1 %v4987_v57, %s4294_s17 }
 0x1b5   : > { %v5010_v3 = vpop.permute.xlu0 %1183 }
 0x1b6   : > { %9863 = vst [vmem:[#allocation58_spill] sm:$0xff] %v5010_v3  ;;  %v5012_v22 = vpop.permute.xlu1 %878 }
 0x1b7   : > { %9864 = vst [vmem:[#allocation59_spill] sm:$0xff] %v5012_v22  ;;  %v730_v22 = vpop.f32.mrf.mxu0 }
 0x1b9   : > { %868 = vrot.lane.b32.xlu2 %v5015_v5, %s4293_s16 }
 0x1bb   : > { %v5019_v36 = vpop.permute.xlu2 %1133  ;;  %1398 = vrot.lane.b32.xlu0 %v4949_v18, %s4295_s19 }
 0x1bc   : > { %9866 = vst [vmem:[#allocation61_spill] sm:$0xff] %v5019_v36  ;;  %1400 = vrot.lane.b32.xlu1 %v4967_v13, %s4295_s19 }
 0x1bd   : > { %v5025_v28 = vpop.permute.xlu0 %888 }
 0x1be   : > { %9867 = vst [vmem:[#allocation62_spill] sm:$0xff] %v5025_v28  ;;  %v5027_v11 = vpop.permute.xlu1 %908 }
 0x1bf   : > { %9868 = vst [vmem:[#allocation63_spill] sm:$0xff] %v5027_v11  ;;  %v733_v15 = vpop.f32.mrf.mxu0 }
 0x1c1   : > { %1145 = vrot.lane.b32.xlu2 %v5015_v5, %s4294_s17 }
 0x1c3   : > { %v5034_v14 = vpop.permute.xlu2 %880  ;;  %1177 = vrot.lane.b32.xlu0 %v5000_v35, %s4294_s17 }
 0x1c4   : > { %9870 = vst [vmem:[#allocation65_spill] sm:$0xff] %v5034_v14  ;;  %902 = vrot.lane.b32.xlu1 %v5032_v17, %s4293_s16 }
 0x1c5   : > { %v5040_v36 = vpop.permute.xlu0 %1165 }
 0x1c6   : > { %9871 = vst [vmem:[#allocation66_spill] sm:$0xff] %v5040_v36  ;;  %v5042_v28 = vpop.permute.xlu1 %1155  ;;  %v5057_v36 = vadd.f32 %v730_v22, %v4704_v10 }
 0x1c7   : > { %9872 = vst [vmem:[#allocation67_spill] sm:$0xff] %v5042_v28  ;;  %v5062_v28 = vadd.f32 %v733_v15, %v4748_v30 }
 0x1c8   : > { %9876 = vst [vmem:[#allocation71_spill] sm:$0xff] %v5057_v36 }
 0x1c9   : > { %1396 = vrot.lane.b32.xlu2 %v4891_v47, %s4295_s19  ;;  %9877 = vst [vmem:[#allocation72_spill] sm:$0xff] %v5062_v28 }
 0x1cb   : > { %v5046_v11 = vpop.permute.xlu2 %910  ;;  %1404 = vrot.lane.b32.xlu0 %v5015_v5, %s4295_s19 }
 0x1cc   : > { %9873 = vst [vmem:[#allocation68_spill] sm:$0xff] %v5046_v11  ;;  %1179 = vrot.lane.b32.xlu1 %v5032_v17, %s4294_s17 }
 0x1cd   : > { %v5052_v29 = vpop.permute.xlu0 %1392 }
 0x1ce   : > { %9874 = vst [vmem:[#allocation69_spill] sm:$0xff] %v5052_v29  ;;  %v5054_v14 = vpop.permute.xlu1 %1185 }
 0x1cf   : > { %9875 = vst [vmem:[#allocation70_spill] sm:$0xff] %v5054_v14 }
 0x1d1   : > { %1402 = vrot.lane.b32.xlu2 %v4987_v57, %s4295_s19 }
 0x1d3   : > { %v5064_v11 = vpop.permute.xlu2 %1157  ;;  %870 = vrot.lane.b32.xlu0 %v5057_v36, %s4293_s16 }
 0x1d4   : > { %9878 = vst [vmem:[#allocation73_spill] sm:$0xff] %v5064_v11  ;;  %872 = vrot.lane.b32.xlu1 %v5062_v28, %s4293_s16 }
 0x1d5   : > { %v5070_v29 = vpop.permute.xlu0 %858 }
 0x1d6   : > { %9879 = vst [vmem:[#allocation74_spill] sm:$0xff] %v5070_v29  ;;  %v5072_v14 = vpop.permute.xlu1 %890 }
 0x1d7   : > { %9880 = vst [vmem:[#allocation75_spill] sm:$0xff] %v5072_v14 }
 0x1d9   : > { %1408 = vrot.lane.b32.xlu2 %v5062_v28, %s4295_s19 }
 0x1db   : > { %v5076_v10 = vpop.permute.xlu2 %1187  ;;  %1147 = vrot.lane.b32.xlu0 %v5057_v36, %s4294_s17 }
 0x1dc   : > { %9881 = vst [vmem:[#allocation76_spill] sm:$0xff] %v5076_v10  ;;  %1149 = vrot.lane.b32.xlu1 %v5062_v28, %s4294_s17 }
 0x1dd   : > { %v5082_v15 = vpop.permute.xlu0 %1135 }
 0x1de   : > { %9882 = vst [vmem:[#allocation77_spill] sm:$0xff] %v5082_v15  ;;  %v5084_v30 = vpop.permute.xlu1 %1167 }
 0x1df   : > { %9883 = vst [vmem:[#allocation78_spill] sm:$0xff] %v5084_v30 }
 0x1e1   : > { %1414 = vrot.lane.b32.xlu2 %v4794_v62, %s4295_s19 }
 0x1e3   : > { %v5088_v22 = vpop.permute.xlu2 %892  ;;  %1410 = vrot.lane.b32.xlu0 %v4736_v55, %s4295_s19 }
 0x1e4   : > { %9884 = vst [vmem:[#allocation79_spill] sm:$0xff] %v5088_v22  ;;  %1406 = vrot.lane.b32.xlu1 %v5057_v36, %s4295_s19 }
 0x1e5   : > { %v5094_v11 = vpop.permute.xlu0 %882 }
 0x1e6   : > { %9885 = vst [vmem:[#allocation80_spill] sm:$0xff] %v5094_v11  ;;  %v5096_v10 = vpop.permute.xlu1 %1394 }
 0x1e7   : > { %9886 = vst [vmem:[#allocation81_spill] sm:$0xff] %v5096_v10 }
 0x1e9   : > { %1420 = vrot.lane.b32.xlu2 %v4726_v27, %s4295_s19 }
 0x1eb   : > { %v5100_v29 = vpop.permute.xlu2 %1169  ;;  %1416 = vrot.lane.b32.xlu0 %v4854_v2, %s4295_s19 }
 0x1ec   : > { %9887 = vst [vmem:[#allocation82_spill] sm:$0xff] %v5100_v29  ;;  %1412 = vrot.lane.b32.xlu1 %v4754_v33, %s4295_s19 }
 0x1ed   : > { %v5106_v22 = vpop.permute.xlu0 %912 }
 0x1ee   : > { %9888 = vst [vmem:[#allocation83_spill] sm:$0xff] %v5106_v22  ;;  %v5108_v14 = vpop.permute.xlu1 %860  ;;  %v4296_v22 = vmov 2  }
 0x1ef   : > { %9889 = vst [vmem:[#allocation84_spill] sm:$0xff] %v5108_v14  ;;  %4136 = vset.pattern.permute.xlu0 %v4296_v22  ;;  %4138 = vset.pattern.permute.xlu2 %v4296_v22 }
 0x1f0   : > { %4137 = vset.pattern.permute.xlu1 %v4296_v22 }
 0x1f1   : > { %1426 = vrot.lane.b32.xlu2 %v4847_v49, %s4295_s19 }
 0x1f3   : > { %v5112_v11 = vpop.permute.xlu2 %862  ;;  %1422 = vrot.lane.b32.xlu0 %v4786_v48, %s4295_s19 }
 0x1f4   : > { %9890 = vst [vmem:[#allocation85_spill] sm:$0xff] %v5112_v11  ;;  %1418 = vrot.lane.b32.xlu1 %v4871_v63, %s4295_s19 }
 0x1f5   : > { %v5118_v10 = vpop.permute.xlu0 %1159 }
 0x1f6   : > { %9891 = vst [vmem:[#allocation86_spill] sm:$0xff] %v5118_v10  ;;  %v5120_v29 = vpop.permute.xlu1 %1137 }
 0x1f7   : > { %9892 = vst [vmem:[#allocation87_spill] sm:$0xff] %v5120_v29 }
 0x1f9   : > { %1432 = vrot.lane.b32.xlu2 %v4954_v16, %s4295_s19 }
 0x1fb   : > { %v5124_v14 = vpop.permute.xlu2 %1139  ;;  %1428 = vrot.lane.b32.xlu0 %v4916_v54, %s4295_s19 }
 0x1fc   : > { %9893 = vst [vmem:[#allocation88_spill] sm:$0xff] %v5124_v14  ;;  %1424 = vrot.lane.b32.xlu1 %v4801_v6, %s4295_s19 }
 0x1fd   : > { %v5130_v11 = vpop.permute.xlu0 %1189 }
 0x1fe   : > { %9894 = vst [vmem:[#allocation89_spill] sm:$0xff] %v5130_v11  ;;  %v5132_v10 = vpop.permute.xlu1 %914 }
 0x1ff   : > { %9895 = vst [vmem:[#allocation90_spill] sm:$0xff] %v5132_v10 }
 0x201   : > { %1438 = vrot.lane.b32.xlu2 %v5032_v17, %s4295_s19 }
 0x203   : > { %v5136_v29 = vpop.permute.xlu2 %898  ;;  %1434 = vrot.lane.b32.xlu0 %v4982_v8, %s4295_s19 }
 0x204   : > { %9896 = vst [vmem:[#allocation91_spill] sm:$0xff] %v5136_v29  ;;  %1430 = vrot.lane.b32.xlu1 %v4934_v0, %s4295_s19 }
 0x205   : > { %v5142_v22 = vpop.permute.xlu0 %894 }
 0x206   : > { %9897 = vst [vmem:[#allocation92_spill] sm:$0xff] %v5142_v22  ;;  %v5144_v14 = vpop.permute.xlu1 %1191 }
 0x207   : > { %9898 = vst [vmem:[#allocation93_spill] sm:$0xff] %v5144_v14 }
 0x209   : > { %1444 = vrot.lane.b32.xlu2 %v4806_v9, %s4295_s19 }
 0x20b   : > { %v5148_v11 = vpop.permute.xlu2 %1175  ;;  %1440 = vrot.lane.b32.xlu0 %v4751_v56, %s4295_s19 }
 0x20c   : > { %9899 = vst [vmem:[#allocation94_spill] sm:$0xff] %v5148_v11  ;;  %1436 = vrot.lane.b32.xlu1 %v5000_v35, %s4295_s19 }
 0x20d   : > { %v5154_v29 = vpop.permute.xlu0 %1171 }
 0x20e   : > { %9900 = vst [vmem:[#allocation95_spill] sm:$0xff] %v5154_v29  ;;  %v5156_v10 = vpop.permute.xlu1 %896 }
 0x20f   : > { %9901 = vst [vmem:[#allocation96_spill] sm:$0xff] %v5156_v10 }
 0x211   : > { %1450 = vrot.lane.b32.xlu2 %v4921_v45, %s4295_s19 }
 0x213   : > { %v5160_v22 = vpop.permute.xlu2 %868  ;;  %1446 = vrot.lane.b32.xlu0 %v4868_v53, %s4295_s19 }
 0x214   : > { %9902 = vst [vmem:[#allocation97_spill] sm:$0xff] %v5160_v22  ;;  %1442 = vrot.lane.b32.xlu1 %v4766_v40, %s4295_s19 }
 0x215   : > { %v5166_v11 = vpop.permute.xlu0 %864 }
 0x216   : > { %9903 = vst [vmem:[#allocation98_spill] sm:$0xff] %v5166_v11  ;;  %v5168_v14 = vpop.permute.xlu1 %1173 }
 0x217   : > { %9904 = vst [vmem:[#allocation99_spill] sm:$0xff] %v5168_v14 }
 0x219   : > { %1528 = vperm.xlu2 %4138, %v4509_v20  }
 0x21b   : > { %v5171_v29 = vpop.permute.xlu2 %1145  ;;  %1520 = vperm.xlu0 %4136, %v4504_v19  }
 0x21c   : > { %9905 = vst [vmem:[#allocation100_spill] sm:$0xff] %v5171_v29  ;;  %1448 = vrot.lane.b32.xlu1 %v4886_v39, %s4295_s19  ;;  %s9414_s19 = scalar_lea.vmem %s9445_s10, %s4093_s27 }
 0x21d   : > { %v5176_v22 = vpop.permute.xlu0 %1141 }
 0x21e   : > { %9906 = vst [vmem:[#allocation101_spill] sm:$0xff] %v5176_v22  ;;  %v5178_v10 = vpop.permute.xlu1 %866 }
 0x21f   : > { %9907 = vst [vmem:[#allocation102_spill] sm:$0xff] %v5178_v10 }
 0x221   : > { %1536 = vperm.xlu2 %4138, %v4634_v52  }
 0x223   : > { %v5181_v15 = vpop.permute.xlu2 %1396  ;;  %1540 = vperm.xlu0 %4136, %v4521_v26  }
 0x224   : > { %9908 = vst [vmem:[#allocation103_spill] sm:$0xff] %v5181_v15  ;;  %1524 = vperm.xlu1 %4137, %v4648_v58  }
 0x225   : > { %v5185_v20 = vpop.permute.xlu0 %900 }
 0x226   : > { %9909 = vst [vmem:[#allocation104_spill] sm:$0xff] %v5185_v20  ;;  %v5187_v29 = vpop.permute.xlu1 %1143  ;;  %v5416_v20 = vld [vmem:[%s9440_s5 + $0x60] sm:$0xff] }
 0x227   : > { %9910 = vst [vmem:[#allocation105_spill] sm:$0xff] %v5187_v29 }
 0x229   : > { %1548 = vperm.xlu2 %4138, %v4653_v59  }
 0x22b   : > { %v5190_v19 = vpop.permute.xlu2 %1402  ;;  %1552 = vperm.xlu0 %4136, %v4533_v32  }
 0x22c   : > { %9911 = vst [vmem:[#allocation106_spill] sm:$0xff] %v5190_v19  ;;  %1532 = vperm.xlu1 %4137, %v4516_v25  }
 0x22d   : > { %v5194_v10 = vpop.permute.xlu0 %1398 }
 0x22e   : > { %9912 = vst [vmem:[#allocation107_spill] sm:$0xff] %v5194_v10  ;;  %v5196_v11 = vpop.permute.xlu1 %1400 }
 0x22f   : > { %9913 = vst [vmem:[#allocation108_spill] sm:$0xff] %v5196_v11 }
 0x231   : > { %1560 = vperm.xlu2 %4138, %v4664_v60  }
 0x233   : > { %v5199_v26 = vpop.permute.xlu2 %1408  ;;  %1564 = vperm.xlu0 %4136, %v4545_v38  }
 0x234   : > { %9914 = vst [vmem:[#allocation109_spill] sm:$0xff] %v5199_v26  ;;  %1544 = vperm.xlu1 %4137, %v4528_v31  }
 0x235   : > { %v5203_v15 = vpop.permute.xlu0 %1177 }
 0x236   : > { %9915 = vst [vmem:[#allocation110_spill] sm:$0xff] %v5203_v15  ;;  %v5205_v29 = vpop.permute.xlu1 %902  ;;  %v5397_v15 = vld [vmem:[%s9440_s5 + $0x48] sm:$0xff] }
 0x237   : > { %9916 = vst [vmem:[#allocation111_spill] sm:$0xff] %v5205_v29 }
 0x239   : > { %1572 = vperm.xlu2 %4138, %v4677_v1  }
 0x23b   : > { %v5208_v32 = vpop.permute.xlu2 %1414  ;;  %1576 = vperm.xlu0 %4136, %v4559_v44  }
 0x23c   : > { %9917 = vst [vmem:[#allocation112_spill] sm:$0xff] %v5208_v32  ;;  %1556 = vperm.xlu1 %4137, %v4540_v37  }
 0x23d   : > { %v5212_v25 = vpop.permute.xlu0 %1404 }
 0x23e   : > { %9918 = vst [vmem:[#allocation113_spill] sm:$0xff] %v5212_v25  ;;  %v5214_v19 = vpop.permute.xlu1 %1179 }
 0x23f   : > { %9919 = vst [vmem:[#allocation114_spill] sm:$0xff] %v5214_v19  ;;  %v5435_v19 = vld [vmem:[%s9440_s5 + $0x78] sm:$0xff] }
 0x241   : > { %1647 = vrot.lane.b32.xlu2 %v4724_v23, %s4297_s20 }
 0x243   : > { %v5218_v31 = vpop.permute.xlu2 %1420  ;;  %1649 = vrot.lane.b32.xlu0 %v4770_v41, %s4297_s20 }
 0x244   : > { %9920 = vst [vmem:[#allocation115_spill] sm:$0xff] %v5218_v31  ;;  %1568 = vperm.xlu1 %4137, %v4554_v43   ;;  %v4299_v31 = vmov 4  }
 0x245   : > { %v5223_v38 = vpop.permute.xlu0 %870 }
 0x246   : > { %9921 = vst [vmem:[#allocation116_spill] sm:$0xff] %v5223_v38  ;;  %v5225_v44 = vpop.permute.xlu1 %872  ;;  %v5443_v38 = vld [vmem:[%s9440_s5 + $0x58] sm:$0xff] }
 0x247   : > { %9922 = vst [vmem:[#allocation117_spill] sm:$0xff] %v5225_v44 }
 0x249   : > { %1653 = vrot.lane.b32.xlu2 %v4842_v12, %s4297_s20 }
 0x24b   : > { %v5229_v37 = vpop.permute.xlu2 %1426  ;;  %1655 = vrot.lane.b32.xlu0 %v4891_v47, %s4297_s20 }
 0x24c   : > { %9923 = vst [vmem:[#allocation118_spill] sm:$0xff] %v5229_v37  ;;  %1580 = vperm.xlu1 %4137, %v4566_v46   ;;  %v5406_v37 = vld [vmem:[%s9440_s5 + $0x28] sm:$0xff] }
 0x24d   : > { %v5234_v32 = vpop.permute.xlu0 %1147 }
 0x24e   : > { %9924 = vst [vmem:[#allocation119_spill] sm:$0xff] %v5234_v32  ;;  %v5236_v26 = vpop.permute.xlu1 %1149  ;;  %v5424_v32 = vld [vmem:[%s9440_s5 + $0x40] sm:$0xff] }
 0x24f   : > { %9925 = vst [vmem:[#allocation120_spill] sm:$0xff] %v5236_v26 }
 0x251   : > { %1659 = vrot.lane.b32.xlu2 %v4967_v13, %s4297_s20 }
 0x253   : > { %v5240_v43 = vpop.permute.xlu2 %1432  ;;  %1661 = vrot.lane.b32.xlu0 %v4987_v57, %s4297_s20 }
 0x254   : > { %9926 = vst [vmem:[#allocation121_spill] sm:$0xff] %v5240_v43  ;;  %1651 = vrot.lane.b32.xlu1 %v4827_v61, %s4297_s20 }
 0x255   : > { %v5246_v25 = vpop.permute.xlu0 %1410 }
 0x256   : > { %9927 = vst [vmem:[#allocation122_spill] sm:$0xff] %v5246_v25  ;;  %v5248_v44 = vpop.permute.xlu1 %1406 }
 0x257   : > { %9928 = vst [vmem:[#allocation123_spill] sm:$0xff] %v5248_v44 }
 0x259   : > { %1665 = vrot.lane.b32.xlu2 %v5057_v36, %s4297_s20 }
 0x25b   : > { %v5252_v46 = vpop.permute.xlu2 %1438  ;;  %1667 = vrot.lane.b32.xlu0 %v5062_v28, %s4297_s20 }
 0x25c   : > { %9929 = vst [vmem:[#allocation124_spill] sm:$0xff] %v5252_v46  ;;  %1657 = vrot.lane.b32.xlu1 %v4949_v18, %s4297_s20 }
 0x25d   : > { %v5258_v26 = vpop.permute.xlu0 %1416 }
 0x25e   : > { %9930 = vst [vmem:[#allocation125_spill] sm:$0xff] %v5258_v26  ;;  %v5260_v10 = vpop.permute.xlu1 %1412 }
 0x25f   : > { %9931 = vst [vmem:[#allocation126_spill] sm:$0xff] %v5260_v10 }
 0x261   : > { %1671 = vrot.lane.b32.xlu2 %v4754_v33, %s4297_s20 }
 0x263   : > { %v5264_v25 = vpop.permute.xlu2 %1444  ;;  %1673 = vrot.lane.b32.xlu0 %v4794_v62, %s4297_s20 }
 0x264   : > { %9932 = vst [vmem:[#allocation127_spill] sm:$0xff] %v5264_v25  ;;  %1663 = vrot.lane.b32.xlu1 %v5015_v5, %s4297_s20 }
 0x265   : > { %v5270_v44 = vpop.permute.xlu0 %1422 }
 0x266   : > { %9933 = vst [vmem:[#allocation128_spill] sm:$0xff] %v5270_v44  ;;  %v5272_v46 = vpop.permute.xlu1 %1418 }
 0x267   : > { %9934 = vst [vmem:[#allocation129_spill] sm:$0xff] %v5272_v46 }
 0x269   : > { %1677 = vrot.lane.b32.xlu2 %v4871_v63, %s4297_s20 }
 0x26b   : > { %v5276_v26 = vpop.permute.xlu2 %1450  ;;  %1679 = vrot.lane.b32.xlu0 %v4726_v27, %s4297_s20 }
 0x26c   : > { %9935 = vst [vmem:[#allocation130_spill] sm:$0xff] %v5276_v26  ;;  %1669 = vrot.lane.b32.xlu1 %v4736_v55, %s4297_s20 }
 0x26d   : > { %v5282_v25 = vpop.permute.xlu0 %1428 }
 0x26e   : > { %9936 = vst [vmem:[#allocation131_spill] sm:$0xff] %v5282_v25  ;;  %v5284_v10 = vpop.permute.xlu1 %1424  ;;  %v4298_v25 = vmov 3  }
 0x26f   : > { %9937 = vst [vmem:[#allocation132_spill] sm:$0xff] %v5284_v10  ;;  %4141 = vset.pattern.permute.xlu0 %v4298_v25  ;;  %4140 = vset.pattern.permute.xlu2 %v4298_v25 }
 0x270   : > { %4139 = vset.pattern.permute.xlu1 %v4298_v25 }
 0x271   : > { %1683 = vrot.lane.b32.xlu2 %v4801_v6, %s4297_s20 }
 0x273   : > { %v5288_v44 = vpop.permute.xlu2 %1528  ;;  %1685 = vrot.lane.b32.xlu0 %v4847_v49, %s4297_s20 }
 0x274   : > { %9938 = vst [vmem:[#allocation133_spill] sm:$0xff] %v5288_v44  ;;  %1675 = vrot.lane.b32.xlu1 %v4854_v2, %s4297_s20 }
 0x275   : > { %v5294_v46 = vpop.permute.xlu0 %1434 }
 0x276   : > { %9939 = vst [vmem:[#allocation134_spill] sm:$0xff] %v5294_v46  ;;  %v5296_v26 = vpop.permute.xlu1 %1430 }
 0x277   : > { %9940 = vst [vmem:[#allocation135_spill] sm:$0xff] %v5296_v26 }
 0x279   : > { %1689 = vrot.lane.b32.xlu2 %v4934_v0, %s4297_s20 }
 0x27b   : > { %v5300_v11 = vpop.permute.xlu2 %1536  ;;  %1691 = vrot.lane.b32.xlu0 %v4954_v16, %s4297_s20 }
 0x27c   : > { %9941 = vst [vmem:[#allocation136_spill] sm:$0xff] %v5300_v11  ;;  %1681 = vrot.lane.b32.xlu1 %v4786_v48, %s4297_s20 }
 0x27d   : > { %v5306_v44 = vpop.permute.xlu0 %1440 }
 0x27e   : > { %9942 = vst [vmem:[#allocation137_spill] sm:$0xff] %v5306_v44  ;;  %v5308_v46 = vpop.permute.xlu1 %1436 }
 0x27f   : > { %9943 = vst [vmem:[#allocation138_spill] sm:$0xff] %v5308_v46 }
 0x281   : > { %1695 = vrot.lane.b32.xlu2 %v5000_v35, %s4297_s20 }
 0x283   : > { %v5312_v26 = vpop.permute.xlu2 %1548  ;;  %1697 = vrot.lane.b32.xlu0 %v5032_v17, %s4297_s20 }
 0x284   : > { %9944 = vst [vmem:[#allocation139_spill] sm:$0xff] %v5312_v26  ;;  %1687 = vrot.lane.b32.xlu1 %v4916_v54, %s4297_s20 }
 0x285   : > { %v5318_v25 = vpop.permute.xlu0 %1446 }
 0x286   : > { %9945 = vst [vmem:[#allocation140_spill] sm:$0xff] %v5318_v25  ;;  %v5320_v11 = vpop.permute.xlu1 %1442 }
 0x287   : > { %9946 = vst [vmem:[#allocation141_spill] sm:$0xff] %v5320_v11 }
 0x289   : > { %1701 = vrot.lane.b32.xlu2 %v4766_v40, %s4297_s20 }
 0x28b   : > { %v5324_v44 = vpop.permute.xlu2 %1560  ;;  %1703 = vrot.lane.b32.xlu0 %v4806_v9, %s4297_s20 }
 0x28c   : > { %9947 = vst [vmem:[#allocation142_spill] sm:$0xff] %v5324_v44  ;;  %1693 = vrot.lane.b32.xlu1 %v4982_v8, %s4297_s20 }
 0x28d   : > { %v5330_v26 = vpop.permute.xlu0 %1520 }
 0x28e   : > { %9948 = vst [vmem:[#allocation143_spill] sm:$0xff] %v5330_v26  ;;  %v5332_v46 = vpop.permute.xlu1 %1448 }
 0x28f   : > { %9949 = vst [vmem:[#allocation144_spill] sm:$0xff] %v5332_v46  ;;  %v5352_v46 = vld [vmem:[%s9440_s5 + $0x10] sm:$0xff] }
 0x290   : > { %9954 = vst [vmem:[#allocation149_spill] sm:$0xff] %v5352_v46 }
 0x291   : > { %1707 = vrot.lane.b32.xlu2 %v4886_v39, %s4297_s20 }
 0x293   : > { %v5336_v25 = vpop.permute.xlu2 %1572  ;;  %1709 = vrot.lane.b32.xlu0 %v4921_v45, %s4297_s20 }
 0x294   : > { %9950 = vst [vmem:[#allocation145_spill] sm:$0xff] %v5336_v25  ;;  %1699 = vrot.lane.b32.xlu1 %v4751_v56, %s4297_s20 }
 0x295   : > { %v5342_v44 = vpop.permute.xlu0 %1540 }
 0x296   : > { %9951 = vst [vmem:[#allocation146_spill] sm:$0xff] %v5342_v44  ;;  %v5344_v11 = vpop.permute.xlu1 %1524  ;;  %v5368_v44 = vld [vmem:[%s9440_s5] sm:$0xff] }
 0x297   : > { %9952 = vst [vmem:[#allocation147_spill] sm:$0xff] %v5344_v11 }
 0x299   : > { %1783 = vperm.xlu2 %4140, %v4648_v58  }
 0x29b   : > { %v5347_v26 = vpop.permute.xlu2 %1647  ;;  %1787 = vperm.xlu0 %4141, %v5352_v46  }
 0x29c   : > { %9953 = vst [vmem:[#allocation148_spill] sm:$0xff] %v5347_v26  ;;  %1705 = vrot.lane.b32.xlu1 %v4868_v53, %s4297_s20 }
 0x29d   : > { %v5357_v25 = vpop.permute.xlu0 %1552 }
 0x29e   : > { %9955 = vst [vmem:[#allocation150_spill] sm:$0xff] %v5357_v25  ;;  %v5359_v43 = vpop.permute.xlu1 %1532  ;;  %v5378_v25 = vld [vmem:[%s9440_s5 + $0x30] sm:$0xff] }
 0x29f   : > { %9956 = vst [vmem:[#allocation151_spill] sm:$0xff] %v5359_v43  ;;  %v5387_v43 = vld [vmem:[%s9440_s5 + $0x18] sm:$0xff] }
 0x2a1   : > { %1795 = vperm.xlu2 %4140, %v4634_v52  }
 0x2a3   : > { %v5362_v11 = vpop.permute.xlu2 %1653  ;;  %1807 = vperm.xlu0 %4141, %v4653_v59  }
 0x2a4   : > { %9957 = vst [vmem:[#allocation152_spill] sm:$0xff] %v5362_v11  ;;  %1779 = vperm.xlu1 %4139, %v5368_v44  }
 0x2a5   : > { %v5371_v26 = vpop.permute.xlu0 %1564 }
 0x2a6   : > { %9958 = vst [vmem:[#allocation153_spill] sm:$0xff] %v5371_v26  ;;  %v5373_v10 = vpop.permute.xlu1 %1544 }
 0x2a7   : > { %9959 = vst [vmem:[#allocation154_spill] sm:$0xff] %v5373_v10 }
 0x2a9   : > { %1803 = vperm.xlu2 %4140, %v5378_v25  }
 0x2ab   : > { %v5381_v11 = vpop.permute.xlu2 %1659  ;;  %1819 = vperm.xlu0 %4141, %v4664_v60  }
 0x2ac   : > { %9960 = vst [vmem:[#allocation155_spill] sm:$0xff] %v5381_v11  ;;  %1791 = vperm.xlu1 %4139, %v5387_v43  }
 0x2ad   : > { %v5390_v26 = vpop.permute.xlu0 %1576 }
 0x2ae   : > { %9961 = vst [vmem:[#allocation156_spill] sm:$0xff] %v5390_v26  ;;  %v5392_v10 = vpop.permute.xlu1 %1556 }
 0x2af   : > { %9962 = vst [vmem:[#allocation157_spill] sm:$0xff] %v5392_v10 }
 0x2b1   : > { %1815 = vperm.xlu2 %4140, %v5397_v15  }
 0x2b3   : > { %v5400_v11 = vpop.permute.xlu2 %1665  ;;  %1831 = vperm.xlu0 %4141, %v4677_v1  }
 0x2b4   : > { %9963 = vst [vmem:[#allocation158_spill] sm:$0xff] %v5400_v11  ;;  %1799 = vperm.xlu1 %4139, %v5406_v37  }
 0x2b5   : > { %v5409_v26 = vpop.permute.xlu0 %1649 }
 0x2b6   : > { %9964 = vst [vmem:[#allocation159_spill] sm:$0xff] %v5409_v26  ;;  %v5411_v10 = vpop.permute.xlu1 %1568 }
 0x2b7   : > { %9965 = vst [vmem:[#allocation160_spill] sm:$0xff] %v5411_v10 }
 0x2b9   : > { %1827 = vperm.xlu2 %4140, %v5416_v20  }
 0x2bb   : > { %v5419_v11 = vpop.permute.xlu2 %1671  ;;  %4142 = vset.pattern.permute.xlu0 %v4299_v31 }
 0x2bc   : > { %9966 = vst [vmem:[#allocation161_spill] sm:$0xff] %v5419_v11  ;;  %1811 = vperm.xlu1 %4139, %v5424_v32   ;;  %1941 = vperm.xlu0 %4142, %v5368_v44  }
 0x2bd   : > { %v5428_v26 = vpop.permute.xlu0 %1655 }
 0x2be   : > { %9967 = vst [vmem:[#allocation162_spill] sm:$0xff] %v5428_v26  ;;  %v5430_v10 = vpop.permute.xlu1 %1580 }
 0x2bf   : > { %9968 = vst [vmem:[#allocation163_spill] sm:$0xff] %v5430_v10 }
 0x2c1   : > { %1839 = vperm.xlu2 %4140, %v5435_v19  }
 0x2c3   : > { %v5438_v11 = vpop.permute.xlu2 %1677 }
 0x2c4   : > { %9969 = vst [vmem:[#allocation164_spill] sm:$0xff] %v5438_v11  ;;  %1823 = vperm.xlu1 %4139, %v5443_v38   ;;  %1961 = vperm.xlu0 %4142, %v5406_v37   ;;  %v5457_v11 = vld [vmem:[%s9440_s5 + $0x70] sm:$0xff] }
 0x2c5   : > { %v5447_v26 = vpop.permute.xlu0 %1661 }
 0x2c6   : > { %9970 = vst [vmem:[#allocation165_spill] sm:$0xff] %v5447_v26  ;;  %v5449_v10 = vpop.permute.xlu1 %1651 }
 0x2c7   : > { %9971 = vst [vmem:[#allocation166_spill] sm:$0xff] %v5449_v10 }
 0x2c9   : > { %4144 = vset.pattern.permute.xlu2 %v4299_v31 }
 0x2ca   : > { %1949 = vperm.xlu2 %4144, %v5352_v46  }
 0x2cb   : > { %v5452_v29 = vpop.permute.xlu2 %1683 }
 0x2cc   : > { %9972 = vst [vmem:[#allocation167_spill] sm:$0xff] %v5452_v29  ;;  %1835 = vperm.xlu1 %4139, %v5457_v11   ;;  %1973 = vperm.xlu0 %4142, %v5424_v32  }
 0x2cd   : > { %v5461_v22 = vpop.permute.xlu0 %1667 }
 0x2ce   : > { %9973 = vst [vmem:[#allocation168_spill] sm:$0xff] %v5461_v22  ;;  %v5463_v14 = vpop.permute.xlu1 %1657 }
 0x2cf   : > { %9974 = vst [vmem:[#allocation169_spill] sm:$0xff] %v5463_v14 }
 0x2d2   : > { %1957 = vperm.xlu2 %4144, %v4634_v52  }
 0x2d3   : > { %v5466_v26 = vpop.permute.xlu2 %1689 }
 0x2d4   : > { %9975 = vst [vmem:[#allocation170_spill] sm:$0xff] %v5466_v26  ;;  %4143 = vset.pattern.permute.xlu1 %v4299_v31  ;;  %1985 = vperm.xlu0 %4142, %v5443_v38   ;;  %v5667_v26 = vld [vmem:[%s9440_s5 + $0x68] sm:$0xff] }
 0x2d5   : > { %1945 = vperm.xlu1 %4143, %v4648_v58   ;;  %v5470_v10 = vpop.permute.xlu0 %1673  ;;  %10028 = vst [vmem:[#allocation223_spill] sm:$0xff] %v5667_v26 }
 0x2d6   : > { %9976 = vst [vmem:[#allocation171_spill] sm:$0xff] %v5470_v10  ;;  %v5472_v29 = vpop.permute.xlu1 %1663 }
 0x2d7   : > { %9977 = vst [vmem:[#allocation172_spill] sm:$0xff] %v5472_v29 }
 0x2da   : > { %1969 = vperm.xlu2 %4144, %v4653_v59  }
 0x2db   : > { %v5475_v30 = vpop.permute.xlu2 %1695 }
 0x2dc   : > { %9978 = vst [vmem:[#allocation173_spill] sm:$0xff] %v5475_v30  ;;  %1997 = vperm.xlu0 %4142, %v5457_v11  }
 0x2dd   : > { %1953 = vperm.xlu1 %4143, %v5387_v43   ;;  %v5479_v52 = vpop.permute.xlu0 %1679 }
 0x2de   : > { %9979 = vst [vmem:[#allocation174_spill] sm:$0xff] %v5479_v52  ;;  %v5481_v22 = vpop.permute.xlu1 %1669 }
 0x2df   : > { %9980 = vst [vmem:[#allocation175_spill] sm:$0xff] %v5481_v22 }
 0x2e2   : > { %1981 = vperm.xlu2 %4144, %v4664_v60  }
 0x2e3   : > { %v5484_v31 = vpop.permute.xlu2 %1701 }
 0x2e4   : > { %9981 = vst [vmem:[#allocation176_spill] sm:$0xff] %v5484_v31  ;;  %2070 = vrot.lane.b32.xlu0 %v4770_v41, %s4300_s28 }
 0x2e5   : > { %1965 = vperm.xlu1 %4143, %v5378_v25   ;;  %v5489_v58 = vpop.permute.xlu0 %1685 }
 0x2e6   : > { %9982 = vst [vmem:[#allocation177_spill] sm:$0xff] %v5489_v58  ;;  %v5491_v59 = vpop.permute.xlu1 %1675 }
 0x2e7   : > { %9983 = vst [vmem:[#allocation178_spill] sm:$0xff] %v5491_v59 }
 0x2ea   : > { %1993 = vperm.xlu2 %4144, %v4677_v1  }
 0x2eb   : > { %v5494_v10 = vpop.permute.xlu2 %1707 }
 0x2ec   : > { %9984 = vst [vmem:[#allocation179_spill] sm:$0xff] %v5494_v10  ;;  %2076 = vrot.lane.b32.xlu0 %v4891_v47, %s4300_s28 }
 0x2ed   : > { %1977 = vperm.xlu1 %4143, %v5397_v15   ;;  %v5499_v60 = vpop.permute.xlu0 %1691 }
 0x2ee   : > { %9985 = vst [vmem:[#allocation180_spill] sm:$0xff] %v5499_v60  ;;  %v5501_v29 = vpop.permute.xlu1 %1681 }
 0x2ef   : > { %9986 = vst [vmem:[#allocation181_spill] sm:$0xff] %v5501_v29 }
 0x2f2   : > { %2068 = vrot.lane.b32.xlu2 %v4724_v23, %s4300_s28 }
 0x2f3   : > { %v5505_v30 = vpop.permute.xlu2 %1783 }
 0x2f4   : > { %9987 = vst [vmem:[#allocation182_spill] sm:$0xff] %v5505_v30  ;;  %2082 = vrot.lane.b32.xlu0 %v4987_v57, %s4300_s28 }
 0x2f5   : > { %1989 = vperm.xlu1 %4143, %v5416_v20   ;;  %v5510_v1 = vpop.permute.xlu0 %1697 }
 0x2f6   : > { %9988 = vst [vmem:[#allocation183_spill] sm:$0xff] %v5510_v1  ;;  %v5512_v10 = vpop.permute.xlu1 %1687 }
 0x2f7   : > { %9989 = vst [vmem:[#allocation184_spill] sm:$0xff] %v5512_v10 }
 0x2fa   : > { %2074 = vrot.lane.b32.xlu2 %v4842_v12, %s4300_s28 }
 0x2fb   : > { %v5516_v60 = vpop.permute.xlu2 %1795 }
 0x2fc   : > { %9990 = vst [vmem:[#allocation185_spill] sm:$0xff] %v5516_v60  ;;  %2088 = vrot.lane.b32.xlu0 %v5062_v28, %s4300_s28 }
 0x2fd   : > { %2001 = vperm.xlu1 %4143, %v5435_v19   ;;  %v5521_v30 = vpop.permute.xlu0 %1703 }
 0x2fe   : > { %9991 = vst [vmem:[#allocation186_spill] sm:$0xff] %v5521_v30  ;;  %v5523_v29 = vpop.permute.xlu1 %1693 }
 0x2ff   : > { %9992 = vst [vmem:[#allocation187_spill] sm:$0xff] %v5523_v29 }
 0x302   : > { %2080 = vrot.lane.b32.xlu2 %v4967_v13, %s4300_s28 }
 0x303   : > { %v5527_v1 = vpop.permute.xlu2 %1803 }
 0x304   : > { %9993 = vst [vmem:[#allocation188_spill] sm:$0xff] %v5527_v1  ;;  %2094 = vrot.lane.b32.xlu0 %v4794_v62, %s4300_s28 }
 0x305   : > { %2072 = vrot.lane.b32.xlu1 %v4827_v61, %s4300_s28  ;;  %v5533_v60 = vpop.permute.xlu0 %1709 }
 0x306   : > { %9994 = vst [vmem:[#allocation189_spill] sm:$0xff] %v5533_v60  ;;  %v5535_v10 = vpop.permute.xlu1 %1699 }
 0x307   : > { %9995 = vst [vmem:[#allocation190_spill] sm:$0xff] %v5535_v10 }
 0x30a   : > { %2086 = vrot.lane.b32.xlu2 %v5057_v36, %s4300_s28 }
 0x30b   : > { %v5539_v30 = vpop.permute.xlu2 %1815 }
 0x30c   : > { %9996 = vst [vmem:[#allocation191_spill] sm:$0xff] %v5539_v30  ;;  %2100 = vrot.lane.b32.xlu0 %v4726_v27, %s4300_s28 }
 0x30d   : > { %2078 = vrot.lane.b32.xlu1 %v4949_v18, %s4300_s28  ;;  %v5545_v29 = vpop.permute.xlu0 %1787 }
 0x30e   : > { %9997 = vst [vmem:[#allocation192_spill] sm:$0xff] %v5545_v29  ;;  %v5547_v1 = vpop.permute.xlu1 %1705  ;;  %v5659_v29 = vld [vmem:[%s9440_s5 + $0x20] sm:$0xff] }
 0x30f   : > { %9998 = vst [vmem:[#allocation193_spill] sm:$0xff] %v5547_v1  ;;  %v4301_v1 = vmov 5  }
 0x310   : > { %4147 = vset.pattern.permute.xlu0 %v4301_v1  ;;  %4146 = vset.pattern.permute.xlu2 %v4301_v1  ;;  %10026 = vst [vmem:[#allocation221_spill] sm:$0xff] %v5659_v29 }
 0x311   : > { %4145 = vset.pattern.permute.xlu1 %v4301_v1 }
 0x312   : > { %2092 = vrot.lane.b32.xlu2 %v4754_v33, %s4300_s28 }
 0x313   : > { %v5551_v60 = vpop.permute.xlu2 %1827 }
 0x314   : > { %9999 = vst [vmem:[#allocation194_spill] sm:$0xff] %v5551_v60  ;;  %2106 = vrot.lane.b32.xlu0 %v4847_v49, %s4300_s28 }
 0x315   : > { %2084 = vrot.lane.b32.xlu1 %v5015_v5, %s4300_s28  ;;  %v5557_v10 = vpop.permute.xlu0 %1807 }
 0x316   : > { %10000 = vst [vmem:[#allocation195_spill] sm:$0xff] %v5557_v10  ;;  %v5559_v30 = vpop.permute.xlu1 %1779 }
 0x317   : > { %10001 = vst [vmem:[#allocation196_spill] sm:$0xff] %v5559_v30 }
 0x31a   : > { %2098 = vrot.lane.b32.xlu2 %v4871_v63, %s4300_s28 }
 0x31b   : > { %v5563_v59 = vpop.permute.xlu2 %1839 }
 0x31c   : > { %10002 = vst [vmem:[#allocation197_spill] sm:$0xff] %v5563_v59  ;;  %2112 = vrot.lane.b32.xlu0 %v4954_v16, %s4300_s28 }
 0x31d   : > { %2090 = vrot.lane.b32.xlu1 %v4736_v55, %s4300_s28  ;;  %v5569_v60 = vpop.permute.xlu0 %1819 }
 0x31e   : > { %10003 = vst [vmem:[#allocation198_spill] sm:$0xff] %v5569_v60  ;;  %v5571_v10 = vpop.permute.xlu1 %1791 }
 0x31f   : > { %10004 = vst [vmem:[#allocation199_spill] sm:$0xff] %v5571_v10 }
 0x322   : > { %2104 = vrot.lane.b32.xlu2 %v4801_v6, %s4300_s28 }
 0x324   : > { %v5575_v58 = vpop.permute.xlu2 %1949  ;;  %2118 = vrot.lane.b32.xlu0 %v5032_v17, %s4300_s28 }
 0x325   : > { %10005 = vst [vmem:[#allocation200_spill] sm:$0xff] %v5575_v58  ;;  %2096 = vrot.lane.b32.xlu1 %v4854_v2, %s4300_s28  ;;  %v5581_v59 = vpop.permute.xlu0 %1831  ;;  %v5647_v58 = vld [vmem:[%s9440_s5 + $0x50] sm:$0xff] }
 0x326   : > { %10006 = vst [vmem:[#allocation201_spill] sm:$0xff] %v5581_v59  ;;  %v5583_v1 = vpop.permute.xlu1 %1799 }
 0x327   : > { %10007 = vst [vmem:[#allocation202_spill] sm:$0xff] %v5583_v1 }
 0x328   : > { %10023 = vst [vmem:[#allocation218_spill] sm:$0xff] %v5647_v58 }
 0x32a   : > { %2110 = vrot.lane.b32.xlu2 %v4934_v0, %s4300_s28 }
 0x32c   : > { %v5587_v60 = vpop.permute.xlu2 %1957  ;;  %2124 = vrot.lane.b32.xlu0 %v4806_v9, %s4300_s28 }
 0x32d   : > { %10008 = vst [vmem:[#allocation203_spill] sm:$0xff] %v5587_v60  ;;  %2102 = vrot.lane.b32.xlu1 %v4786_v48, %s4300_s28 }
 0x32e   : > { %v5593_v10 = vpop.permute.xlu1 %1811  ;;  %v5595_v22 = vpop.permute.xlu0 %1941 }
 0x32f   : > { %10009 = vst [vmem:[#allocation204_spill] sm:$0xff] %v5593_v10 }
 0x330   : > { %10010 = vst [vmem:[#allocation205_spill] sm:$0xff] %v5595_v22 }
 0x332   : > { %2116 = vrot.lane.b32.xlu2 %v5000_v35, %s4300_s28 }
 0x334   : > { %v5599_v59 = vpop.permute.xlu2 %1969  ;;  %2130 = vrot.lane.b32.xlu0 %v4921_v45, %s4300_s28 }
 0x335   : > { %10011 = vst [vmem:[#allocation206_spill] sm:$0xff] %v5599_v59  ;;  %2108 = vrot.lane.b32.xlu1 %v4916_v54, %s4300_s28 }
 0x336   : > { %v5605_v60 = vpop.permute.xlu1 %1823  ;;  %v5607_v31 = vpop.permute.xlu0 %1961 }
 0x337   : > { %10012 = vst [vmem:[#allocation207_spill] sm:$0xff] %v5605_v60 }
 0x338   : > { %10013 = vst [vmem:[#allocation208_spill] sm:$0xff] %v5607_v31  ;;  %v5627_v31 = vld [vmem:[%s9440_s5 + $0x38] sm:$0xff] }
 0x339   : > { %10018 = vst [vmem:[#allocation213_spill] sm:$0xff] %v5627_v31 }
 0x33a   : > { %2122 = vrot.lane.b32.xlu2 %v4766_v40, %s4300_s28 }
 0x33c   : > { %v5611_v10 = vpop.permute.xlu2 %1981  ;;  %2208 = vperm.xlu0 %4147, %v5352_v46  }
 0x33d   : > { %10014 = vst [vmem:[#allocation209_spill] sm:$0xff] %v5611_v10  ;;  %2114 = vrot.lane.b32.xlu1 %v4982_v8, %s4300_s28 }
 0x33e   : > { %v5616_v59 = vpop.permute.xlu1 %1835  ;;  %v5618_v1 = vpop.permute.xlu0 %1973 }
 0x33f   : > { %10015 = vst [vmem:[#allocation210_spill] sm:$0xff] %v5616_v59 }
 0x340   : > { %10016 = vst [vmem:[#allocation211_spill] sm:$0xff] %v5618_v1  ;;  %v5639_v1 = vld [vmem:[%s9440_s5 + $0x8] sm:$0xff] }
 0x341   : > { %10021 = vst [vmem:[#allocation216_spill] sm:$0xff] %v5639_v1 }
 0x342   : > { %2128 = vrot.lane.b32.xlu2 %v4886_v39, %s4300_s28 }
 0x344   : > { %v5622_v60 = vpop.permute.xlu2 %1993  ;;  %2228 = vperm.xlu0 %4147, %v5627_v31  }
 0x345   : > { %10017 = vst [vmem:[#allocation212_spill] sm:$0xff] %v5622_v60  ;;  %2120 = vrot.lane.b32.xlu1 %v4751_v56, %s4300_s28 }
 0x346   : > { %v5632_v10 = vpop.permute.xlu0 %1985 }
 0x347   : > { %10019 = vst [vmem:[#allocation214_spill] sm:$0xff] %v5632_v10  ;;  %v5634_v59 = vpop.permute.xlu1 %1945 }
 0x348   : > { %10020 = vst [vmem:[#allocation215_spill] sm:$0xff] %v5634_v59 }
 0x34a   : > { %2204 = vperm.xlu2 %4146, %v5639_v1  }
 0x34c   : > { %v5642_v60 = vpop.permute.xlu2 %2068  ;;  %2240 = vperm.xlu0 %4147, %v5647_v58  }
 0x34d   : > { %10022 = vst [vmem:[#allocation217_spill] sm:$0xff] %v5642_v60  ;;  %2126 = vrot.lane.b32.xlu1 %v4868_v53, %s4300_s28 }
 0x34e   : > { %v5652_v59 = vpop.permute.xlu0 %1997 }
 0x34f   : > { %10024 = vst [vmem:[#allocation219_spill] sm:$0xff] %v5652_v59  ;;  %v5654_v10 = vpop.permute.xlu1 %1953 }
 0x350   : > { %10025 = vst [vmem:[#allocation220_spill] sm:$0xff] %v5654_v10 }
 0x352   : > { %2216 = vperm.xlu2 %4146, %v5659_v29  }
 0x354   : > { %v5662_v14 = vpop.permute.xlu2 %2074  ;;  %2252 = vperm.xlu0 %4147, %v5667_v26  }
 0x355   : > { %10027 = vst [vmem:[#allocation222_spill] sm:$0xff] %v5662_v14  ;;  %2200 = vperm.xlu1 %4145, %v5368_v44  }
 0x356   : > { %v5671_v59 = vpop.permute.xlu0 %2070 }
 0x357   : > { %10029 = vst [vmem:[#allocation224_spill] sm:$0xff] %v5671_v59  ;;  %v5673_v10 = vpop.permute.xlu1 %1965 }
 0x358   : > { %10030 = vst [vmem:[#allocation225_spill] sm:$0xff] %v5673_v10 }
 0x35a   : > { %2224 = vperm.xlu2 %4146, %v5378_v25  }
 0x35c   : > { %v5676_v22 = vpop.permute.xlu2 %2080  ;;  %2327 = vrot.lane.b32.xlu0 %v4724_v23, %s4302_s22 }
 0x35d   : > { %10031 = vst [vmem:[#allocation226_spill] sm:$0xff] %v5676_v22  ;;  %2212 = vperm.xlu1 %4145, %v5387_v43  }
 0x35e   : > { %v5681_v14 = vpop.permute.xlu0 %2076 }
 0x35f   : > { %10032 = vst [vmem:[#allocation227_spill] sm:$0xff] %v5681_v14  ;;  %v5683_v30 = vpop.permute.xlu1 %1977 }
 0x360   : > { %10033 = vst [vmem:[#allocation228_spill] sm:$0xff] %v5683_v30 }
 0x362   : > { %2236 = vperm.xlu2 %4146, %v5397_v15  }
 0x364   : > { %v5686_v60 = vpop.permute.xlu2 %2086  ;;  %2333 = vrot.lane.b32.xlu0 %v4842_v12, %s4302_s22 }
 0x365   : > { %10034 = vst [vmem:[#allocation229_spill] sm:$0xff] %v5686_v60  ;;  %2220 = vperm.xlu1 %4145, %v5406_v37  }
 0x366   : > { %v5691_v59 = vpop.permute.xlu0 %2082 }
 0x367   : > { %10035 = vst [vmem:[#allocation230_spill] sm:$0xff] %v5691_v59  ;;  %v5693_v10 = vpop.permute.xlu1 %1989 }
 0x368   : > { %10036 = vst [vmem:[#allocation231_spill] sm:$0xff] %v5693_v10 }
 0x36a   : > { %2248 = vperm.xlu2 %4146, %v5416_v20  }
 0x36c   : > { %v5696_v22 = vpop.permute.xlu2 %2092  ;;  %2339 = vrot.lane.b32.xlu0 %v4967_v13, %s4302_s22 }
 0x36d   : > { %10037 = vst [vmem:[#allocation232_spill] sm:$0xff] %v5696_v22  ;;  %2232 = vperm.xlu1 %4145, %v5424_v32  }
 0x36e   : > { %v5701_v14 = vpop.permute.xlu0 %2088 }
 0x36f   : > { %10038 = vst [vmem:[#allocation233_spill] sm:$0xff] %v5701_v14  ;;  %v5703_v30 = vpop.permute.xlu1 %2001 }
 0x370   : > { %10039 = vst [vmem:[#allocation234_spill] sm:$0xff] %v5703_v30 }
 0x372   : > { %2260 = vperm.xlu2 %4146, %v5435_v19  }
 0x374   : > { %v5706_v60 = vpop.permute.xlu2 %2098  ;;  %2345 = vrot.lane.b32.xlu0 %v5057_v36, %s4302_s22 }
 0x375   : > { %10040 = vst [vmem:[#allocation235_spill] sm:$0xff] %v5706_v60  ;;  %2244 = vperm.xlu1 %4145, %v5443_v38  }
 0x376   : > { %v5711_v59 = vpop.permute.xlu0 %2094 }
 0x377   : > { %10041 = vst [vmem:[#allocation236_spill] sm:$0xff] %v5711_v59  ;;  %v5713_v10 = vpop.permute.xlu1 %2072 }
 0x378   : > { %10042 = vst [vmem:[#allocation237_spill] sm:$0xff] %v5713_v10 }
 0x37a   : > { %2331 = vrot.lane.b32.xlu2 %v4827_v61, %s4302_s22 }
 0x37c   : > { %v5717_v22 = vpop.permute.xlu2 %2104  ;;  %2351 = vrot.lane.b32.xlu0 %v4754_v33, %s4302_s22 }
 0x37d   : > { %10043 = vst [vmem:[#allocation238_spill] sm:$0xff] %v5717_v22  ;;  %2256 = vperm.xlu1 %4145, %v5457_v11  }
 0x37e   : > { %v5722_v14 = vpop.permute.xlu0 %2100 }
 0x37f   : > { %10044 = vst [vmem:[#allocation239_spill] sm:$0xff] %v5722_v14  ;;  %v5724_v30 = vpop.permute.xlu1 %2078 }
 0x380   : > { %10045 = vst [vmem:[#allocation240_spill] sm:$0xff] %v5724_v30 }
 0x382   : > { %2337 = vrot.lane.b32.xlu2 %v4949_v18, %s4302_s22 }
 0x384   : > { %v5728_v59 = vpop.permute.xlu2 %2110  ;;  %2357 = vrot.lane.b32.xlu0 %v4871_v63, %s4302_s22 }
 0x385   : > { %10046 = vst [vmem:[#allocation241_spill] sm:$0xff] %v5728_v59  ;;  %2329 = vrot.lane.b32.xlu1 %v4770_v41, %s4302_s22 }
 0x386   : > { %v5734_v60 = vpop.permute.xlu0 %2106 }
 0x387   : > { %10047 = vst [vmem:[#allocation242_spill] sm:$0xff] %v5734_v60  ;;  %v5736_v10 = vpop.permute.xlu1 %2084  ;;  %v4303_v60 = vmov 6  }
 0x388   : > { %10048 = vst [vmem:[#allocation243_spill] sm:$0xff] %v5736_v10  ;;  %4149 = vset.pattern.permute.xlu0 %v4303_v60  ;;  %4148 = vset.pattern.permute.xlu2 %v4303_v60 }
 0x389   : > { %4150 = vset.pattern.permute.xlu1 %v4303_v60 }
 0x38a   : > { %2343 = vrot.lane.b32.xlu2 %v5015_v5, %s4302_s22 }
 0x38c   : > { %v5740_v22 = vpop.permute.xlu2 %2116  ;;  %2363 = vrot.lane.b32.xlu0 %v4801_v6, %s4302_s22 }
 0x38d   : > { %10049 = vst [vmem:[#allocation244_spill] sm:$0xff] %v5740_v22  ;;  %2335 = vrot.lane.b32.xlu1 %v4891_v47, %s4302_s22 }
 0x38e   : > { %v5746_v30 = vpop.permute.xlu0 %2112 }
 0x38f   : > { %10050 = vst [vmem:[#allocation245_spill] sm:$0xff] %v5746_v30  ;;  %v5748_v59 = vpop.permute.xlu1 %2090 }
 0x390   : > { %10051 = vst [vmem:[#allocation246_spill] sm:$0xff] %v5748_v59 }
 0x392   : > { %2349 = vrot.lane.b32.xlu2 %v4736_v55, %s4302_s22 }
 0x394   : > { %v5752_v10 = vpop.permute.xlu2 %2122  ;;  %2369 = vrot.lane.b32.xlu0 %v4934_v0, %s4302_s22 }
 0x395   : > { %10052 = vst [vmem:[#allocation247_spill] sm:$0xff] %v5752_v10  ;;  %2341 = vrot.lane.b32.xlu1 %v4987_v57, %s4302_s22 }
 0x396   : > { %v5758_v22 = vpop.permute.xlu0 %2118 }
 0x397   : > { %10053 = vst [vmem:[#allocation248_spill] sm:$0xff] %v5758_v22  ;;  %v5760_v30 = vpop.permute.xlu1 %2096 }
 0x398   : > { %10054 = vst [vmem:[#allocation249_spill] sm:$0xff] %v5760_v30 }
 0x39a   : > { %2355 = vrot.lane.b32.xlu2 %v4854_v2, %s4302_s22 }
 0x39c   : > { %v5764_v59 = vpop.permute.xlu2 %2128  ;;  %2375 = vrot.lane.b32.xlu0 %v5000_v35, %s4302_s22 }
 0x39d   : > { %10055 = vst [vmem:[#allocation250_spill] sm:$0xff] %v5764_v59  ;;  %2347 = vrot.lane.b32.xlu1 %v5062_v28, %s4302_s22 }
 0x39e   : > { %v5770_v10 = vpop.permute.xlu0 %2124 }
 0x39f   : > { %10056 = vst [vmem:[#allocation251_spill] sm:$0xff] %v5770_v10  ;;  %v5772_v60 = vpop.permute.xlu1 %2102 }
 0x3a0   : > { %10057 = vst [vmem:[#allocation252_spill] sm:$0xff] %v5772_v60 }
 0x3a2   : > { %2361 = vrot.lane.b32.xlu2 %v4786_v48, %s4302_s22 }
 0x3a4   : > { %v5776_v22 = vpop.permute.xlu2 %2204  ;;  %2381 = vrot.lane.b32.xlu0 %v4766_v40, %s4302_s22 }
 0x3a5   : > { %10058 = vst [vmem:[#allocation253_spill] sm:$0xff] %v5776_v22  ;;  %2353 = vrot.lane.b32.xlu1 %v4794_v62, %s4302_s22 }
 0x3a6   : > { %v5782_v30 = vpop.permute.xlu0 %2130 }
 0x3a7   : > { %10059 = vst [vmem:[#allocation254_spill] sm:$0xff] %v5782_v30  ;;  %v5784_v59 = vpop.permute.xlu1 %2108 }
 0x3a8   : > { %10060 = vst [vmem:[#allocation255_spill] sm:$0xff] %v5784_v59 }
 0x3aa   : > { %2367 = vrot.lane.b32.xlu2 %v4916_v54, %s4302_s22 }
 0x3ac   : > { %v5788_v10 = vpop.permute.xlu2 %2216  ;;  %2387 = vrot.lane.b32.xlu0 %v4886_v39, %s4302_s22 }
 0x3ad   : > { %10061 = vst [vmem:[#allocation256_spill] sm:$0xff] %v5788_v10  ;;  %2359 = vrot.lane.b32.xlu1 %v4726_v27, %s4302_s22 }
 0x3ae   : > { %v5794_v22 = vpop.permute.xlu0 %2208 }
 0x3af   : > { %10062 = vst [vmem:[#allocation257_spill] sm:$0xff] %v5794_v22  ;;  %v5796_v60 = vpop.permute.xlu1 %2114 }
 0x3b0   : > { %10063 = vst [vmem:[#allocation258_spill] sm:$0xff] %v5796_v60 }
 0x3b2   : > { %2373 = vrot.lane.b32.xlu2 %v4982_v8, %s4302_s22 }
 0x3b4   : > { %v5800_v30 = vpop.permute.xlu2 %2224  ;;  %2463 = vperm.xlu0 %4149, %v5639_v1  }
 0x3b5   : > { %10064 = vst [vmem:[#allocation259_spill] sm:$0xff] %v5800_v30  ;;  %2365 = vrot.lane.b32.xlu1 %v4847_v49, %s4302_s22 }
 0x3b6   : > { %v5805_v10 = vpop.permute.xlu0 %2228 }
 0x3b7   : > { %10065 = vst [vmem:[#allocation260_spill] sm:$0xff] %v5805_v10  ;;  %v5807_v59 = vpop.permute.xlu1 %2120 }
 0x3b8   : > { %10066 = vst [vmem:[#allocation261_spill] sm:$0xff] %v5807_v59 }
 0x3ba   : > { %2379 = vrot.lane.b32.xlu2 %v4751_v56, %s4302_s22 }
 0x3bc   : > { %v5811_v22 = vpop.permute.xlu2 %2236  ;;  %2483 = vperm.xlu0 %4149, %v5378_v25  }
 0x3bd   : > { %10067 = vst [vmem:[#allocation262_spill] sm:$0xff] %v5811_v22  ;;  %2371 = vrot.lane.b32.xlu1 %v4954_v16, %s4302_s22 }
 0x3be   : > { %v5816_v60 = vpop.permute.xlu0 %2240 }
 0x3bf   : > { %10068 = vst [vmem:[#allocation263_spill] sm:$0xff] %v5816_v60  ;;  %v5818_v30 = vpop.permute.xlu1 %2126 }
 0x3c0   : > { %10069 = vst [vmem:[#allocation264_spill] sm:$0xff] %v5818_v30 }
 0x3c2   : > { %2385 = vrot.lane.b32.xlu2 %v4868_v53, %s4302_s22 }
 0x3c4   : > { %v5822_v10 = vpop.permute.xlu2 %2248  ;;  %2495 = vperm.xlu0 %4149, %v5397_v15  }
 0x3c5   : > { %10070 = vst [vmem:[#allocation265_spill] sm:$0xff] %v5822_v10  ;;  %2377 = vrot.lane.b32.xlu1 %v5032_v17, %s4302_s22 }
 0x3c6   : > { %v5827_v59 = vpop.permute.xlu0 %2252 }
 0x3c7   : > { %10071 = vst [vmem:[#allocation266_spill] sm:$0xff] %v5827_v59  ;;  %v5829_v25 = vpop.permute.xlu1 %2200 }
 0x3c8   : > { %10072 = vst [vmem:[#allocation267_spill] sm:$0xff] %v5829_v25 }
 0x3ca   : > { %2459 = vperm.xlu2 %4148, %v5368_v44  }
 0x3cc   : > { %v5832_v22 = vpop.permute.xlu2 %2260  ;;  %2507 = vperm.xlu0 %4149, %v5416_v20  }
 0x3cd   : > { %10073 = vst [vmem:[#allocation268_spill] sm:$0xff] %v5832_v22  ;;  %2383 = vrot.lane.b32.xlu1 %v4806_v9, %s4302_s22 }
 0x3ce   : > { %v5837_v60 = vpop.permute.xlu0 %2327 }
 0x3cf   : > { %10074 = vst [vmem:[#allocation269_spill] sm:$0xff] %v5837_v60  ;;  %v5839_v30 = vpop.permute.xlu1 %2212 }
 0x3d0   : > { %10075 = vst [vmem:[#allocation270_spill] sm:$0xff] %v5839_v30 }
 0x3d2   : > { %2471 = vperm.xlu2 %4148, %v5387_v43  }
 0x3d4   : > { %v5842_v15 = vpop.permute.xlu2 %2331  ;;  %2519 = vperm.xlu0 %4149, %v5435_v19  }
 0x3d5   : > { %10076 = vst [vmem:[#allocation271_spill] sm:$0xff] %v5842_v15  ;;  %2389 = vrot.lane.b32.xlu1 %v4921_v45, %s4302_s22 }
 0x3d6   : > { %v5847_v59 = vpop.permute.xlu0 %2333 }
 0x3d7   : > { %10077 = vst [vmem:[#allocation272_spill] sm:$0xff] %v5847_v59  ;;  %v5849_v22 = vpop.permute.xlu1 %2220 }
 0x3d8   : > { %10078 = vst [vmem:[#allocation273_spill] sm:$0xff] %v5849_v22 }
 0x3da   : > { %2479 = vperm.xlu2 %4148, %v5406_v37  }
 0x3dc   : > { %v5852_v20 = vpop.permute.xlu2 %2337  ;;  %2590 = vrot.lane.b32.xlu0 %v4827_v61, %s4304_s23 }
 0x3dd   : > { %10079 = vst [vmem:[#allocation274_spill] sm:$0xff] %v5852_v20  ;;  %2467 = vperm.xlu1 %4150, %v5352_v46  }
 0x3de   : > { %v5857_v43 = vpop.permute.xlu0 %2339 }
 0x3df   : > { %v5859_v19 = vpop.permute.xlu1 %2232 }
 0x3e0   : > { %10080 = vst [vmem:[#allocation275_spill] sm:$0xff] %v5859_v19 }
 0x3e2   : > { %2491 = vperm.xlu2 %4148, %v5424_v32  }
 0x3e4   : > { %v5862_v10 = vpop.permute.xlu2 %2343  ;;  %2596 = vrot.lane.b32.xlu0 %v4949_v18, %s4304_s23 }
 0x3e5   : > { %2475 = vperm.xlu1 %4150, %v5659_v29  }
 0x3e6   : > { %v5867_v30 = vpop.permute.xlu0 %2345 }
 0x3e7   : > { %v5869_v59 = vpop.permute.xlu1 %2244 }
 0x3e8   : > { %10081 = vst [vmem:[#allocation276_spill] sm:$0xff] %v5869_v59 }
 0x3ea   : > { %2503 = vperm.xlu2 %4148, %v5443_v38  }
 0x3ec   : > { %v5872_v22 = vpop.permute.xlu2 %2349  ;;  %2602 = vrot.lane.b32.xlu0 %v5015_v5, %s4304_s23 }
 0x3ed   : > { %2487 = vperm.xlu1 %4150, %v5627_v31  }
 0x3ee   : > { %v5877_v19 = vpop.permute.xlu0 %2351 }
 0x3ef   : > { %v5879_v20 = vpop.permute.xlu1 %2256 }
 0x3f0   : > { %10082 = vst [vmem:[#allocation277_spill] sm:$0xff] %v5879_v20 }
 0x3f2   : > { %2515 = vperm.xlu2 %4148, %v5457_v11  }
 0x3f4   : > { %v5882_v15 = vpop.permute.xlu2 %2355  ;;  %2608 = vrot.lane.b32.xlu0 %v4736_v55, %s4304_s23 }
 0x3f5   : > { %2499 = vperm.xlu1 %4150, %v5647_v58  }
 0x3f6   : > { %v5887_v59 = vpop.permute.xlu0 %2357 }
 0x3f7   : > { %v5889_v25 = vpop.permute.xlu1 %2329 }
 0x3f8   : > { %10083 = vst [vmem:[#allocation278_spill] sm:$0xff] %v5889_v25 }
 0x3fa   : > { %2588 = vrot.lane.b32.xlu2 %v4770_v41, %s4304_s23 }
 0x3fc   : > { %v5893_v60 = vpop.permute.xlu2 %2361  ;;  %2614 = vrot.lane.b32.xlu0 %v4854_v2, %s4304_s23 }
 0x3fd   : > { %10084 = vst [vmem:[#allocation279_spill] sm:$0xff] %v5893_v60  ;;  %2511 = vperm.xlu1 %4150, %v5667_v26  }
 0x3fe   : > { %v5898_v20 = vpop.permute.xlu0 %2363 }
 0x3ff   : > { %10085 = vst [vmem:[#allocation280_spill] sm:$0xff] %v5898_v20  ;;  %v5900_v14 = vpop.permute.xlu1 %2335  ;;  %v4305_v20 = vmov 7  }
 0x400   : > { %10086 = vst [vmem:[#allocation281_spill] sm:$0xff] %v5900_v14  ;;  %4151 = vset.pattern.permute.xlu0 %v4305_v20  ;;  %4153 = vset.pattern.permute.xlu2 %v4305_v20 }
 0x402   : > { %2594 = vrot.lane.b32.xlu2 %v4891_v47, %s4304_s23 }
 0x404   : > { %v5904_v52 = vpop.permute.xlu2 %2367  ;;  %2620 = vrot.lane.b32.xlu0 %v4786_v48, %s4304_s23 }
 0x405   : > { %10087 = vst [vmem:[#allocation282_spill] sm:$0xff] %v5904_v52  ;;  %2586 = vrot.lane.b32.xlu1 %v4724_v23, %s4304_s23 }
 0x406   : > { %v5910_v25 = vpop.permute.xlu0 %2369  ;;  %4152 = vset.pattern.permute.xlu1 %v4305_v20 }
 0x407   : > { %10088 = vst [vmem:[#allocation283_spill] sm:$0xff] %v5910_v25  ;;  %v5912_v60 = vpop.permute.xlu1 %2341 }
 0x408   : > { %10089 = vst [vmem:[#allocation284_spill] sm:$0xff] %v5912_v60  ;;  %v916_v60 = vlaneseq }
 0x40a   : > { %2600 = vrot.lane.b32.xlu2 %v4987_v57, %s4304_s23 }
 0x40c   : > { %v5916_v14 = vpop.permute.xlu2 %2373  ;;  %2626 = vrot.lane.b32.xlu0 %v4916_v54, %s4304_s23 }
 0x40d   : > { %10090 = vst [vmem:[#allocation285_spill] sm:$0xff] %v5916_v14  ;;  %2592 = vrot.lane.b32.xlu1 %v4842_v12, %s4304_s23  ;;  %v5963_v14 = vand.u32 127, %v916_v60 }
 0x40e   : > { %v2376_v52 = vpop.permute.xlu0 %2375 }
 0x40f   : > { %v5922_v26 = vpop.permute.xlu1 %2347  ;;  %vm2391_vm8 = vcmp.lt.s32.totalorder %v5963_v14, 113  ;;  %vm918_vm9 = vcmp.lt.s32.totalorder %v5963_v14, 17  ;;  %vm1193_vm10 = vcmp.lt.s32.totalorder %v5963_v14, 16  ;;  %vm2650_vm11 = vcmp.lt.s32.totalorder %v5963_v14, 112 }
 0x410   : > { %10091 = vst [vmem:[#allocation286_spill] sm:$0xff] %v5922_v26  ;;  %vm1452_vm12 = vcmp.lt.s32.totalorder %v5963_v14, 15  ;;  %vm1711_vm13 = vcmp.lt.s32.totalorder %v5963_v14, 1  ;;  %vm2132_vm14 = vcmp.lt.s32.totalorder %v5963_v14, 127  ;;  %vm2909_vm15 = vcmp.lt.s32.totalorder %v5963_v14, 111 }
 0x412   : > { %2606 = vrot.lane.b32.xlu2 %v5062_v28, %s4304_s23 }
 0x414   : > { %v5926_v25 = vpop.permute.xlu2 %2379  ;;  %2632 = vrot.lane.b32.xlu0 %v4982_v8, %s4304_s23 }
 0x415   : > { %10092 = vst [vmem:[#allocation287_spill] sm:$0xff] %v5926_v25  ;;  %2598 = vrot.lane.b32.xlu1 %v4967_v13, %s4304_s23 }
 0x416   : > { %v2382_v58 = vpop.permute.xlu0 %2381 }
 0x417   : > { %v5932_v31 = vpop.permute.xlu1 %2353 }
 0x418   : > { %10093 = vst [vmem:[#allocation288_spill] sm:$0xff] %v5932_v31 }
 0x41a   : > { %2612 = vrot.lane.b32.xlu2 %v4794_v62, %s4304_s23 }
 0x41c   : > { %v5936_v20 = vpop.permute.xlu2 %2385  ;;  %2638 = vrot.lane.b32.xlu0 %v4751_v56, %s4304_s23 }
 0x41d   : > { %10094 = vst [vmem:[#allocation289_spill] sm:$0xff] %v5936_v20  ;;  %2604 = vrot.lane.b32.xlu1 %v5057_v36, %s4304_s23 }
 0x41e   : > { %v5942_v26 = vpop.permute.xlu0 %2387 }
 0x41f   : > { %v5944_v25 = vpop.permute.xlu1 %2359 }
 0x420   : > { %10095 = vst [vmem:[#allocation290_spill] sm:$0xff] %v5944_v25 }
 0x422   : > { %2618 = vrot.lane.b32.xlu2 %v4726_v27, %s4304_s23 }
 0x424   : > { %v5948_v1 = vpop.permute.xlu2 %2459  ;;  %2644 = vrot.lane.b32.xlu0 %v4868_v53, %s4304_s23 }
 0x425   : > { %10096 = vst [vmem:[#allocation291_spill] sm:$0xff] %v5948_v1  ;;  %2610 = vrot.lane.b32.xlu1 %v4754_v33, %s4304_s23  ;;  %v5970_v1 = vld [vmem:[%s9444_s9] sm:$0xff] }
 0x426   : > { %v5954_v31 = vpop.permute.xlu0 %2463 }
 0x427   : > { %10097 = vst [vmem:[#allocation292_spill] sm:$0xff] %v5954_v31  ;;  %v5956_v20 = vpop.permute.xlu1 %2365  ;;  %v5975_v31 = vld [vmem:[%s9444_s9 + $0x8] sm:$0xff] }
 0x428   : > { %10098 = vst [vmem:[#allocation293_spill] sm:$0xff] %v5956_v20  ;;  %v5982_v60 = vperm.slane %v5975_v31, 6 }
 0x42a   : > { %2624 = vrot.lane.b32.xlu2 %v4847_v49, %s4304_s23 }
 0x42c   : > { %v5960_v25 = vpop.permute.xlu2 %2471  ;;  %2718 = vperm.xlu0 %4151, %v5368_v44   ;;  %v5979_v44 = vperm.slane %v5970_v1, 6 }
 0x42d   : > { %10099 = vst [vmem:[#allocation294_spill] sm:$0xff] %v5960_v25  ;;  %2616 = vrot.lane.b32.xlu1 %v4871_v63, %s4304_s23 }
 0x42e   : > { %v2484_v20 = vpop.permute.xlu0 %2483 }
 0x42f   : > { %v2372_v25 = vpop.permute.xlu1 %2371 }
 0x430   : > { %v2398_v29 = vsel %vm2391_vm8, %v5857_v43, %v2372_v25  ;;  %v2414_v46 = vsel %vm2391_vm8, %v2372_v25, %v5857_v43 }
 0x431   : > { %v2438_v36 = vmul.f32 %v5979_v44, %v2398_v29  ;;  %v2439_v28 = vmul.f32 %v5982_v60, %v2414_v46  ;;  %v2400_v29 = vsel %vm2391_vm8, %v5862_v10, %v2376_v52 }
 0x432   : > { %2630 = vrot.lane.b32.xlu2 %v4954_v16, %s4304_s23 }
 0x433   : > { %v5994_v50 = vmul.f32 %v2484_v20, %v2438_v36  ;;  %v5996_v3 = vmul.f32 %v2484_v20, %v2439_v28  ;;  %v2416_v36 = vsel %vm2391_vm8, %v2376_v52, %v5862_v10  ;;  %v2442_v20 = vmul.f32 %v5979_v44, %v2400_v29 }
 0x434   : > { %v5998_v51 = vpop.permute.xlu2 %2479  ;;  %2738 = vperm.xlu0 %4151, %v5406_v37  }
 0x435   : > { %10100 = vst [vmem:[#allocation295_spill] sm:$0xff] %v5994_v50  ;;  %2622 = vrot.lane.b32.xlu1 %v4801_v6, %s4304_s23 }
 0x436   : > { %10101 = vst [vmem:[#allocation296_spill] sm:$0xff] %v5996_v3  ;;  %v2496_v5 = vpop.permute.xlu0 %2495  ;;  %v2443_v3 = vmul.f32 %v5982_v60, %v2416_v36 }
 0x437   : > { %10102 = vst [vmem:[#allocation297_spill] sm:$0xff] %v5998_v51  ;;  %v2378_v25 = vpop.permute.xlu1 %2377 }
 0x438   : > { %v2401_v28 = vsel %vm2391_vm8, %v5867_v30, %v2378_v25  ;;  %v2417_v37 = vsel %vm2391_vm8, %v2378_v25, %v5867_v30  ;;  %v6027_v30 = vperm.slane %v5970_v1, 4  ;;  %v6030_v25 = vperm.slane %v5975_v31, 4 }
 0x439   : > { %v2444_v46 = vmul.f32 %v5979_v44, %v2401_v28  ;;  %v2445_v43 = vmul.f32 %v5982_v60, %v2417_v37 }
 0x43a   : > { %2636 = vrot.lane.b32.xlu2 %v5032_v17, %s4304_s23 }
 0x43b   : > { %v6021_v10 = vmul.f32 %v2496_v5, %v2444_v46  ;;  %v6023_v52 = vmul.f32 %v2496_v5, %v2445_v43  ;;  %v2403_v5 = vsel %vm2391_vm8, %v5872_v22, %v2382_v58  ;;  %v6056_v43 = vmul.f32 %v6027_v30, %v4724_v23 }
 0x43c   : > { %v2492_v50 = vpop.permute.xlu2 %2491  ;;  %2750 = vperm.xlu0 %4151, %v5424_v32   ;;  %v2419_v32 = vsel %vm2391_vm8, %v2382_v58, %v5872_v22  ;;  %v6062_v58 = vmul.f32 %v6030_v25, %v4751_v56  ;;  %v6094_v56 = vmul.f32 %v6030_v25, %v4766_v40 }
 0x43d   : > { %10103 = vst [vmem:[#allocation298_spill] sm:$0xff] %v6021_v10  ;;  %v6032_v28 = vmul.f32 %v2492_v50, %v2442_v20  ;;  %v6034_v37 = vmul.f32 %v2492_v50, %v2443_v3  ;;  %2628 = vrot.lane.b32.xlu1 %v4934_v0, %s4304_s23  ;;  %v6052_v50 = vmul.f32 %v6030_v25, %v4726_v27 }
 0x43e   : > { %10104 = vst [vmem:[#allocation299_spill] sm:$0xff] %v6023_v52  ;;  %v2508_v29 = vpop.permute.xlu0 %2507  ;;  %v6159_v52 = vperm.slane %v5975_v31, 1 }
 0x43f   : > { %10105 = vst [vmem:[#allocation300_spill] sm:$0xff] %v6032_v28  ;;  %v2384_v36 = vpop.permute.xlu1 %2383 }
 0x440   : > { %10106 = vst [vmem:[#allocation301_spill] sm:$0xff] %v6034_v37  ;;  %v2404_v46 = vsel %vm2391_vm8, %v5877_v19, %v2384_v36  ;;  %v2420_v3 = vsel %vm2391_vm8, %v2384_v36, %v5877_v19  ;;  %v6066_v37 = vmul.f32 %v6027_v30, %v4770_v41  ;;  %v6070_v19 = vmul.f32 %v6030_v25, %v4786_v48 }
 0x441   : > { %v2450_v20 = vmul.f32 %v5979_v44, %v2404_v46  ;;  %v2451_v22 = vmul.f32 %v5982_v60, %v2420_v3  ;;  %10107 = vst [vmem:[#allocation302_spill] sm:$0xff] %v6062_v58  ;;  %v6074_v36 = vmul.f32 %v6027_v30, %v4736_v55  ;;  %v2448_v46 = vmul.f32 %v5979_v44, %v2403_v5 }
 0x442   : > { %10108 = vst [vmem:[#allocation303_spill] sm:$0xff] %v6066_v37  ;;  %2642 = vrot.lane.b32.xlu2 %v4806_v9, %s4304_s23  ;;  %v2449_v3 = vmul.f32 %v5982_v60, %v2419_v32  ;;  %v6086_v37 = vmul.f32 %v6027_v30, %v4827_v61  ;;  %v6098_v5 = vmul.f32 %v6027_v30, %v4754_v33 }
 0x443   : > { %10109 = vst [vmem:[#allocation304_spill] sm:$0xff] %v6070_v19  ;;  %v6080_v58 = vmul.f32 %v2508_v29, %v2450_v20  ;;  %v6082_v28 = vmul.f32 %v2508_v29, %v2451_v22  ;;  %v6090_v19 = vmul.f32 %v6030_v25, %v4801_v6  ;;  %v6103_v29 = vmul.f32 %v6027_v30, %v4794_v62 }
 0x444   : > { %10110 = vst [vmem:[#allocation305_spill] sm:$0xff] %v6074_v36  ;;  %v2504_v32 = vpop.permute.xlu2 %2503  ;;  %2762 = vperm.xlu0 %4151, %v5443_v38   ;;  %v6107_v20 = vmul.f32 %v6030_v25, %v4806_v9  ;;  %v6121_v38 = vmul.f32 %v6027_v30, %v4842_v12  ;;  %v10149_v36 = vld [vmem:[#allocation58_spill] sm:$0xff] }
 0x445   : > { %10111 = vst [vmem:[#allocation306_spill] sm:$0xff] %v6080_v58  ;;  %v6109_v22 = vmul.f32 %v2504_v32, %v2448_v46  ;;  %2634 = vrot.lane.b32.xlu1 %v5000_v35, %s4304_s23  ;;  %v6117_v58 = vmul.f32 %v6030_v25, %v4868_v53  ;;  %v6129_v46 = vmul.f32 %v6027_v30, %v4854_v2  ;;  %v10156_v2 = vld [vmem:[#allocation149_spill] sm:$0xff] }
 0x446   : > { %10112 = vst [vmem:[#allocation307_spill] sm:$0xff] %v6082_v28  ;;  %v6111_v28 = vmul.f32 %v2504_v32, %v2449_v3  ;;  %v2520_v3 = vpop.permute.xlu0 %2519  ;;  %v6135_v32 = vmul.f32 %v6027_v30, %v4891_v47  ;;  %v2406_v53 = vsel %vm2391_vm8, %v5882_v15, %v5942_v26 }
 0x447   : > { %10113 = vst [vmem:[#allocation308_spill] sm:$0xff] %v6090_v19  ;;  %v2390_v9 = vpop.permute.xlu1 %2389 }
 0x448   : > { %10114 = vst [vmem:[#allocation309_spill] sm:$0xff] %v6094_v56  ;;  %v919_v56 = vsel %vm918_vm9, %v4929_v7, %v4931_v21 }
 0x449   : > { %10115 = vst [vmem:[#allocation310_spill] sm:$0xff] %v6098_v5 }
 0x44a   : > { %10116 = vst [vmem:[#allocation311_spill] sm:$0xff] %v6103_v29  ;;  %v6125_v29 = vmul.f32 %v6030_v25, %v4847_v49  ;;  %2648 = vrot.lane.b32.xlu2 %v4921_v45, %s4304_s23  ;;  %v10198_v49 = vld [vmem:[#allocation67_spill] sm:$0xff] }
 0x44b   : > { %10117 = vst [vmem:[#allocation312_spill] sm:$0xff] %v6107_v20 }
 0x44c   : > { %10118 = vst [vmem:[#allocation313_spill] sm:$0xff] %v6109_v22  ;;  %v2407_v22 = vsel %vm2391_vm8, %v5887_v59, %v2390_v9  ;;  %2774 = vperm.xlu0 %4151, %v5457_v11   ;;  %v6220_v11 = vmul.f32 %v6027_v30, %v4967_v13 }
 0x44d   : > { %10119 = vst [vmem:[#allocation314_spill] sm:$0xff] %v6111_v28  ;;  %v2422_v28 = vsel %vm2391_vm8, %v5942_v26, %v5882_v15  ;;  %v2456_v10 = vmul.f32 %v5979_v44, %v2407_v22  ;;  %v6164_v26 = vperm.slane %v5970_v1, 0  ;;  %v6167_v15 = vperm.slane %v5975_v31, 0  ;;  %2640 = vrot.lane.b32.xlu1 %v4766_v40, %s4304_s23 }
 0x44e   : > { %10120 = vst [vmem:[#allocation315_spill] sm:$0xff] %v6117_v58  ;;  %v6139_v58 = vmul.f32 %v6030_v25, %v4916_v54  ;;  %v2454_v22 = vmul.f32 %v5979_v44, %v2406_v53  ;;  %v6199_v53 = vmul.f32 %v6027_v30, %v4871_v63  ;;  %v6236_v40 = vmul.f32 %v6030_v25, %v4954_v16 }
 0x44f   : > { %10121 = vst [vmem:[#allocation316_spill] sm:$0xff] %v6121_v38  ;;  %v6181_v20 = vmul.f32 %v2520_v3, %v2456_v10  ;;  %v946_v63 = vsel %vm918_vm9, %v4977_v34, %v4895_v24  ;;  %v10158_v38 = vld [vmem:[#allocation52_spill] sm:$0xff] }
 0x450   : > { %10122 = vst [vmem:[#allocation317_spill] sm:$0xff] %v6125_v29 }
 0x451   : > { %10123 = vst [vmem:[#allocation318_spill] sm:$0xff] %v6129_v46 }
 0x452   : > { %10124 = vst [vmem:[#allocation319_spill] sm:$0xff] %v6135_v32  ;;  %v2423_v32 = vsel %vm2391_vm8, %v2390_v9, %v5887_v59  ;;  %v1194_v9 = vsel %vm1193_vm10, %v4944_v4, %v4946_v42  ;;  %v1210_v59 = vsel %vm1193_vm10, %v4946_v42, %v4944_v4  ;;  %v935_v42 = vsel %vm918_vm9, %v4931_v21, %v4929_v7 }
 0x453   : > { %10125 = vst [vmem:[#allocation320_spill] sm:$0xff] %v6139_v58  ;;  %v6156_v58 = vperm.slane %v5970_v1, 1  ;;  %v2457_v33 = vmul.f32 %v5982_v60, %v2423_v32  ;;  %v2455_v32 = vmul.f32 %v5982_v60, %v2422_v28  ;;  %v6195_v4 = vmul.f32 %v6030_v25, %v4886_v39  ;;  %2726 = vperm.xlu2 %4153, %v10156_v2  }
 0x454   : > { %10127 = vst [vmem:[#allocation322_spill] sm:$0xff] %v6159_v52  ;;  %v1229_v28 = vmul.f32 %v6159_v52, %v1194_v9  ;;  %v6212_v7 = vmul.f32 %v6027_v30, %v4949_v18  ;;  %v6216_v21 = vmul.f32 %v6030_v25, %v4934_v0  ;;  %v6224_v9 = vmul.f32 %v6030_v25, %v4921_v45 }
 0x455   : > { %10126 = vst [vmem:[#allocation321_spill] sm:$0xff] %v6156_v58  ;;  %v6183_v5 = vmul.f32 %v2520_v3, %v2457_v33  ;;  %v2516_v33 = vpop.permute.xlu2 %2515  ;;  %v1228_v10 = vmul.f32 %v6156_v58, %v1210_v59  ;;  %v6226_v59 = vpop.permute.xlu0 %2590  ;;  %2847 = vrot.lane.b32.xlu0 %v4770_v41, %s4306_s29  ;;  %2646 = vrot.lane.b32.xlu1 %v4886_v39, %s4304_s23  ;;  %v10164_v41 = vld [vmem:[#allocation66_spill] sm:$0xff] }
 0x456   : > { %10128 = vst [vmem:[#allocation323_spill] sm:$0xff] %v6164_v26  ;;  %v6204_v3 = vmul.f32 %v2516_v33, %v2454_v22  ;;  %v953_v22 = vmul.f32 %v6164_v26, %v935_v42  ;;  %v6246_v42 = vmul.f32 %v6030_v25, %v4982_v8 }
 0x457   : > { %10129 = vst [vmem:[#allocation324_spill] sm:$0xff] %v6167_v15 }
 0x458   : > { %10130 = vst [vmem:[#allocation325_spill] sm:$0xff] %v6181_v20  ;;  %v6238_v20 = vpop.permute.xlu1 %2467 }
 0x459   : > { %10131 = vst [vmem:[#allocation326_spill] sm:$0xff] %v6183_v5  ;;  %v6206_v5 = vmul.f32 %v2516_v33, %v2455_v32  ;;  %v954_v32 = vmul.f32 %v6167_v15, %v919_v56  ;;  %v6232_v33 = vmul.f32 %v6027_v30, %v4987_v57  ;;  %v10145_v56 = vld [vmem:[#allocation60_spill] sm:$0xff] }
 0x45a   : > { %10132 = vst [vmem:[#allocation327_spill] sm:$0xff] %v6195_v4 }
 0x45b   : > { %10133 = vst [vmem:[#allocation328_spill] sm:$0xff] %v6199_v53  ;;  %v10148_v53 = vld [vmem:[#allocation16_spill] sm:$0xff] }
 0x45c   : > { %10134 = vst [vmem:[#allocation329_spill] sm:$0xff] %v6204_v3  ;;  %v1324_v45 = vmul.f32 %v10148_v53, %v1228_v10  ;;  %v1325_v62 = vmul.f32 %v10148_v53, %v1229_v28  ;;  %v10153_v53 = vld [vmem:[#allocation71_spill] sm:$0xff] }
 0x45d   : > { %10135 = vst [vmem:[#allocation330_spill] sm:$0xff] %v6206_v5  ;;  %v6276_v28 = vmul.f32 %v6027_v30, %v10153_v53  ;;  %v10160_v5 = vld [vmem:[#allocation51_spill] sm:$0xff]  ;;  %2853 = vrot.lane.b32.xlu0 %v4891_v47, %s4306_s29 }
 0x45e   : > { %10136 = vst [vmem:[#allocation331_spill] sm:$0xff] %v6212_v7 }
 0x45f   : > { %10137 = vst [vmem:[#allocation332_spill] sm:$0xff] %v6216_v21  ;;  %v10216_v21 = vld [vmem:[#allocation43_spill] sm:$0xff] }
 0x460   : > { %10138 = vst [vmem:[#allocation333_spill] sm:$0xff] %v6220_v11 }
 0x461   : > { %10139 = vst [vmem:[#allocation334_spill] sm:$0xff] %v6224_v9  ;;  %v6250_v9 = vmul.f32 %v6027_v30, %v10145_v56 }
 0x462   : > { %10140 = vst [vmem:[#allocation335_spill] sm:$0xff] %v6226_v59 }
 0x463   : > { %10141 = vst [vmem:[#allocation336_spill] sm:$0xff] %v6232_v33  ;;  %v6254_v33 = vmul.f32 %v6030_v25, %v5000_v35  ;;  %v930_v35 = vsel %vm918_vm9, %v4895_v24, %v4977_v34  ;;  %v10159_v34 = vld [vmem:[#allocation48_spill] sm:$0xff] }
 0x464   : > { %10142 = vst [vmem:[#allocation337_spill] sm:$0xff] %v6236_v40  ;;  %v10150_v40 = vld [vmem:[#allocation46_spill] sm:$0xff]  ;;  %v936_v24 = vsel %vm918_vm9, %v10159_v34, %v10158_v38 }
 0x465   : > { %10143 = vst [vmem:[#allocation338_spill] sm:$0xff] %v6238_v20  ;;  %v1205_v11 = vsel %vm1193_vm10, %v10150_v40, %v10149_v36  ;;  %2859 = vrot.lane.b32.xlu0 %v4987_v57, %s4306_s29  ;;  %v6481_v57 = vld [vmem:[%s9440_s5 + $0x18] sm:$0xff]  ;;  %v4254_v20 = vld [vmem:[%s9440_s5 + $0x48] sm:$0xff] }
 0x466   : > { %10144 = vst [vmem:[#allocation339_spill] sm:$0xff] %v6246_v42  ;;  %v1221_v42 = vsel %vm1193_vm10, %v10149_v36, %v10150_v40  ;;  %v10157_v40 = vld [vmem:[#allocation2_spill] sm:$0xff] }
 0x467   : > { %10146 = vst [vmem:[#allocation60_spill] sm:$0xff] %v6250_v9  ;;  %v6280_v9 = vmul.f32 %v6030_v25, %v5032_v17  ;;  %v1065_v36 = vmul.f32 %v10157_v40, %v953_v22  ;;  %v1066_v29 = vmul.f32 %v10157_v40, %v954_v32  ;;  %v1250_v25 = vmul.f32 %v6156_v58, %v1221_v42  ;;  %v6300_v32 = vpop.permute.xlu2 %2588  ;;  %v10163_v42 = vld [vmem:[#allocation62_spill] sm:$0xff] }
 0x468   : > { %10147 = vst [vmem:[#allocation340_spill] sm:$0xff] %v6254_v33  ;;  %v10151_v33 = vld [vmem:[#allocation72_spill] sm:$0xff]  ;;  %v1251_v22 = vmul.f32 %v6159_v52, %v1205_v11  ;;  %v976_v40 = vmul.f32 %v6167_v15, %v930_v35  ;;  %v10162_v11 = vld [vmem:[#allocation57_spill] sm:$0xff]  ;;  %v6330_v35 = vmul.f32 %v6164_v26, %v936_v24 }
 0x469   : > { %v6272_v10 = vmul.f32 %v6027_v30, %v10151_v33  ;;  %10154 = vst [vmem:[#allocation58_spill] sm:$0xff] %v6276_v28  ;;  %v10161_v30 = vld [vmem:[#allocation55_spill] sm:$0xff]  ;;  %v6309_v17 = vadd.f32 %v1324_v45, %v1065_v36  ;;  %v10168_v36 = vld [vmem:[#allocation49_spill] sm:$0xff]  ;;  %v921_v3 = vsel %vm918_vm9, %v10162_v11, %v10163_v42  ;;  %v10172_v24 = vld [vmem:[#allocation32_spill] sm:$0xff] }
 0x46a   : > { %10155 = vst [vmem:[#allocation46_spill] sm:$0xff] %v6280_v9  ;;  %v1195_v28 = vsel %vm1193_vm10, %v10161_v30, %v10160_v5  ;;  %v1211_v2 = vsel %vm1193_vm10, %v10160_v5, %v10161_v30  ;;  %v6311_v5 = vadd.f32 %v1325_v62, %v1066_v29  ;;  %v937_v30 = vsel %vm918_vm9, %v10163_v42, %v10162_v11  ;;  %v10165_v9 = vld [vmem:[#allocation61_spill] sm:$0xff]  ;;  %v6327_v62 = vpop.permute.xlu0 %2596  ;;  %v10176_v42 = vld [vmem:[#allocation284_spill] sm:$0xff] }
 0x46b   : > { %10152 = vst [vmem:[#allocation16_spill] sm:$0xff] %v6272_v10  ;;  %v975_v10 = vmul.f32 %v6164_v26, %v946_v63  ;;  %v920_v63 = vsel %vm918_vm9, %v10158_v38, %v10159_v34  ;;  %v1196_v27 = vsel %vm1193_vm10, %v10165_v9, %v10164_v41  ;;  %v1212_v45 = vsel %vm1193_vm10, %v10164_v41, %v10165_v9  ;;  %v10169_v34 = vld [vmem:[#allocation63_spill] sm:$0xff]  ;;  %v6342_v9 = vpop.permute.xlu1 %2475  ;;  %v10171_v41 = vld [vmem:[#allocation22_spill] sm:$0xff]  ;;  %v10174_v11 = vld [vmem:[#allocation221_spill] sm:$0xff] }
 0x46c   : > { %10166 = vst [vmem:[#allocation72_spill] sm:$0xff] %v6327_v62  ;;  %v1230_v29 = vmul.f32 %v6156_v58, %v1211_v2  ;;  %v1231_v38 = vmul.f32 %v6159_v52, %v1195_v28  ;;  %v947_v39 = vsel %vm918_vm9, %v10169_v34, %v10168_v36  ;;  %v1347_v2 = vmul.f32 %v10172_v24, %v1251_v22  ;;  %v10210_v62 = vld [vmem:[#allocation84_spill] sm:$0xff] }
 0x46d   : > { %10167 = vst [vmem:[#allocation71_spill] sm:$0xff] %v6330_v35  ;;  %v1087_v4 = vmul.f32 %v10171_v41, %v975_v10  ;;  %v1346_v35 = vmul.f32 %v10172_v24, %v1250_v25  ;;  %v6348_v28 = vmul.f32 %v6167_v15, %v920_v63  ;;  %v1088_v48 = vmul.f32 %v10171_v41, %v976_v40  ;;  %v10175_v63 = vld [vmem:[#allocation285_spill] sm:$0xff] }
 0x46e   : > { %10170 = vst [vmem:[#allocation149_spill] sm:$0xff] %v6342_v9  ;;  %v957_v46 = vmul.f32 %v6164_v26, %v937_v30  ;;  %v1232_v6 = vmul.f32 %v6156_v58, %v1212_v45  ;;  %v1233_v54 = vmul.f32 %v6159_v52, %v1196_v27  ;;  %v931_v10 = vsel %vm918_vm9, %v10168_v36, %v10169_v34  ;;  %v10177_v45 = vld [vmem:[#allocation25_spill] sm:$0xff]  ;;  %v10181_v34 = vld [vmem:[#allocation54_spill] sm:$0xff] }
 0x46f   : > { %10173 = vst [vmem:[#allocation2_spill] sm:$0xff] %v6348_v28  ;;  %v977_v25 = vmul.f32 %v6164_v26, %v947_v39  ;;  %v958_v22 = vmul.f32 %v6167_v15, %v921_v3  ;;  %2734 = vperm.xlu2 %4153, %v10174_v11   ;;  %v2399_v40 = vsel %vm2391_vm8, %v10176_v42, %v10175_v63  ;;  %v9742_v30 = vmov 8   ;;  %v10180_v3 = vld [vmem:[#allocation70_spill] sm:$0xff]  ;;  %v10195_v28 = vld [vmem:[#allocation59_spill] sm:$0xff] }
 0x470   : > { %v2415_v27 = vsel %vm2391_vm8, %v10175_v63, %v10176_v42  ;;  %4155 = vset.pattern.permute.xlu0 %v9742_v30  ;;  %v6371_v36 = vmul.f32 %v10177_v45, %v1230_v29  ;;  %v6374_v39 = vmul.f32 %v10177_v45, %v1231_v38  ;;  %v1206_v41 = vsel %vm1193_vm10, %v10181_v34, %v10180_v3  ;;  %v6388_v42 = vpop.permute.xlu2 %2594  ;;  %v10184_v38 = vld [vmem:[#allocation10_spill] sm:$0xff] }
 0x471   : > { %v1222_v24 = vsel %vm1193_vm10, %v10180_v3, %v10181_v34  ;;  %v6384_v11 = vadd.f32 %v1346_v35, %v1087_v4  ;;  %v6386_v63 = vadd.f32 %v1347_v2, %v1088_v48  ;;  %v978_v29 = vmul.f32 %v6167_v15, %v931_v10  ;;  %v10185_v30 = vld [vmem:[#allocation26_spill] sm:$0xff]  ;;  %v10187_v3 = vld [vmem:[#allocation11_spill] sm:$0xff]  ;;  %2865 = vrot.lane.b32.xlu0 %v10151_v33, %s4306_s29  ;;  %v6576_v33 = vld [vmem:[%s9440_s5 + $0x30] sm:$0xff] }
 0x472   : > { %10178 = vst [vmem:[#allocation52_spill] sm:$0xff] %v6371_v36  ;;  %v1069_v45 = vmul.f32 %v10184_v38, %v957_v46  ;;  %v1328_v9 = vmul.f32 %v10185_v30, %v1232_v6  ;;  %v10186_v36 = vld [vmem:[#allocation216_spill] sm:$0xff]  ;;  %v1089_v4 = vmul.f32 %v10187_v3, %v977_v25  ;;  %v1070_v48 = vmul.f32 %v10184_v38, %v958_v22  ;;  %v6401_v34 = vpop.permute.xlu0 %2602  ;;  %v10189_v10 = vld [vmem:[#allocation78_spill] sm:$0xff]  ;;  %v10190_v6 = vld [vmem:[#allocation77_spill] sm:$0xff] }
 0x473   : > { %10179 = vst [vmem:[#allocation48_spill] sm:$0xff] %v6374_v39  ;;  %v1329_v39 = vmul.f32 %v10185_v30, %v1233_v54  ;;  %2722 = vperm.xlu1 %4152, %v10186_v36   ;;  %v2440_v35 = vmul.f32 %v5979_v44, %v2399_v40  ;;  %v2441_v2 = vmul.f32 %v5982_v60, %v2415_v27  ;;  %v2488_v22 = vpop.permute.xlu1 %2487  ;;  %v10191_v40 = vld [vmem:[#allocation75_spill] sm:$0xff]  ;;  %v10192_v30 = vld [vmem:[#allocation74_spill] sm:$0xff] }
 0x474   : > { %10182 = vst [vmem:[#allocation51_spill] sm:$0xff] %v6384_v11  ;;  %v1252_v47 = vmul.f32 %v6156_v58, %v1222_v24  ;;  %v1253_v46 = vmul.f32 %v6159_v52, %v1206_v41  ;;  %v1197_v54 = vsel %vm1193_vm10, %v10190_v6, %v10189_v10  ;;  %v1213_v25 = vsel %vm1193_vm10, %v10189_v10, %v10190_v6  ;;  %v10197_v11 = vld [vmem:[#allocation76_spill] sm:$0xff] }
 0x475   : > { %10183 = vst [vmem:[#allocation55_spill] sm:$0xff] %v6386_v63  ;;  %v922_v27 = vsel %vm918_vm9, %v10192_v30, %v10191_v40  ;;  %v938_v36 = vsel %vm918_vm9, %v10191_v40, %v10192_v30  ;;  %v6421_v41 = vmul.f32 %v2488_v22, %v2440_v35  ;;  %v6423_v24 = vmul.f32 %v2488_v22, %v2441_v2  ;;  %v10199_v2 = vld [vmem:[#allocation213_spill] sm:$0xff] }
 0x476   : > { %10188 = vst [vmem:[#allocation57_spill] sm:$0xff] %v6401_v34  ;;  %v1090_v38 = vmul.f32 %v10187_v3, %v978_v29  ;;  %v10196_v34 = vld [vmem:[#allocation68_spill] sm:$0xff]  ;;  %v6430_v6 = vadd.f32 %v1328_v9, %v1069_v45  ;;  %v6432_v63 = vadd.f32 %v1329_v39, %v1070_v48  ;;  %v1207_v40 = vsel %vm1193_vm10, %v10198_v49, %v10197_v11  ;;  %v10200_v45 = vld [vmem:[#allocation287_spill] sm:$0xff]  ;;  %v10201_v48 = vld [vmem:[#allocation286_spill] sm:$0xff] }
 0x477   : > { %10193 = vst [vmem:[#allocation62_spill] sm:$0xff] %v6421_v41  ;;  %v948_v10 = vsel %vm918_vm9, %v10196_v34, %v10195_v28  ;;  %v1223_v35 = vsel %vm1193_vm10, %v10197_v11, %v10198_v49  ;;  %v1234_v29 = vmul.f32 %v6156_v58, %v1213_v25  ;;  %v1235_v3 = vmul.f32 %v6159_v52, %v1197_v54  ;;  %v10202_v54 = vld [vmem:[#allocation39_spill] sm:$0xff] }
 0x478   : > { %10194 = vst [vmem:[#allocation66_spill] sm:$0xff] %v6423_v24  ;;  %2746 = vperm.xlu2 %4153, %v10199_v2   ;;  %v959_v9 = vmul.f32 %v6164_v26, %v938_v36  ;;  %v960_v39 = vmul.f32 %v6167_v15, %v922_v27  ;;  %v2402_v22 = vsel %vm2391_vm8, %v10201_v48, %v10200_v45  ;;  %v6461_v27 = vpop.permute.xlu2 %2600  ;;  %v10205_v24 = vld [vmem:[#allocation65_spill] sm:$0xff] }
 0x479   : > { %v2418_v49 = vsel %vm2391_vm8, %v10200_v45, %v10201_v48  ;;  %v932_v11 = vsel %vm918_vm9, %v10195_v28, %v10196_v34  ;;  %v1348_v25 = vmul.f32 %v10202_v54, %v1252_v47  ;;  %v1349_v30 = vmul.f32 %v10202_v54, %v1253_v46  ;;  %v10204_v48 = vld [vmem:[#allocation83_spill] sm:$0xff]  ;;  %v10206_v47 = vld [vmem:[#allocation21_spill] sm:$0xff]  ;;  %2889 = vrot.lane.b32.xlu0 %v4954_v16, %s4306_s29 }
 0x47a   : > { %v6466_v36 = vmul.f32 %v6164_v26, %v948_v10  ;;  %v1254_v2 = vmul.f32 %v6156_v58, %v1223_v35  ;;  %v1255_v45 = vmul.f32 %v6159_v52, %v1207_v40  ;;  %v933_v28 = vsel %vm918_vm9, %v10205_v24, %v10204_v48  ;;  %v6488_v54 = vpop.permute.xlu0 %2608 }
 0x47b   : > { %v949_v34 = vsel %vm918_vm9, %v10204_v48, %v10205_v24  ;;  %2730 = vperm.xlu1 %4152, %v6481_v57   ;;  %v1330_v46 = vmul.f32 %v10206_v47, %v1234_v29  ;;  %v1331_v10 = vmul.f32 %v10206_v47, %v1235_v3  ;;  %v2446_v40 = vmul.f32 %v5979_v44, %v2402_v22  ;;  %v10209_v48 = vld [vmem:[#allocation79_spill] sm:$0xff]  ;;  %v2500_v3 = vpop.permute.xlu1 %2499 }
 0x47c   : > { %10203 = vst [vmem:[#allocation61_spill] sm:$0xff] %v6466_v36  ;;  %v2447_v35 = vmul.f32 %v5982_v60, %v2418_v49  ;;  %v10208_v36 = vld [vmem:[#allocation3_spill] sm:$0xff]  ;;  %v923_v51 = vsel %vm918_vm9, %v10210_v62, %v10209_v48  ;;  %v939_v29 = vsel %vm918_vm9, %v10209_v48, %v10210_v62  ;;  %v981_v22 = vmul.f32 %v6164_v26, %v949_v34  ;;  %v10218_v62 = vld [vmem:[#allocation73_spill] sm:$0xff] }
 0x47d   : > { %10207 = vst [vmem:[#allocation49_spill] sm:$0xff] %v6488_v54  ;;  %v1071_v41 = vmul.f32 %v10208_v36, %v959_v9  ;;  %v1072_v24 = vmul.f32 %v10208_v36, %v960_v39  ;;  %v982_v49 = vmul.f32 %v6167_v15, %v933_v28  ;;  %v6502_v47 = vmul.f32 %v2500_v3, %v2446_v40  ;;  %v10219_v48 = vld [vmem:[#allocation89_spill] sm:$0xff] }
 0x47e   : > { %v6504_v9 = vmul.f32 %v2500_v3, %v2447_v35  ;;  %v6506_v39 = vadd.f32 %v1348_v25, %v1089_v4  ;;  %v6508_v36 = vadd.f32 %v1349_v30, %v1090_v38  ;;  %v6511_v54 = vmul.f32 %v6167_v15, %v932_v11  ;;  %v10220_v35 = vld [vmem:[#allocation218_spill] sm:$0xff]  ;;  %v10222_v38 = vld [vmem:[#allocation289_spill] sm:$0xff]  ;;  %v10223_v11 = vld [vmem:[#allocation288_spill] sm:$0xff] }
 0x47f   : > { %10211 = vst [vmem:[#allocation63_spill] sm:$0xff] %v6502_v47  ;;  %v6514_v7 = vmul.f32 %v10216_v21, %v1254_v2  ;;  %v1224_v34 = vsel %vm1193_vm10, %v10219_v48, %v10218_v62  ;;  %v6520_v28 = vadd.f32 %v1330_v46, %v1071_v41  ;;  %v6522_v40 = vadd.f32 %v1331_v10, %v1072_v24  ;;  %v10226_v46 = vld [vmem:[#allocation24_spill] sm:$0xff]  ;;  %v10228_v24 = vld [vmem:[#allocation82_spill] sm:$0xff] }
 0x480   : > { %10212 = vst [vmem:[#allocation22_spill] sm:$0xff] %v6504_v9  ;;  %2758 = vperm.xlu2 %4153, %v10220_v35   ;;  %v6526_v4 = vmul.f32 %v10216_v21, %v1255_v45  ;;  %v2405_v25 = vsel %vm2391_vm8, %v10223_v11, %v10222_v38  ;;  %v2421_v30 = vsel %vm2391_vm8, %v10222_v38, %v10223_v11  ;;  %v10227_v45 = vld [vmem:[#allocation87_spill] sm:$0xff]  ;;  %v6556_v35 = vpop.permute.xlu2 %2606  ;;  %v10231_v11 = vld [vmem:[#allocation93_spill] sm:$0xff] }
 0x481   : > { %10213 = vst [vmem:[#allocation32_spill] sm:$0xff] %v6506_v39  ;;  %v6537_v41 = vmul.f32 %v6164_v26, %v939_v29  ;;  %v6540_v2 = vmul.f32 %v6167_v15, %v923_v51  ;;  %v6543_v10 = vmul.f32 %v10226_v46, %v981_v22  ;;  %v6546_v21 = vmul.f32 %v10226_v46, %v982_v49  ;;  %v10229_v22 = vld [vmem:[#allocation90_spill] sm:$0xff]  ;;  %v10230_v49 = vld [vmem:[#allocation80_spill] sm:$0xff] }
 0x482   : > { %10214 = vst [vmem:[#allocation221_spill] sm:$0xff] %v6508_v36  ;;  %v1214_v3 = vsel %vm1193_vm10, %v10228_v24, %v10227_v45  ;;  %v1208_v29 = vsel %vm1193_vm10, %v10218_v62, %v10219_v48  ;;  %v1198_v51 = vsel %vm1193_vm10, %v10227_v45, %v10228_v24  ;;  %v934_v38 = vsel %vm918_vm9, %v10230_v49, %v10229_v22  ;;  %v10232_v46 = vld [vmem:[#allocation86_spill] sm:$0xff] }
 0x483   : > { %10215 = vst [vmem:[#allocation285_spill] sm:$0xff] %v6511_v54  ;;  %v950_v62 = vsel %vm918_vm9, %v10229_v22, %v10230_v49  ;;  %v1256_v48 = vmul.f32 %v6156_v58, %v1224_v34  ;;  %2742 = vperm.xlu1 %4152, %v6576_v33   ;;  %v1209_v45 = vsel %vm1193_vm10, %v10232_v46, %v10231_v11  ;;  %v6589_v49 = vpop.permute.xlu0 %2614 }
 0x484   : > { %10217 = vst [vmem:[#allocation284_spill] sm:$0xff] %v6514_v7  ;;  %v1225_v24 = vsel %vm1193_vm10, %v10231_v11, %v10232_v46  ;;  %v2452_v22 = vmul.f32 %v5979_v44, %v2405_v25  ;;  %v2453_v34 = vmul.f32 %v5982_v60, %v2421_v30  ;;  %v1236_v9 = vmul.f32 %v6156_v58, %v1214_v3  ;;  %v10235_v7 = vld [vmem:[#allocation88_spill] sm:$0xff]  ;;  %v2512_v46 = vpop.permute.xlu1 %2511  ;;  %v10236_v30 = vld [vmem:[#allocation85_spill] sm:$0xff] }
 0x485   : > { %10221 = vst [vmem:[#allocation25_spill] sm:$0xff] %v6526_v4  ;;  %v1257_v47 = vmul.f32 %v6159_v52, %v1208_v29  ;;  %v10234_v4 = vld [vmem:[#allocation95_spill] sm:$0xff]  ;;  %v983_v25 = vmul.f32 %v6164_v26, %v950_v62  ;;  %v1258_v36 = vmul.f32 %v6156_v58, %v1225_v24  ;;  %v1259_v39 = vmul.f32 %v6159_v52, %v1209_v45  ;;  %v10240_v62 = vld [vmem:[#allocation37_spill] sm:$0xff] }
 0x486   : > { %10224 = vst [vmem:[#allocation70_spill] sm:$0xff] %v6537_v41  ;;  %v1199_v54 = vsel %vm1193_vm10, %v10235_v7, %v10234_v4  ;;  %v1215_v11 = vsel %vm1193_vm10, %v10234_v4, %v10235_v7  ;;  %v6606_v41 = vmul.f32 %v2512_v46, %v2452_v22  ;;  %v6608_v29 = vmul.f32 %v2512_v46, %v2453_v34  ;;  %v10241_v46 = vld [vmem:[#allocation223_spill] sm:$0xff] }
 0x487   : > { %10225 = vst [vmem:[#allocation54_spill] sm:$0xff] %v6540_v2  ;;  %v10237_v2 = vld [vmem:[#allocation92_spill] sm:$0xff]  ;;  %v1237_v4 = vmul.f32 %v6159_v52, %v1198_v51  ;;  %v1352_v59 = vmul.f32 %v10240_v62, %v1256_v48  ;;  %v1238_v22 = vmul.f32 %v6156_v58, %v1215_v11  ;;  %v1239_v34 = vmul.f32 %v6159_v52, %v1199_v54  ;;  %v10242_v45 = vld [vmem:[#allocation99_spill] sm:$0xff]  ;;  %v10245_v54 = vld [vmem:[#allocation98_spill] sm:$0xff] }
 0x488   : > { %10233 = vst [vmem:[#allocation10_spill] sm:$0xff] %v6589_v49  ;;  %v940_v3 = vsel %vm918_vm9, %v10237_v2, %v10236_v30  ;;  %v984_v49 = vmul.f32 %v6167_v15, %v934_v38  ;;  %v924_v7 = vsel %vm918_vm9, %v10236_v30, %v10237_v2  ;;  %2770 = vperm.xlu2 %4153, %v10241_v46   ;;  %v10244_v48 = vld [vmem:[#allocation96_spill] sm:$0xff]  ;;  %v6641_v30 = vpop.permute.xlu2 %2612 }
 0x489   : > { %10238 = vst [vmem:[#allocation26_spill] sm:$0xff] %v6606_v41  ;;  %v1353_v38 = vmul.f32 %v10240_v62, %v1257_v47  ;;  %v963_v24 = vmul.f32 %v6164_v26, %v940_v3  ;;  %v964_v51 = vmul.f32 %v6167_v15, %v924_v7  ;;  %v925_v11 = vsel %vm918_vm9, %v10245_v54, %v10244_v48  ;;  %v10246_v3 = vld [vmem:[#allocation14_spill] sm:$0xff] }
 0x48a   : > { %10239 = vst [vmem:[#allocation216_spill] sm:$0xff] %v6608_v29  ;;  %v10243_v29 = vld [vmem:[#allocation101_spill] sm:$0xff]  ;;  %v941_v47 = vsel %vm918_vm9, %v10244_v48, %v10245_v54  ;;  %v1096_v7 = vmul.f32 %v10246_v3, %v984_v49  ;;  %v10247_v62 = vld [vmem:[#allocation42_spill] sm:$0xff]  ;;  %v10248_v48 = vld [vmem:[#allocation23_spill] sm:$0xff]  ;;  %3001 = vperm.xlu0 %4155, %v6576_v33  }
 0x48b   : > { %v1200_v41 = vsel %vm1193_vm10, %v10243_v29, %v10242_v45  ;;  %v1216_v2 = vsel %vm1193_vm10, %v10242_v45, %v10243_v29  ;;  %v1095_v29 = vmul.f32 %v10246_v3, %v983_v25  ;;  %v1354_v46 = vmul.f32 %v10247_v62, %v1258_v36  ;;  %2754 = vperm.xlu1 %4152, %v4254_v20   ;;  %v2621_v25 = vpop.permute.xlu0 %2620  ;;  %v4255_v33 = vld [vmem:[%s9440_s5 + $0x60] sm:$0xff] }
 0x48c   : > { %v1355_v45 = vmul.f32 %v10247_v62, %v1259_v39  ;;  %v1334_v54 = vmul.f32 %v10248_v48, %v1238_v22  ;;  %v1335_v55 = vmul.f32 %v10248_v48, %v1239_v34  ;;  %v1240_v16 = vmul.f32 %v6156_v58, %v1216_v2  ;;  %v2587_v3 = vpop.permute.xlu1 %2586  ;;  %v10251_v22 = vld [vmem:[#allocation13_spill] sm:$0xff]  ;;  %v10252_v2 = vld [vmem:[#allocation31_spill] sm:$0xff] }
 0x48d   : > { %v1241_v19 = vmul.f32 %v6159_v52, %v1200_v41  ;;  %v965_v49 = vmul.f32 %v6164_v26, %v941_v47  ;;  %v966_v36 = vmul.f32 %v6167_v15, %v925_v11  ;;  %v6662_v39 = vsel %vm2650_vm11, %v6300_v32, %v2621_v25 }
 0x48e   : > { %10249 = vst [vmem:[#allocation11_spill] sm:$0xff] %v6662_v39  ;;  %v6667_v20 = vsel %vm2650_vm11, %v2621_v25, %v6300_v32  ;;  %v1075_v34 = vmul.f32 %v10251_v22, %v963_v24  ;;  %v1076_v41 = vmul.f32 %v10251_v22, %v964_v51  ;;  %v6672_v62 = vmul.f32 %v10252_v2, %v1236_v9  ;;  %v10259_v25 = vld [vmem:[#allocation30_spill] sm:$0xff] }
 0x48f   : > { %10250 = vst [vmem:[#allocation78_spill] sm:$0xff] %v6667_v20  ;;  %v6675_v11 = vmul.f32 %v10252_v2, %v1237_v4  ;;  %v6678_v47 = vadd.f32 %v1352_v59, %v6543_v10  ;;  %v6681_v48 = vadd.f32 %v1353_v38, %v6546_v21  ;;  %v6683_v39 = vadd.f32 %v1354_v46, %v1095_v29  ;;  %v10260_v59 = vld [vmem:[#allocation5_spill] sm:$0xff]  ;;  %v10261_v4 = vld [vmem:[#allocation91_spill] sm:$0xff]  ;;  %v10262_v38 = vld [vmem:[#allocation102_spill] sm:$0xff] }
 0x490   : > { %10253 = vst [vmem:[#allocation77_spill] sm:$0xff] %v6672_v62  ;;  %v6685_v32 = vadd.f32 %v1355_v45, %v1096_v7  ;;  %v1336_v24 = vmul.f32 %v10259_v25, %v1240_v16  ;;  %v1337_v51 = vmul.f32 %v10259_v25, %v1241_v19  ;;  %v6689_v22 = vadd.f32 %v1334_v54, %v1075_v34  ;;  %v10267_v7 = vld [vmem:[#allocation111_spill] sm:$0xff]  ;;  %v10268_v46 = vld [vmem:[#allocation116_spill] sm:$0xff]  ;;  %v2619_v16 = vpop.permute.xlu2 %2618 }
 0x491   : > { %10254 = vst [vmem:[#allocation75_spill] sm:$0xff] %v6675_v11  ;;  %v6691_v9 = vadd.f32 %v1335_v55, %v1076_v41  ;;  %2845 = vrot.lane.b32.xlu2 %v4724_v23, %s4306_s29  ;;  %v1077_v10 = vmul.f32 %v10260_v59, %v965_v49  ;;  %v1078_v21 = vmul.f32 %v10260_v59, %v966_v36  ;;  %v10264_v19 = vmov 8   ;;  %v10269_v49 = vld [vmem:[#allocation114_spill] sm:$0xff]  ;;  %v10270_v36 = vld [vmem:[#allocation119_spill] sm:$0xff] }
 0x492   : > { %10255 = vst [vmem:[#allocation74_spill] sm:$0xff] %v6678_v47  ;;  %v6701_v29 = vsel %vm918_vm9, %v10262_v38, %v10261_v4  ;;  %4156 = vset.pattern.permute.xlu2 %v10264_v19  ;;  %v6709_v55 = vsel %vm918_vm9, %v10261_v4, %v10262_v38  ;;  %v6712_v23 = vperm.slane %v5970_v1, 2  ;;  %v928_v45 = vsel %vm918_vm9, %v10268_v46, %v10267_v7  ;;  %v10272_v4 = vld [vmem:[#allocation50_spill] sm:$0xff]  ;;  %v10273_v38 = vld [vmem:[#allocation115_spill] sm:$0xff] }
 0x493   : > { %10256 = vst [vmem:[#allocation59_spill] sm:$0xff] %v6681_v48  ;;  %v944_v54 = vsel %vm918_vm9, %v10267_v7, %v10268_v46  ;;  %v1203_v34 = vsel %vm1193_vm10, %v10270_v36, %v10269_v49  ;;  %v1219_v41 = vsel %vm1193_vm10, %v10269_v49, %v10270_v36  ;;  %v6733_v2 = vsel %vm2650_vm11, %v2587_v3, %v2619_v16  ;;  %v2627_v36 = vpop.permute.xlu0 %2626  ;;  %v10306_v48 = vld [vmem:[#allocation129_spill] sm:$0xff] }
 0x494   : > { %10257 = vst [vmem:[#allocation68_spill] sm:$0xff] %v6683_v39  ;;  %v6737_v25 = vsel %vm2650_vm11, %v2619_v16, %v2587_v3  ;;  %2766 = vperm.xlu1 %4152, %v4255_v33   ;;  %v6743_v59 = vperm.slane %v5975_v31, 2  ;;  %v1469_v7 = vsel %vm1452_vm12, %v10273_v38, %v10272_v4  ;;  %v6749_v46 = vadd.f32 %v1336_v24, %v1077_v10  ;;  %v2593_v11 = vpop.permute.xlu1 %2592  ;;  %v10275_v24 = vld [vmem:[#allocation104_spill] sm:$0xff]  ;;  %v10276_v10 = vld [vmem:[#allocation97_spill] sm:$0xff] }
 0x495   : > { %10258 = vst [vmem:[#allocation76_spill] sm:$0xff] %v6685_v32  ;;  %v6751_v49 = vadd.f32 %v1337_v51, %v1078_v21  ;;  %v971_v3 = vmul.f32 %v6164_v26, %v944_v54  ;;  %v972_v16 = vmul.f32 %v6167_v15, %v928_v45  ;;  %v6758_v33 = vsel %vm2650_vm11, %v6388_v42, %v2627_v36  ;;  %v10279_v15 = vld [vmem:[#allocation105_spill] sm:$0xff] }
 0x496   : > { %10263 = vst [vmem:[#allocation67_spill] sm:$0xff] %v6701_v29  ;;  %v6763_v62 = vsel %vm2650_vm11, %v2627_v36, %v6388_v42  ;;  %v6769_v51 = vsel %vm918_vm9, %v10276_v10, %v10275_v24  ;;  %v1453_v21 = vsel %vm1452_vm12, %v10272_v4, %v10273_v38  ;;  %v1246_v45 = vmul.f32 %v6156_v58, %v1219_v41  ;;  %v10278_v29 = vld [vmem:[#allocation94_spill] sm:$0xff]  ;;  %v10283_v41 = vld [vmem:[#allocation81_spill] sm:$0xff] }
 0x497   : > { %10265 = vst [vmem:[#allocation213_spill] sm:$0xff] %v6709_v55  ;;  %v1247_v54 = vmul.f32 %v6159_v52, %v1203_v34  ;;  %v6781_v42 = vsel %vm1193_vm10, %v10279_v15, %v10278_v29  ;;  %v6787_v36 = vsel %vm1193_vm10, %v10278_v29, %v10279_v15  ;;  %v6793_v4 = vsel %vm918_vm9, %v10275_v24, %v10276_v10  ;;  %v10284_v34 = vld [vmem:[#allocation118_spill] sm:$0xff]  ;;  %v10286_v55 = vld [vmem:[#allocation100_spill] sm:$0xff]  ;;  %v10289_v24 = vld [vmem:[#allocation69_spill] sm:$0xff] }
 0x498   : > { %10266 = vst [vmem:[#allocation287_spill] sm:$0xff] %v6712_v23  ;;  %v1472_v38 = vsel %vm1452_vm12, %v10284_v34, %v10283_v41  ;;  %v1487_v29 = vmul.f32 %v6712_v23, %v1469_v7  ;;  %v10290_v10 = vld [vmem:[#allocation132_spill] sm:$0xff]  ;;  %v1488_v26 = vmul.f32 %v6743_v59, %v1453_v21  ;;  %v1456_v7 = vsel %vm1452_vm12, %v10283_v41, %v10284_v34  ;;  %v10302_v32 = vld [vmem:[#allocation133_spill] sm:$0xff] }
 0x499   : > { %10271 = vst [vmem:[#allocation286_spill] sm:$0xff] %v6743_v59  ;;  %2851 = vrot.lane.b32.xlu2 %v4842_v12, %s4306_s29  ;;  %v10292_v12 = vld [vmem:[#allocation35_spill] sm:$0xff] }
 0x49a   : > { %10274 = vst [vmem:[#allocation39_spill] sm:$0xff] %v6751_v49  ;;  %v1342_v58 = vmul.f32 %v10292_v12, %v1246_v45  ;;  %v1343_v21 = vmul.f32 %v10292_v12, %v1247_v54  ;;  %v10299_v12 = vld [vmem:[#allocation123_spill] sm:$0xff] }
 0x49b   : > { %10277 = vst [vmem:[#allocation83_spill] sm:$0xff] %v6769_v51  ;;  %v10285_v51 = vld [vmem:[#allocation110_spill] sm:$0xff] }
 0x49c   : > { %10280 = vst [vmem:[#allocation65_spill] sm:$0xff] %v6781_v42  ;;  %v6803_v42 = vsel %vm1193_vm10, %v10286_v55, %v10285_v51  ;;  %v6809_v15 = vsel %vm1193_vm10, %v10285_v51, %v10286_v55  ;;  %v1455_v55 = vsel %vm1452_vm12, %v10289_v24, %v10290_v10  ;;  %v6830_v51 = vmul.f32 %v6712_v23, %v1472_v38  ;;  %v6856_v38 = vld [vmem:[%s9440_s5 + $0x78] sm:$0xff] }
 0x49d   : > { %10281 = vst [vmem:[#allocation21_spill] sm:$0xff] %v6787_v36  ;;  %v1471_v36 = vsel %vm1452_vm12, %v10290_v10, %v10289_v24  ;;  %v10294_v24 = vld [vmem:[#allocation108_spill] sm:$0xff]  ;;  %2778 = vperm.xlu1 %4152, %v6856_v38  }
 0x49e   : > { %10282 = vst [vmem:[#allocation3_spill] sm:$0xff] %v6793_v4  ;;  %v10291_v4 = vld [vmem:[#allocation7_spill] sm:$0xff]  ;;  %v1491_v34 = vmul.f32 %v6712_v23, %v1471_v36  ;;  %v10298_v10 = vld [vmem:[#allocation124_spill] sm:$0xff] }
 0x49f   : > { %10287 = vst [vmem:[#allocation79_spill] sm:$0xff] %v6803_v42  ;;  %v1083_v52 = vmul.f32 %v10291_v4, %v971_v3  ;;  %v1084_v42 = vmul.f32 %v10291_v4, %v972_v16  ;;  %v2625_v3 = vpop.permute.xlu2 %2624  ;;  %v6837_v16 = vld [vmem:[%s9440_s5 + $0x20] sm:$0xff]  ;;  %v10293_v4 = vld [vmem:[#allocation121_spill] sm:$0xff] }
 0x4a0   : > { %10288 = vst [vmem:[#allocation84_spill] sm:$0xff] %v6809_v15  ;;  %2993 = vperm.xlu0 %4155, %v6837_v16   ;;  %v1459_v41 = vsel %vm1452_vm12, %v10294_v24, %v10293_v4  ;;  %v6847_v45 = vsel %vm2650_vm11, %v2593_v11, %v2625_v3  ;;  %v6851_v54 = vsel %vm2650_vm11, %v2625_v3, %v2593_v11 }
 0x4a1   : > { %10295 = vst [vmem:[#allocation43_spill] sm:$0xff] %v6847_v45  ;;  %v1475_v36 = vsel %vm1452_vm12, %v10293_v4, %v10294_v24  ;;  %v1462_v15 = vsel %vm1452_vm12, %v10299_v12, %v10298_v10  ;;  %v1478_v11 = vsel %vm1452_vm12, %v10298_v10, %v10299_v12  ;;  %v1492_v3 = vmul.f32 %v6743_v59, %v1455_v55  ;;  %v10300_v45 = vld [vmem:[#allocation126_spill] sm:$0xff]  ;;  %v2599_v24 = vpop.permute.xlu1 %2598 }
 0x4a2   : > { %10296 = vst [vmem:[#allocation73_spill] sm:$0xff] %v6851_v54  ;;  %v2633_v54 = vpop.permute.xlu0 %2632  ;;  %v1587_v4 = vmul.f32 %v10302_v32, %v1491_v34  ;;  %v10305_v12 = vld [vmem:[#allocation130_spill] sm:$0xff]  ;;  %v6914_v49 = vmul.f32 %v6712_v23, %v1478_v11  ;;  %2857 = vrot.lane.b32.xlu2 %v4967_v13, %s4306_s29 }
 0x4a3   : > { %10297 = vst [vmem:[#allocation89_spill] sm:$0xff] %v6856_v38  ;;  %v10301_v38 = vld [vmem:[#allocation127_spill] sm:$0xff]  ;;  %v6880_v39 = vsel %vm2650_vm11, %v6461_v27, %v2633_v54  ;;  %v6885_v10 = vsel %vm2650_vm11, %v2633_v54, %v6461_v27  ;;  %v1468_v34 = vsel %vm1452_vm12, %v10306_v48, %v10305_v12  ;;  %v1588_v47 = vmul.f32 %v10302_v32, %v1492_v3 }
 0x4a4   : > { %v1481_v20 = vsel %vm1452_vm12, %v10301_v38, %v10300_v45  ;;  %10303 = vst [vmem:[#allocation218_spill] sm:$0xff] %v6880_v39  ;;  %v1465_v55 = vsel %vm1452_vm12, %v10300_v45, %v10301_v38  ;;  %v1484_v39 = vsel %vm1452_vm12, %v10305_v12, %v10306_v48  ;;  %v6901_v27 = vmul.f32 %v6743_v59, %v1456_v7  ;;  %v10316_v12 = vld [vmem:[#allocation144_spill] sm:$0xff] }
 0x4a5   : > { %10304 = vst [vmem:[#allocation289_spill] sm:$0xff] %v6885_v10  ;;  %v6904_v54 = vmul.f32 %v6712_v23, %v1475_v36  ;;  %v6906_v10 = vadd.f32 %v1342_v58, %v1083_v52  ;;  %v6908_v45 = vadd.f32 %v1343_v21, %v1084_v42  ;;  %v6911_v38 = vmul.f32 %v6743_v59, %v1459_v41  ;;  %v10310_v21 = vld [vmem:[#allocation107_spill] sm:$0xff]  ;;  %v10311_v41 = vld [vmem:[#allocation141_spill] sm:$0xff]  ;;  %v10312_v36 = vld [vmem:[#allocation122_spill] sm:$0xff] }
 0x4a6   : > { %v6917_v48 = vmul.f32 %v6743_v59, %v1462_v15  ;;  %v6920_v32 = vmul.f32 %v6712_v23, %v1481_v20  ;;  %v6925_v52 = vmul.f32 %v6743_v59, %v1465_v55  ;;  %v6928_v58 = vmul.f32 %v6712_v23, %v1484_v39  ;;  %v10309_v20 = vld [vmem:[#allocation135_spill] sm:$0xff]  ;;  %2849 = vrot.lane.b32.xlu1 %v4827_v61, %s4306_s29 }
 0x4a7   : > { %v6931_v42 = vmul.f32 %v6743_v59, %v1468_v34  ;;  %v6934_v7 = vadd.f32 %v1587_v4, %v6430_v6  ;;  %v6937_v15 = vadd.f32 %v1588_v47, %v6432_v63  ;;  %v1458_v13 = vsel %vm1452_vm12, %v10310_v21, %v10309_v20  ;;  %v2631_v6 = vpop.permute.xlu2 %2630  ;;  %v10313_v47 = vld [vmem:[#allocation143_spill] sm:$0xff]  ;;  %4154 = vset.pattern.permute.xlu1 %v10264_v19 }
 0x4a8   : > { %10307 = vst [vmem:[#allocation288_spill] sm:$0xff] %v6928_v58  ;;  %v1474_v39 = vsel %vm1452_vm12, %v10309_v20, %v10310_v21  ;;  %v1464_v11 = vsel %vm1452_vm12, %v10312_v36, %v10311_v41  ;;  %2989 = vperm.xlu0 %4155, %v6481_v57   ;;  %v1480_v63 = vsel %vm1452_vm12, %v10311_v41, %v10312_v36  ;;  %v10317_v57 = vld [vmem:[#allocation125_spill] sm:$0xff]  ;;  %v10319_v41 = vld [vmem:[#allocation148_spill] sm:$0xff]  ;;  %v6999_v19 = vperm.slane %v5970_v1, 3 }
 0x4a9   : > { %10308 = vst [vmem:[#allocation24_spill] sm:$0xff] %v6931_v42  ;;  %v1583_v3 = vmul.f32 %v10313_v47, %v1487_v29  ;;  %v6959_v4 = vsel %vm2650_vm11, %v2599_v24, %v2631_v6  ;;  %v6963_v55 = vsel %vm2650_vm11, %v2631_v6, %v2599_v24  ;;  %v1467_v34 = vsel %vm1452_vm12, %v10317_v57, %v10316_v12  ;;  %v10318_v24 = vld [vmem:[#allocation174_spill] sm:$0xff]  ;;  %v2605_v6 = vpop.permute.xlu1 %2604 }
 0x4aa   : > { %10314 = vst [vmem:[#allocation87_spill] sm:$0xff] %v6959_v4  ;;  %v1483_v29 = vsel %vm1452_vm12, %v10316_v12, %v10317_v57  ;;  %v1584_v20 = vmul.f32 %v10313_v47, %v1488_v26  ;;  %v2639_v21 = vpop.permute.xlu0 %2638  ;;  %v1712_v61 = vsel %vm1711_vm13, %v10319_v41, %v10318_v24  ;;  %v1728_v36 = vsel %vm1711_vm13, %v10318_v24, %v10319_v41 }
 0x4ab   : > { %10315 = vst [vmem:[#allocation82_spill] sm:$0xff] %v6963_v55  ;;  %v6989_v26 = vsel %vm2650_vm11, %v6556_v35, %v2639_v21  ;;  %v6994_v47 = vsel %vm2650_vm11, %v2639_v21, %v6556_v35  ;;  %v1497_v12 = vmul.f32 %v6712_v23, %v1474_v39  ;;  %v1498_v57 = vmul.f32 %v6743_v59, %v1458_v13 }
 0x4ac   : > { %10320 = vst [vmem:[#allocation90_spill] sm:$0xff] %v6989_v26  ;;  %v7002_v24 = vperm.slane %v5975_v31, 3  ;;  %v7005_v41 = vmul.f32 %v6712_v23, %v1480_v63  ;;  %v7008_v55 = vmul.f32 %v6743_v59, %v1464_v11  ;;  %v7011_v4 = vmul.f32 %v6712_v23, %v1483_v29  ;;  %2863 = vrot.lane.b32.xlu2 %v10153_v53, %s4306_s29  ;;  %v10322_v63 = vld [vmem:[#allocation146_spill] sm:$0xff]  ;;  %v10323_v29 = vld [vmem:[#allocation239_spill] sm:$0xff]  ;;  %v10324_v23 = vld [vmem:[#allocation217_spill] sm:$0xff] }
 0x4ad   : > { %10321 = vst [vmem:[#allocation80_spill] sm:$0xff] %v6994_v47  ;;  %v7014_v35 = vmul.f32 %v6743_v59, %v1467_v34  ;;  %v1615_v13 = vadd.f32 %v1583_v3, %v6309_v17  ;;  %v1746_v39 = vmul.f32 %v6999_v19, %v1728_v36  ;;  %v1616_v11 = vadd.f32 %v1584_v20, %v6311_v5  ;;  %v10325_v3 = vld [vmem:[#allocation196_spill] sm:$0xff]  ;;  %v10326_v59 = vld [vmem:[#allocation205_spill] sm:$0xff] }
 0x4ae   : > { %v1747_v21 = vmul.f32 %v7002_v24, %v1712_v61  ;;  %v1593_v47 = vmul.f32 %v10322_v63, %v1497_v12  ;;  %v2133_v34 = vsel %vm2132_vm14, %v10324_v23, %v10323_v29  ;;  %v2149_v17 = vsel %vm2132_vm14, %v10323_v29, %v10324_v23  ;;  %v4258_v12 = vld [vmem:[%s9440_s5 + $0x10] sm:$0xff]  ;;  %2855 = vrot.lane.b32.xlu1 %v4949_v18, %s4306_s29 }
 0x4af   : > { %v1842_v61 = vmul.f32 %v10325_v3, %v1746_v39  ;;  %v7035_v53 = vperm.slane %v5970_v1, 5  ;;  %v7038_v5 = vperm.slane %v5975_v31, 5  ;;  %v2637_v20 = vpop.permute.xlu2 %2636  ;;  %v2004_v26 = vmul.f32 %v10326_v59, %v6056_v43  ;;  %v10330_v43 = vld [vmem:[#allocation269_spill] sm:$0xff] }
 0x4b0   : > { %v1843_v36 = vmul.f32 %v10325_v3, %v1747_v21  ;;  %2985 = vperm.xlu0 %4155, %v4258_v12   ;;  %v2005_v23 = vmul.f32 %v10326_v59, %v6052_v50  ;;  %v7049_v39 = vsel %vm2650_vm11, %v2605_v6, %v2637_v20  ;;  %v7053_v21 = vsel %vm2650_vm11, %v2637_v20, %v2605_v6  ;;  %v10329_v12 = vld [vmem:[#allocation290_spill] sm:$0xff] }
 0x4b1   : > { %10327 = vst [vmem:[#allocation93_spill] sm:$0xff] %v7049_v39  ;;  %v2167_v29 = vmul.f32 %v7035_v53, %v2133_v34  ;;  %v2168_v3 = vmul.f32 %v7038_v5, %v2149_v17  ;;  %v2392_v50 = vsel %vm2391_vm8, %v10330_v43, %v10329_v12  ;;  %v2408_v59 = vsel %vm2391_vm8, %v10329_v12, %v10330_v43  ;;  %v2611_v18 = vpop.permute.xlu1 %2610  ;;  %v10332_v12 = vld [vmem:[#allocation267_spill] sm:$0xff] }
 0x4b2   : > { %10328 = vst [vmem:[#allocation86_spill] sm:$0xff] %v7053_v21  ;;  %v2645_v39 = vpop.permute.xlu0 %2644  ;;  %v1594_v6 = vmul.f32 %v10322_v63, %v1498_v57  ;;  %v7069_v20 = vadd.f32 %v1593_v47, %v6689_v22  ;;  %v1874_v21 = vadd.f32 %v1842_v61, %v1615_v13  ;;  %v1875_v42 = vadd.f32 %v1843_v36, %v1616_v11  ;;  %v10333_v63 = vld [vmem:[#allocation167_spill] sm:$0xff]  ;;  %v10334_v22 = vld [vmem:[#allocation166_spill] sm:$0xff] }
 0x4b3   : > { %v7074_v34 = vsel %vm2650_vm11, %v6641_v30, %v2645_v39  ;;  %v7079_v17 = vsel %vm2650_vm11, %v2645_v39, %v6641_v30  ;;  %v2263_v43 = vmul.f32 %v10332_v12, %v2167_v29  ;;  %v2264_v57 = vmul.f32 %v10332_v12, %v2168_v3  ;;  %v10335_v13 = vld [vmem:[#allocation151_spill] sm:$0xff] }
 0x4b4   : > { %10331 = vst [vmem:[#allocation95_spill] sm:$0xff] %v7074_v34  ;;  %v1714_v47 = vsel %vm1711_vm13, %v10334_v22, %v10333_v63  ;;  %v1730_v34 = vsel %vm1711_vm13, %v10333_v63, %v10334_v22  ;;  %v2426_v58 = vmul.f32 %v5979_v44, %v2392_v50  ;;  %v2427_v30 = vmul.f32 %v5982_v60, %v2408_v59  ;;  %v10336_v29 = vld [vmem:[#allocation291_spill] sm:$0xff] }
 0x4b5   : > { %v1589_v11 = vmul.f32 %v10335_v13, %v6830_v51  ;;  %v1590_v61 = vmul.f32 %v10335_v13, %v6901_v27  ;;  %v2036_v36 = vadd.f32 %v2004_v26, %v1874_v21  ;;  %v2037_v39 = vadd.f32 %v2005_v23, %v1875_v42  ;;  %2891 = vrot.lane.b32.xlu2 %v4982_v8, %s4306_s29  ;;  %v4259_v8 = vld [vmem:[%s9440_s5 + $0x8] sm:$0xff]  ;;  %v10337_v21 = vld [vmem:[#allocation170_spill] sm:$0xff] }
 0x4b6   : > { %v2522_v3 = vmul.f32 %v10336_v29, %v2426_v58  ;;  %v2523_v12 = vmul.f32 %v10336_v29, %v2427_v30  ;;  %v7102_v63 = vperm.slane %v5970_v1, 7  ;;  %v7105_v50 = vperm.slane %v5975_v31, 7  ;;  %2861 = vrot.lane.b32.xlu1 %v10145_v56, %s4306_s29 }
 0x4b7   : > { %v1750_v51 = vmul.f32 %v6999_v19, %v1730_v34  ;;  %v1751_v59 = vmul.f32 %v7002_v24, %v1714_v47  ;;  %v2295_v27 = vadd.f32 %v2263_v43, %v2036_v36  ;;  %v2296_v26 = vadd.f32 %v2264_v57, %v2037_v39  ;;  %v2643_v42 = vpop.permute.xlu2 %2642  ;;  %v10338_v34 = vld [vmem:[#allocation169_spill] sm:$0xff] }
 0x4b8   : > { %2981 = vperm.xlu0 %4155, %v4259_v8   ;;  %v2685_v58 = vmul.f32 %v7102_v63, %v6733_v2  ;;  %v2686_v1 = vmul.f32 %v7105_v50, %v6737_v25  ;;  %v7118_v31 = vsel %vm2650_vm11, %v2611_v18, %v2643_v42  ;;  %v7122_v23 = vsel %vm2650_vm11, %v2643_v42, %v2611_v18  ;;  %v10339_v25 = vld [vmem:[#allocation192_spill] sm:$0xff] }
 0x4b9   : > { %v1717_v43 = vsel %vm1711_vm13, %v10338_v34, %v10337_v21  ;;  %v1733_v2 = vsel %vm1711_vm13, %v10337_v21, %v10338_v34  ;;  %v1846_v57 = vmul.f32 %v10339_v25, %v1750_v51  ;;  %v1847_v22 = vmul.f32 %v10339_v25, %v1751_v59  ;;  %v2617_v13 = vpop.permute.xlu1 %2616  ;;  %v10340_v21 = vld [vmem:[#allocation153_spill] sm:$0xff] }
 0x4ba   : > { %v2719_v47 = vpop.permute.xlu0 %2718  ;;  %v2554_v18 = vadd.f32 %v2522_v3, %v2295_v27  ;;  %v2555_v30 = vadd.f32 %v2523_v12, %v2296_v26  ;;  %v1626_v39 = vadd.f32 %v1594_v6, %v6691_v9  ;;  %v7138_v29 = vadd.f32 %v1589_v11, %v6520_v28  ;;  %v10341_v3 = vld [vmem:[#allocation238_spill] sm:$0xff]  ;;  %v10342_v12 = vld [vmem:[#allocation237_spill] sm:$0xff]  ;;  %v10346_v26 = vld [vmem:[#allocation308_spill] sm:$0xff] }
 0x4bb   : > { %v2781_v36 = vmul.f32 %v2719_v47, %v2685_v58  ;;  %v2782_v56 = vmul.f32 %v2719_v47, %v2686_v1  ;;  %v7141_v42 = vadd.f32 %v1590_v61, %v6522_v40  ;;  %v7145_v34 = vmul.f32 %v10340_v21, %v7005_v41  ;;  %v10345_v41 = vld [vmem:[#allocation200_spill] sm:$0xff] }
 0x4bc   : > { %v7149_v51 = vmul.f32 %v10340_v21, %v7008_v55  ;;  %v2135_v59 = vsel %vm2132_vm14, %v10342_v12, %v10341_v3  ;;  %v1756_v40 = vmul.f32 %v6999_v19, %v1733_v2  ;;  %v1757_v6 = vmul.f32 %v7002_v24, %v1717_v43  ;;  %v10347_v1 = vld [vmem:[#allocation280_spill] sm:$0xff]  ;;  %v10348_v43 = vld [vmem:[#allocation271_spill] sm:$0xff]  ;;  %v10349_v2 = vld [vmem:[#allocation202_spill] sm:$0xff] }
 0x4bd   : > { %v7155_v9 = vadd.f32 %v2781_v36, %v2554_v18  ;;  %v7157_v28 = vadd.f32 %v2782_v56, %v2555_v30  ;;  %v2008_v11 = vmul.f32 %v10345_v41, %v6086_v37  ;;  %v2151_v55 = vsel %vm2132_vm14, %v10341_v3, %v10342_v12  ;;  %2887 = vrot.lane.b32.xlu2 %v4934_v0, %s4306_s29  ;;  %v10352_v36 = vld [vmem:[#allocation6_spill] sm:$0xff]  ;;  %v10354_v12 = vld [vmem:[#allocation257_spill] sm:$0xff] }
 0x4be   : > { %v1878_v61 = vadd.f32 %v1846_v57, %v6934_v7  ;;  %v1879_v27 = vadd.f32 %v1847_v22, %v6937_v15  ;;  %v2009_v58 = vmul.f32 %v10345_v41, %v10346_v26  ;;  %v2394_v37 = vsel %vm2391_vm8, %v10348_v43, %v10347_v1  ;;  %2867 = vrot.lane.b32.xlu1 %v10352_v36, %s4306_s29  ;;  %v10353_v56 = vld [vmem:[#allocation154_spill] sm:$0xff]  ;;  %v10356_v26 = vld [vmem:[#allocation240_spill] sm:$0xff] }
 0x4bf   : > { %10343 = vst [vmem:[#allocation88_spill] sm:$0xff] %v7155_v9  ;;  %v1852_v25 = vmul.f32 %v10349_v2, %v1756_v40  ;;  %v1853_v47 = vmul.f32 %v10349_v2, %v1757_v6  ;;  %v2171_v18 = vmul.f32 %v7035_v53, %v2135_v59  ;;  %v2410_v0 = vsel %vm2391_vm8, %v10347_v1, %v10348_v43  ;;  %v2649_v7 = vpop.permute.xlu2 %2648  ;;  %v10357_v2 = vld [vmem:[#allocation338_spill] sm:$0xff]  ;;  %v10362_v36 = vld [vmem:[#allocation208_spill] sm:$0xff] }
 0x4c0   : > { %10344 = vst [vmem:[#allocation85_spill] sm:$0xff] %v7157_v28  ;;  %v10350_v15 = vmov 0   ;;  %v2172_v57 = vmul.f32 %v7038_v5, %v2151_v55  ;;  %v7188_v22 = vsel %vm2650_vm11, %v2617_v13, %v2649_v7  ;;  %v7192_v30 = vsel %vm2650_vm11, %v2649_v7, %v2617_v13  ;;  %v10355_v55 = vld [vmem:[#allocation241_spill] sm:$0xff]  ;;  %v10360_v7 = vld [vmem:[#allocation274_spill] sm:$0xff] }
 0x4c1   : > { %4158 = vset.pattern.permute.xlu0 %v10350_v15  ;;  %10351 = vst [vmem:[#allocation92_spill] sm:$0xff] %v7192_v30  ;;  %v7198_v21 = vmul.f32 %v10353_v56, %v6904_v54  ;;  %v2040_v3 = vadd.f32 %v2008_v11, %v1878_v61  ;;  %v2267_v59 = vmul.f32 %v10354_v12, %v2171_v18  ;;  %v2623_v43 = vpop.permute.xlu1 %2622  ;;  %v10358_v61 = vld [vmem:[#allocation335_spill] sm:$0xff] }
 0x4c2   : > { %992 = vperm.xlu0 %4158, %v4259_v8   ;;  %v2430_v40 = vmul.f32 %v5979_v44, %v2394_v37  ;;  %v2739_v6 = vpop.permute.xlu0 %2738  ;;  %v2041_v41 = vadd.f32 %v2009_v58, %v1879_v27  ;;  %v2138_v13 = vsel %vm2132_vm14, %v10356_v26, %v10355_v55  ;;  %v2268_v1 = vmul.f32 %v10354_v12, %v2172_v57  ;;  %v10361_v57 = vld [vmem:[#allocation331_spill] sm:$0xff] }
 0x4c3   : > { %v2431_v8 = vmul.f32 %v5982_v60, %v2410_v0  ;;  %v1884_v54 = vadd.f32 %v1852_v25, %v7069_v20  ;;  %v2653_v37 = vsel %vm2650_vm11, %v10358_v61, %v2623_v43  ;;  %v2669_v27 = vsel %vm2650_vm11, %v2623_v43, %v10358_v61  ;;  %v10359_v0 = vld [vmem:[#allocation283_spill] sm:$0xff] }
 0x4c4   : > { %v2526_v11 = vmul.f32 %v10357_v2, %v2430_v40  ;;  %v1885_v58 = vadd.f32 %v1853_v47, %v1626_v39  ;;  %v2154_v18 = vsel %vm2132_vm14, %v10355_v55, %v10356_v26  ;;  %v2397_v20 = vsel %vm2391_vm8, %v10360_v7, %v10359_v0  ;;  %v10363_v40 = vld [vmem:[#allocation332_spill] sm:$0xff]  ;;  %v4260_v55 = vld [vmem:[%s9440_s5 + $0x28] sm:$0xff] }
 0x4c5   : > { %v2527_v25 = vmul.f32 %v10357_v2, %v2431_v8  ;;  %v2014_v12 = vmul.f32 %v10362_v36, %v10361_v57  ;;  %v2015_v28 = vmul.f32 %v10362_v36, %v10363_v40  ;;  %v2177_v39 = vmul.f32 %v7035_v53, %v2138_v13  ;;  %2997 = vperm.xlu2 %4156, %v4260_v55   ;;  %v10364_v57 = vld [vmem:[#allocation273_spill] sm:$0xff] }
 0x4c6   : > { %v2299_v47 = vadd.f32 %v2267_v59, %v2040_v3  ;;  %v2300_v26 = vadd.f32 %v2268_v1, %v2041_v41  ;;  %v2413_v8 = vsel %vm2391_vm8, %v10359_v0, %v10360_v7  ;;  %v2689_v43 = vmul.f32 %v7102_v63, %v2653_v37  ;;  %v4261_v1 = vld [vmem:[%s9440_s5 + $0x38] sm:$0xff] }
 0x4c7   : > { %v2690_v2 = vmul.f32 %v7105_v50, %v2669_v27  ;;  %v2178_v61 = vmul.f32 %v7038_v5, %v2154_v18  ;;  %v2273_v13 = vmul.f32 %v10364_v57, %v2177_v39  ;;  %v2436_v3 = vmul.f32 %v5979_v44, %v2397_v20  ;;  %v2727_v36 = vpop.permute.xlu2 %2726  ;;  %3005 = vperm.xlu1 %4154, %v4261_v1   ;;  %v10365_v0 = vld [vmem:[#allocation297_spill] sm:$0xff] }
 0x4c8   : > { %v2558_v59 = vadd.f32 %v2526_v11, %v2299_v47  ;;  %v2559_v40 = vadd.f32 %v2527_v25, %v2300_v26  ;;  %v2785_v55 = vmul.f32 %v2727_v36, %v2689_v43  ;;  %v2046_v37 = vadd.f32 %v2014_v12, %v1884_v54  ;;  %v10368_v54 = vld [vmem:[#allocation72_spill] sm:$0xff] }
 0x4c9   : > { %v2786_v41 = vmul.f32 %v2727_v36, %v2690_v2  ;;  %v2274_v27 = vmul.f32 %v10364_v57, %v2178_v61  ;;  %v2437_v18 = vmul.f32 %v5982_v60, %v2413_v8  ;;  %v2532_v7 = vmul.f32 %v10365_v0, %v2436_v3  ;;  %v2629_v26 = vpop.permute.xlu1 %2628  ;;  %v10369_v2 = vld [vmem:[#allocation156_spill] sm:$0xff]  ;;  %v10370_v61 = vld [vmem:[#allocation157_spill] sm:$0xff] }
 0x4ca   : > { %1007 = vperm.xlu0 %4158, %v6837_v16   ;;  %v2751_v20 = vpop.permute.xlu0 %2750  ;;  %v1596_v11 = vmul.f32 %v10353_v56, %v6911_v38  ;;  %v2047_v25 = vadd.f32 %v2015_v28, %v1885_v58  ;;  %v7251_v39 = vadd.f32 %v2785_v55, %v2558_v59  ;;  %v2305_v43 = vadd.f32 %v2273_v13, %v2046_v37  ;;  %v10371_v36 = vld [vmem:[#allocation28_spill] sm:$0xff] }
 0x4cb   : > { %v7253_v47 = vadd.f32 %v2786_v41, %v2559_v40  ;;  %v2533_v16 = vmul.f32 %v10365_v0, %v2437_v18  ;;  %v2656_v12 = vsel %vm2650_vm11, %v10368_v54, %v2629_v26  ;;  %v2672_v8 = vsel %vm2650_vm11, %v2629_v26, %v10368_v54  ;;  %v10372_v41 = vld [vmem:[#allocation51_spill] sm:$0xff] }
 0x4cc   : > { %10366 = vst [vmem:[#allocation37_spill] sm:$0xff] %v7251_v39  ;;  %v1611_v38 = vmul.f32 %v10369_v2, %v7011_v4  ;;  %v1612_v28 = vmul.f32 %v10369_v2, %v7014_v35  ;;  %v2695_v56 = vmul.f32 %v7102_v63, %v2656_v12  ;;  %v2696_v58 = vmul.f32 %v7105_v50, %v2672_v8  ;;  %v10383_v2 = vld [vmem:[#allocation288_spill] sm:$0xff] }
 0x4cd   : > { %10367 = vst [vmem:[#allocation223_spill] sm:$0xff] %v7253_v47  ;;  %v1601_v57 = vmul.f32 %v10370_v61, %v6914_v49  ;;  %v1602_v13 = vmul.f32 %v10370_v61, %v6917_v48  ;;  %v2306_v3 = vadd.f32 %v2274_v27, %v2047_v25  ;;  %v2564_v59 = vadd.f32 %v2532_v7, %v2305_v43  ;;  %v10373_v49 = vld [vmem:[#allocation55_spill] sm:$0xff]  ;;  %v10374_v27 = vld [vmem:[#allocation160_spill] sm:$0xff]  ;;  %v10421_v47 = vld [vmem:[#allocation277_spill] sm:$0xff] }
 0x4ce   : > { %2883 = vrot.lane.b32.xlu2 %v10371_v36, %s4306_s29  ;;  %v2693_v4 = vmul.f32 %v7102_v63, %v6758_v33  ;;  %v2694_v35 = vmul.f32 %v7105_v50, %v6763_v62  ;;  %v2791_v40 = vmul.f32 %v2739_v6, %v2695_v56  ;;  %v2792_v55 = vmul.f32 %v2739_v6, %v2696_v58  ;;  %v10377_v62 = vld [vmem:[#allocation44_spill] sm:$0xff] }
 0x4cf   : > { %v7280_v37 = vadd.f32 %v7145_v34, %v10372_v41  ;;  %v7284_v48 = vadd.f32 %v7149_v51, %v10373_v49  ;;  %v1607_v18 = vmul.f32 %v10374_v27, %v6920_v32  ;;  %v2565_v0 = vadd.f32 %v2533_v16, %v2306_v3  ;;  %v2735_v7 = vpop.permute.xlu2 %2734  ;;  %2885 = vrot.lane.b32.xlu1 %v10377_v62, %s4306_s29  ;;  %v10379_v51 = vld [vmem:[#allocation39_spill] sm:$0xff]  ;;  %v10380_v32 = vld [vmem:[#allocation74_spill] sm:$0xff]  ;;  %v10385_v58 = vld [vmem:[#allocation24_spill] sm:$0xff] }
 0x4d0   : > { %v7288_v25 = vmul.f32 %v2735_v7, %v2693_v4  ;;  %v7290_v33 = vmul.f32 %v2735_v7, %v2694_v35  ;;  %v7294_v6 = vadd.f32 %v2791_v40, %v2564_v59  ;;  %v7298_v34 = vadd.f32 %v7198_v21, %v6749_v46  ;;  %4157 = vset.pattern.permute.xlu1 %v10350_v15  ;;  %v10382_v46 = vld [vmem:[#allocation59_spill] sm:$0xff]  ;;  %v10386_v3 = vld [vmem:[#allocation57_spill] sm:$0xff] }
 0x4d1   : > { %v7301_v26 = vadd.f32 %v1596_v11, %v10379_v51  ;;  %v7304_v43 = vadd.f32 %v1611_v38, %v10380_v32  ;;  %v7309_v54 = vadd.f32 %v2792_v55, %v2565_v0  ;;  %v7315_v12 = vadd.f32 %v1602_v13, %v6908_v45  ;;  %v2635_v8 = vpop.permute.xlu1 %2634  ;;  %v10384_v38 = vld [vmem:[#allocation163_spill] sm:$0xff]  ;;  %v10388_v13 = vld [vmem:[#allocation176_spill] sm:$0xff]  ;;  %v10390_v40 = vld [vmem:[#allocation177_spill] sm:$0xff] }
 0x4d2   : > { %10375 = vst [vmem:[#allocation99_spill] sm:$0xff] %v7288_v25  ;;  %1022 = vperm.xlu0 %4158, %v4261_v1   ;;  %v7306_v16 = vpop.permute.xlu0 %2762  ;;  %v7312_v1 = vadd.f32 %v1601_v57, %v6906_v10  ;;  %v7318_v21 = vadd.f32 %v1612_v28, %v10382_v46  ;;  %v1608_v11 = vmul.f32 %v10374_v27, %v6925_v52  ;;  %v10387_v28 = vld [vmem:[#allocation32_spill] sm:$0xff]  ;;  %v10389_v52 = vld [vmem:[#allocation175_spill] sm:$0xff]  ;;  %v10392_v27 = vld [vmem:[#allocation178_spill] sm:$0xff] }
 0x4d3   : > { %10376 = vst [vmem:[#allocation101_spill] sm:$0xff] %v7290_v33  ;;  %v1613_v56 = vmul.f32 %v10384_v38, %v10383_v2  ;;  %v1614_v61 = vmul.f32 %v10384_v38, %v10385_v58  ;;  %v2659_v10 = vsel %vm2650_vm11, %v10386_v3, %v2635_v8  ;;  %v2675_v45 = vsel %vm2650_vm11, %v2635_v8, %v10386_v3  ;;  %v10391_v55 = vld [vmem:[#allocation152_spill] sm:$0xff]  ;;  %v10394_v7 = vld [vmem:[#allocation19_spill] sm:$0xff]  ;;  %v839_v62 = vld [vmem:[%s9441_s6 + $0x38] sm:$0xff] }
 0x4d4   : > { %10378 = vst [vmem:[#allocation96_spill] sm:$0xff] %v7294_v6  ;;  %v7333_v57 = vadd.f32 %v1607_v18, %v10387_v28  ;;  %v1723_v59 = vsel %vm1711_vm13, %v10389_v52, %v10388_v13  ;;  %v2701_v36 = vmul.f32 %v7102_v63, %v2659_v10  ;;  %v2702_v4 = vmul.f32 %v7105_v50, %v2675_v45  ;;  %v10393_v18 = vld [vmem:[#allocation179_spill] sm:$0xff]  ;;  %v10395_v51 = vld [vmem:[#allocation218_spill] sm:$0xff]  ;;  %v10396_v46 = vld [vmem:[#allocation289_spill] sm:$0xff] }
 0x4d5   : > { %10381 = vst [vmem:[#allocation98_spill] sm:$0xff] %v7309_v54  ;;  %v1739_v35 = vsel %vm1711_vm13, %v10388_v13, %v10389_v52  ;;  %v1715_v41 = vsel %vm1711_vm13, %v10391_v55, %v10390_v40  ;;  %v1731_v49 = vsel %vm1711_vm13, %v10390_v40, %v10391_v55  ;;  %v1742_v0 = vsel %vm1711_vm13, %v10393_v18, %v10392_v27  ;;  %v10399_v58 = vld [vmem:[#allocation221_spill] sm:$0xff]  ;;  %v10400_v10 = vld [vmem:[#allocation68_spill] sm:$0xff]  ;;  %v10416_v25 = vld [vmem:[#allocation219_spill] sm:$0xff] }
 0x4d6   : > { %2881 = vrot.lane.b32.xlu2 %v10394_v7, %s4306_s29  ;;  %v2699_v32 = vmul.f32 %v7102_v63, %v10395_v51  ;;  %v2700_v8 = vmul.f32 %v7105_v50, %v10396_v46  ;;  %v7366_v2 = vmul.f32 %v2751_v20, %v2701_v36  ;;  %v7368_v38 = vmul.f32 %v2751_v20, %v2702_v4  ;;  %v10401_v28 = vld [vmem:[#allocation76_spill] sm:$0xff]  ;;  %v10409_v46 = vld [vmem:[#allocation183_spill] sm:$0xff] }
 0x4d7   : > { %v7371_v3 = vadd.f32 %v1608_v11, %v10399_v58  ;;  %v7374_v45 = vadd.f32 %v1613_v56, %v10400_v10  ;;  %v7377_v13 = vadd.f32 %v1614_v61, %v10401_v28  ;;  %v1726_v52 = vsel %vm1711_vm13, %v10392_v27, %v10393_v18  ;;  %v2747_v40 = vpop.permute.xlu2 %2746  ;;  %3141 = vperm.xlu1 %4157, %v839_v62   ;;  %v7393_v11 = vld [vmem:[%s9440_s5 + $0x50] sm:$0xff]  ;;  %v10406_v62 = vld [vmem:[#allocation155_spill] sm:$0xff]  ;;  %v10411_v10 = vld [vmem:[#allocation210_spill] sm:$0xff] }
 0x4d8   : > { %10397 = vst [vmem:[#allocation14_spill] sm:$0xff] %v7366_v2  ;;  %v7384_v36 = vmul.f32 %v6999_v19, %v1739_v35  ;;  %v7386_v20 = vmul.f32 %v2747_v40, %v2699_v32  ;;  %v7388_v4 = vmul.f32 %v2747_v40, %v2700_v8  ;;  %v7397_v56 = vmul.f32 %v7002_v24, %v1723_v59  ;;  %v10405_v7 = vld [vmem:[#allocation180_spill] sm:$0xff]  ;;  %v10408_v32 = vld [vmem:[#allocation249_spill] sm:$0xff]  ;;  %v10410_v8 = vld [vmem:[#allocation158_spill] sm:$0xff] }
 0x4d9   : > { %10398 = vst [vmem:[#allocation42_spill] sm:$0xff] %v7368_v38  ;;  %v1752_v61 = vmul.f32 %v6999_v19, %v1731_v49  ;;  %v7401_v35 = vmul.f32 %v7002_v24, %v1715_v41  ;;  %v1774_v55 = vmul.f32 %v6999_v19, %v1742_v0  ;;  %v1775_v18 = vmul.f32 %v7002_v24, %v1726_v52  ;;  %v10407_v49 = vld [vmem:[#allocation250_spill] sm:$0xff]  ;;  %v2641_v0 = vpop.permute.xlu1 %2640  ;;  %v10412_v52 = vld [vmem:[#allocation49_spill] sm:$0xff] }
 0x4da   : > { %10402 = vst [vmem:[#allocation23_spill] sm:$0xff] %v7386_v20  ;;  %1037 = vperm.xlu0 %4158, %v7393_v11   ;;  %v7404_v27 = vpop.permute.xlu0 %2774  ;;  %v1718_v51 = vsel %vm1711_vm13, %v10406_v62, %v10405_v7  ;;  %v1734_v59 = vsel %vm1711_vm13, %v10405_v7, %v10406_v62  ;;  %v2147_v41 = vsel %vm2132_vm14, %v10408_v32, %v10407_v49  ;;  %v10414_v20 = vld [vmem:[#allocation186_spill] sm:$0xff] }
 0x4db   : > { %10403 = vst [vmem:[#allocation13_spill] sm:$0xff] %v7388_v4  ;;  %v1721_v58 = vsel %vm1711_vm13, %v10410_v8, %v10409_v46  ;;  %v1870_v28 = vmul.f32 %v10411_v10, %v1774_v55  ;;  %v2662_v40 = vsel %vm2650_vm11, %v10412_v52, %v2641_v0  ;;  %v2678_v7 = vsel %vm2650_vm11, %v2641_v0, %v10412_v52  ;;  %v10413_v4 = vld [vmem:[#allocation161_spill] sm:$0xff]  ;;  %v10415_v52 = vld [vmem:[#allocation318_spill] sm:$0xff] }
 0x4dc   : > { %10404 = vst [vmem:[#allocation31_spill] sm:$0xff] %v7393_v11  ;;  %v1737_v62 = vsel %vm1711_vm13, %v10409_v46, %v10410_v8  ;;  %v2163_v54 = vsel %vm2132_vm14, %v10407_v49, %v10408_v32  ;;  %v2707_v55 = vmul.f32 %v7102_v63, %v2662_v40  ;;  %v2708_v6 = vmul.f32 %v7105_v50, %v2678_v7  ;;  %v10417_v8 = vld [vmem:[#allocation15_spill] sm:$0xff]  ;;  %v838_v49 = vld [vmem:[%s9441_s6 + $0x30] sm:$0xff]  ;;  %v10418_v32 = vld [vmem:[#allocation90_spill] sm:$0xff] }
 0x4dd   : > { %v1740_v33 = vsel %vm1711_vm13, %v10414_v20, %v10413_v4  ;;  %v1871_v0 = vmul.f32 %v10411_v10, %v1775_v18  ;;  %v2032_v9 = vmul.f32 %v10416_v25, %v10415_v52  ;;  %v2195_v46 = vmul.f32 %v7035_v53, %v2147_v41  ;;  %v10419_v7 = vld [vmem:[#allocation80_spill] sm:$0xff]  ;;  %v10420_v52 = vld [vmem:[#allocation327_spill] sm:$0xff] }
 0x4de   : > { %2879 = vrot.lane.b32.xlu2 %v10417_v8, %s4306_s29  ;;  %v2705_v40 = vmul.f32 %v7102_v63, %v10418_v32  ;;  %v2706_v38 = vmul.f32 %v7105_v50, %v10419_v7  ;;  %v7458_v18 = vmul.f32 %v7306_v16, %v2707_v55  ;;  %v7461_v10 = vmul.f32 %v7306_v16, %v2708_v6  ;;  %v7476_v6 = vld [vmem:[%s9440_s5 + $0x68] sm:$0xff] }
 0x4df   : > { %v1902_v41 = vadd.f32 %v1870_v28, %v7304_v43  ;;  %v2033_v8 = vmul.f32 %v10416_v25, %v10420_v52  ;;  %v2196_v2 = vmul.f32 %v7038_v5, %v2163_v54  ;;  %v2291_v39 = vmul.f32 %v10421_v47, %v2195_v46  ;;  %v2759_v11 = vpop.permute.xlu2 %2758  ;;  %3136 = vperm.xlu1 %4157, %v838_v49  }
 0x4e0   : > { %v1758_v32 = vmul.f32 %v6999_v19, %v1734_v59  ;;  %v7469_v30 = vmul.f32 %v2759_v11, %v2705_v40  ;;  %v7471_v7 = vmul.f32 %v2759_v11, %v2706_v38  ;;  %v1724_v25 = vsel %vm1711_vm13, %v10413_v4, %v10414_v20  ;;  %v10424_v4 = vld [vmem:[#allocation10_spill] sm:$0xff] }
 0x4e1   : > { %v1903_v43 = vadd.f32 %v1871_v0, %v7318_v21  ;;  %v2064_v16 = vadd.f32 %v2032_v9, %v1902_v41  ;;  %v2292_v54 = vmul.f32 %v10421_v47, %v2196_v2  ;;  %v1759_v11 = vmul.f32 %v7002_v24, %v1718_v51  ;;  %v2647_v46 = vpop.permute.xlu1 %2646  ;;  %v10425_v2 = vld [vmem:[#allocation188_spill] sm:$0xff]  ;;  %v10426_v0 = vld [vmem:[#allocation199_spill] sm:$0xff]  ;;  %v10427_v41 = vld [vmem:[#allocation329_spill] sm:$0xff] }
 0x4e2   : > { %10422 = vst [vmem:[#allocation30_spill] sm:$0xff] %v7469_v30  ;;  %1052 = vperm.xlu0 %4158, %v7476_v6   ;;  %v7485_v38 = vpop.permute.xlu0 %2847  ;;  %v1764_v59 = vmul.f32 %v6999_v19, %v1737_v62  ;;  %v7490_v28 = vmul.f32 %v7002_v24, %v1721_v58  ;;  %v7493_v55 = vmul.f32 %v6999_v19, %v1740_v33 }
 0x4e3   : > { %10423 = vst [vmem:[#allocation5_spill] sm:$0xff] %v7471_v7  ;;  %v2065_v49 = vadd.f32 %v2033_v8, %v1903_v43  ;;  %v2323_v20 = vadd.f32 %v2291_v39, %v2064_v16  ;;  %v2665_v9 = vsel %vm2650_vm11, %v10424_v4, %v2647_v46  ;;  %v2681_v47 = vsel %vm2650_vm11, %v2647_v46, %v10424_v4  ;;  %v10428_v8 = vld [vmem:[#allocation4_spill] sm:$0xff]  ;;  %v10429_v43 = vld [vmem:[#allocation95_spill] sm:$0xff] }
 0x4e4   : > { %v1771_v21 = vmul.f32 %v7002_v24, %v1724_v25  ;;  %v1854_v51 = vmul.f32 %v10425_v2, %v1758_v32  ;;  %v2713_v58 = vmul.f32 %v7102_v63, %v2665_v9  ;;  %v2714_v33 = vmul.f32 %v7105_v50, %v2681_v47  ;;  %v837_v25 = vld [vmem:[%s9441_s6 + $0x28] sm:$0xff]  ;;  %v834_v32 = vld [vmem:[%s9441_s6 + $0x10] sm:$0xff]  ;;  %v10432_v47 = vld [vmem:[#allocation330_spill] sm:$0xff] }
 0x4e5   : > { %v1855_v62 = vmul.f32 %v10425_v2, %v1759_v11  ;;  %v1848_v39 = vmul.f32 %v10426_v0, %v1752_v61  ;;  %v2324_v40 = vadd.f32 %v2292_v54, %v2065_v49  ;;  %v2582_v52 = vadd.f32 %v10427_v41, %v2323_v20  ;;  %v10430_v49 = vld [vmem:[#allocation242_spill] sm:$0xff] }
 0x4e6   : > { %2877 = vrot.lane.b32.xlu2 %v10428_v8, %s4306_s29  ;;  %v2711_v16 = vmul.f32 %v7102_v63, %v10429_v43  ;;  %v2712_v61 = vmul.f32 %v7105_v50, %v7079_v17  ;;  %v2809_v54 = vmul.f32 %v7404_v27, %v2713_v58  ;;  %v2810_v11 = vmul.f32 %v7404_v27, %v2714_v33  ;;  %v10431_v20 = vld [vmem:[#allocation222_spill] sm:$0xff]  ;;  %v10436_v33 = vld [vmem:[#allocation11_spill] sm:$0xff] }
 0x4e7   : > { %v1849_v46 = vmul.f32 %v10426_v0, %v7401_v35  ;;  %v2136_v4 = vsel %vm2132_vm14, %v10431_v20, %v10430_v49  ;;  %v2152_v9 = vsel %vm2132_vm14, %v10430_v49, %v10431_v20  ;;  %v2583_v2 = vadd.f32 %v10432_v47, %v2324_v40  ;;  %v2771_v17 = vpop.permute.xlu2 %2770  ;;  %3131 = vperm.xlu1 %4157, %v837_v25   ;;  %v10437_v8 = vld [vmem:[#allocation78_spill] sm:$0xff]  ;;  %v10441_v25 = vld [vmem:[#allocation317_spill] sm:$0xff] }
 0x4e8   : > { %v7533_v41 = vmul.f32 %v2771_v17, %v2711_v16  ;;  %v7535_v58 = vmul.f32 %v2771_v17, %v2712_v61  ;;  %v7537_v35 = vadd.f32 %v2809_v54, %v2582_v52  ;;  %v7540_v27 = vadd.f32 %v1854_v51, %v7298_v34  ;;  %v10439_v16 = vld [vmem:[#allocation316_spill] sm:$0xff] }
 0x4e9   : > { %v2687_v0 = vmul.f32 %v7102_v63, %v10436_v33  ;;  %v2688_v43 = vmul.f32 %v7105_v50, %v10437_v8  ;;  %v7548_v40 = vadd.f32 %v2810_v11, %v2583_v2  ;;  %v10440_v61 = vld [vmem:[#allocation220_spill] sm:$0xff]  ;;  %v2723_v47 = vpop.permute.xlu1 %2722  ;;  %v2173_v11 = vmul.f32 %v7035_v53, %v2136_v4 }
 0x4ea   : > { %10433 = vst [vmem:[#allocation91_spill] sm:$0xff] %v7533_v41  ;;  %3116 = vperm.xlu0 %4158, %v834_v32   ;;  %v7546_v49 = vpop.permute.xlu0 %2853  ;;  %v2010_v20 = vmul.f32 %v10440_v61, %v10439_v16  ;;  %v2011_v52 = vmul.f32 %v10440_v61, %v10441_v25  ;;  %v10442_v32 = vld [vmem:[#allocation293_spill] sm:$0xff]  ;;  %v10443_v54 = vld [vmem:[#allocation272_spill] sm:$0xff]  ;;  %v2174_v2 = vmul.f32 %v7038_v5, %v2152_v9 }
 0x4eb   : > { %10434 = vst [vmem:[#allocation102_spill] sm:$0xff] %v7535_v58  ;;  %v2395_v34 = vsel %vm2391_vm8, %v10443_v54, %v10442_v32  ;;  %v2411_v51 = vsel %vm2391_vm8, %v10442_v32, %v10443_v54  ;;  %v7564_v17 = vmul.f32 %v2723_v47, %v2687_v0  ;;  %v7566_v33 = vmul.f32 %v2723_v47, %v2688_v43  ;;  %v10444_v16 = vld [vmem:[#allocation189_spill] sm:$0xff]  ;;  %v10445_v61 = vld [vmem:[#allocation164_spill] sm:$0xff]  ;;  %v10446_v54 = vld [vmem:[#allocation270_spill] sm:$0xff] }
 0x4ec   : > { %10435 = vst [vmem:[#allocation111_spill] sm:$0xff] %v7537_v35  ;;  %v1887_v8 = vadd.f32 %v1855_v62, %v7301_v26  ;;  %v1727_v25 = vsel %vm1711_vm13, %v10445_v61, %v10444_v16  ;;  %v1880_v7 = vadd.f32 %v1848_v39, %v7138_v29  ;;  %v1881_v32 = vadd.f32 %v1849_v46, %v7141_v42  ;;  %v4264_v26 = vld [vmem:[%s9440_s5] sm:$0xff]  ;;  %v10447_v42 = vld [vmem:[#allocation191_spill] sm:$0xff]  ;;  %v10567_v41 = vld [vmem:[#allocation181_spill] sm:$0xff] }
 0x4ed   : > { %10438 = vst [vmem:[#allocation116_spill] sm:$0xff] %v7548_v40  ;;  %v2269_v30 = vmul.f32 %v10446_v54, %v2173_v11  ;;  %v2270_v4 = vmul.f32 %v10446_v54, %v2174_v2  ;;  %v2432_v9 = vmul.f32 %v5979_v44, %v2395_v34  ;;  %v2433_v0 = vmul.f32 %v5982_v60, %v2411_v51  ;;  %v836_v62 = vld [vmem:[%s9441_s6 + $0x20] sm:$0xff]  ;;  %v10448_v34 = vld [vmem:[#allocation245_spill] sm:$0xff] }
 0x4ee   : > { %2977 = vperm.xlu2 %4156, %v4264_v26   ;;  %v1743_v29 = vsel %vm1711_vm13, %v10444_v16, %v10445_v61  ;;  %v1860_v39 = vmul.f32 %v10447_v42, %v1764_v59  ;;  %v2042_v46 = vadd.f32 %v2010_v20, %v1880_v7  ;;  %v2043_v43 = vadd.f32 %v2011_v52, %v1881_v32  ;;  %v10449_v51 = vld [vmem:[#allocation226_spill] sm:$0xff]  ;;  %v10452_v16 = vld [vmem:[#allocation29_spill] sm:$0xff] }
 0x4ef   : > { %v2139_v47 = vsel %vm2132_vm14, %v10449_v51, %v10448_v34  ;;  %v2155_v11 = vsel %vm2132_vm14, %v10448_v34, %v10449_v51  ;;  %v10450_v2 = vld [vmem:[#allocation294_spill] sm:$0xff]  ;;  %v7600_v40 = vpop.permute.xlu2 %2845  ;;  %v1861_v7 = vmul.f32 %v10447_v42, %v7490_v28  ;;  %3126 = vperm.xlu1 %4157, %v836_v62   ;;  %v10453_v34 = vld [vmem:[#allocation43_spill] sm:$0xff]  ;;  %v10455_v28 = vld [vmem:[#allocation333_spill] sm:$0xff] }
 0x4f0   : > { %v2528_v54 = vmul.f32 %v10450_v2, %v2432_v9  ;;  %v2529_v26 = vmul.f32 %v10450_v2, %v2433_v0  ;;  %v10451_v59 = vld [vmem:[#allocation194_spill] sm:$0xff]  ;;  %v2301_v61 = vadd.f32 %v2269_v30, %v2042_v46  ;;  %v2302_v32 = vadd.f32 %v2270_v4, %v2043_v43  ;;  %v10454_v0 = vld [vmem:[#allocation73_spill] sm:$0xff] }
 0x4f1   : > { %v1866_v20 = vmul.f32 %v10451_v59, %v7493_v55  ;;  %v1867_v52 = vmul.f32 %v10451_v59, %v1771_v21  ;;  %v2691_v9 = vmul.f32 %v7102_v63, %v10453_v34  ;;  %v2692_v51 = vmul.f32 %v7105_v50, %v10454_v0  ;;  %v10456_v42 = vld [vmem:[#allocation225_spill] sm:$0xff]  ;;  %v2731_v30 = vpop.permute.xlu1 %2730  ;;  %v832_v34 = vld [vmem:[%s9441_s6] sm:$0xff] }
 0x4f2   : > { %2873 = vrot.lane.b32.xlu0 %v10452_v16, %s4306_s29  ;;  %v7613_v2 = vpop.permute.xlu0 %2859  ;;  %v2016_v35 = vmul.f32 %v10456_v42, %v10455_v28  ;;  %v10457_v55 = vld [vmem:[#allocation337_spill] sm:$0xff]  ;;  %v2179_v62 = vmul.f32 %v7035_v53, %v2139_v47  ;;  %v2180_v59 = vmul.f32 %v7038_v5, %v2155_v11  ;;  %v2560_v4 = vadd.f32 %v2528_v54, %v2301_v61  ;;  %v10458_v47 = vld [vmem:[#allocation259_spill] sm:$0xff] }
 0x4f3   : > { %v2017_v21 = vmul.f32 %v10456_v42, %v10457_v55  ;;  %v2561_v46 = vadd.f32 %v2529_v26, %v2302_v32  ;;  %v2787_v43 = vmul.f32 %v2731_v30, %v2691_v9  ;;  %v2788_v16 = vmul.f32 %v2731_v30, %v2692_v51  ;;  %v10460_v9 = vld [vmem:[#allocation248_spill] sm:$0xff]  ;;  %v10461_v51 = vld [vmem:[#allocation229_spill] sm:$0xff] }
 0x4f4   : > { %v1776_v0 = vmul.f32 %v6999_v19, %v1743_v29  ;;  %v1777_v28 = vmul.f32 %v7002_v24, %v1727_v25  ;;  %v1892_v58 = vadd.f32 %v1860_v39, %v7312_v1  ;;  %v1893_v42 = vadd.f32 %v1861_v7, %v7315_v12  ;;  %v835_v29 = vld [vmem:[%s9441_s6 + $0x18] sm:$0xff] }
 0x4f5   : > { %v2275_v55 = vmul.f32 %v10458_v47, %v2179_v62  ;;  %v2276_v11 = vmul.f32 %v10458_v47, %v2180_v59  ;;  %v7630_v54 = vadd.f32 %v2787_v43, %v2560_v4  ;;  %v7632_v26 = vadd.f32 %v2788_v16, %v2561_v46  ;;  %v10459_v12 = vld [vmem:[#allocation197_spill] sm:$0xff]  ;;  %v10466_v46 = vld [vmem:[#allocation87_spill] sm:$0xff]  ;;  %v10467_v16 = vld [vmem:[#allocation82_spill] sm:$0xff] }
 0x4f6   : > { %4159 = vset.pattern.permute.xlu2 %v10350_v15  ;;  %v7639_v25 = vadd.f32 %v1866_v20, %v7333_v57  ;;  %v7642_v1 = vadd.f32 %v1867_v52, %v7371_v3  ;;  %v1872_v39 = vmul.f32 %v10459_v12, %v1776_v0  ;;  %v1873_v7 = vmul.f32 %v10459_v12, %v1777_v28  ;;  %v10462_v20 = vld [vmem:[#allocation207_spill] sm:$0xff]  ;;  %v10470_v28 = vld [vmem:[#allocation228_spill] sm:$0xff]  ;;  %v10471_v47 = vld [vmem:[#allocation46_spill] sm:$0xff] }
 0x4f7   : > { %3106 = vperm.xlu2 %4159, %v832_v34   ;;  %v2048_v61 = vadd.f32 %v2016_v35, %v7540_v27  ;;  %v2049_v32 = vadd.f32 %v2017_v21, %v1887_v8  ;;  %v2142_v62 = vsel %vm2132_vm14, %v10461_v51, %v10460_v9  ;;  %v2158_v57 = vsel %vm2132_vm14, %v10460_v9, %v10461_v51  ;;  %v7655_v3 = vpop.permute.xlu2 %2851  ;;  %v10463_v35 = vld [vmem:[#allocation305_spill] sm:$0xff]  ;;  %v10464_v27 = vld [vmem:[#allocation214_spill] sm:$0xff] }
 0x4f8   : > { %v1864_v52 = vmul.f32 %v10462_v20, %v7384_v36  ;;  %v1865_v59 = vmul.f32 %v10462_v20, %v7397_v56  ;;  %v2026_v8 = vmul.f32 %v10464_v27, %v10463_v35  ;;  %3121 = vperm.xlu1 %4157, %v835_v29   ;;  %v10465_v21 = vld [vmem:[#allocation18_spill] sm:$0xff]  ;;  %v2697_v43 = vmul.f32 %v7102_v63, %v10466_v46 }
 0x4f9   : > { %v2307_v30 = vadd.f32 %v2275_v55, %v2048_v61  ;;  %v2308_v4 = vadd.f32 %v2276_v11, %v2049_v32  ;;  %v2698_v34 = vmul.f32 %v7105_v50, %v10467_v16  ;;  %v10469_v36 = vld [vmem:[#allocation58_spill] sm:$0xff]  ;;  %v2023_v12 = vmul.f32 %v10470_v28, %v10471_v47  ;;  %v2743_v55 = vpop.permute.xlu1 %2742  ;;  %v10472_v11 = vld [vmem:[#allocation295_spill] sm:$0xff]  ;;  %v10473_v32 = vld [vmem:[#allocation296_spill] sm:$0xff] }
 0x4fa   : > { %2871 = vrot.lane.b32.xlu0 %v10465_v21, %s4306_s29  ;;  %v7669_v0 = vpop.permute.xlu0 %2865  ;;  %v2022_v56 = vmul.f32 %v10470_v28, %v10469_v36  ;;  %v2185_v29 = vmul.f32 %v7035_v53, %v2142_v62  ;;  %v2186_v9 = vmul.f32 %v7038_v5, %v2158_v57  ;;  %v2793_v20 = vmul.f32 %v2743_v55, %v2697_v43  ;;  %v10474_v36 = vld [vmem:[#allocation247_spill] sm:$0xff]  ;;  %v10475_v28 = vld [vmem:[#allocation246_spill] sm:$0xff] }
 0x4fb   : > { %10468 = vst [vmem:[#allocation114_spill] sm:$0xff] %v7669_v0  ;;  %v2566_v61 = vadd.f32 %v10472_v11, %v2307_v30  ;;  %v2567_v51 = vadd.f32 %v10473_v32, %v2308_v4  ;;  %v2794_v35 = vmul.f32 %v2743_v55, %v2698_v34  ;;  %v7680_v21 = vadd.f32 %v1872_v39, %v7374_v45  ;;  %v10476_v57 = vld [vmem:[#allocation262_spill] sm:$0xff]  ;;  %v833_v45 = vld [vmem:[%s9441_s6 + $0x8] sm:$0xff]  ;;  %v10478_v34 = vld [vmem:[#allocation45_spill] sm:$0xff] }
 0x4fc   : > { %v7683_v46 = vadd.f32 %v1873_v7, %v7377_v13  ;;  %v1896_v16 = vadd.f32 %v1864_v52, %v7280_v37  ;;  %v2144_v62 = vsel %vm2132_vm14, %v10475_v28, %v10474_v36  ;;  %v2281_v47 = vmul.f32 %v10476_v57, %v2185_v29  ;;  %v10477_v37 = vld [vmem:[#allocation309_spill] sm:$0xff]  ;;  %v10479_v55 = vld [vmem:[#allocation251_spill] sm:$0xff]  ;;  %v10480_v11 = vld [vmem:[#allocation232_spill] sm:$0xff] }
 0x4fd   : > { %v2282_v30 = vmul.f32 %v10476_v57, %v2186_v9  ;;  %v7692_v4 = vadd.f32 %v2793_v20, %v2566_v61  ;;  %v7694_v43 = vadd.f32 %v2794_v35, %v2567_v51  ;;  %v1897_v13 = vadd.f32 %v1865_v59, %v7284_v48  ;;  %v10485_v51 = vld [vmem:[#allocation9_spill] sm:$0xff] }
 0x4fe   : > { %v2027_v39 = vmul.f32 %v10464_v27, %v10477_v37  ;;  %v2058_v7 = vadd.f32 %v2026_v8, %v1896_v16  ;;  %v2054_v52 = vadd.f32 %v2022_v56, %v1892_v58  ;;  %v2055_v29 = vadd.f32 %v2023_v12, %v1893_v42  ;;  %v10482_v27 = vld [vmem:[#allocation310_spill] sm:$0xff]  ;;  %v10483_v42 = vld [vmem:[#allocation231_spill] sm:$0xff]  ;;  %v10484_v56 = vld [vmem:[#allocation312_spill] sm:$0xff] }
 0x4ff   : > { %2907 = vrot.lane.b32.xlu2 %v10478_v34, %s4306_s29  ;;  %v2160_v9 = vsel %vm2132_vm14, %v10474_v36, %v10475_v28  ;;  %v2145_v61 = vsel %vm2132_vm14, %v10480_v11, %v10479_v55  ;;  %v2161_v48 = vsel %vm2132_vm14, %v10479_v55, %v10480_v11  ;;  %v2858_v58 = vpop.permute.xlu2 %2857  ;;  %v10481_v59 = vmov 8   ;;  %v10486_v16 = vld [vmem:[#allocation93_spill] sm:$0xff]  ;;  %v10487_v28 = vld [vmem:[#allocation86_spill] sm:$0xff] }
 0x500   : > { %4160 = vset.pattern.permute.xlu2 %v10481_v59  ;;  %v2028_v8 = vmul.f32 %v10483_v42, %v10482_v27  ;;  %v2029_v12 = vmul.f32 %v10483_v42, %v10484_v56  ;;  %v2189_v32 = vmul.f32 %v7035_v53, %v2144_v62  ;;  %3111 = vperm.xlu1 %4157, %v833_v45   ;;  %v10488_v45 = vld [vmem:[#allocation298_spill] sm:$0xff]  ;;  %v10491_v56 = vld [vmem:[#allocation235_spill] sm:$0xff] }
 0x501   : > { %v2313_v20 = vadd.f32 %v2281_v47, %v2054_v52  ;;  %v2314_v35 = vadd.f32 %v2282_v30, %v2055_v29  ;;  %v2703_v36 = vmul.f32 %v7102_v63, %v10486_v16  ;;  %v2704_v57 = vmul.f32 %v7105_v50, %v10487_v28  ;;  %v2755_v62 = vpop.permute.xlu1 %2754  ;;  %v10489_v47 = vld [vmem:[#allocation299_spill] sm:$0xff]  ;;  %v10490_v42 = vld [vmem:[#allocation254_spill] sm:$0xff] }
 0x502   : > { %2869 = vrot.lane.b32.xlu0 %v10485_v51, %s4306_s29  ;;  %v2890_v37 = vpop.permute.xlu0 %2889  ;;  %v2190_v34 = vmul.f32 %v7038_v5, %v2160_v9  ;;  %v2191_v55 = vmul.f32 %v7035_v53, %v2145_v61  ;;  %v2192_v11 = vmul.f32 %v7038_v5, %v2161_v48  ;;  %v2148_v51 = vsel %vm2132_vm14, %v10491_v56, %v10490_v42  ;;  %v10492_v61 = vld [vmem:[#allocation265_spill] sm:$0xff] }
 0x503   : > { %v2572_v27 = vadd.f32 %v10488_v45, %v2313_v20  ;;  %v2573_v30 = vadd.f32 %v10489_v47, %v2314_v35  ;;  %v2799_v52 = vmul.f32 %v2755_v62, %v2703_v36  ;;  %v2800_v29 = vmul.f32 %v2755_v62, %v2704_v57  ;;  %v7747_v20 = vld [vmem:[%s9444_s9 + $0x10] ss:$0 sm:$0xff]  ;;  %v7752_v35 = vld [vmem:[%s9444_s9 + $0x18] ss:$0 sm:$0xff] }
 0x504   : > { %v2164_v9 = vsel %vm2132_vm14, %v10490_v42, %v10491_v56  ;;  %v2287_v48 = vmul.f32 %v10492_v61, %v2191_v55  ;;  %v2288_v16 = vmul.f32 %v10492_v61, %v2192_v11  ;;  %v2916_v57 = vsel %vm2909_vm15, %v2858_v58, %v2890_v37  ;;  %v847_v11 = vld [vmem:[%s9441_s6 + $0x78] sm:$0xff]  ;;  %v10495_v47 = vld [vmem:[#allocation276_spill] sm:$0xff]  ;;  %v10498_v56 = vld [vmem:[#allocation234_spill] sm:$0xff] }
 0x505   : > { %v7754_v36 = vadd.f32 %v2799_v52, %v2572_v27  ;;  %v7756_v28 = vadd.f32 %v2800_v29, %v2573_v30  ;;  %v2932_v55 = vsel %vm2909_vm15, %v2890_v37, %v2858_v58  ;;  %v2059_v62 = vadd.f32 %v2027_v39, %v1897_v13  ;;  %v10496_v52 = vld [vmem:[#allocation89_spill] sm:$0xff]  ;;  %v10497_v29 = vld [vmem:[#allocation328_spill] sm:$0xff] }
 0x506   : > { %v2060_v45 = vadd.f32 %v2028_v8, %v7639_v25  ;;  %v2285_v42 = vmul.f32 %v10495_v47, %v2189_v32  ;;  %v2286_v27 = vmul.f32 %v10495_v47, %v2190_v34  ;;  %v2061_v30 = vadd.f32 %v2029_v12, %v7642_v1  ;;  %v10501_v8 = vld [vmem:[#allocation34_spill] sm:$0xff] }
 0x507   : > { %10493 = vst [vmem:[#allocation119_spill] sm:$0xff] %v7754_v36  ;;  %3037 = vperm.xlu2 %4160, %v10496_v52   ;;  %v2034_v61 = vmul.f32 %v10498_v56, %v10497_v29  ;;  %v2197_v37 = vmul.f32 %v7035_v53, %v2148_v51  ;;  %v7775_v36 = vpop.permute.xlu2 %2863  ;;  %v2198_v25 = vmul.f32 %v7038_v5, %v2164_v9  ;;  %v10502_v52 = vld [vmem:[#allocation306_spill] sm:$0xff] }
 0x508   : > { %10494 = vst [vmem:[#allocation50_spill] sm:$0xff] %v7756_v28  ;;  %v10499_v28 = vld [vmem:[#allocation334_spill] sm:$0xff]  ;;  %v2956_v13 = vmul.f32 %v7747_v20, %v2916_v57  ;;  %v2957_v39 = vmul.f32 %v7752_v35, %v2932_v55  ;;  %2875 = vrot.lane.b32.xlu1 %v10501_v8, %s4306_s29  ;;  %v2319_v1 = vadd.f32 %v2287_v48, %v2060_v45  ;;  %v10504_v45 = vld [vmem:[#allocation313_spill] sm:$0xff] }
 0x509   : > { %v2035_v58 = vmul.f32 %v10498_v56, %v10499_v28  ;;  %10500 = vst [vmem:[#allocation115_spill] sm:$0xff] %v7775_v36  ;;  %v2320_v12 = vadd.f32 %v2288_v16, %v2061_v30  ;;  %v2709_v32 = vmul.f32 %v7102_v63, %v7118_v31  ;;  %v2710_v34 = vmul.f32 %v7105_v50, %v7122_v23  ;;  %v2767_v57 = vpop.permute.xlu1 %2766  ;;  %v10503_v56 = vld [vmem:[#allocation307_spill] sm:$0xff]  ;;  %v10505_v31 = vld [vmem:[#allocation314_spill] sm:$0xff] }
 0x50a   : > { %3181 = vperm.xlu0 %4158, %v847_v11   ;;  %v3002_v51 = vpop.permute.xlu0 %3001  ;;  %4161 = vset.pattern.permute.xlu1 %v10481_v59  ;;  %v2317_v9 = vadd.f32 %v2285_v42, %v2058_v7  ;;  %v2318_v28 = vadd.f32 %v2286_v27, %v2059_v62  ;;  %v2578_v29 = vadd.f32 %v10502_v52, %v2319_v1  ;;  %v10508_v7 = vld [vmem:[#allocation268_spill] sm:$0xff] }
 0x50b   : > { %v3052_v47 = vmul.f32 %v3002_v51, %v2956_v13  ;;  %v3053_v55 = vmul.f32 %v3002_v51, %v2957_v39  ;;  %v2579_v11 = vadd.f32 %v10503_v56, %v2320_v12  ;;  %v2805_v48 = vmul.f32 %v2767_v57, %v2709_v32  ;;  %v846_v39 = vld [vmem:[%s9441_s6 + $0x70] sm:$0xff]  ;;  %v10512_v12 = vld [vmem:[#allocation321_spill] sm:$0xff] }
 0x50c   : > { %v2806_v16 = vmul.f32 %v2767_v57, %v2710_v34  ;;  %v2576_v30 = vadd.f32 %v10504_v45, %v2317_v9  ;;  %v2577_v8 = vadd.f32 %v10505_v31, %v2318_v28  ;;  %v2293_v62 = vmul.f32 %v10508_v7, %v2197_v37  ;;  %v10511_v1 = vld [vmem:[#allocation84_spill] sm:$0xff]  ;;  %v10514_v34 = vld [vmem:[#allocation322_spill] sm:$0xff]  ;;  %v10517_v9 = vld [vmem:[#allocation3_spill] sm:$0xff] }
 0x50d   : > { %v7792_v23 = vadd.f32 %v3052_v47, %v7692_v4  ;;  %v7795_v59 = vadd.f32 %v3053_v55, %v7694_v43  ;;  %v2294_v42 = vmul.f32 %v10508_v7, %v2198_v25  ;;  %v7799_v27 = vadd.f32 %v2805_v48, %v2578_v29  ;;  %v10513_v4 = vld [vmem:[#allocation79_spill] sm:$0xff]  ;;  %v4265_v43 = vld [vmem:[%s9440_s5 + $0x70] sm:$0xff]  ;;  %v10519_v29 = vld [vmem:[#allocation213_spill] sm:$0xff] }
 0x50e   : > { %v7801_v13 = vadd.f32 %v2806_v16, %v2579_v11  ;;  %v1244_v32 = vmul.f32 %v10512_v12, %v10511_v1  ;;  %v1245_v51 = vmul.f32 %v10514_v34, %v10513_v4  ;;  %v7814_v37 = vadd.f32 %v7458_v18, %v2576_v30  ;;  %v10518_v28 = vld [vmem:[#allocation323_spill] sm:$0xff]  ;;  %v10520_v11 = vld [vmem:[#allocation21_spill] sm:$0xff]  ;;  %v10523_v45 = vld [vmem:[#allocation324_spill] sm:$0xff] }
 0x50f   : > { %10506 = vst [vmem:[#allocation104_spill] sm:$0xff] %v7792_v23  ;;  %3033 = vperm.xlu2 %4160, %v4265_v43   ;;  %v7817_v25 = vadd.f32 %v7461_v10, %v2577_v8  ;;  %v969_v57 = vmul.f32 %v10518_v28, %v10517_v9  ;;  %v2066_v47 = vadd.f32 %v2034_v61, %v7680_v21  ;;  %v7823_v52 = vpop.permute.xlu2 %2891  ;;  %v10521_v48 = vld [vmem:[#allocation65_spill] sm:$0xff]  ;;  %v10522_v16 = vld [vmem:[#allocation83_spill] sm:$0xff]  ;;  %v10524_v31 = vld [vmem:[#allocation38_spill] sm:$0xff] }
 0x510   : > { %10507 = vst [vmem:[#allocation97_spill] sm:$0xff] %v7795_v59  ;;  %v2067_v55 = vadd.f32 %v2035_v58, %v7683_v46  ;;  %v7827_v56 = vmul.f32 %v10518_v28, %v10519_v29  ;;  %v1242_v18 = vmul.f32 %v10512_v12, %v10520_v11  ;;  %v1243_v10 = vmul.f32 %v10514_v34, %v10521_v48  ;;  %v10525_v58 = vld [vmem:[#allocation92_spill] sm:$0xff]  ;;  %v10526_v1 = vld [vmem:[#allocation27_spill] sm:$0xff]  ;;  %v10580_v59 = vld [vmem:[#allocation190_spill] sm:$0xff] }
 0x511   : > { %10509 = vst [vmem:[#allocation94_spill] sm:$0xff] %v7799_v27  ;;  %v970_v30 = vmul.f32 %v10523_v45, %v10522_v16  ;;  %2905 = vrot.lane.b32.xlu1 %v10524_v31, %s4306_s29  ;;  %v2325_v21 = vadd.f32 %v2293_v62, %v2066_v47  ;;  %v2715_v61 = vmul.f32 %v7102_v63, %v7188_v22  ;;  %v10527_v9 = vld [vmem:[#allocation47_spill] sm:$0xff]  ;;  %v10528_v29 = vld [vmem:[#allocation120_spill] sm:$0xff]  ;;  %v2779_v63 = vpop.permute.xlu1 %2778  ;;  %v10529_v22 = vld [vmem:[#allocation325_spill] sm:$0xff] }
 0x512   : > { %10510 = vst [vmem:[#allocation105_spill] sm:$0xff] %v7801_v13  ;;  %3176 = vperm.xlu0 %4158, %v846_v39   ;;  %v2326_v46 = vadd.f32 %v2294_v42, %v2067_v55  ;;  %v2716_v8 = vmul.f32 %v7105_v50, %v10525_v58  ;;  %v7841_v7 = vpop.permute.xlu0 %2993  ;;  %v1340_v4 = vmul.f32 %v10526_v1, %v1244_v32  ;;  %v10530_v50 = vld [vmem:[#allocation326_spill] sm:$0xff]  ;;  %v10531_v32 = vld [vmem:[#allocation17_spill] sm:$0xff]  ;;  %v10560_v27 = vld [vmem:[#allocation139_spill] sm:$0xff] }
 0x513   : > { %10515 = vst [vmem:[#allocation81_spill] sm:$0xff] %v7814_v37  ;;  %v1341_v43 = vmul.f32 %v10526_v1, %v1245_v51  ;;  %v1204_v11 = vsel %vm1193_vm10, %v10528_v29, %v10527_v9  ;;  %v1220_v62 = vsel %vm1193_vm10, %v10527_v9, %v10528_v29  ;;  %v2584_v42 = vadd.f32 %v10529_v22, %v2325_v21  ;;  %v10532_v16 = vld [vmem:[#allocation41_spill] sm:$0xff]  ;;  %v10536_v9 = vld [vmem:[#allocation67_spill] sm:$0xff] }
 0x514   : > { %10516 = vst [vmem:[#allocation118_spill] sm:$0xff] %v7817_v25  ;;  %v2585_v39 = vadd.f32 %v10530_v50, %v2326_v46  ;;  %v2811_v47 = vmul.f32 %v2779_v63, %v2715_v61  ;;  %v2812_v55 = vmul.f32 %v2779_v63, %v2716_v8  ;;  %v1081_v48 = vmul.f32 %v10531_v32, %v969_v57  ;;  %v10533_v31 = vld [vmem:[#allocation117_spill] sm:$0xff]  ;;  %v845_v57 = vld [vmem:[%s9441_s6 + $0x68] sm:$0xff]  ;;  %v10537_v63 = vld [vmem:[#allocation36_spill] sm:$0xff] }
 0x515   : > { %v1082_v51 = vmul.f32 %v10531_v32, %v970_v30  ;;  %v929_v58 = vsel %vm918_vm9, %v10533_v31, %v10532_v16  ;;  %v945_v1 = vsel %vm918_vm9, %v10532_v16, %v10533_v31  ;;  %v1248_v21 = vmul.f32 %v10512_v12, %v1220_v62  ;;  %v10546_v32 = vld [vmem:[#allocation106_spill] sm:$0xff]  ;;  %v10558_v25 = vld [vmem:[#allocation112_spill] sm:$0xff] }
 0x516   : > { %v1249_v46 = vmul.f32 %v10514_v34, %v1204_v11  ;;  %v7867_v61 = vadd.f32 %v2811_v47, %v2584_v42  ;;  %v7869_v8 = vadd.f32 %v2812_v55, %v2585_v39  ;;  %v1372_v30 = vadd.f32 %v1340_v4, %v1081_v48  ;;  %v10538_v34 = vld [vmem:[#allocation128_spill] sm:$0xff]  ;;  %v10539_v11 = vld [vmem:[#allocation53_spill] sm:$0xff]  ;;  %v10543_v39 = vld [vmem:[#allocation103_spill] sm:$0xff] }
 0x517   : > { %3029 = vperm.xlu2 %4160, %v7476_v6   ;;  %v7877_v29 = vmul.f32 %v10523_v45, %v10536_v9  ;;  %v7880_v22 = vmul.f32 %v10537_v63, %v1242_v18  ;;  %v7883_v12 = vmul.f32 %v10537_v63, %v1243_v10  ;;  %v1454_v62 = vsel %vm1452_vm12, %v10539_v11, %v10538_v34  ;;  %v7893_v42 = vpop.permute.xlu2 %2887  ;;  %v10542_v18 = vld [vmem:[#allocation131_spill] sm:$0xff]  ;;  %v10544_v55 = vld [vmem:[#allocation33_spill] sm:$0xff]  ;;  %v10549_v16 = vld [vmem:[#allocation138_spill] sm:$0xff] }
 0x518   : > { %10534 = vst [vmem:[#allocation110_spill] sm:$0xff] %v7867_v61  ;;  %v1470_v6 = vsel %vm1452_vm12, %v10538_v34, %v10539_v11  ;;  %v1373_v4 = vadd.f32 %v1341_v43, %v1082_v51  ;;  %v7896_v50 = vmul.f32 %v10518_v28, %v945_v1  ;;  %v1457_v10 = vsel %vm1452_vm12, %v10543_v39, %v10542_v18  ;;  %v10547_v28 = vld [vmem:[#allocation134_spill] sm:$0xff]  ;;  %v10548_v51 = vld [vmem:[#allocation113_spill] sm:$0xff]  ;;  %v10550_v9 = vld [vmem:[#allocation40_spill] sm:$0xff] }
 0x519   : > { %10535 = vst [vmem:[#allocation100_spill] sm:$0xff] %v7869_v8  ;;  %v1473_v47 = vsel %vm1452_vm12, %v10542_v18, %v10543_v39  ;;  %2903 = vrot.lane.b32.xlu1 %v10544_v55, %s4306_s29  ;;  %v7909_v43 = vmul.f32 %v10523_v45, %v929_v58  ;;  %v1476_v48 = vsel %vm1452_vm12, %v10547_v28, %v10546_v32  ;;  %v10553_v45 = vld [vmem:[#allocation287_spill] sm:$0xff]  ;;  %v10554_v34 = vld [vmem:[#allocation286_spill] sm:$0xff]  ;;  %v10555_v39 = vld [vmem:[#allocation109_spill] sm:$0xff]  ;;  %v7937_v0 = vpop.permute.xlu1 %2849 }
 0x51a   : > { %10540 = vst [vmem:[#allocation69_spill] sm:$0xff] %v7893_v42  ;;  %3171 = vperm.xlu0 %4158, %v845_v57   ;;  %v1477_v31 = vsel %vm1452_vm12, %v10549_v16, %v10548_v51  ;;  %v7919_v1 = vpop.permute.xlu0 %2989  ;;  %v7922_v63 = vmul.f32 %v10550_v9, %v1248_v21  ;;  %v7925_v57 = vmul.f32 %v10550_v9, %v1249_v46  ;;  %v10556_v55 = vld [vmem:[#allocation137_spill] sm:$0xff]  ;;  %v10557_v9 = vld [vmem:[#allocation140_spill] sm:$0xff]  ;;  %v10568_v8 = vld [vmem:[#allocation159_spill] sm:$0xff] }
 0x51b   : > { %10541 = vst [vmem:[#allocation132_spill] sm:$0xff] %v7896_v50  ;;  %v1489_v58 = vmul.f32 %v10553_v45, %v1470_v6  ;;  %v1490_v11 = vmul.f32 %v10554_v34, %v1454_v62  ;;  %v1460_v18 = vsel %vm1452_vm12, %v10546_v32, %v10547_v28  ;;  %v1479_v36 = vsel %vm1452_vm12, %v10556_v55, %v10555_v39 }
 0x51c   : > { %10545 = vst [vmem:[#allocation7_spill] sm:$0xff] %v7909_v43  ;;  %v1495_v21 = vmul.f32 %v10553_v45, %v1473_v47  ;;  %v1496_v46 = vmul.f32 %v10554_v34, %v1457_v10  ;;  %v1461_v62 = vsel %vm1452_vm12, %v10548_v51, %v10549_v16  ;;  %v1463_v6 = vsel %vm1452_vm12, %v10555_v39, %v10556_v55  ;;  %v10559_v16 = vld [vmem:[#allocation136_spill] sm:$0xff]  ;;  %v10589_v43 = vld [vmem:[#allocation243_spill] sm:$0xff] }
 0x51d   : > { %10551 = vst [vmem:[#allocation35_spill] sm:$0xff] %v7922_v63  ;;  %v1501_v32 = vmul.f32 %v10553_v45, %v1476_v48  ;;  %v1503_v28 = vmul.f32 %v10553_v45, %v1477_v31  ;;  %v1466_v47 = vsel %vm1452_vm12, %v10558_v25, %v10557_v9  ;;  %v1482_v10 = vsel %vm1452_vm12, %v10557_v9, %v10558_v25  ;;  %v844_v31 = vld [vmem:[%s9441_s6 + $0x60] sm:$0xff] }
 0x51e   : > { %10552 = vst [vmem:[#allocation121_spill] sm:$0xff] %v7925_v57  ;;  %v1502_v51 = vmul.f32 %v10554_v34, %v1460_v18  ;;  %v7961_v37 = vmul.f32 %v10559_v16, %v1495_v21  ;;  %v7964_v39 = vmul.f32 %v10559_v16, %v1496_v46  ;;  %v1507_v48 = vmul.f32 %v10553_v45, %v1479_v36  ;;  %v10561_v18 = vld [vmem:[#allocation150_spill] sm:$0xff] }
 0x51f   : > { %v1504_v55 = vmul.f32 %v10554_v34, %v1461_v62  ;;  %v1508_v13 = vmul.f32 %v10554_v34, %v1463_v6  ;;  %v7973_v25 = vmul.f32 %v10560_v27, %v1501_v32  ;;  %v1599_v9 = vmul.f32 %v10561_v18, %v1503_v28  ;;  %v4266_v21 = vld [vmem:[%s9440_s5 + $0x60] sm:$0xff]  ;;  %v7991_v32 = vpop.permute.xlu2 %2997 }
 0x520   : > { %3025 = vperm.xlu2 %4160, %v4266_v21   ;;  %v7980_v36 = vmul.f32 %v10560_v27, %v1502_v51  ;;  %v7983_v46 = vmul.f32 %v10553_v45, %v1482_v10  ;;  %v7986_v62 = vmul.f32 %v10554_v34, %v1466_v47  ;;  %v10564_v6 = vld [vmem:[#allocation142_spill] sm:$0xff]  ;;  %10566 = vst [vmem:[#allocation126_spill] sm:$0xff] %v7991_v32  ;;  %v10569_v45 = vld [vmem:[#allocation20_spill] sm:$0xff]  ;;  %v10571_v47 = vld [vmem:[#allocation147_spill] sm:$0xff] }
 0x521   : > { %v7989_v16 = vmul.f32 %v10564_v6, %v1507_v48  ;;  %v1600_v28 = vmul.f32 %v10561_v18, %v1504_v55  ;;  %v1713_v21 = vsel %vm1711_vm13, %v10568_v8, %v10567_v41  ;;  %v1729_v27 = vsel %vm1711_vm13, %v10567_v41, %v10568_v8  ;;  %2901 = vrot.lane.b32.xlu1 %v10569_v45, %s4306_s29  ;;  %v10572_v51 = vld [vmem:[#allocation184_spill] sm:$0xff]  ;;  %v10573_v48 = vld [vmem:[#allocation162_spill] sm:$0xff]  ;;  %v10574_v18 = vld [vmem:[#allocation173_spill] sm:$0xff]  ;;  %v8031_v61 = vpop.permute.xlu1 %2855 }
 0x522   : > { %10562 = vst [vmem:[#allocation108_spill] sm:$0xff] %v7983_v46  ;;  %3166 = vperm.xlu0 %4158, %v844_v31   ;;  %v8005_v34 = vmul.f32 %v10564_v6, %v1508_v13  ;;  %v8008_v10 = vmul.f32 %v10571_v47, %v1489_v58  ;;  %v1716_v55 = vsel %vm1711_vm13, %v10573_v48, %v10572_v51  ;;  %v8018_v8 = vpop.permute.xlu0 %2985  ;;  %v10575_v6 = vld [vmem:[#allocation172_spill] sm:$0xff]  ;;  %v10577_v32 = vld [vmem:[#allocation187_spill] sm:$0xff] }
 0x523   : > { %10563 = vst [vmem:[#allocation124_spill] sm:$0xff] %v7986_v62  ;;  %v1732_v41 = vsel %vm1711_vm13, %v10572_v51, %v10573_v48  ;;  %v8021_v31 = vmul.f32 %v10571_v47, %v1490_v11  ;;  %v1631_v13 = vadd.f32 %v1599_v9, %v1372_v30  ;;  %v1720_v58 = vsel %vm1711_vm13, %v10575_v6, %v10574_v18  ;;  %v10578_v11 = vld [vmem:[#allocation165_spill] sm:$0xff] }
 0x524   : > { %10565 = vst [vmem:[#allocation123_spill] sm:$0xff] %v7989_v16  ;;  %v1736_v45 = vsel %vm1711_vm13, %v10574_v18, %v10575_v6  ;;  %v1748_v51 = vmul.f32 %v6999_v19, %v1729_v27  ;;  %v1749_v48 = vmul.f32 %v7002_v24, %v1713_v21  ;;  %v1719_v30 = vsel %vm1711_vm13, %v10578_v11, %v10577_v32  ;;  %v10579_v6 = vld [vmem:[#allocation168_spill] sm:$0xff]  ;;  %v10581_v16 = vld [vmem:[#allocation182_spill] sm:$0xff] }
 0x525   : > { %10570 = vst [vmem:[#allocation127_spill] sm:$0xff] %v8005_v34  ;;  %v1735_v9 = vsel %vm1711_vm13, %v10577_v32, %v10578_v11  ;;  %v1632_v47 = vadd.f32 %v1600_v28, %v1373_v4  ;;  %v1754_v34 = vmul.f32 %v6999_v19, %v1732_v41  ;;  %v1755_v18 = vmul.f32 %v7002_v24, %v1716_v55  ;;  %v843_v4 = vld [vmem:[%s9441_s6 + $0x58] sm:$0xff] }
 0x526   : > { %10576 = vst [vmem:[#allocation133_spill] sm:$0xff] %v8031_v61  ;;  %v1738_v21 = vsel %vm1711_vm13, %v10580_v59, %v10579_v6  ;;  %v1762_v27 = vmul.f32 %v6999_v19, %v1736_v45  ;;  %v1763_v23 = vmul.f32 %v7002_v24, %v1720_v58  ;;  %v8052_v57 = vmul.f32 %v10581_v16, %v1748_v51  ;;  %v10582_v32 = vld [vmem:[#allocation185_spill] sm:$0xff] }
 0x527   : > { %v8055_v63 = vmul.f32 %v10581_v16, %v1749_v48  ;;  %v8061_v28 = vmul.f32 %v10582_v32, %v1754_v34  ;;  %v8064_v55 = vmul.f32 %v10582_v32, %v1755_v18  ;;  %v1760_v41 = vmul.f32 %v6999_v19, %v1735_v9  ;;  %v4267_v45 = vld [vmem:[%s9440_s5 + $0x58] sm:$0xff]  ;;  %v10585_v48 = vld [vmem:[#allocation171_spill] sm:$0xff]  ;;  %v10586_v18 = vld [vmem:[#allocation204_spill] sm:$0xff] }
 0x528   : > { %v1761_v58 = vmul.f32 %v7002_v24, %v1719_v30  ;;  %3021 = vperm.xlu2 %4160, %v4267_v45   ;;  %v1722_v16 = vsel %vm1711_vm13, %v10579_v6, %v10580_v59  ;;  %v8076_v34 = vmul.f32 %v6999_v19, %v1738_v21  ;;  %v10584_v51 = vld [vmem:[#allocation193_spill] sm:$0xff]  ;;  %v2884_v9 = vpop.permute.xlu2 %2883  ;;  %v1858_v32 = vmul.f32 %v10586_v18, %v1762_v27  ;;  %v10587_v21 = vld [vmem:[#allocation12_spill] sm:$0xff] }
 0x529   : > { %v1725_v11 = vsel %vm1711_vm13, %v10585_v48, %v10584_v51  ;;  %v1741_v30 = vsel %vm1711_vm13, %v10584_v51, %v10585_v48  ;;  %v2913_v59 = vsel %vm2909_vm15, %v7655_v3, %v2884_v9  ;;  %v2929_v6 = vsel %vm2909_vm15, %v2884_v9, %v7655_v3  ;;  %2899 = vrot.lane.b32.xlu1 %v10587_v21, %s4306_s29  ;;  %v10588_v45 = vld [vmem:[#allocation244_spill] sm:$0xff]  ;;  %v8117_v50 = vpop.permute.xlu1 %2861 }
 0x52a   : > { %10583 = vst [vmem:[#allocation130_spill] sm:$0xff] %v8076_v34  ;;  %3161 = vperm.xlu0 %4158, %v843_v4   ;;  %v2141_v51 = vsel %vm2132_vm14, %v10589_v43, %v10588_v45  ;;  %v2157_v27 = vsel %vm2132_vm14, %v10588_v45, %v10589_v43  ;;  %v2950_v48 = vmul.f32 %v7747_v20, %v2913_v59  ;;  %v8105_v42 = vpop.permute.xlu0 %2981  ;;  %v10594_v43 = vld [vmem:[#allocation195_spill] sm:$0xff]  ;;  %v10595_v59 = vld [vmem:[#allocation60_spill] sm:$0xff] }
 0x52b   : > { %v2951_v61 = vmul.f32 %v7752_v35, %v2929_v6  ;;  %v8108_v3 = vmul.f32 %v7002_v24, %v1722_v16  ;;  %v8111_v4 = vmul.f32 %v6999_v19, %v1741_v30  ;;  %v8114_v9 = vmul.f32 %v7002_v24, %v1725_v11  ;;  %10593 = vst [vmem:[#allocation141_spill] sm:$0xff] %v8117_v50  ;;  %v10596_v6 = vld [vmem:[#allocation211_spill] sm:$0xff]  ;;  %v10597_v30 = vld [vmem:[#allocation340_spill] sm:$0xff] }
 0x52c   : > { %v1859_v21 = vmul.f32 %v10586_v18, %v1763_v23  ;;  %v8120_v45 = vmul.f32 %v10594_v43, %v1760_v41  ;;  %v2020_v34 = vmul.f32 %v10596_v6, %v10595_v59  ;;  %v3046_v62 = vmul.f32 %v7919_v1, %v2950_v48  ;;  %v10598_v18 = vld [vmem:[#allocation319_spill] sm:$0xff] }
 0x52d   : > { %10590 = vst [vmem:[#allocation129_spill] sm:$0xff] %v8108_v3  ;;  %v3047_v16 = vmul.f32 %v7919_v1, %v2951_v61  ;;  %v8127_v19 = vmul.f32 %v10594_v43, %v1761_v58  ;;  %v2021_v24 = vmul.f32 %v10596_v6, %v10597_v30  ;;  %v2183_v23 = vmul.f32 %v7035_v53, %v2141_v51  ;;  %v10599_v41 = vld [vmem:[#allocation203_spill] sm:$0xff]  ;;  %v10602_v58 = vld [vmem:[#allocation320_spill] sm:$0xff]  ;;  %v10606_v30 = vld [vmem:[#allocation206_spill] sm:$0xff] }
 0x52e   : > { %10591 = vst [vmem:[#allocation135_spill] sm:$0xff] %v8111_v4  ;;  %v2184_v11 = vmul.f32 %v7038_v5, %v2157_v27  ;;  %v8135_v50 = vmul.f32 %v10599_v41, %v10598_v18  ;;  %v841_v48 = vld [vmem:[%s9441_s6 + $0x48] sm:$0xff]  ;;  %v8141_v61 = vadd.f32 %v3046_v62, %v7630_v54  ;;  %v8148_v51 = vmul.f32 %v10599_v41, %v10602_v58  ;;  %v10610_v58 = vld [vmem:[#allocation8_spill] sm:$0xff]  ;;  %v10617_v3 = vld [vmem:[#allocation253_spill] sm:$0xff] }
 0x52f   : > { %10592 = vst [vmem:[#allocation107_spill] sm:$0xff] %v8114_v9  ;;  %v1890_v9 = vadd.f32 %v1858_v32, %v1631_v13  ;;  %v8144_v1 = vadd.f32 %v3047_v16, %v7632_v26  ;;  %v1891_v27 = vadd.f32 %v1859_v21, %v1632_v47  ;;  %v10603_v43 = vld [vmem:[#allocation275_spill] sm:$0xff]  ;;  %v10605_v32 = vld [vmem:[#allocation336_spill] sm:$0xff] }
 0x530   : > { %10600 = vst [vmem:[#allocation122_spill] sm:$0xff] %v8141_v61  ;;  %v2279_v59 = vmul.f32 %v10603_v43, %v2183_v23  ;;  %v2280_v6 = vmul.f32 %v10603_v43, %v2184_v11  ;;  %v10604_v13 = vld [vmem:[#allocation31_spill] sm:$0xff]  ;;  %v8155_v18 = vmul.f32 %v10606_v30, %v10605_v32  ;;  %v10608_v16 = vld [vmem:[#allocation252_spill] sm:$0xff]  ;;  %v2882_v21 = vpop.permute.xlu2 %2881 }
 0x531   : > { %10601 = vst [vmem:[#allocation143_spill] sm:$0xff] %v8144_v1  ;;  %3017 = vperm.xlu2 %4160, %v10604_v13   ;;  %v10607_v54 = vld [vmem:[#allocation339_spill] sm:$0xff]  ;;  %v2052_v26 = vadd.f32 %v2020_v34, %v1890_v9  ;;  %v10609_v1 = vld [vmem:[#allocation224_spill] sm:$0xff]  ;;  %v2053_v23 = vadd.f32 %v2021_v24, %v1891_v27  ;;  %v2912_v11 = vsel %vm2909_vm15, %v7937_v0, %v2882_v21 }
 0x532   : > { %v8159_v62 = vmul.f32 %v10606_v30, %v10607_v54  ;;  %v2134_v47 = vsel %vm2132_vm14, %v10609_v1, %v10608_v16  ;;  %v2928_v41 = vsel %vm2909_vm15, %v2882_v21, %v7937_v0  ;;  %2897 = vrot.lane.b32.xlu1 %v10610_v58, %s4306_s29  ;;  %3151 = vperm.xlu0 %4158, %v841_v48   ;;  %v10611_v34 = vld [vmem:[#allocation303_spill] sm:$0xff]  ;;  %v10613_v32 = vld [vmem:[#allocation304_spill] sm:$0xff]  ;;  %v8184_v48 = vpop.permute.xlu1 %2867 }
 0x533   : > { %v10612_v9 = vld [vmem:[#allocation215_spill] sm:$0xff]  ;;  %v2150_v24 = vsel %vm2132_vm14, %v10608_v16, %v10609_v1  ;;  %v2948_v27 = vmul.f32 %v7747_v20, %v2912_v11  ;;  %v2949_v13 = vmul.f32 %v7752_v35, %v2928_v41  ;;  %v2169_v0 = vmul.f32 %v7035_v53, %v2134_v47  ;;  %10614 = vst [vmem:[#allocation144_spill] sm:$0xff] %v8184_v48  ;;  %v10616_v16 = vld [vmem:[#allocation2_spill] sm:$0xff]  ;;  %v10619_v47 = vld [vmem:[#allocation301_spill] sm:$0xff] }
 0x534   : > { %v2006_v43 = vmul.f32 %v10612_v9, %v10611_v34  ;;  %v2007_v30 = vmul.f32 %v10612_v9, %v10613_v32  ;;  %v2311_v54 = vadd.f32 %v2279_v59, %v2052_v26  ;;  %v2312_v21 = vadd.f32 %v2280_v6, %v2053_v23  ;;  %v993_v58 = vpop.permute.xlu0 %992  ;;  %v10615_v4 = vld [vmem:[#allocation71_spill] sm:$0xff]  ;;  %v10618_v9 = vld [vmem:[#allocation300_spill] sm:$0xff] }
 0x535   : > { %v3044_v34 = vmul.f32 %v8018_v8, %v2948_v27  ;;  %v3045_v61 = vmul.f32 %v8018_v8, %v2949_v13  ;;  %v1067_v1 = vmul.f32 %v993_v58, %v10615_v4  ;;  %v1068_v11 = vmul.f32 %v993_v58, %v10616_v16  ;;  %v10620_v6 = vld [vmem:[#allocation52_spill] sm:$0xff]  ;;  %v3877_v8 = vld [vmem:[%s9443_s8 + $0x8] sm:$0xff]  ;;  %v10622_v27 = vld [vmem:[#allocation37_spill] sm:$0xff] }
 0x536   : > { %v2170_v41 = vmul.f32 %v7038_v5, %v2150_v24  ;;  %v2265_v46 = vmul.f32 %v10617_v3, %v2169_v0  ;;  %v2570_v32 = vadd.f32 %v10618_v9, %v2311_v54  ;;  %v2571_v59 = vadd.f32 %v10619_v47, %v2312_v21  ;;  %v10621_v23 = vld [vmem:[#allocation48_spill] sm:$0xff]  ;;  %v10623_v13 = vld [vmem:[#allocation223_spill] sm:$0xff]  ;;  %v10631_v47 = vld [vmem:[#allocation278_spill] sm:$0xff] }
 0x537   : > { %v1358_v26 = vadd.f32 %v10620_v6, %v1067_v1  ;;  %v1359_v48 = vadd.f32 %v10621_v23, %v1068_v11  ;;  %v8200_v4 = vadd.f32 %v3044_v34, %v10622_v27  ;;  %v8203_v58 = vadd.f32 %v3045_v61, %v10623_v13  ;;  %v10624_v24 = vld [vmem:[#allocation255_spill] sm:$0xff]  ;;  %v10626_v34 = vld [vmem:[#allocation14_spill] sm:$0xff] }
 0x538   : > { %v10625_v0 = vld [vmem:[#allocation227_spill] sm:$0xff]  ;;  %v8217_v16 = vadd.f32 %v10626_v34, %v2570_v32  ;;  %v10628_v61 = vld [vmem:[#allocation42_spill] sm:$0xff]  ;;  %v2266_v32 = vmul.f32 %v10617_v3, %v2170_v41 }
 0x539   : > { %v2137_v54 = vsel %vm2132_vm14, %v10625_v0, %v10624_v24  ;;  %v2153_v21 = vsel %vm2132_vm14, %v10624_v24, %v10625_v0  ;;  %v4268_v1 = vld [vmem:[%s9440_s5 + $0x48] sm:$0xff]  ;;  %v8220_v11 = vadd.f32 %v10628_v61, %v2571_v59  ;;  %v1617_v27 = vadd.f32 %v8008_v10, %v1358_v26  ;;  %v2880_v24 = vpop.permute.xlu2 %2879 }
 0x53a   : > { %3013 = vperm.xlu2 %4160, %v4268_v1   ;;  %10627 = vst [vmem:[#allocation125_spill] sm:$0xff] %v8217_v16  ;;  %v10630_v9 = vld [vmem:[#allocation279_spill] sm:$0xff]  ;;  %v1618_v13 = vadd.f32 %v8021_v31, %v1359_v48  ;;  %v2911_v59 = vsel %vm2909_vm15, %v7485_v38, %v2880_v24  ;;  %v2927_v0 = vsel %vm2909_vm15, %v2880_v24, %v7485_v38  ;;  %v10632_v1 = vld [vmem:[#allocation64_spill] sm:$0xff]  ;;  %v8249_v61 = vpop.permute.xlu1 %3005  ;;  %v10636_v24 = vld [vmem:[#allocation54_spill] sm:$0xff] }
 0x53b   : > { %10629 = vst [vmem:[#allocation174_spill] sm:$0xff] %v8220_v11  ;;  %v2393_v6 = vsel %vm2391_vm8, %v10631_v47, %v10630_v9  ;;  %v2409_v23 = vsel %vm2391_vm8, %v10630_v9, %v10631_v47  ;;  %2895 = vrot.lane.b32.xlu1 %v10632_v1, %s4306_s29  ;;  %3887 = vperm.xlu0 %4158, %v3877_v8   ;;  %v10639_v11 = vld [vmem:[#allocation77_spill] sm:$0xff] }
 0x53c   : > { %v1876_v34 = vadd.f32 %v8052_v57, %v1617_v27  ;;  %v1877_v10 = vadd.f32 %v8055_v63, %v1618_v13  ;;  %v2946_v31 = vmul.f32 %v7747_v20, %v2911_v59  ;;  %v2947_v3 = vmul.f32 %v7752_v35, %v2927_v0  ;;  %v1008_v9 = vpop.permute.xlu0 %1007  ;;  %v10633_v27 = vld [vmem:[#allocation282_spill] sm:$0xff]  ;;  %v10634_v13 = vld [vmem:[#allocation281_spill] sm:$0xff] }
 0x53d   : > { %v2175_v48 = vmul.f32 %v7035_v53, %v2137_v54  ;;  %v2176_v41 = vmul.f32 %v7038_v5, %v2153_v21  ;;  %v2428_v26 = vmul.f32 %v5979_v44, %v2393_v6  ;;  %v2429_v38 = vmul.f32 %v5982_v60, %v2409_v23  ;;  %v10635_v6 = vld [vmem:[#allocation70_spill] sm:$0xff] }
 0x53e   : > { %v2038_v8 = vadd.f32 %v2006_v43, %v1876_v34  ;;  %v2039_v47 = vadd.f32 %v2007_v30, %v1877_v10  ;;  %v3042_v57 = vmul.f32 %v8105_v42, %v2946_v31  ;;  %v3043_v63 = vmul.f32 %v8105_v42, %v2947_v3  ;;  %v842_v43 = vld [vmem:[%s9441_s6 + $0x50] sm:$0xff] }
 0x53f   : > { %v2396_v54 = vsel %vm2391_vm8, %v10634_v13, %v10633_v27  ;;  %v2412_v21 = vsel %vm2391_vm8, %v10633_v27, %v10634_v13  ;;  %v1073_v23 = vmul.f32 %v1008_v9, %v10635_v6  ;;  %v1074_v59 = vmul.f32 %v1008_v9, %v10636_v24  ;;  %v10637_v30 = vld [vmem:[#allocation292_spill] sm:$0xff]  ;;  %v10640_v13 = vld [vmem:[#allocation75_spill] sm:$0xff] }
 0x540   : > { %v2524_v42 = vmul.f32 %v10637_v30, %v2428_v26  ;;  %v2525_v0 = vmul.f32 %v10637_v30, %v2429_v38  ;;  %v2297_v1 = vadd.f32 %v2265_v46, %v2038_v8  ;;  %v2298_v34 = vadd.f32 %v2266_v32, %v2039_v47  ;;  %v10638_v10 = vld [vmem:[#allocation256_spill] sm:$0xff]  ;;  %v10641_v46 = vld [vmem:[#allocation258_spill] sm:$0xff]  ;;  %v10644_v8 = vld [vmem:[#allocation149_spill] sm:$0xff] }
 0x541   : > { %v2271_v31 = vmul.f32 %v10638_v10, %v2175_v48  ;;  %v2272_v3 = vmul.f32 %v10638_v10, %v2176_v41  ;;  %v1364_v27 = vadd.f32 %v10639_v11, %v1073_v23  ;;  %v1365_v6 = vadd.f32 %v10640_v13, %v1074_v59  ;;  %v2878_v16 = vpop.permute.xlu2 %2877  ;;  %v10642_v32 = vld [vmem:[#allocation230_spill] sm:$0xff] }
 0x542   : > { %4162 = vset.pattern.permute.xlu2 %v10350_v15  ;;  %v2434_v9 = vmul.f32 %v5979_v44, %v2396_v54  ;;  %v2435_v24 = vmul.f32 %v5982_v60, %v2412_v21  ;;  %v2556_v26 = vadd.f32 %v2524_v42, %v2297_v1  ;;  %v2557_v38 = vadd.f32 %v2525_v0, %v2298_v34  ;;  %v10643_v60 = vld [vmem:[#allocation56_spill] sm:$0xff]  ;;  %v2886_v30 = vpop.permute.xlu1 %2885 }
 0x543   : > { %3156 = vperm.xlu2 %4162, %v842_v43   ;;  %v2140_v48 = vsel %vm2132_vm14, %v10642_v32, %v10641_v46  ;;  %v2156_v11 = vsel %vm2132_vm14, %v10641_v46, %v10642_v32  ;;  %v1623_v41 = vadd.f32 %v7961_v37, %v1364_v27  ;;  %v1624_v44 = vadd.f32 %v7964_v39, %v1365_v6 }
 0x544   : > { %2893 = vrot.lane.b32.xlu1 %v10643_v60, %s4306_s29  ;;  %v2530_v47 = vmul.f32 %v10644_v8, %v2434_v9  ;;  %v2531_v54 = vmul.f32 %v10644_v8, %v2435_v24  ;;  %v2815_v21 = vadd.f32 %v7564_v17, %v2556_v26  ;;  %v2816_v23 = vadd.f32 %v7566_v33, %v2557_v38  ;;  %v1023_v42 = vpop.permute.xlu0 %1022  ;;  %v10648_v8 = vld [vmem:[#allocation101_spill] sm:$0xff] }
 0x545   : > { %v1882_v59 = vadd.f32 %v8061_v28, %v1623_v41  ;;  %v1883_v43 = vadd.f32 %v8064_v55, %v1624_v44  ;;  %v2910_v37 = vsel %vm2909_vm15, %v7600_v40, %v2878_v16  ;;  %v2926_v39 = vsel %vm2909_vm15, %v2878_v16, %v7600_v40  ;;  %v10647_v44 = vld [vmem:[#allocation99_spill] sm:$0xff] }
 0x546   : > { %v2914_v17 = vsel %vm2909_vm15, %v7546_v49, %v2886_v30  ;;  %v2930_v33 = vsel %vm2909_vm15, %v2886_v30, %v7546_v49  ;;  %v1079_v28 = vmul.f32 %v1023_v42, %v7827_v56  ;;  %v1080_v55 = vmul.f32 %v1023_v42, %v7877_v29  ;;  %v10651_v30 = vld [vmem:[#allocation145_spill] sm:$0xff] }
 0x547   : > { %v2044_v0 = vadd.f32 %v8135_v50, %v1882_v59  ;;  %v2045_v1 = vadd.f32 %v8148_v51, %v1883_v43  ;;  %v2952_v40 = vmul.f32 %v7747_v20, %v2914_v17  ;;  %v2953_v16 = vmul.f32 %v7752_v35, %v2930_v33 }
 0x548   : > { %v1370_v34 = vadd.f32 %v7880_v22, %v1079_v28  ;;  %v1371_v10 = vadd.f32 %v7883_v12, %v1080_v55  ;;  %v8313_v27 = vadd.f32 %v3042_v57, %v2815_v21  ;;  %v8315_v13 = vadd.f32 %v3043_v63, %v2816_v23  ;;  %v4269_v63 = vld [vmem:[%s9440_s5 + $0x40] sm:$0xff]  ;;  %v10649_v23 = vld [vmem:[#allocation260_spill] sm:$0xff] }
 0x549   : > { %v2944_v49 = vmul.f32 %v7747_v20, %v2910_v37  ;;  %v2945_v56 = vmul.f32 %v7752_v35, %v2926_v39  ;;  %v2303_v29 = vadd.f32 %v2271_v31, %v2044_v0  ;;  %v2304_v50 = vadd.f32 %v2272_v3, %v2045_v1  ;;  %v2978_v24 = vpop.permute.xlu2 %2977  ;;  %v10650_v39 = vld [vmem:[#allocation108_spill] sm:$0xff]  ;;  %v10653_v28 = vld [vmem:[#allocation130_spill] sm:$0xff]  ;;  %v10655_v1 = vld [vmem:[#allocation129_spill] sm:$0xff] }
 0x54a   : > { %v2181_v51 = vmul.f32 %v7035_v53, %v2140_v48  ;;  %v2182_v6 = vmul.f32 %v7038_v5, %v2156_v11  ;;  %v1629_v9 = vadd.f32 %v7973_v25, %v1370_v34  ;;  %v1630_v22 = vadd.f32 %v7980_v36, %v1371_v10  ;;  %v3142_v32 = vpop.permute.xlu1 %3141  ;;  %v10645_v36 = vld [vmem:[#allocation88_spill] sm:$0xff]  ;;  %v10646_v11 = vld [vmem:[#allocation85_spill] sm:$0xff]  ;;  %v10654_v55 = vld [vmem:[#allocation198_spill] sm:$0xff] }
 0x54b   : > { %v3040_v12 = vmul.f32 %v2978_v24, %v2944_v49  ;;  %v3041_v57 = vmul.f32 %v2978_v24, %v2945_v56  ;;  %v2562_v26 = vadd.f32 %v2530_v47, %v2303_v29  ;;  %v2563_v38 = vadd.f32 %v2531_v54, %v2304_v50  ;;  %v10658_v34 = vld [vmem:[#allocation107_spill] sm:$0xff]  ;;  %v840_v49 = vld [vmem:[%s9441_s6 + $0x40] sm:$0xff]  ;;  %v10661_v24 = vld [vmem:[#allocation16_spill] sm:$0xff] }
 0x54c   : > { %3009 = vperm.xlu1 %4161, %v4269_v63   ;;  %v3048_v31 = vmul.f32 %v7841_v7, %v2952_v40  ;;  %v3049_v3 = vmul.f32 %v7841_v7, %v2953_v16  ;;  %v1888_v46 = vadd.f32 %v8120_v45, %v1629_v9  ;;  %v1889_v25 = vadd.f32 %v8127_v19, %v1630_v22  ;;  %v10657_v40 = vld [vmem:[#allocation201_spill] sm:$0xff]  ;;  %v10659_v50 = vld [vmem:[#allocation62_spill] sm:$0xff] }
 0x54d   : > { %v3072_v48 = vadd.f32 %v3040_v12, %v10645_v36  ;;  %v3073_v41 = vadd.f32 %v3041_v57, %v10646_v11  ;;  %v2821_v60 = vadd.f32 %v10647_v44, %v2562_v26  ;;  %v2822_v21 = vadd.f32 %v10648_v8, %v2563_v38  ;;  %v3876_v22 = vld [vmem:[%s9443_s8] sm:$0xff]  ;;  %v10662_v12 = vld [vmem:[#allocation209_spill] sm:$0xff]  ;;  %v10666_v44 = vld [vmem:[#allocation23_spill] sm:$0xff] }
 0x54e   : > { %v2277_v47 = vmul.f32 %v10649_v23, %v2181_v51  ;;  %v2278_v54 = vmul.f32 %v10649_v23, %v2182_v6  ;;  %v2050_v59 = vadd.f32 %v8155_v18, %v1888_v46  ;;  %v2051_v7 = vadd.f32 %v8159_v62, %v1889_v25  ;;  %v10652_v18 = vld [vmem:[#allocation124_spill] sm:$0xff]  ;;  %v10660_v6 = vld [vmem:[#allocation66_spill] sm:$0xff]  ;;  %v10664_v38 = vld [vmem:[#allocation261_spill] sm:$0xff]  ;;  %v1038_v46 = vpop.permute.xlu0 %1037  ;;  %3882 = vperm.xlu2 %4162, %v3876_v22  }
 0x54f   : > { %v2917_v45 = vsel %vm2909_vm15, %v7613_v2, %v7823_v52  ;;  %v2933_v19 = vsel %vm2909_vm15, %v7823_v52, %v7613_v2  ;;  %v8346_v43 = vadd.f32 %v3048_v31, %v2821_v60  ;;  %v8348_v37 = vadd.f32 %v3049_v3, %v2822_v21  ;;  %v10656_v52 = vld [vmem:[#allocation135_spill] sm:$0xff]  ;;  %v10663_v63 = vld [vmem:[#allocation302_spill] sm:$0xff]  ;;  %v10665_v31 = vld [vmem:[#allocation233_spill] sm:$0xff] }
 0x550   : > { %v8352_v42 = vmul.f32 %v10651_v30, %v10650_v39  ;;  %v8356_v62 = vmul.f32 %v10651_v30, %v10652_v18  ;;  %v2309_v17 = vadd.f32 %v2277_v47, %v2050_v59  ;;  %v2310_v33 = vadd.f32 %v2278_v54, %v2051_v7  ;;  %v10667_v8 = vld [vmem:[#allocation13_spill] sm:$0xff]  ;;  %v10668_v23 = vld [vmem:[#allocation311_spill] sm:$0xff]  ;;  %v10669_v47 = vld [vmem:[#allocation212_spill] sm:$0xff] }
 0x551   : > { %v8360_v0 = vmul.f32 %v10654_v55, %v10653_v28  ;;  %v8364_v2 = vmul.f32 %v10654_v55, %v10655_v1  ;;  %v8368_v16 = vmul.f32 %v10657_v40, %v10656_v52  ;;  %v8372_v10 = vmul.f32 %v10657_v40, %v10658_v34  ;;  %v3107_v25 = vpop.permute.xlu2 %3106  ;;  %v10670_v59 = vld [vmem:[#allocation315_spill] sm:$0xff]  ;;  %v10673_v30 = vld [vmem:[#allocation132_spill] sm:$0xff]  ;;  %v10674_v28 = vld [vmem:[#allocation69_spill] sm:$0xff] }
 0x552   : > { %v2958_v56 = vmul.f32 %v7747_v20, %v2917_v45  ;;  %v2959_v29 = vmul.f32 %v7752_v35, %v2933_v19  ;;  %v2568_v51 = vadd.f32 %v10659_v50, %v2309_v17  ;;  %v2569_v9 = vadd.f32 %v10660_v6, %v2310_v33  ;;  %v3137_v17 = vpop.permute.xlu1 %3136  ;;  %v10675_v55 = vld [vmem:[#allocation133_spill] sm:$0xff]  ;;  %v10676_v34 = vld [vmem:[#allocation7_spill] sm:$0xff] }
 0x553   : > { %v8386_v57 = vmul.f32 %v10662_v12, %v10661_v24  ;;  %v8390_v26 = vmul.f32 %v10662_v12, %v10663_v63  ;;  %v2143_v3 = vsel %vm2132_vm14, %v10665_v31, %v10664_v38  ;;  %v8403_v54 = vmul.f32 %v10669_v47, %v10668_v23 }
 0x554   : > { %4163 = vset.pattern.permute.xlu1 %v10350_v15  ;;  %v3054_v36 = vmul.f32 %v8249_v61, %v2958_v56  ;;  %v3055_v11 = vmul.f32 %v8249_v61, %v2959_v29  ;;  %v2827_v60 = vadd.f32 %v10666_v44, %v2568_v51  ;;  %v2828_v21 = vadd.f32 %v10667_v8, %v2569_v9  ;;  %v3878_v56 = vld [vmem:[%s9443_s8 + $0x10] sm:$0xff]  ;;  %v10678_v9 = vld [vmem:[#allocation35_spill] sm:$0xff] }
 0x555   : > { %3146 = vperm.xlu1 %4163, %v840_v49   ;;  %v8407_v7 = vmul.f32 %v10669_v47, %v10670_v59  ;;  %v8409_v15 = vadd.f32 %v3107_v25, %v3072_v48  ;;  %v8411_v45 = vadd.f32 %v3107_v25, %v3073_v41  ;;  %v2159_v61 = vsel %vm2132_vm14, %v10664_v38, %v10665_v31  ;;  %v10681_v25 = vld [vmem:[#allocation121_spill] sm:$0xff]  ;;  %v10682_v44 = vld [vmem:[#allocation264_spill] sm:$0xff] }
 0x556   : > { %v3086_v19 = vadd.f32 %v3054_v36, %v2827_v60  ;;  %v3087_v39 = vadd.f32 %v3055_v11, %v2828_v21  ;;  %v1085_v18 = vmul.f32 %v1038_v46, %v10673_v30  ;;  %v2187_v33 = vmul.f32 %v7035_v53, %v2143_v3  ;;  %v10683_v60 = vld [vmem:[#allocation236_spill] sm:$0xff]  ;;  %v3879_v59 = vld [vmem:[%s9443_s8 + $0x18] sm:$0xff] }
 0x557   : > { %10671 = vst [vmem:[#allocation148_spill] sm:$0xff] %v8409_v15  ;;  %v2915_v48 = vsel %vm2909_vm15, %v10675_v55, %v10674_v28  ;;  %v3232_v41 = vmul.f32 0.70710677, %v8409_v15  ;;  %v3233_v1 = vmul.f32 0.70710677, %v8411_v45  ;;  %v1086_v49 = vmul.f32 %v1038_v46, %v10676_v34  ;;  %3897 = vperm.xlu2 %4162, %v3879_v59   ;;  %v10687_v34 = vld [vmem:[#allocation97_spill] sm:$0xff] }
 0x558   : > { %10672 = vst [vmem:[#allocation146_spill] sm:$0xff] %v8411_v45  ;;  %v8425_v52 = vadd.f32 %v3142_v32, %v3086_v19  ;;  %v8427_v40 = vadd.f32 %v3142_v32, %v3087_v39  ;;  %v2931_v51 = vsel %vm2909_vm15, %v10674_v28, %v10675_v55  ;;  %v1376_v22 = vadd.f32 %v10678_v9, %v1085_v18  ;;  %v10684_v39 = vld [vmem:[#allocation123_spill] sm:$0xff]  ;;  %v10685_v18 = vld [vmem:[#allocation104_spill] sm:$0xff] }
 0x559   : > { %vm3248_vm0 = vcmp.ge.f32.partialorder %v3232_v41, 0.0  ;;  %vm3249_vm1 = vcmp.ge.f32.partialorder %v3233_v1, 0.0  ;;  %v8433_v29 = vand.u32 2147483647, %v3232_v41  ;;  %v8435_v50 = vand.u32 2147483647, %v3233_v1 }
 0x55a   : > { %v8442_v32 = vmul.f32 0.70710677, %v8425_v52  ;;  %v8445_v6 = vmul.f32 0.70710677, %v8427_v40  ;;  %v2188_v24 = vmul.f32 %v7038_v5, %v2159_v61  ;;  %v9776_v12 = vmov -1.0   ;;  %v10711_v45 = vld [vmem:[#allocation284_spill] sm:$0xff] }
 0x55b   : > { %10677 = vst [vmem:[#allocation239_spill] sm:$0xff] %v8435_v50  ;;  %v8450_v63 = vsel %vm3248_vm0, 1.0, %v9776_v12  ;;  %v8453_v38 = vsel %vm3249_vm1, 1.0, %v9776_v12  ;;  %v3296_v31 = vmul.f32 0.3275911, %v8433_v29  ;;  %v1377_v36 = vadd.f32 %v10681_v25, %v1086_v49  ;;  %v3132_v25 = vpop.permute.xlu1 %3131 }
 0x55c   : > { %10679 = vst [vmem:[#allocation217_spill] sm:$0xff] %v8450_v63  ;;  %v3294_v3 = vand.u32 2147483647, %v8442_v32  ;;  %v3295_v46 = vand.u32 2147483647, %v8445_v6  ;;  %v2146_v8 = vsel %vm2132_vm14, %v10683_v60, %v10682_v44  ;;  %v2162_v21 = vsel %vm2132_vm14, %v10682_v44, %v10683_v60  ;;  %v10693_v60 = vld [vmem:[#allocation126_spill] sm:$0xff] }
 0x55d   : > { %10680 = vst [vmem:[#allocation196_spill] sm:$0xff] %v8453_v38  ;;  %v3297_v11 = vmul.f32 0.3275911, %v8435_v50  ;;  %3892 = vperm.xlu1 %4163, %v3878_v56   ;;  %v2954_v23 = vmul.f32 %v7747_v20, %v2915_v48  ;;  %v2955_v47 = vmul.f32 %v7752_v35, %v2931_v51  ;;  %v1635_v30 = vadd.f32 %v10684_v39, %v1376_v22  ;;  %v10688_v20 = vld [vmem:[#allocation263_spill] sm:$0xff]  ;;  %v8487_v22 = vpop.permute.xlu0 %1052 }
 0x55e   : > { %v3310_v61 = vmul.f32 0.3275911, %v3294_v3  ;;  %v3726_v19 = vsub.f32 0.0, %v3294_v3  ;;  %v3196_v28 = vadd.f32 %v3137_v17, %v10685_v18  ;;  %v3311_v55 = vmul.f32 0.3275911, %v3295_v46  ;;  %v10691_v56 = vld [vmem:[#allocation127_spill] sm:$0xff] }
 0x55f   : > { %v3727_v41 = vsub.f32 0.0, %v3295_v46  ;;  %v8475_v1 = vadd.f32 1.0, %v3296_v31  ;;  %v3197_v49 = vadd.f32 %v3137_v17, %v10687_v34  ;;  %v8479_v48 = vmul.f32 %v10688_v20, %v2187_v33 }
 0x560   : > { %v8482_v35 = vmul.f32 %v10688_v20, %v2188_v24  ;;  %v1636_v51 = vadd.f32 %v10691_v56, %v1377_v36  ;;  %v8485_v9 = vadd.f32 1.0, %v3297_v11  ;;  %v2193_v44 = vmul.f32 %v7035_v53, %v2146_v8  ;;  %v10694_v53 = vld [vmem:[#allocation266_spill] sm:$0xff] }
 0x561   : > { %10686 = vst [vmem:[#allocation205_spill] sm:$0xff] %v8475_v1  ;;  %v2194_v31 = vmul.f32 %v7038_v5, %v2162_v21  ;;  %v3050_v59 = vmul.f32 %v10693_v60, %v2954_v23  ;;  %v8492_v17 = vadd.f32 1.0, %v3310_v61  ;;  %v3051_v33 = vmul.f32 %v10693_v60, %v2955_v47  ;;  %v10696_v61 = vld [vmem:[#allocation98_spill] sm:$0xff] }
 0x562   : > { %10689 = vst [vmem:[#allocation290_spill] sm:$0xff] %v8479_v48  ;;  %v3742_v39 = vmul.f32 %v3726_v19, %v3294_v3  ;;  %v1894_v24 = vadd.f32 %v8360_v0, %v1635_v30  ;;  %v3244_v18 = vmul.f32 0.70710677, %v3196_v28  ;;  %v8496_v36 = vadd.f32 1.0, %v3311_v55  ;;  %v10695_v3 = vld [vmem:[#allocation96_spill] sm:$0xff] }
 0x563   : > { %10690 = vst [vmem:[#allocation269_spill] sm:$0xff] %v8482_v35  ;;  %v3743_v11 = vmul.f32 %v3727_v41, %v3295_v46  ;;  %4172 = vrcp.f32 %v8475_v1  ;;  %v8499_v34 = vmul.f32 0.70710677, %v3197_v49  ;;  %v8502_v8 = vmul.f32 %v10694_v53, %v2193_v44 }
 0x564   : > { %10692 = vst [vmem:[#allocation267_spill] sm:$0xff] %v8485_v9  ;;  %v8505_v5 = vmul.f32 %v10694_v53, %v2194_v31  ;;  %v1895_v21 = vadd.f32 %v8364_v2, %v1636_v51  ;;  %4174 = vrcp.f32 %v8485_v9  ;;  %vm3262_vm2 = vcmp.ge.f32.partialorder %v8442_v32, 0.0 }
 0x565   : > { %4176 = vrcp.f32 %v8492_v17  ;;  %v3292_v0 = vand.u32 2147483647, %v3244_v18  ;;  %v3082_v46 = vadd.f32 %v3050_v59, %v10695_v3  ;;  %vm3263_vm3 = vcmp.ge.f32.partialorder %v8445_v6, 0.0  ;;  %v8545_v59 = vpop.permute.xlu1 %3126 }
 0x566   : > { %v3772_v23 = vmul.f32 1.442695, %v3742_v39  ;;  %v3712_v47 = vsub.f32 0.0, %v8433_v29  ;;  %v3083_v19 = vadd.f32 %v3051_v33, %v10696_v61  ;;  %4178 = vrcp.f32 %v8496_v36 }
 0x567   : > { %v3774_v30 = vmul.f32 1.442695, %v3743_v11  ;;  %v8517_v2 = vadd.f32 %v8386_v57, %v1894_v24  ;;  %v3293_v32 = vand.u32 2147483647, %v8499_v34  ;;  %v8521_v55 = vmul.f32 0.5, %v8425_v52 }
 0x568   : > { %v8524_v41 = vmul.f32 0.5, %v8427_v40  ;;  %v8527_v6 = vsel %vm3262_vm2, 1.0, %v9776_v12  ;;  %v8530_v20 = vadd.f32 %v8390_v26, %v1895_v21  ;;  %v8535_v51 = vsel %vm3263_vm3, 1.0, %v9776_v12  ;;  %v3117_v26 = vpop.permute.xlu0 %3116 }
 0x569   : > { %10697 = vst [vmem:[#allocation167_spill] sm:$0xff] %v8517_v2  ;;  %v8532_v56 = vpop.eup %4172  ;;  %vm3260_vm4 = vcmp.ge.f32.partialorder %v3244_v18, 0.0  ;;  %v3724_v44 = vsub.f32 0.0, %v3292_v0  ;;  %4180 = vpow2.f32 %v3772_v23  ;;  %v8541_v40 = vmul.f32 %v3712_v47, %v8433_v29  ;;  %v10706_v18 = vld [vmem:[#allocation61_spill] sm:$0xff] }
 0x56a   : > { %10698 = vst [vmem:[#allocation166_spill] sm:$0xff] %v8521_v55  ;;  %v8538_v52 = vpop.eup %4174  ;;  %v8543_v31 = vmul.f32 0.5, %v3196_v28  ;;  %v3308_v60 = vmul.f32 0.3275911, %v3292_v0  ;;  %4182 = vpow2.f32 %v3774_v30  ;;  %v8549_v39 = vmul.f32 0.5, %v3197_v49 }
 0x56b   : > { %10699 = vst [vmem:[#allocation151_spill] sm:$0xff] %v8524_v41  ;;  %v8547_v33 = vpop.eup %4176  ;;  %v3725_v24 = vsub.f32 0.0, %v3293_v32  ;;  %v1091_v11 = vmul.f32 %v8487_v22, %v10706_v18  ;;  %vm3261_vm5 = vcmp.ge.f32.partialorder %v8499_v34, 0.0  ;;  %v8555_v29 = vsel %vm3260_vm4, 1.0, %v9776_v12 }
 0x56c   : > { %10700 = vst [vmem:[#allocation291_spill] sm:$0xff] %v8530_v20  ;;  %v3309_v28 = vmul.f32 0.3275911, %v3293_v32  ;;  %v3194_v53 = vadd.f32 %v3132_v25, %v3082_v46  ;;  %v8557_v21 = vpop.eup %4178  ;;  %v8561_v3 = vmul.f32 %v8532_v56, %v8475_v1  ;;  %v3740_v23 = vmul.f32 %v3724_v44, %v3292_v0  ;;  %v10710_v46 = vld [vmem:[#allocation285_spill] sm:$0xff] }
 0x56d   : > { %10701 = vst [vmem:[#allocation170_spill] sm:$0xff] %v8532_v56  ;;  %v3195_v49 = vadd.f32 %v3132_v25, %v3083_v19  ;;  %v3188_v47 = vadd.f32 %v3117_v26, %v8200_v4  ;;  %v8566_v61 = vmul.f32 %v8547_v33, %v8492_v17  ;;  %v8570_v30 = vmul.f32 %v8538_v52, %v8485_v9 }
 0x56e   : > { %10702 = vst [vmem:[#allocation169_spill] sm:$0xff] %v8538_v52  ;;  %v8572_v18 = vadd.f32 1.0, %v3308_v60  ;;  %v1092_v57 = vmul.f32 %v8487_v22, %v10710_v46  ;;  %v3741_v12 = vmul.f32 %v3725_v24, %v3293_v32  ;;  %v1382_v38 = vadd.f32 %v10711_v45, %v1091_v11  ;;  %v3122_v52 = vpop.permute.xlu1 %3121 }
 0x56f   : > { %10703 = vst [vmem:[#allocation192_spill] sm:$0xff] %v8541_v40  ;;  %v8577_v0 = vmul.f32 0.70710677, %v3194_v53  ;;  %v8579_v25 = vmul.f32 0.70710677, %v3195_v49  ;;  %v8581_v4 = vpop.eup %4180  ;;  %v8585_v19 = vmul.f32 %v8557_v21, %v8496_v36  ;;  %v8587_v44 = vadd.f32 1.0, %v3309_v28 }
 0x570   : > { %10704 = vst [vmem:[#allocation153_spill] sm:$0xff] %v8543_v31  ;;  %v3189_v60 = vadd.f32 %v3117_v26, %v8203_v58  ;;  %v3236_v15 = vmul.f32 0.70710677, %v3188_v47  ;;  %v8590_v63 = vpop.eup %4182  ;;  %v10712_v45 = vmov -1.0   ;;  %v3768_v24 = vmul.f32 1.442695, %v3740_v23 }
 0x571   : > { %10705 = vst [vmem:[#allocation238_spill] sm:$0xff] %v8549_v39  ;;  %v8596_v32 = vsel %vm3261_vm5, 1.0, %v10712_v45  ;;  %v3290_v11 = vand.u32 2147483647, %v8577_v0  ;;  %4184 = vrcp.f32 %v8572_v18  ;;  %v10714_v58 = vld [vmem:[#allocation25_spill] sm:$0xff]  ;;  %v1641_v40 = vadd.f32 %v8352_v42, %v1382_v38 }
 0x572   : > { %10707 = vst [vmem:[#allocation237_spill] sm:$0xff] %v8555_v29  ;;  %v1383_v26 = vadd.f32 %v10714_v58, %v1092_v57  ;;  %v3770_v50 = vmul.f32 1.442695, %v3741_v12  ;;  %v3291_v22 = vand.u32 2147483647, %v8579_v25  ;;  %4186 = vrcp.f32 %v8587_v44 }
 0x573   : > { %10708 = vst [vmem:[#allocation200_spill] sm:$0xff] %v8561_v3  ;;  %v3306_v9 = vmul.f32 0.3275911, %v3290_v11  ;;  %v3237_v23 = vmul.f32 0.70710677, %v3189_v60  ;;  %vm3252_vm6 = vcmp.ge.f32.partialorder %v3236_v15, 0.0  ;;  %4188 = vpow2.f32 %v3768_v24 }
 0x574   : > { %10709 = vst [vmem:[#allocation308_spill] sm:$0xff] %v8570_v30  ;;  %v3307_v46 = vmul.f32 0.3275911, %v3291_v22  ;;  %v3722_v28 = vsub.f32 0.0, %v3290_v11  ;;  %v3284_v30 = vand.u32 2147483647, %v3236_v15  ;;  %v1642_v1 = vadd.f32 %v8356_v62, %v1383_v26 }
 0x575   : > { %10713 = vst [vmem:[#allocation280_spill] sm:$0xff] %v8596_v32  ;;  %vm3253_vm7 = vcmp.ge.f32.partialorder %v3237_v23, 0.0  ;;  %v8609_v12 = vsel %vm3252_vm6, 1.0, %v10712_v45  ;;  %v3285_v42 = vand.u32 2147483647, %v3237_v23  ;;  %4190 = vpow2.f32 %v3770_v50 }
 0x576   : > { %10715 = vst [vmem:[#allocation271_spill] sm:$0xff] %v8609_v12  ;;  %v1900_v38 = vadd.f32 %v8368_v16, %v1641_v40  ;;  %v8612_v57 = vadd.f32 1.0, %v3306_v9  ;;  %v3723_v58 = vsub.f32 0.0, %v3291_v22  ;;  %v8616_v56 = vmul.f32 0.5, %v3194_v53 }
 0x577   : > { %v8614_v34 = vpop.eup %4184  ;;  %v8618_v24 = vmul.f32 0.5, %v3195_v49  ;;  %v8620_v15 = vadd.f32 1.0, %v3307_v46  ;;  %v8623_v62 = vsel %vm3253_vm7, 1.0, %v10712_v45  ;;  %v3738_v26 = vmul.f32 %v3722_v28, %v3290_v11 }
 0x578   : > { %10716 = vst [vmem:[#allocation202_spill] sm:$0xff] %v8616_v56  ;;  %v8625_v12 = vmul.f32 0.5, %v3188_v47  ;;  %v3716_v50 = vsub.f32 0.0, %v3284_v30  ;;  %v3192_v16 = vadd.f32 %v8545_v59, %v8346_v43  ;;  %v8629_v9 = vpop.eup %4186  ;;  %v1901_v40 = vadd.f32 %v8372_v10, %v1642_v1  ;;  %v8643_v1 = vpop.permute.xlu0 %2873 }
 0x579   : > { %10717 = vst [vmem:[#allocation6_spill] sm:$0xff] %v8618_v24  ;;  %v3300_v53 = vmul.f32 0.3275911, %v3284_v30  ;;  %v3717_v23 = vsub.f32 0.0, %v3285_v42  ;;  %v3193_v49 = vadd.f32 %v8545_v59, %v8348_v37  ;;  %v8634_v46 = vpop.eup %4188  ;;  %4192 = vrcp.f32 %v8612_v57 }
 0x57a   : > { %10718 = vst [vmem:[#allocation154_spill] sm:$0xff] %v8623_v62  ;;  %v8637_v62 = vadd.f32 %v8403_v54, %v1900_v38  ;;  %v3739_v47 = vmul.f32 %v3723_v58, %v3291_v22  ;;  %v3240_v11 = vmul.f32 0.70710677, %v3192_v16  ;;  %4194 = vrcp.f32 %v8620_v15  ;;  %v3112_v58 = vpop.permute.xlu1 %3111 }
 0x57b   : > { %10719 = vst [vmem:[#allocation257_spill] sm:$0xff] %v8625_v12  ;;  %v8641_v43 = vmul.f32 0.5, %v3189_v60  ;;  %v3301_v28 = vmul.f32 0.3275911, %v3285_v42  ;;  %v3241_v10 = vmul.f32 0.70710677, %v3193_v49  ;;  %v8645_v12 = vpop.eup %4190  ;;  %v3732_v59 = vmul.f32 %v3716_v50, %v3284_v30 }
 0x57c   : > { %10721 = vst [vmem:[#allocation240_spill] sm:$0xff] %v8645_v12  ;;  %vm3258_vm8 = vcmp.ge.f32.partialorder %v8577_v0, 0.0  ;;  %v3764_v37 = vmul.f32 1.442695, %v3738_v26  ;;  %v8648_v54 = vand.u32 2147483647, %v3240_v11  ;;  %v8652_v22 = vmul.f32 %v8614_v34, %v8572_v18 }
 0x57d   : > { %10720 = vst [vmem:[#allocation241_spill] sm:$0xff] %v8641_v43  ;;  %vm3259_vm9 = vcmp.ge.f32.partialorder %v8579_v25, 0.0  ;;  %v8655_v60 = vadd.f32 1.0, %v3300_v53  ;;  %v3733_v38 = vmul.f32 %v3717_v23, %v3285_v42  ;;  %v8659_v43 = vmul.f32 %v8629_v9, %v8587_v44  ;;  %v10725_v53 = vld [vmem:[#allocation122_spill] sm:$0xff] }
 0x57e   : > { %v8662_v0 = vadd.f32 %v8407_v7, %v1901_v40  ;;  %v3766_v30 = vmul.f32 1.442695, %v3739_v47  ;;  %v3289_v26 = vand.u32 2147483647, %v3241_v10  ;;  %v8665_v50 = vsel %vm3258_vm8, 1.0, %v10712_v45  ;;  %v10727_v7 = vld [vmem:[#allocation143_spill] sm:$0xff] }
 0x57f   : > { %10722 = vst [vmem:[#allocation338_spill] sm:$0xff] %v8655_v60  ;;  %v8667_v3 = vadd.f32 1.0, %v3301_v28  ;;  %v3304_v25 = vmul.f32 0.3275911, %v8648_v54  ;;  %v3190_v35 = vadd.f32 %v3122_v52, %v10725_v53  ;;  %v8671_v42 = vpop.eup %4192  ;;  %v8674_v23 = vsel %vm3259_vm9, 1.0, %v10712_v45 }
 0x580   : > { %10723 = vst [vmem:[#allocation335_spill] sm:$0xff] %v8665_v50  ;;  %4196 = vpow2.f32 %v3764_v37  ;;  %v3752_v20 = vmul.f32 1.442695, %v3732_v59  ;;  %v8677_v40 = vadd.f32 %v3122_v52, %v10727_v7  ;;  %v8679_v47 = vpop.eup %4194  ;;  %v3754_v28 = vmul.f32 1.442695, %v3733_v38  ;;  %v8709_v7 = vpop.permute.xlu0 %2871 }
 0x581   : > { %10724 = vst [vmem:[#allocation283_spill] sm:$0xff] %v8667_v3  ;;  %4198 = vrcp.f32 %v8655_v60  ;;  %v3305_v48 = vmul.f32 0.3275911, %v3289_v26  ;;  %vm3256_vm10 = vcmp.ge.f32.partialorder %v3240_v11, 0.0  ;;  %v8684_v2 = vmul.f32 0.70710677, %v3190_v35 }
 0x582   : > { %10726 = vst [vmem:[#allocation274_spill] sm:$0xff] %v8674_v23  ;;  %4200 = vpow2.f32 %v3766_v30  ;;  %vm3257_vm11 = vcmp.ge.f32.partialorder %v3241_v10, 0.0  ;;  %v8687_v37 = vadd.f32 1.0, %v3304_v25  ;;  %v8690_v52 = vmul.f32 0.70710677, %v8677_v40 }
 0x583   : > { %4202 = vrcp.f32 %v8667_v3  ;;  %v8694_v59 = vmul.f32 %v8671_v42, %v8612_v57  ;;  %v8698_v38 = vmul.f32 %v8679_v47, %v8620_v15  ;;  %v8700_v11 = vmul.f32 0.5, %v3192_v16 }
 0x584   : > { %10728 = vst [vmem:[#allocation331_spill] sm:$0xff] %v8687_v37  ;;  %4204 = vpow2.f32 %v3752_v20  ;;  %v8702_v30 = vmul.f32 0.5, %v3193_v49  ;;  %v8705_v10 = vsel %vm3256_vm10, 1.0, %v10712_v45  ;;  %v8707_v25 = vadd.f32 1.0, %v3305_v48 }
 0x585   : > { %10729 = vst [vmem:[#allocation208_spill] sm:$0xff] %v8700_v11  ;;  %4206 = vpow2.f32 %v3754_v28  ;;  %v8714_v24 = vsel %vm3257_vm11, 1.0, %v10712_v45  ;;  %v3720_v23 = vsub.f32 0.0, %v8648_v54  ;;  %v3286_v20 = vand.u32 2147483647, %v8684_v2  ;;  %v2908_v28 = vpop.permute.xlu2 %2907 }
 0x586   : > { %10730 = vst [vmem:[#allocation332_spill] sm:$0xff] %v8702_v30  ;;  %v8711_v53 = vpop.eup %4196  ;;  %v3287_v16 = vand.u32 2147483647, %v8690_v52  ;;  %4208 = vrcp.f32 %v8687_v37  ;;  %v3721_v48 = vsub.f32 0.0, %v3289_v26  ;;  %v8723_v30 = vadd.f32 %v3112_v58, %v8313_v27 }
 0x587   : > { %10731 = vst [vmem:[#allocation273_spill] sm:$0xff] %v8705_v10  ;;  %v8719_v49 = vpop.eup %4198  ;;  %v8726_v11 = vadd.f32 %v3112_v58, %v8315_v13  ;;  %v2876_v10 = vpop.permute.xlu1 %2875  ;;  %4210 = vrcp.f32 %v8707_v25  ;;  %v3718_v32 = vsub.f32 0.0, %v3286_v20  ;;  %v3736_v58 = vmul.f32 %v3720_v23, %v8648_v54 }
 0x588   : > { %10732 = vst [vmem:[#allocation297_spill] sm:$0xff] %v8711_v53  ;;  %v3302_v53 = vmul.f32 0.3275911, %v3286_v20  ;;  %v3303_v39 = vmul.f32 0.3275911, %v3287_v16  ;;  %v3719_v41 = vsub.f32 0.0, %v3287_v16  ;;  %v8740_v13 = vmul.f32 %v8719_v49, %v8655_v60 }
 0x589   : > { %10733 = vst [vmem:[#allocation72_spill] sm:$0xff] %v8714_v24  ;;  %v8728_v24 = vpop.eup %4200  ;;  %v3234_v27 = vmul.f32 0.70710677, %v8723_v30  ;;  %v8743_v56 = vmul.f32 0.5, %v3190_v35  ;;  %v3737_v12 = vmul.f32 %v3721_v48, %v3289_v26  ;;  %v3235_v55 = vmul.f32 0.70710677, %v8726_v11 }
 0x58a   : > { %10734 = vst [vmem:[#allocation156_spill] sm:$0xff] %v8719_v49  ;;  %v8732_v31 = vpop.eup %4202  ;;  %v8745_v50 = vadd.f32 1.0, %v3302_v53  ;;  %v8756_v60 = vadd.f32 1.0, %v3303_v39  ;;  %v2941_v54 = vsel %vm2909_vm15, %v2908_v28, %v2876_v10  ;;  %v3734_v26 = vmul.f32 %v3718_v32, %v3286_v20  ;;  %v8772_v39 = vld [vmem:[%s9444_s9 + $0x10] ss:$0 sm:$0xff] }
 0x58b   : > { %10735 = vst [vmem:[#allocation157_spill] sm:$0xff] %v8723_v30  ;;  %v8736_v29 = vpop.eup %4204  ;;  %vm3250_vm12 = vcmp.ge.f32.partialorder %v3234_v27, 0.0  ;;  %v2925_v30 = vsel %vm2909_vm15, %v2876_v10, %v2908_v28  ;;  %v3735_v53 = vmul.f32 %v3719_v41, %v3287_v16  ;;  %vm3251_vm13 = vcmp.ge.f32.partialorder %v3235_v55, 0.0  ;;  %v8781_v28 = vpop.permute.xlu0 %2869 }
 0x58c   : > { %10736 = vst [vmem:[#allocation28_spill] sm:$0xff] %v8726_v11  ;;  %v8759_v35 = vsel %vm3250_vm12, 1.0, %v10712_v45  ;;  %v3282_v48 = vand.u32 2147483647, %v3234_v27  ;;  %4212 = vrcp.f32 %v8745_v50  ;;  %v8767_v11 = vsel %vm3251_vm13, 1.0, %v10712_v45 }
 0x58d   : > { %10737 = vst [vmem:[#allocation51_spill] sm:$0xff] %v8728_v24  ;;  %v8747_v24 = vpop.eup %4206  ;;  %v3760_v41 = vmul.f32 1.442695, %v3736_v58  ;;  %v8779_v20 = vmul.f32 0.5, %v8677_v40  ;;  %v3762_v27 = vmul.f32 1.442695, %v3737_v12  ;;  %4214 = vrcp.f32 %v8756_v60 }
 0x58e   : > { %10738 = vst [vmem:[#allocation55_spill] sm:$0xff] %v8732_v31  ;;  %v8763_v23 = vpop.eup %4208  ;;  %v3714_v16 = vsub.f32 0.0, %v3282_v48  ;;  %vm3254_vm14 = vcmp.ge.f32.partialorder %v8684_v2, 0.0  ;;  %vm3255_vm0 = vcmp.ge.f32.partialorder %v8690_v52, 0.0  ;;  %v3756_v32 = vmul.f32 1.442695, %v3734_v26 }
 0x58f   : > { %10739 = vst [vmem:[#allocation160_spill] sm:$0xff] %v8736_v29  ;;  %v8754_v29 = vmul.f32 %v8732_v31, %v8667_v3  ;;  %v8775_v10 = vpop.eup %4210  ;;  %v3298_v58 = vmul.f32 0.3275911, %v3282_v48  ;;  %v8793_v40 = vld [vmem:[%s9444_s9 + $0x18] ss:$0 sm:$0xff]  ;;  %4216 = vpow2.f32 %v3760_v41  ;;  %v8802_v26 = vsel %vm3254_vm14, 1.0, %v10712_v45 }
 0x590   : > { %10740 = vst [vmem:[#allocation44_spill] sm:$0xff] %v8740_v13  ;;  %v8798_v12 = vmul.f32 %v8775_v10, %v8707_v25  ;;  %v3758_v2 = vmul.f32 1.442695, %v3735_v53  ;;  %v3730_v49 = vmul.f32 %v3714_v16, %v3282_v48  ;;  %4218 = vpow2.f32 %v3762_v27 }
 0x591   : > { %10741 = vst [vmem:[#allocation39_spill] sm:$0xff] %v8743_v56  ;;  %4220 = vpow2.f32 %v3756_v32  ;;  %vm3543_vm1 = vweird.f32 %v8492_v17  ;;  %vm3544_vm2 = vweird.f32 %v8547_v33  ;;  %vm3558_vm4 = vweird.f32 %v8496_v36 }
 0x592   : > { %10742 = vst [vmem:[#allocation74_spill] sm:$0xff] %v8747_v24  ;;  %v3283_v24 = vand.u32 2147483647, %v3235_v55  ;;  %v8785_v55 = vmul.f32 %v8763_v23, %v8687_v37  ;;  %v8804_v13 = vpop.eup %4212  ;;  %4222 = vpow2.f32 %v3758_v2  ;;  %v10749_v37 = vld [vmem:[#allocation110_spill] sm:$0xff]  ;;  %v3748_v32 = vmul.f32 1.442695, %v3730_v49  ;;  %vm8874_vm3 = vmor %vm3543_vm1, %vm3544_vm2 }
 0x593   : > { %10743 = vst [vmem:[#allocation59_spill] sm:$0xff] %v8759_v35  ;;  %v2974_v35 = vmul.f32 %v8772_v39, %v2925_v30  ;;  %v3038_v30 = vpop.permute.xlu2 %3037  ;;  %v8817_v48 = vpop.eup %4214  ;;  %vm3559_vm5 = vweird.f32 %v8557_v21  ;;  %vm3514_vm8 = vweird.f32 %v8614_v34  ;;  %vm3513_vm9 = vweird.f32 %v8572_v18 }
 0x594   : > { %10744 = vst [vmem:[#allocation288_spill] sm:$0xff] %v8767_v11  ;;  %v2975_v11 = vmul.f32 %v8793_v40, %v2941_v54  ;;  %v3299_v56 = vmul.f32 0.3275911, %v3283_v24  ;;  %v8810_v54 = vsel %vm3255_vm0, 1.0, %v10712_v45  ;;  %v3715_v53 = vsub.f32 0.0, %v3283_v24  ;;  %vm8895_vm7 = vmor %vm3558_vm4, %vm3559_vm5 }
 0x595   : > { %10745 = vst [vmem:[#allocation163_spill] sm:$0xff] %v8779_v20  ;;  %v2906_v20 = vpop.permute.xlu1 %2905  ;;  %v3070_v3 = vmul.f32 %v3038_v30, %v2974_v35  ;;  %v8812_v35 = vadd.f32 1.0, %v3298_v58  ;;  %v8825_v45 = vmul.f32 %v8804_v13, %v8745_v50  ;;  %v8840_v16 = vpop.eup %4216  ;;  %v8844_v49 = vmul.f32 %v8817_v48, %v8756_v60  ;;  %vm8918_vm11 = vmor %vm3513_vm9, %vm3514_vm8 }
 0x596   : > { %10746 = vst [vmem:[#allocation24_spill] sm:$0xff] %v8802_v26  ;;  %v3071_v31 = vmul.f32 %v3038_v30, %v2975_v11  ;;  %v2924_v41 = vsel %vm2909_vm15, %v8643_v1, %v2906_v20  ;;  %v8820_v27 = vadd.f32 1.0, %v3299_v56  ;;  %v2940_v11 = vsel %vm2909_vm15, %v2906_v20, %v8643_v1  ;;  %v10753_v1 = vld [vmem:[#allocation26_spill] sm:$0xff] }
 0x597   : > { %10747 = vst [vmem:[#allocation57_spill] sm:$0xff] %v8810_v54  ;;  %v3102_v52 = vadd.f32 %v3070_v3, %v10749_v37  ;;  %v2321_v30 = vadd.f32 %v8502_v8, %v8637_v62  ;;  %v8832_v58 = vmul.f32 %v3715_v53, %v3283_v24  ;;  %v2972_v2 = vmul.f32 %v8772_v39, %v2924_v41  ;;  %v10752_v8 = vld [vmem:[#allocation100_spill] sm:$0xff]  ;;  %v3182_v62 = vpop.permute.xlu0 %3181  ;;  %v8849_v53 = vpop.eup %4218  ;;  %v10758_v26 = vld [vmem:[#allocation102_spill] sm:$0xff] }
 0x598   : > { %10748 = vst [vmem:[#allocation32_spill] sm:$0xff] %v8812_v35  ;;  %v2322_v56 = vadd.f32 %v8505_v5, %v8662_v0  ;;  %v10751_v3 = vsub.f32 1.0, %v8566_v61  ;;  %4224 = vrcp.f32 %v8812_v35  ;;  %v3103_v24 = vadd.f32 %v3071_v31, %v10752_v8  ;;  %v10754_v0 = vld [vmem:[#allocation216_spill] sm:$0xff]  ;;  %v10756_v31 = vld [vmem:[#allocation91_spill] sm:$0xff] }
 0x599   : > { %10750 = vst [vmem:[#allocation176_spill] sm:$0xff] %v8832_v58  ;;  %v2580_v20 = vadd.f32 %v10753_v1, %v2321_v30  ;;  %4226 = vrcp.f32 %v8820_v27  ;;  %v8852_v5 = vadd.f32 %v3182_v62, %v3102_v52  ;;  %v2973_v61 = vmul.f32 %v8793_v40, %v2940_v11 }
 0x59a   : > { %v3541_v37 = vmul.f32 %v8547_v33, %v10751_v3  ;;  %v2581_v41 = vadd.f32 %v10754_v0, %v2322_v56  ;;  %v8856_v3 = vpop.eup %4220  ;;  %4228 = vpow2.f32 %v3748_v32  ;;  %v3547_v11 = vand.u32 2147483647, %v8492_v17 }
 0x59b   : > { %10755 = vst [vmem:[#allocation175_spill] sm:$0xff] %v8856_v3  ;;  %v8860_v8 = vadd.f32 %v10756_v31, %v2580_v20  ;;  %v8863_v1 = vpop.eup %4222  ;;  %v3034_v56 = vpop.permute.xlu2 %3033  ;;  %v8872_v0 = vadd.f32 %v3182_v62, %v3103_v24  ;;  %vm3529_vm12 = vweird.f32 %v8629_v9  ;;  %vm3528_vm13 = vweird.f32 %v8587_v44 }
 0x59c   : > { %v3542_v30 = vadd.f32 %v8547_v33, %v3541_v37  ;;  %10757 = vst [vmem:[#allocation177_spill] sm:$0xff] %v8863_v1  ;;  %v8866_v52 = vadd.f32 %v10758_v26, %v2581_v41  ;;  %v3549_v37 = vand.u32 2147483648, %v8492_v17  ;;  %v10761_v26 = vsub.f32 1.0, %v8585_v19  ;;  %vm8937_vm0 = vmor %vm3528_vm13, %vm3529_vm12 }
 0x59d   : > { %v2904_v54 = vpop.permute.xlu1 %2903  ;;  %v3068_v31 = vmul.f32 %v3034_v56, %v2972_v2  ;;  %v3069_v58 = vmul.f32 %v3034_v56, %v2973_v61  ;;  %vm3548_vm6 = vcmp.eq.f32.partialorder %v3547_v11, 8.507059e+37  ;;  %v3562_v2 = vand.u32 2147483647, %v8496_v36 }
 0x59e   : > { %v3556_v41 = vmul.f32 %v8557_v21, %v10761_v26  ;;  %v2923_v1 = vsel %vm2909_vm15, %v8709_v7, %v2904_v54  ;;  %v3546_v24 = vsel %vm8874_vm3, %v8547_v33, %v3542_v30  ;;  %v8888_v62 = vpop.eup %4224  ;;  %v3550_v32 = vor.u32 1.1754944e-38, %v3549_v37 }
 0x59f   : > { %v8893_v17 = vpop.eup %4226  ;;  %v3564_v33 = vand.u32 2147483648, %v8496_v36  ;;  %v10764_v61 = vsub.f32 1.0, %v8652_v22  ;;  %v2939_v20 = vsel %vm2909_vm15, %v2904_v54, %v8709_v7  ;;  %vm3563_vm10 = vcmp.eq.f32.partialorder %v3562_v2, 8.507059e+37 }
 0x5a0   : > { %v3557_v3 = vadd.f32 %v8557_v21, %v3556_v41  ;;  %v8904_v56 = vpop.eup %4228  ;;  %v8909_v37 = vsel %vm3548_vm6, %v3550_v32, %v3546_v24  ;;  %v3517_v7 = vand.u32 2147483647, %v8572_v18  ;;  %v3519_v54 = vand.u32 2147483648, %v8572_v18 }
 0x5a1   : > { %v3511_v30 = vmul.f32 %v8614_v34, %v10764_v61  ;;  %10765 = vst [vmem:[#allocation152_spill] sm:$0xff] %v8904_v56  ;;  %v3582_v36 = vmul.f32 1.0614054, %v8909_v37  ;;  %v3565_v26 = vor.u32 1.1754944e-38, %v3564_v33  ;;  %vm3484_vm2 = vweird.f32 %v8671_v42 }
 0x5a2   : > { %v3561_v11 = vsel %vm8895_vm7, %v8557_v21, %v3557_v3  ;;  %v10768_v21 = vsub.f32 1.0, %v8659_v43  ;;  %v3520_v33 = vor.u32 1.1754944e-38, %v3519_v54  ;;  %vm3518_vm14 = vcmp.eq.f32.partialorder %v3517_v7, 8.507059e+37 }
 0x5a3   : > { %v3512_v22 = vadd.f32 %v8614_v34, %v3511_v30  ;;  %v3598_v32 = vadd.f32 -1.4531521, %v3582_v36  ;;  %v8927_v24 = vsel %vm3563_vm10, %v3565_v26, %v3561_v11  ;;  %v3532_v30 = vand.u32 2147483647, %v8587_v44  ;;  %v3030_v43 = vpop.permute.xlu2 %3029 }
 0x5a4   : > { %v3526_v3 = vmul.f32 %v8629_v9, %v10768_v21  ;;  %v3583_v2 = vmul.f32 1.0614054, %v8927_v24  ;;  %v2970_v7 = vmul.f32 %v8772_v39, %v2923_v1  ;;  %vm3483_vm3 = vweird.f32 %v8612_v57 }
 0x5a5   : > { %v3516_v19 = vsel %vm8918_vm11, %v8614_v34, %v3512_v22  ;;  %v3614_v18 = vmul.f32 %v3598_v32, %v8909_v37  ;;  %v3534_v34 = vand.u32 2147483648, %v8587_v44  ;;  %v10771_v22 = vsub.f32 1.0, %v8694_v59  ;;  %v10772_v32 = vld [vmem:[#allocation111_spill] sm:$0xff]  ;;  %vm8974_vm4 = vmor %vm3483_vm3, %vm3484_vm2 }
 0x5a6   : > { %v3527_v61 = vadd.f32 %v8629_v9, %v3526_v3  ;;  %v3599_v11 = vadd.f32 -1.4531521, %v3583_v2  ;;  %v8943_v36 = vsel %vm3518_vm14, %v3520_v33, %v3516_v19  ;;  %v3100_v56 = vadd.f32 %v3068_v31, %v10772_v32  ;;  %v10773_v2 = vld [vmem:[#allocation116_spill] sm:$0xff] }
 0x5a7   : > { %v3481_v41 = vmul.f32 %v8671_v42, %v10771_v22  ;;  %v3630_v54 = vadd.f32 1.4214138, %v3614_v18  ;;  %v3580_v21 = vmul.f32 1.0614054, %v8943_v36  ;;  %v3535_v3 = vor.u32 1.1754944e-38, %v3534_v34 }
 0x5a8   : > { %v3531_v26 = vsel %vm8937_vm0, %v8629_v9, %v3527_v61  ;;  %v2971_v44 = vmul.f32 %v8793_v40, %v2939_v20  ;;  %v3615_v19 = vmul.f32 %v3599_v11, %v8927_v24  ;;  %vm3533_vm1 = vcmp.eq.f32.partialorder %v3532_v30, 8.507059e+37  ;;  %v3177_v11 = vpop.permute.xlu0 %3176 }
 0x5a9   : > { %v3101_v33 = vadd.f32 %v3069_v58, %v10773_v2  ;;  %v3646_v9 = vmul.f32 %v3630_v54, %v8909_v37  ;;  %v3596_v59 = vadd.f32 -1.4531521, %v3580_v21  ;;  %v8958_v61 = vsel %vm3533_vm1, %v3535_v3, %v3531_v26 }
 0x5aa   : > { %v3631_v1 = vadd.f32 1.4214138, %v3615_v19  ;;  %v3581_v18 = vmul.f32 1.0614054, %v8958_v61  ;;  %v3482_v34 = vadd.f32 %v8671_v42, %v3481_v41  ;;  %v8965_v31 = vmul.f32 %v8888_v62, %v8812_v35 }
 0x5ab   : > { %v3066_v20 = vmul.f32 %v3030_v43, %v2970_v7  ;;  %v3662_v30 = vadd.f32 -0.28449672, %v3646_v9  ;;  %v3612_v58 = vmul.f32 %v3596_v59, %v8943_v36  ;;  %v3487_v54 = vand.u32 2147483647, %v8612_v57 }
 0x5ac   : > { %v3647_v26 = vmul.f32 %v3631_v1, %v8927_v24  ;;  %v3597_v22 = vadd.f32 -1.4531521, %v3581_v18  ;;  %v8971_v21 = vadd.f32 %v3177_v11, %v3100_v56  ;;  %v3489_v7 = vand.u32 2147483648, %v8612_v57 }
 0x5ad   : > { %v3678_v41 = vmul.f32 %v3662_v30, %v8909_v37  ;;  %v3628_v3 = vadd.f32 1.4214138, %v3612_v58  ;;  %v3486_v9 = vsel %vm8974_vm4, %v8671_v42, %v3482_v34  ;;  %v10776_v59 = vsub.f32 1.0, %v8698_v38 }
 0x5ae   : > { %v3663_v19 = vadd.f32 -0.28449672, %v3647_v26  ;;  %v3613_v2 = vmul.f32 %v3597_v22, %v8958_v61  ;;  %v3067_v1 = vmul.f32 %v3030_v43, %v2971_v44  ;;  %v3490_v58 = vor.u32 1.1754944e-38, %v3489_v7 }
 0x5af   : > { %v3496_v56 = vmul.f32 %v8679_v47, %v10776_v59  ;;  %v3694_v18 = vadd.f32 0.2548296, %v3678_v41  ;;  %v3644_v30 = vmul.f32 %v3628_v3, %v8943_v36  ;;  %v8989_v35 = vmul.f32 %v8893_v17, %v8820_v27 }
 0x5b0   : > { %v3679_v57 = vmul.f32 %v3663_v19, %v8927_v24  ;;  %v3629_v26 = vadd.f32 1.4214138, %v3613_v2  ;;  %vm3488_vm5 = vcmp.eq.f32.partialorder %v3487_v54, 8.507059e+37  ;;  %vm3498_vm6 = vweird.f32 %v8620_v15 }
 0x5b1   : > { %v3710_v22 = vmul.f32 %v3694_v18, %v8909_v37  ;;  %v3660_v42 = vadd.f32 -0.28449672, %v3644_v30  ;;  %v8993_v34 = vsel %vm3488_vm5, %v3490_v58, %v3486_v9  ;;  %v3497_v38 = vadd.f32 %v8679_v47, %v3496_v56 }
 0x5b2   : > { %v3695_v44 = vadd.f32 0.2548296, %v3679_v57  ;;  %v3645_v43 = vmul.f32 %v3629_v26, %v8958_v61  ;;  %v3578_v41 = vmul.f32 1.0614054, %v8993_v34  ;;  %vm3499_vm7 = vweird.f32 %v8679_v47 }
 0x5b3   : > { %v3790_v3 = vmul.f32 %v8581_v4, %v3710_v22  ;;  %v3676_v32 = vmul.f32 %v3660_v42, %v8943_v36  ;;  %v3502_v37 = vand.u32 2147483647, %v8620_v15  ;;  %vm9004_vm8 = vmor %vm3498_vm6, %vm3499_vm7  ;;  %v3504_v9 = vand.u32 2147483648, %v8620_v15 }
 0x5b4   : > { %v3711_v54 = vmul.f32 %v3695_v44, %v8927_v24  ;;  %v3661_v7 = vadd.f32 -0.28449672, %v3645_v43  ;;  %v3594_v19 = vadd.f32 -1.4531521, %v3578_v41  ;;  %v9009_v59 = vadd.f32 %v3177_v11, %v3101_v33  ;;  %v2902_v33 = vpop.permute.xlu1 %2901 }
 0x5b5   : > { %v3806_v56 = vsub.f32 1.0, %v3790_v3  ;;  %v3692_v4 = vadd.f32 0.2548296, %v3676_v32  ;;  %v3501_v18 = vsel %vm9004_vm8, %v8679_v47, %v3497_v38  ;;  %v3505_v57 = vor.u32 1.1754944e-38, %v3504_v9  ;;  %v3172_v3 = vpop.permute.xlu0 %3171  ;;  %v10779_v32 = vld [vmem:[#allocation166_spill] sm:$0xff] }
 0x5b6   : > { %v3791_v30 = vmul.f32 %v8590_v63, %v3711_v54  ;;  %v3677_v24 = vmul.f32 %v3661_v7, %v8958_v61  ;;  %v3610_v58 = vmul.f32 %v3594_v19, %v8993_v34  ;;  %v3098_v26 = vadd.f32 %v3066_v20, %v8860_v8  ;;  %v10781_v19 = vld [vmem:[#allocation240_spill] sm:$0xff] }
 0x5b7   : > { %v3822_v22 = vmul.f32 %v3806_v56, %v8527_v6  ;;  %v3708_v15 = vmul.f32 %v3692_v4, %v8943_v36  ;;  %vm3503_vm9 = vcmp.eq.f32.partialorder %v3502_v37, 8.507059e+37  ;;  %v3099_v63 = vadd.f32 %v3067_v1, %v8866_v52  ;;  %v10782_v56 = vld [vmem:[#allocation237_spill] sm:$0xff] }
 0x5b8   : > { %v3807_v11 = vsub.f32 1.0, %v3791_v30  ;;  %v3693_v42 = vadd.f32 0.2548296, %v3677_v24  ;;  %v3626_v44 = vadd.f32 1.4214138, %v3610_v58  ;;  %v9020_v43 = vsel %vm3503_vm9, %v3505_v57, %v3501_v18  ;;  %v10783_v24 = vld [vmem:[#allocation151_spill] sm:$0xff] }
 0x5b9   : > { %v3838_v47 = vadd.f32 1.0, %v3822_v22  ;;  %v3788_v38 = vmul.f32 %v8634_v46, %v3708_v15  ;;  %v3579_v41 = vmul.f32 1.0614054, %v9020_v43  ;;  %v2922_v36 = vsel %vm2909_vm15, %v8781_v28, %v2902_v33 }
 0x5ba   : > { %v3823_v8 = vmul.f32 %v3807_v11, %v8535_v51  ;;  %v3709_v6 = vmul.f32 %v3693_v42, %v8958_v61  ;;  %v3642_v20 = vmul.f32 %v3626_v44, %v8993_v34  ;;  %v10780_v1 = vsub.f32 1.0, %v8785_v55  ;;  %v10784_v44 = vld [vmem:[#allocation280_spill] sm:$0xff] }
 0x5bb   : > { %v3854_v37 = vmul.f32 %v3838_v47, %v10779_v32  ;;  %v3804_v54 = vsub.f32 1.0, %v3788_v38  ;;  %v3595_v52 = vadd.f32 -1.4531521, %v3579_v41  ;;  %v9035_v7 = vadd.f32 %v3172_v3, %v3098_v26  ;;  %v3026_v38 = vpop.permute.xlu2 %3025  ;;  %v10785_v41 = vld [vmem:[#allocation153_spill] sm:$0xff] }
 0x5bc   : > { %v3451_v46 = vmul.f32 %v8763_v23, %v10780_v1  ;;  %v3839_v51 = vadd.f32 1.0, %v3823_v8  ;;  %v3789_v61 = vmul.f32 %v10781_v19, %v3709_v6  ;;  %v3658_v2 = vadd.f32 -0.28449672, %v3642_v20  ;;  %v10790_v19 = vld [vmem:[#allocation297_spill] sm:$0xff] }
 0x5bd   : > { %v3874_v9 = vmul.f32 %v3854_v37, %v8852_v5  ;;  %v3820_v4 = vmul.f32 %v3804_v54, %v10782_v56  ;;  %v2938_v18 = vsel %vm2909_vm15, %v2902_v33, %v8781_v28  ;;  %v3611_v30 = vmul.f32 %v3595_v52, %v9020_v43 }
 0x5be   : > { %v3855_v55 = vmul.f32 %v3839_v51, %v10783_v24  ;;  %v3805_v58 = vsub.f32 1.0, %v3789_v61  ;;  %v2968_v57 = vmul.f32 %v8772_v39, %v2922_v36  ;;  %v3674_v26 = vmul.f32 %v3658_v2, %v8993_v34  ;;  %v10786_v36 = vld [vmem:[#allocation331_spill] sm:$0xff] }
 0x5bf   : > { %v9047_v22 = vadd.f32 %v3172_v3, %v3099_v63  ;;  %3921 = vmatpush.msrb.mxu2 %v3874_v9  ;;  %v3836_v15 = vadd.f32 1.0, %v3820_v4  ;;  %v3627_v5 = vadd.f32 1.4214138, %v3611_v30  ;;  %v3452_v11 = vadd.f32 %v8763_v23, %v3451_v46  ;;  %v10789_v46 = vld [vmem:[#allocation238_spill] sm:$0xff]  ;;  %v2900_v4 = vpop.permute.xlu1 %2899 }
 0x5c0   : > { %v3875_v42 = vmul.f32 %v3855_v55, %v8872_v0  ;;  %v3821_v28 = vmul.f32 %v3805_v58, %v10784_v44  ;;  %v2969_v33 = vmul.f32 %v8793_v40, %v2938_v18  ;;  %v3690_v47 = vadd.f32 0.2548296, %v3674_v26 }
 0x5c1   : > { %v3852_v8 = vmul.f32 %v3836_v15, %v10785_v41  ;;  %v3643_v6 = vmul.f32 %v3627_v5, %v9020_v43  ;;  %vm3453_vm10 = vweird.f32 %v10786_v36  ;;  %vm3454_vm11 = vweird.f32 %v8763_v23  ;;  %v10795_v15 = vld [vmem:[#allocation335_spill] sm:$0xff] }
 0x5c2   : > { %3950 = vmatpush.msrb.mxu3 %v3875_v42  ;;  %v3837_v63 = vadd.f32 1.0, %v3821_v28  ;;  %v3064_v20 = vmul.f32 %v3026_v38, %v2968_v57  ;;  %v3706_v3 = vmul.f32 %v3690_v47, %v8993_v34  ;;  %vm9058_vm12 = vmor %vm3453_vm10, %vm3454_vm11  ;;  %v3457_v32 = vand.u32 2147483647, %v10786_v36  ;;  %v10796_v28 = vld [vmem:[#allocation144_spill] sm:$0xff] }
 0x5c3   : > { %v3872_v37 = vmul.f32 %v3852_v8, %v8971_v21  ;;  %v3659_v54 = vadd.f32 -0.28449672, %v3643_v6  ;;  %v3456_v52 = vsel %vm9058_vm12, %v8763_v23, %v3452_v11  ;;  %v3459_v1 = vand.u32 2147483648, %v10786_v36  ;;  %v10798_v6 = vld [vmem:[#allocation51_spill] sm:$0xff] }
 0x5c4   : > { %v3853_v51 = vmul.f32 %v3837_v63, %v10789_v46  ;;  %v3786_v61 = vmul.f32 %v10790_v19, %v3706_v3  ;;  %vm3458_vm13 = vcmp.eq.f32.partialorder %v3457_v32, 8.507059e+37  ;;  %v10791_v34 = vsub.f32 1.0, %v8798_v12  ;;  %v10799_v63 = vld [vmem:[#allocation202_spill] sm:$0xff] }
 0x5c5   : > { %3922 = vmatpush.msrb.mxu2 %v3872_v37  ;;  %v3675_v9 = vmul.f32 %v3659_v54, %v9020_v43  ;;  %v3460_v21 = vor.u32 1.1754944e-38, %v3459_v1  ;;  %vm3468_vm14 = vweird.f32 %v8707_v25  ;;  %vm3469_vm0 = vweird.f32 %v8775_v10  ;;  %v10800_v37 = vld [vmem:[#allocation105_spill] sm:$0xff] }
 0x5c6   : > { %v3466_v2 = vmul.f32 %v8775_v10, %v10791_v34  ;;  %v3873_v23 = vmul.f32 %v3853_v51, %v9009_v59  ;;  %v3802_v56 = vsub.f32 1.0, %v3786_v61  ;;  %v3472_v30 = vand.u32 2147483647, %v8707_v25  ;;  %vm9081_vm1 = vmor %vm3468_vm14, %vm3469_vm0 }
 0x5c7   : > { %v3691_v24 = vadd.f32 0.2548296, %v3675_v9  ;;  %v9079_v12 = vsel %vm3458_vm13, %v3460_v21, %v3456_v52  ;;  %v3474_v58 = vand.u32 2147483648, %v8707_v25  ;;  %v10794_v57 = vsub.f32 1.0, %v8825_v45 }
 0x5c8   : > { %v3467_v18 = vadd.f32 %v8775_v10, %v3466_v2  ;;  %3951 = vmatpush.msrb.mxu3 %v3873_v23  ;;  %v3065_v59 = vmul.f32 %v3026_v38, %v2969_v33  ;;  %v3818_v5 = vmul.f32 %v3802_v56, %v10795_v15  ;;  %v3576_v11 = vmul.f32 1.0614054, %v9079_v12  ;;  %v10797_v38 = vld [vmem:[#allocation94_spill] sm:$0xff] }
 0x5c9   : > { %v3421_v26 = vmul.f32 %v8804_v13, %v10794_v57  ;;  %v3707_v44 = vmul.f32 %v3691_v24, %v9020_v43  ;;  %v2921_v25 = vsel %vm2909_vm15, %v10796_v28, %v2900_v4  ;;  %vm3473_vm2 = vcmp.eq.f32.partialorder %v3472_v30, 8.507059e+37  ;;  %v10803_v2 = vld [vmem:[#allocation274_spill] sm:$0xff] }
 0x5ca   : > { %v3471_v42 = vsel %vm9081_vm1, %v8775_v10, %v3467_v18  ;;  %v3475_v45 = vor.u32 1.1754944e-38, %v3474_v58  ;;  %v3834_v47 = vadd.f32 1.0, %v3818_v5  ;;  %v3592_v41 = vadd.f32 -1.4531521, %v3576_v11  ;;  %v10811_v5 = vld [vmem:[#allocation6_spill] sm:$0xff] }
 0x5cb   : > { %v3422_v33 = vadd.f32 %v8804_v13, %v3421_v26  ;;  %vm3424_vm3 = vweird.f32 %v8804_v13  ;;  %v9101_v8 = vadd.f32 %v3064_v20, %v10797_v38  ;;  %v3787_v36 = vmul.f32 %v10798_v6, %v3707_v44  ;;  %v10809_v26 = vld [vmem:[#allocation167_spill] sm:$0xff]  ;;  %v10813_v38 = vld [vmem:[#allocation269_spill] sm:$0xff] }
 0x5cc   : > { %v9104_v10 = vsel %vm3473_vm2, %v3475_v45, %v3471_v42  ;;  %v3427_v43 = vand.u32 2147483647, %v8745_v50  ;;  %v3850_v3 = vmul.f32 %v3834_v47, %v10799_v63  ;;  %v3608_v0 = vmul.f32 %v3592_v41, %v9079_v12  ;;  %v3022_v63 = vpop.permute.xlu2 %3021 }
 0x5cd   : > { %v3577_v32 = vmul.f32 1.0614054, %v9104_v10  ;;  %vm3423_vm4 = vweird.f32 %v8745_v50  ;;  %v9112_v54 = vadd.f32 %v3065_v59, %v10800_v37  ;;  %v3803_v52 = vsub.f32 1.0, %v3787_v36  ;;  %v10810_v59 = vld [vmem:[#allocation290_spill] sm:$0xff]  ;;  %v10814_v36 = vld [vmem:[#allocation63_spill] sm:$0xff] }
 0x5ce   : > { %v2937_v20 = vsel %vm2909_vm15, %v2900_v4, %v10796_v28  ;;  %v2966_v1 = vmul.f32 %v8772_v39, %v2921_v25  ;;  %vm9118_vm5 = vmor %vm3423_vm4, %vm3424_vm3  ;;  %v3870_v51 = vmul.f32 %v3850_v3, %v9035_v7  ;;  %v3624_v19 = vadd.f32 1.4214138, %v3608_v0 }
 0x5cf   : > { %v3593_v61 = vadd.f32 -1.4531521, %v3577_v32  ;;  %v3426_v34 = vsel %vm9118_vm5, %v8804_v13, %v3422_v33  ;;  %v3819_v9 = vmul.f32 %v3803_v52, %v10803_v2  ;;  %vm9127_vm6 = vcmp.eq.f32.partialorder %v3427_v43, 8.507059e+37  ;;  %v10812_v33 = vld [vmem:[#allocation291_spill] sm:$0xff] }
 0x5d0   : > { %v3429_v23 = vand.u32 2147483648, %v8745_v50  ;;  %v10806_v56 = vsub.f32 1.0, %v8844_v49  ;;  %3923 = vmatpush.msrb.mxu2 %v3870_v51  ;;  %v3640_v7 = vmul.f32 %v3624_v19, %v9079_v12  ;;  %vm3438_vm7 = vweird.f32 %v8756_v60  ;;  %v10816_v51 = vld [vmem:[#allocation30_spill] sm:$0xff] }
 0x5d1   : > { %v3609_v18 = vmul.f32 %v3593_v61, %v9104_v10  ;;  %vm3439_vm8 = vweird.f32 %v8817_v48  ;;  %v3835_v13 = vadd.f32 1.0, %v3819_v9  ;;  %v3442_v55 = vand.u32 2147483647, %v8756_v60 }
 0x5d2   : > { %v3436_v4 = vmul.f32 %v8817_v48, %v10806_v56  ;;  %v3430_v30 = vor.u32 1.1754944e-38, %v3429_v23  ;;  %v3656_v50 = vadd.f32 -0.28449672, %v3640_v7  ;;  %vm9141_vm9 = vmor %vm3438_vm7, %vm3439_vm8  ;;  %v3444_v57 = vand.u32 2147483648, %v8756_v60  ;;  %v10817_v23 = vld [vmem:[#allocation5_spill] sm:$0xff]  ;;  %v10820_v7 = vld [vmem:[#allocation156_spill] sm:$0xff] }
 0x5d3   : > { %v3625_v58 = vadd.f32 1.4214138, %v3609_v18  ;;  %v2315_v15 = vadd.f32 %v10810_v59, %v10809_v26  ;;  %v3851_v11 = vmul.f32 %v3835_v13, %v10811_v5  ;;  %v2967_v42 = vmul.f32 %v8793_v40, %v2937_v20  ;;  %v10815_v20 = vld [vmem:[#allocation22_spill] sm:$0xff] }
 0x5d4   : > { %v3437_v24 = vadd.f32 %v8817_v48, %v3436_v4  ;;  %v9152_v44 = vsel %vm9127_vm6, %v3430_v30, %v3426_v34  ;;  %v3672_v25 = vmul.f32 %v3656_v50, %v9079_v12  ;;  %v3445_v47 = vor.u32 1.1754944e-38, %v3444_v57  ;;  %v3167_v30 = vpop.permute.xlu0 %3166  ;;  %v10821_v57 = vld [vmem:[#allocation81_spill] sm:$0xff] }
 0x5d5   : > { %v3641_v45 = vmul.f32 %v3625_v58, %v9104_v10  ;;  %v3574_v60 = vmul.f32 1.0614054, %v9152_v44  ;;  %v3871_v41 = vmul.f32 %v3851_v11, %v9047_v22  ;;  %vm3443_vm10 = vcmp.eq.f32.partialorder %v3442_v55, 8.507059e+37  ;;  %v2898_v55 = vpop.permute.xlu1 %2897 }
 0x5d6   : > { %v3441_v28 = vsel %vm9141_vm9, %v8817_v48, %v3437_v24  ;;  %v2316_v6 = vadd.f32 %v10813_v38, %v10812_v33  ;;  %v2574_v43 = vadd.f32 %v10814_v36, %v2315_v15  ;;  %v3688_v3 = vadd.f32 0.2548296, %v3672_v25  ;;  %v10822_v15 = vld [vmem:[#allocation118_spill] sm:$0xff]  ;;  %v10837_v38 = vld [vmem:[#allocation177_spill] sm:$0xff] }
 0x5d7   : > { %v3657_v0 = vadd.f32 -0.28449672, %v3641_v45  ;;  %v3590_v32 = vadd.f32 -1.4531521, %v3574_v60  ;;  %v9164_v48 = vsel %vm3443_vm10, %v3445_v47, %v3441_v28  ;;  %3952 = vmatpush.msrb.mxu3 %v3871_v41  ;;  %v3062_v37 = vmul.f32 %v3022_v63, %v2966_v1  ;;  %v10818_v1 = vld [vmem:[#allocation44_spill] sm:$0xff]  ;;  %v10823_v25 = vld [vmem:[#allocation114_spill] sm:$0xff] }
 0x5d8   : > { %v3575_v52 = vmul.f32 1.0614054, %v9164_v48  ;;  %v2575_v46 = vadd.f32 %v10815_v20, %v2316_v6  ;;  %v9169_v22 = vadd.f32 %v10816_v51, %v2574_v43  ;;  %v3063_v19 = vmul.f32 %v3022_v63, %v2967_v42  ;;  %v10824_v60 = vld [vmem:[#allocation338_spill] sm:$0xff]  ;;  %v10829_v63 = vld [vmem:[#allocation55_spill] sm:$0xff]  ;;  %v10830_v51 = vld [vmem:[#allocation208_spill] sm:$0xff] }
 0x5d9   : > { %v3704_v61 = vmul.f32 %v3688_v3, %v9079_v12  ;;  %v3673_v34 = vmul.f32 %v3657_v0, %v9104_v10  ;;  %v3606_v2 = vmul.f32 %v3590_v32, %v9152_v44  ;;  %v3360_v9 = vsub.f32 1.0, %v8965_v31 }
 0x5da   : > { %v3591_v21 = vadd.f32 -1.4531521, %v3575_v52  ;;  %v9176_v56 = vadd.f32 %v10817_v23, %v2575_v46  ;;  %v10819_v4 = vsub.f32 1.0, %v10818_v1  ;;  %v3375_v13 = vsub.f32 1.0, %v8989_v35 }
 0x5db   : > { %v3784_v24 = vmul.f32 %v8840_v16, %v3704_v61  ;;  %v3689_v12 = vadd.f32 0.2548296, %v3673_v34  ;;  %v3622_v50 = vadd.f32 1.4214138, %v3606_v2  ;;  %v3208_v58 = vadd.f32 %v3167_v30, %v9101_v8  ;;  %v10831_v61 = vld [vmem:[#allocation72_spill] sm:$0xff]  ;;  %v10832_v2 = vld [vmem:[#allocation283_spill] sm:$0xff] }
 0x5dc   : > { %v3391_v18 = vmul.f32 %v10820_v7, %v10819_v4  ;;  %v3209_v49 = vadd.f32 %v3167_v30, %v9112_v54  ;;  %v3094_v26 = vadd.f32 %v3062_v37, %v10821_v57  ;;  %v3607_v59 = vmul.f32 %v3591_v21, %v9164_v48  ;;  %v10825_v54 = vld [vmem:[#allocation273_spill] sm:$0xff]  ;;  %v3162_v4 = vpop.permute.xlu0 %3161 }
 0x5dd   : > { %v3095_v5 = vadd.f32 %v3063_v19, %v10822_v15  ;;  %v3800_v11 = vsub.f32 1.0, %v3784_v24  ;;  %v3705_v42 = vmul.f32 %v3689_v12, %v9104_v10  ;;  %v3638_v28 = vmul.f32 %v3622_v50, %v9152_v44 }
 0x5de   : > { %v2920_v16 = vsel %vm2909_vm15, %v10823_v25, %v2898_v55  ;;  %v3623_v45 = vadd.f32 1.4214138, %v3607_v59  ;;  %v3392_v8 = vadd.f32 %v10820_v7, %v3391_v18  ;;  %vm3393_vm11 = vweird.f32 %v10824_v60  ;;  %v10845_v59 = vld [vmem:[#allocation115_spill] sm:$0xff] }
 0x5df   : > { %v3816_v47 = vmul.f32 %v3800_v11, %v10825_v54  ;;  %v3785_v41 = vmul.f32 %v8849_v53, %v3705_v42  ;;  %v3654_v33 = vadd.f32 -0.28449672, %v3638_v28  ;;  %vm3394_vm12 = vweird.f32 %v10820_v7  ;;  %v3018_v11 = vpop.permute.xlu2 %3017  ;;  %v10836_v28 = vld [vmem:[#allocation175_spill] sm:$0xff] }
 0x5e0   : > { %v3639_v10 = vmul.f32 %v3623_v45, %v9164_v48  ;;  %vm9199_vm13 = vmor %vm3393_vm11, %vm3394_vm12  ;;  %v3397_v6 = vand.u32 2147483647, %v10824_v60  ;;  %v3399_v36 = vand.u32 2147483648, %v10824_v60  ;;  %v10828_v43 = vsub.f32 1.0, %v8754_v29 }
 0x5e1   : > { %v3832_v0 = vadd.f32 1.0, %v3816_v47  ;;  %v3801_v32 = vsub.f32 1.0, %v3785_v41  ;;  %v3670_v53 = vmul.f32 %v3654_v33, %v9152_v44  ;;  %v3396_v37 = vsel %vm9199_vm13, %v10820_v7, %v3392_v8 }
 0x5e2   : > { %v3406_v3 = vmul.f32 %v10829_v63, %v10828_v43  ;;  %v3655_v52 = vadd.f32 -0.28449672, %v3639_v10  ;;  %vm3398_vm14 = vcmp.eq.f32.partialorder %v3397_v6, 8.507059e+37  ;;  %v3400_v20 = vor.u32 1.1754944e-38, %v3399_v36 }
 0x5e3   : > { %v3848_v19 = vmul.f32 %v3832_v0, %v10830_v51  ;;  %v3817_v34 = vmul.f32 %v3801_v32, %v10831_v61  ;;  %v3686_v29 = vadd.f32 0.2548296, %v3670_v53  ;;  %vm3408_vm0 = vweird.f32 %v10832_v2 }
 0x5e4   : > { %v3407_v46 = vadd.f32 %v10829_v63, %v3406_v3  ;;  %v3671_v21 = vmul.f32 %v3655_v52, %v9164_v48  ;;  %v9217_v23 = vsel %vm3398_vm14, %v3400_v20, %v3396_v37  ;;  %vm3409_vm1 = vweird.f32 %v10829_v63  ;;  %v10839_v3 = vld [vmem:[#allocation32_spill] sm:$0xff]  ;;  %v10840_v37 = vld [vmem:[#allocation57_spill] sm:$0xff] }
 0x5e5   : > { %v3412_v1 = vand.u32 2147483647, %v10832_v2  ;;  %v3868_v7 = vmul.f32 %v3848_v19, %v3208_v58  ;;  %v3833_v18 = vadd.f32 1.0, %v3817_v34  ;;  %v3702_v30 = vmul.f32 %v3686_v29, %v9152_v44  ;;  %vm9226_vm2 = vmor %vm3408_vm0, %vm3409_vm1  ;;  %v10835_v58 = vld [vmem:[#allocation332_spill] sm:$0xff]  ;;  %v10843_v19 = vld [vmem:[#allocation39_spill] sm:$0xff] }
 0x5e6   : > { %v3572_v24 = vmul.f32 1.0614054, %v9217_v23  ;;  %v3206_v12 = vadd.f32 %v3162_v4, %v3094_v26  ;;  %v2936_v50 = vsel %vm2909_vm15, %v2898_v55, %v10823_v25  ;;  %v3687_v57 = vadd.f32 0.2548296, %v3671_v21 }
 0x5e7   : > { %v3414_v15 = vand.u32 2147483648, %v10832_v2  ;;  %3924 = vmatpush.msrb.mxu2 %v3868_v7  ;;  %v3849_v42 = vmul.f32 %v3833_v18, %v10835_v58  ;;  %v3782_v44 = vmul.f32 %v10836_v28, %v3702_v30  ;;  %v3411_v26 = vsel %vm9226_vm2, %v10829_v63, %v3407_v46  ;;  %v9270_v18 = vpop.permute.xlu2 %3013 }
 0x5e8   : > { %v3588_v45 = vadd.f32 -1.4531521, %v3572_v24  ;;  %v2964_v55 = vmul.f32 %v8772_v39, %v2920_v16  ;;  %v3703_v25 = vmul.f32 %v3687_v57, %v9164_v48  ;;  %v3361_v60 = vmul.f32 %v8888_v62, %v3360_v9  ;;  %v10838_v16 = vld [vmem:[#allocation24_spill] sm:$0xff]  ;;  %v10844_v24 = vld [vmem:[#allocation163_spill] sm:$0xff] }
 0x5e9   : > { %v3415_v8 = vor.u32 1.1754944e-38, %v3414_v15  ;;  %v3869_v54 = vmul.f32 %v3849_v42, %v3209_v49  ;;  %v3798_v47 = vsub.f32 1.0, %v3782_v44  ;;  %vm3413_vm3 = vcmp.eq.f32.partialorder %v3412_v1, 8.507059e+37  ;;  %v9267_v1 = vpop.permute.xlu1 %2895 }
 0x5ea   : > { %v3604_v41 = vmul.f32 %v3588_v45, %v9217_v23  ;;  %v3207_v33 = vadd.f32 %v3162_v4, %v3095_v5  ;;  %v2965_v10 = vmul.f32 %v8793_v40, %v2936_v50  ;;  %v3783_v6 = vmul.f32 %v10837_v38, %v3703_v25  ;;  %v10852_v38 = vld [vmem:[#allocation160_spill] sm:$0xff] }
 0x5eb   : > { %v9244_v36 = vsel %vm3413_vm3, %v3415_v8, %v3411_v26  ;;  %3953 = vmatpush.msrb.mxu3 %v3869_v54  ;;  %v3814_v48 = vmul.f32 %v3798_v47, %v10838_v16  ;;  %vm3364_vm4 = vweird.f32 %v8888_v62  ;;  %v3060_v9 = vmul.f32 %v3018_v11, %v2964_v55  ;;  %v10850_v47 = vld [vmem:[#allocation170_spill] sm:$0xff] }
 0x5ec   : > { %v3620_v43 = vadd.f32 1.4214138, %v3604_v41  ;;  %v3573_v31 = vmul.f32 1.0614054, %v9244_v36  ;;  %v3799_v49 = vsub.f32 1.0, %v3783_v6  ;;  %v3362_v63 = vadd.f32 %v8888_v62, %v3361_v60  ;;  %v10848_v60 = vld [vmem:[#allocation200_spill] sm:$0xff] }
 0x5ed   : > { %vm3363_vm5 = vweird.f32 %v10839_v3  ;;  %v3830_v5 = vadd.f32 1.0, %v3814_v48  ;;  %v3367_v32 = vand.u32 2147483647, %v10839_v3  ;;  %v3061_v53 = vmul.f32 %v3018_v11, %v2965_v10 }
 0x5ee   : > { %v3636_v40 = vmul.f32 %v3620_v43, %v9217_v23  ;;  %v3589_v0 = vadd.f32 -1.4531521, %v3573_v31  ;;  %v3815_v52 = vmul.f32 %v3799_v49, %v10840_v37  ;;  %vm9254_vm6 = vmor %vm3363_vm5, %vm3364_vm4  ;;  %v3369_v46 = vand.u32 2147483648, %v10839_v3  ;;  %v10853_v43 = vld [vmem:[#allocation308_spill] sm:$0xff] }
 0x5ef   : > { %v3376_v51 = vmul.f32 %v8893_v17, %v3375_v13  ;;  %v3846_v61 = vmul.f32 %v3830_v5, %v10843_v19  ;;  %v3366_v2 = vsel %vm9254_vm6, %v8888_v62, %v3362_v63  ;;  %vm3368_vm7 = vcmp.eq.f32.partialorder %v3367_v32, 8.507059e+37  ;;  %v3157_v63 = vpop.permute.xlu2 %3156 }
 0x5f0   : > { %v3652_v34 = vadd.f32 -0.28449672, %v3636_v40  ;;  %v3605_v29 = vmul.f32 %v3589_v0, %v9244_v36  ;;  %v3831_v21 = vadd.f32 1.0, %v3815_v52  ;;  %v3370_v4 = vor.u32 1.1754944e-38, %v3369_v46  ;;  %v10856_v46 = vld [vmem:[#allocation271_spill] sm:$0xff] }
 0x5f1   : > { %v3377_v7 = vadd.f32 %v8893_v17, %v3376_v51  ;;  %v3866_v35 = vmul.f32 %v3846_v61, %v3206_v12  ;;  %vm3378_vm8 = vweird.f32 %v8820_v27  ;;  %vm3379_vm9 = vweird.f32 %v8893_v17 }
 0x5f2   : > { %v3668_v13 = vmul.f32 %v3652_v34, %v9217_v23  ;;  %v3621_v30 = vadd.f32 1.4214138, %v3605_v29  ;;  %v3847_v50 = vmul.f32 %v3831_v21, %v10844_v24  ;;  %v9275_v57 = vsel %vm3368_vm7, %v3370_v4, %v3366_v2  ;;  %vm9285_vm10 = vmor %vm3378_vm8, %vm3379_vm9 }
 0x5f3   : > { %v3382_v62 = vand.u32 2147483647, %v8820_v27  ;;  %3925 = vmatpush.msrb.mxu2 %v3866_v35  ;;  %v2919_v15 = vsel %vm2909_vm15, %v10845_v59, %v9267_v1  ;;  %v3570_v58 = vmul.f32 1.0614054, %v9275_v57  ;;  %v3092_v44 = vadd.f32 %v3060_v9, %v9169_v22  ;;  %v10851_v22 = vld [vmem:[#allocation205_spill] sm:$0xff] }
 0x5f4   : > { %v3684_v12 = vadd.f32 0.2548296, %v3668_v13  ;;  %v3637_v11 = vmul.f32 %v3621_v30, %v9244_v36  ;;  %v3867_v28 = vmul.f32 %v3847_v50, %v3207_v33  ;;  %v3381_v45 = vsel %vm9285_vm10, %v8893_v17, %v3377_v7  ;;  %v10855_v9 = vld [vmem:[#allocation169_spill] sm:$0xff]  ;;  %v10858_v13 = vld [vmem:[#allocation267_spill] sm:$0xff] }
 0x5f5   : > { %v3384_v26 = vand.u32 2147483648, %v8820_v27  ;;  %v3586_v8 = vadd.f32 -1.4531521, %v3570_v58  ;;  %v10849_v54 = vsub.f32 1.0, %v10848_v60  ;;  %vm3383_vm11 = vcmp.eq.f32.partialorder %v3382_v62, 8.507059e+37  ;;  %v10859_v30 = vld [vmem:[#allocation257_spill] sm:$0xff]  ;;  %v9330_v62 = vpop.permute.xlu1 %2893 }
 0x5f6   : > { %v3700_v55 = vmul.f32 %v3684_v12, %v9217_v23  ;;  %v3653_v25 = vadd.f32 -0.28449672, %v3637_v11  ;;  %3954 = vmatpush.msrb.mxu3 %v3867_v28  ;;  %vm3334_vm12 = vweird.f32 %v10850_v47  ;;  %v3337_v33 = vand.u32 2147483647, %v10851_v22  ;;  %v10860_v11 = vld [vmem:[#allocation176_spill] sm:$0xff] }
 0x5f7   : > { %v3331_v41 = vmul.f32 %v10850_v47, %v10849_v54  ;;  %v3385_v10 = vor.u32 1.1754944e-38, %v3384_v26  ;;  %v3602_v27 = vmul.f32 %v3586_v8, %v9275_v57  ;;  %vm3333_vm13 = vweird.f32 %v10851_v22 }
 0x5f8   : > { %v3780_v6 = vmul.f32 %v10852_v38, %v3700_v55  ;;  %v3669_v17 = vmul.f32 %v3653_v25, %v9244_v36  ;;  %v3339_v48 = vand.u32 2147483648, %v10851_v22  ;;  %v10854_v31 = vsub.f32 1.0, %v10853_v43  ;;  %vm3335_vm14 = vmor %vm3333_vm13, %vm3334_vm12  ;;  %v10863_v55 = vld [vmem:[#allocation154_spill] sm:$0xff]  ;;  %v10866_v43 = vld [vmem:[#allocation152_spill] sm:$0xff] }
 0x5f9   : > { %v3332_v23 = vadd.f32 %v10850_v47, %v3331_v41  ;;  %v9304_v16 = vsel %vm3383_vm11, %v3385_v10, %v3381_v45  ;;  %v2962_v3 = vmul.f32 %v8772_v39, %v2919_v15  ;;  %v3618_v0 = vadd.f32 1.4214138, %v3602_v27 }
 0x5fa   : > { %v3346_v49 = vmul.f32 %v10855_v9, %v10854_v31  ;;  %v3796_v5 = vsub.f32 1.0, %v3780_v6  ;;  %v3685_v40 = vadd.f32 0.2548296, %v3669_v17  ;;  %v3093_v32 = vadd.f32 %v3061_v53, %v9176_v56  ;;  %v10857_v56 = vld [vmem:[#allocation74_spill] sm:$0xff] }
 0x5fb   : > { %v3571_v37 = vmul.f32 1.0614054, %v9304_v16  ;;  %v3336_v52 = vsel %vm3335_vm14, %v10850_v47, %v3332_v23  ;;  %v3340_v20 = vor.u32 1.1754944e-38, %v3339_v48  ;;  %v3634_v61 = vmul.f32 %v3618_v0, %v9275_v57  ;;  %v10865_v23 = vld [vmem:[#allocation241_spill] sm:$0xff] }
 0x5fc   : > { %v3812_v51 = vmul.f32 %v3796_v5, %v10856_v46  ;;  %v3701_v19 = vmul.f32 %v3685_v40, %v9244_v36  ;;  %vm3338_vm0 = vcmp.eq.f32.partialorder %v3337_v33, 8.507059e+37  ;;  %v3204_v39 = vadd.f32 %v3157_v63, %v3092_v44  ;;  %v10864_v33 = vld [vmem:[#allocation192_spill] sm:$0xff]  ;;  %v10867_v40 = vld [vmem:[#allocation119_spill] sm:$0xff]  ;;  %v10873_v44 = vld [vmem:[#allocation50_spill] sm:$0xff] }
 0x5fd   : > { %v3587_v34 = vadd.f32 -1.4531521, %v3571_v37  ;;  %v9320_v29 = vsel %vm3338_vm0, %v3340_v20, %v3336_v52  ;;  %v3347_v2 = vadd.f32 %v10855_v9, %v3346_v49  ;;  %v3650_v4 = vadd.f32 -0.28449672, %v3634_v61  ;;  %v4272_v49 = vld [vmem:[%s9444_s9 + $0x18] ss:$0 sm:$0xff] }
 0x5fe   : > { %v3828_v21 = vadd.f32 1.0, %v3812_v51  ;;  %v3781_v53 = vmul.f32 %v10857_v56, %v3701_v19  ;;  %v3568_v7 = vmul.f32 1.0614054, %v9320_v29  ;;  %vm3348_vm1 = vweird.f32 %v10858_v13  ;;  %v10868_v52 = vld [vmem:[#allocation239_spill] sm:$0xff] }
 0x5ff   : > { %v3603_v35 = vmul.f32 %v3587_v34, %v9304_v16  ;;  %vm3349_vm2 = vweird.f32 %v10855_v9  ;;  %v3352_v36 = vand.u32 2147483647, %v10858_v13  ;;  %v3666_v15 = vmul.f32 %v3650_v4, %v9275_v57  ;;  %v10870_v61 = vld [vmem:[#allocation59_spill] sm:$0xff]  ;;  %v3010_v34 = vpop.permute.xlu1 %3009 }
 0x600   : > { %v3844_v24 = vmul.f32 %v3828_v21, %v10859_v30  ;;  %v3797_v50 = vsub.f32 1.0, %v3781_v53  ;;  %v3584_v12 = vadd.f32 -1.4531521, %v3568_v7  ;;  %v3750_v58 = vmul.f32 1.442695, %v10860_v11  ;;  %vm9338_vm3 = vmor %vm3348_vm1, %vm3349_vm2  ;;  %v10871_v21 = vld [vmem:[#allocation157_spill] sm:$0xff]  ;;  %v3152_v53 = vpop.permute.xlu0 %3151 }
 0x601   : > { %v2935_v42 = vsel %vm2909_vm15, %v9267_v1, %v10845_v59  ;;  %v3619_v28 = vadd.f32 1.4214138, %v3603_v35  ;;  %v3354_v45 = vand.u32 2147483648, %v10858_v13  ;;  %v3682_v8 = vadd.f32 0.2548296, %v3666_v15 }
 0x602   : > { %v3864_v26 = vmul.f32 %v3844_v24, %v3204_v39  ;;  %v3813_v25 = vmul.f32 %v3797_v50, %v10863_v55  ;;  %v3351_v60 = vsel %vm9338_vm3, %v10855_v9, %v3347_v2  ;;  %v3058_v54 = vmul.f32 %v9270_v18, %v2962_v3 }
 0x603   : > { %v3635_v47 = vmul.f32 %v3619_v28, %v9304_v16  ;;  %v3600_v1 = vmul.f32 %v3584_v12, %v9320_v29  ;;  %v3355_v59 = vor.u32 1.1754944e-38, %v3354_v45  ;;  %v3205_v41 = vadd.f32 %v3157_v63, %v3093_v32 }
 0x604   : > { %3926 = vmatpush.msrb.mxu2 %v3864_v26  ;;  %v3829_v10 = vadd.f32 1.0, %v3813_v25  ;;  %v3698_v22 = vmul.f32 %v3682_v8, %v9275_v57  ;;  %vm3353_vm4 = vcmp.eq.f32.partialorder %v3352_v36, 8.507059e+37  ;;  %v3744_v38 = vmul.f32 1.442695, %v10864_v33  ;;  %v10872_v36 = vld [vmem:[#allocation141_spill] sm:$0xff] }
 0x605   : > { %v3651_v6 = vadd.f32 -0.28449672, %v3635_v47  ;;  %v3616_v17 = vadd.f32 1.4214138, %v3600_v1  ;;  %v3356_v27 = vsel %vm3353_vm4, %v3355_v59, %v3351_v60  ;;  %4230 = vpow2.f32 %v3750_v58 }
 0x606   : > { %v3845_v48 = vmul.f32 %v3829_v10, %v10865_v23  ;;  %v3778_v31 = vmul.f32 %v10866_v43, %v3698_v22  ;;  %v3569_v9 = vmul.f32 1.0614054, %v3356_v27  ;;  %v2963_v63 = vmul.f32 %v4272_v49, %v2935_v42  ;;  %v10876_v43 = vld [vmem:[#allocation125_spill] sm:$0xff] }
 0x607   : > { %v3667_v3 = vmul.f32 %v3651_v6, %v9304_v16  ;;  %v3632_v57 = vmul.f32 %v3616_v17, %v9320_v29  ;;  %v3090_v0 = vadd.f32 %v3058_v54, %v10867_v40  ;;  %v10869_v20 = vsub.f32 0.0, %v10868_v52  ;;  %v10874_v54 = vld [vmem:[#allocation288_spill] sm:$0xff]  ;;  %v3147_v17 = vpop.permute.xlu1 %3146 }
 0x608   : > { %v3865_v5 = vmul.f32 %v3845_v48, %v3205_v41  ;;  %v3794_v32 = vsub.f32 1.0, %v3778_v31  ;;  %v3585_v37 = vadd.f32 -1.4531521, %v3569_v9  ;;  %4232 = vpow2.f32 %v3744_v38  ;;  %v10875_v41 = vld [vmem:[#allocation28_spill] sm:$0xff]  ;;  %v10877_v9 = vld [vmem:[#allocation217_spill] sm:$0xff] }
 0x609   : > { %v3729_v46 = vmul.f32 %v10869_v20, %v10868_v52  ;;  %v3683_v51 = vadd.f32 0.2548296, %v3667_v3  ;;  %v3648_v19 = vadd.f32 -0.28449672, %v3632_v57  ;;  %v3218_v56 = vmul.f32 0.5, %v10871_v21  ;;  %v10878_v40 = vld [vmem:[#allocation148_spill] sm:$0xff] }
 0x60a   : > { %3955 = vmatpush.msrb.mxu3 %v3865_v5  ;;  %v3810_v39 = vmul.f32 %v3794_v32, %v10870_v61  ;;  %v3601_v2 = vmul.f32 %v3585_v37, %v3356_v27  ;;  %v3059_v4 = vmul.f32 %v9270_v18, %v2963_v63  ;;  %v2918_v30 = vsel %vm2909_vm15, %v10872_v36, %v9330_v62  ;;  %v4273_v18 = vld [vmem:[%s9444_s9 + $0x10] ss:$0 sm:$0xff]  ;;  %v10879_v61 = vld [vmem:[#allocation174_spill] sm:$0xff] }
 0x60b   : > { %v3699_v7 = vmul.f32 %v3683_v51, %v9304_v16  ;;  %v3664_v35 = vmul.f32 %v3648_v19, %v9320_v29  ;;  %v4231_v13 = vpop.eup %4230  ;;  %v3202_v24 = vadd.f32 %v3152_v53, %v3090_v0  ;;  %v3746_v12 = vmul.f32 1.442695, %v3729_v46  ;;  %v3856_v19 = vld [vmem:[%s9442_s7] sm:$0xff] }
 0x60c   : > { %v3826_v50 = vadd.f32 1.0, %v3810_v39  ;;  %v3617_v15 = vadd.f32 1.4214138, %v3601_v2  ;;  %v2960_v16 = vmul.f32 %v4273_v18, %v2918_v30  ;;  %v3091_v45 = vadd.f32 %v3059_v4, %v10873_v44  ;;  %v10881_v2 = vld [vmem:[#allocation146_spill] sm:$0xff]  ;;  %v4275_v18 = vld [vmem:[%s4410_s18 + $0x8] sm:$0xff]  ;;  %v4276_v44 = vld [vmem:[%s4410_s18 + $0x10] sm:$0xff] }
 0x60d   : > { %v3779_v11 = vmul.f32 %v4231_v13, %v3699_v7  ;;  %v3680_v58 = vadd.f32 0.2548296, %v3664_v35  ;;  %4234 = vpow2.f32 %v3746_v12  ;;  %v3219_v10 = vmul.f32 0.5, %v10875_v41  ;;  %v3857_v7 = vld [vmem:[%s9442_s7 + $0x8] sm:$0xff]  ;;  %v3858_v35 = vld [vmem:[%s9442_s7 + $0x10] sm:$0xff]  ;;  %v3859_v13 = vld [vmem:[%s9442_s7 + $0x18] sm:$0xff] }
 0x60e   : > { %v3842_v42 = vmul.f32 %v3826_v50, %v3218_v56  ;;  %v3633_v28 = vmul.f32 %v3617_v15, %v3356_v27  ;;  %v4233_v25 = vpop.eup %4232  ;;  %v3056_v1 = vmul.f32 %v3010_v34, %v2960_v16  ;;  %v2934_v33 = vsel %vm2909_vm15, %v9330_v62, %v10872_v36  ;;  %v3883_v36 = vpop.permute.xlu2 %3882  ;;  %v4274_v50 = vld [vmem:[%s4410_s18] sm:$0xff] }
 0x60f   : > { %v3795_v26 = vsub.f32 1.0, %v3779_v11  ;;  %v3696_v55 = vmul.f32 %v3680_v58, %v9320_v29  ;;  %v3203_v38 = vadd.f32 %v3152_v53, %v3091_v45  ;;  %v2961_v3 = vmul.f32 %v4272_v49, %v2934_v33  ;;  %v3888_v11 = vpop.permute.xlu0 %3887 }
 0x610   : > { %v3862_v8 = vmul.f32 %v3842_v42, %v3202_v24  ;;  %v3649_v60 = vadd.f32 -0.28449672, %v3633_v28  ;;  %v3088_v31 = vadd.f32 %v3056_v1, %v10876_v43  ;;  %v3216_v0 = vmul.f32 0.5, %v10878_v40  ;;  %v4278_v1 = vld [vmem:[%s4410_s18 + $0x20] sm:$0xff] }
 0x611   : > { %v3811_v47 = vmul.f32 %v3795_v26, %v10874_v54  ;;  %v3776_v59 = vmul.f32 %v4233_v25, %v3696_v55  ;;  %v3057_v14 = vmul.f32 %v3010_v34, %v2961_v3  ;;  %vm3900_vm15 = vcmask 523264   ;;  %v3893_v55 = vpop.permute.xlu1 %3892  ;;  %v4277_v54 = vld [vmem:[%s4410_s18 + $0x18] sm:$0xff] }
 0x612   : > { %3927 = vmatpush.msrb.mxu2 %v3862_v8  ;;  %v3665_v22 = vmul.f32 %v3649_v60, %v3356_v27  ;;  %v3200_v37 = vadd.f32 %v3147_v17, %v3088_v31  ;;  %v3217_v21 = vmul.f32 0.5, %v10881_v2  ;;  %v4281_v31 = vld [vmem:[%s4410_s18 + $0x38] sm:$0xff] }
 0x613   : > { %v3827_v6 = vadd.f32 1.0, %v3811_v47  ;;  %v3792_v29 = vsub.f32 1.0, %v3776_v59  ;;  %v4235_v5 = vpop.eup %4234  ;;  %v3089_v49 = vadd.f32 %v3057_v14, %v10879_v61 }
 0x614   : > { %v3681_v23 = vadd.f32 0.2548296, %v3665_v22 }
 0x615   : > { %v3843_v48 = vmul.f32 %v3827_v6, %v3219_v10  ;;  %v3808_v63 = vmul.f32 %v3792_v29, %v10877_v9  ;;  %v3201_v56 = vadd.f32 %v3147_v17, %v3089_v49  ;;  %v4279_v6 = vld [vmem:[%s4410_s18 + $0x28] sm:$0xff]  ;;  %v4280_v17 = vld [vmem:[%s4410_s18 + $0x30] sm:$0xff] }
 0x616   : > { %v3697_v57 = vmul.f32 %v3681_v23, %v3356_v27  ;;  %v10880_v27 = vld [vmem:[#allocation196_spill] sm:$0xff]  ;;  %v3898_v10 = vpop.permute.xlu2 %3897 }
 0x617   : > { %v3863_v32 = vmul.f32 %v3843_v48, %v3203_v38  ;;  %v3824_v52 = vadd.f32 1.0, %v3808_v63 }
 0x618   : > { %v3777_v62 = vmul.f32 %v4235_v5, %v3697_v57 }
 0x619   : > { %3956 = vmatpush.msrb.mxu3 %v3863_v32  ;;  %v3840_v20 = vmul.f32 %v3824_v52, %v3216_v0 }
 0x61a   : > { %v3793_v46 = vsub.f32 1.0, %v3777_v62 }
 0x61b   : > { %v3860_v51 = vmul.f32 %v3840_v20, %v3200_v37 }
 0x61c   : > { %v3809_v39 = vmul.f32 %v3793_v46, %v10880_v27 }
 0x61d   : > { %3928 = vmatpush.msrb.mxu2 %v3860_v51 }
 0x61e   : > { %v3825_v53 = vadd.f32 1.0, %v3809_v39  ;;  %4083 = vmatmul.msk.f32.vlgmr.msrb.gmra.mxu2 %vm3900_vm15, %v3856_v19 }
 0x620   : > { %v3841_v34 = vmul.f32 %v3825_v53, %v3217_v21 }
 0x622   : > { %v3861_v4 = vmul.f32 %v3841_v34, %v3201_v56 }
 0x624   : > { %3957 = vmatpush.msrb.mxu3 %v3861_v4 }
 0x625   : > { %4087 = vmatmul.msk.f32.vlgmr.msrb.gmra.mxu3 %vm3900_vm15, %v3856_v19 }
 0x626   : > { %4084 = vmatmul.msk.f32.gmra.mxu2 %vm3900_vm15, %v3857_v7 }
 0x62d   : > { %4088 = vmatmul.msk.f32.gmra.mxu3 %vm3900_vm15, %v3857_v7 }
 0x62e   : > { %4085 = vmatmul.msk.f32.gmra.mxu2 %vm3900_vm15, %v3858_v35 }
 0x635   : > { %4089 = vmatmul.msk.f32.gmra.mxu3 %vm3900_vm15, %v3858_v35 }
 0x636   : > { %4086 = vmatmul.msk.f32.gmra.mxu2 %vm3900_vm15, %v3859_v13 }
 0x63d   : > { %4090 = vmatmul.msk.f32.gmra.mxu3 %vm3900_vm15, %v3859_v13 }
 0x6a1   : > { %v3930_v30 = vpop.f32.mrf.mxu2 }
 0x6a2   : > { %v3931_v24 = vadd.f32 %v3930_v30, %v3883_v36 }
 0x6a4   : > { %v3971_v15 = vadd.f32 %v4274_v50, %v3931_v24 }
 0x6a6   : > { %3979 = vst [vmem:[%s9414_s19] sm:$0xff] %v3971_v15 }
 0x6a8   : > { %v3959_v12 = vpop.f32.mrf.mxu3 }
 0x6a9   : > { %v3960_v58 = vadd.f32 %v3959_v12, %v3883_v36  ;;  %v3933_v42 = vpop.f32.mrf.mxu2 }
 0x6aa   : > { %v3934_v28 = vadd.f32 %v3933_v42, %v3888_v11 }
 0x6ab   : > { %v3972_v16 = vadd.f32 %v4275_v18, %v3960_v58 }
 0x6ac   : > { %v3973_v45 = vadd.f32 %v4276_v44, %v3934_v28 }
 0x6ad   : > { %3980 = vst [vmem:[%s9414_s19 + $0x8] sm:$0xff] %v3972_v16 }
 0x6ae   : > { %3981 = vst [vmem:[%s9414_s19 + $0x10] sm:$0xff] %v3973_v45 }
 0x6b0   : > { %v3962_v26 = vpop.f32.mrf.mxu3 }
 0x6b1   : > { %v3963_v25 = vadd.f32 %v3962_v26, %v3888_v11  ;;  %v3936_v8 = vpop.f32.mrf.mxu2 }
 0x6b2   : > { %v3937_v60 = vadd.f32 %v3936_v8, %v3893_v55 }
 0x6b3   : > { %v3974_v47 = vadd.f32 %v4277_v54, %v3963_v25 }
 0x6b4   : > { %v3975_v59 = vadd.f32 %v4278_v1, %v3937_v60 }
 0x6b5   : > { %3982 = vst [vmem:[%s9414_s19 + $0x18] sm:$0xff] %v3974_v47 }
 0x6b6   : > { %3983 = vst [vmem:[%s9414_s19 + $0x20] sm:$0xff] %v3975_v59 }
 0x6b8   : > { %v3965_v41 = vpop.f32.mrf.mxu3 }
 0x6b9   : > { %v3966_v22 = vadd.f32 %v3965_v41, %v3893_v55  ;;  %v3939_v33 = vpop.f32.mrf.mxu2 }
 0x6ba   : > { %v3940_v38 = vadd.f32 %v3939_v33, %v3898_v10 }
 0x6bb   : > { %v3976_v29 = vadd.f32 %v4279_v6, %v3966_v22 }
 0x6bc   : > { %v3977_v23 = vadd.f32 %v4280_v17, %v3940_v38 }
 0x6bd   : > { %3984 = vst [vmem:[%s9414_s19 + $0x28] sm:$0xff] %v3976_v29 }
 0x6be   : > { %3985 = vst [vmem:[%s9414_s19 + $0x30] sm:$0xff] %v3977_v23 }
 0x6c0   : > { %v3968_v48 = vpop.f32.mrf.mxu3 }
 0x6c1   : > { %v3969_v43 = vadd.f32 %v3968_v48, %v3898_v10 }
 0x6c3   : > { %v3978_v9 = vadd.f32 %v4281_v31, %v3969_v43 }
 0x6c5   : > { %3986 = vst [vmem:[%s9414_s19 + $0x38] sm:$0xff] %v3978_v9 }
 0x6c6 PF: > { %s20_s13 = sadd.s32 1, %s4288_s13  }
 0x6c7   : > { %p17_p4 = scmp.ge.s32.totalorder %s20_s13, 4  }
 0x6c9   :  { %19 = sbr.rel (!%p17_p4) target bundleno = 1 (0x1), region = 90 }

</bundles_post_ra>
